<compile_context>
chip_gen: v5e
topology: v5e:2x2
jax: 0.10.0
libtpu: 0.0.40
codegen_flags: <defaults>
</compile_context>

<pallas_src>
import functools
import numpy as np
import jax
import jax.numpy as jnp
from jax import lax
from jax.experimental import pallas as pl
from jax.experimental.pallas import tpu as pltpu


# --------------------------------------------------------------------------
# Fused kernel: conv1 + BN1 + ReLU + conv2 + BN2 + residual add
# --------------------------------------------------------------------------
def _basic_block_kernel(x_ref, w1_ref, b1_ref, w2_ref, b2_ref, o_ref,
                        pad_ref, slab_ref, *, H, W, Wp):
    """One batch element per grid step.

    x_ref   : (1, C, H*W)  f32   channel-major input (lane-dense, 256 lanes)
    w1_ref  : (9*C, C)     bf16  conv1 weights, BN1 scale folded in, rows = (ky*3+kx)*C + c
    b1_ref  : (1, C)       f32   BN1 folded bias
    w2_ref  : (9*C, C)     bf16  conv2 weights, BN2 scale folded in
    b2_ref  : (1, C)       f32   BN2 folded bias
    o_ref   : (1, C, H*W)  f32   output (lane-dense)
    pad_ref : (H+2, Wp, C) f32   shared zero-halo padded activation scratch
    slab_ref: (H*W, 9*C)   bf16  shared im2col slab scratch
    """
    C = x_ref.shape[1]
    HW = H * W

    # ---- zero only the 1-pixel halo strips of the padded scratch ----
    pad_ref[0:1, :, :] = jnp.zeros((1, Wp, C), jnp.float32)
    pad_ref[H + 1:H + 2, :, :] = jnp.zeros((1, Wp, C), jnp.float32)
    pad_ref[:, 0:1, :] = jnp.zeros((H + 2, 1, C), jnp.float32)
    pad_ref[:, W + 1:W + 2, :] = jnp.zeros((H + 2, 1, C), jnp.float32)

    # ---- input: channel-major (C, HW) -> pixel-major interior of the padded buffer ----
    pad_ref[1:1 + H, 1:1 + W, :] = jnp.transpose(x_ref[0]).reshape(H, W, C)

    def build_slab():
        # im2col: slab[:, tap*C:(tap+1)*C] = shifted window (tap = ky*3 + kx)
        for dy in range(3):
            for dx in range(3):
                tap = dy * 3 + dx
                patch = pad_ref[dy:dy + H, dx:dx + W, :]
                slab_ref[:, tap * C:(tap + 1) * C] = (
                    patch.reshape(HW, C).astype(jnp.bfloat16))

    # ---- conv1: single K=9*C bf16 matmul on the MXU, f32 accumulation ----
    build_slab()
    acc1 = jnp.dot(slab_ref[...], w1_ref[...],
                   preferred_element_type=jnp.float32)          # (HW, C) f32
    out1 = jnp.maximum(acc1 + b1_ref[...], 0.0)                 # BN1 bias + ReLU (f32)

    # stash conv1 activation back into the interior; halo is still zero
    pad_ref[1:1 + H, 1:1 + W, :] = out1.reshape(H, W, C)

    # ---- conv2 + BN2 + residual add (in channel-major layout, lane-dense store) ----
    build_slab()
    acc2 = jnp.dot(slab_ref[...], w2_ref[...],
                   preferred_element_type=jnp.float32)          # (HW, C) f32
    y = acc2 + b2_ref[...]                                      # BN2 bias (f32)
    o_ref[0] = jnp.transpose(y) + x_ref[0]                      # (C, HW) + residual


def basic_block_forward(x_nchw, params, *, eps=1e-5):
    """params = (w1, g1, b1, m1, v1, w2, g2, b2, m2, v2) with HWIO conv weights."""
    w1, g1, b1, m1, v1, w2, g2, b2, m2, v2 = params
    B, Cin, H, W = x_nchw.shape
    Cmid = w1.shape[-1]
    Cout = w2.shape[-1]
    assert Cin == Cmid == Cout, "downsample=None => residual add needs Cin == Cout"
    C = Cin
    HW = H * W
    Wp = ((W + 2 + 7) // 8) * 8          # padded width rounded to a sublane multiple

    # Channel-major, pixel-flattened view of x (pure reshape of NCHW — no HBM transpose)
    x = x_nchw.reshape(B, C, HW).astype(jnp.float32)

    # Fold eval-mode BatchNorm: scale into the (bf16) weights, bias stays f32.
    s1 = g1 / jnp.sqrt(v1 + eps)
    s2 = g2 / jnp.sqrt(v2 + eps)
    w1f = (w1.astype(jnp.float32) * s1).reshape(9 * C, C).astype(jnp.bfloat16)
    w2f = (w2.astype(jnp.float32) * s2).reshape(9 * C, C).astype(jnp.bfloat16)
    bb1 = (b1 - m1 * s1).reshape(1, C).astype(jnp.float32)
    bb2 = (b2 - m2 * s2).reshape(1, C).astype(jnp.float32)

    flops = int(B) * 2 * (2 * HW * (9 * C) * C)
    bytes_accessed = (x.size * 4 + w1f.size * 2 + w2f.size * 2
                      + bb1.size * 4 + bb2.size * 4 + B * C * HW * 4)

    kern = functools.partial(_basic_block_kernel, H=H, W=W, Wp=Wp)
    out = pl.pallas_call(
        kern,
        out_shape=jax.ShapeDtypeStruct((B, C, HW), jnp.float32),
        grid_spec=pltpu.PrefetchScalarGridSpec(
            num_scalar_prefetch=0,
            grid=(B,),
            in_specs=[
                pl.BlockSpec((1, C, HW), lambda b: (b, 0, 0)),
                pl.BlockSpec((9 * C, C), lambda b: (0, 0)),
                pl.BlockSpec((1, C), lambda b: (0, 0)),
                pl.BlockSpec((9 * C, C), lambda b: (0, 0)),
                pl.BlockSpec((1, C), lambda b: (0, 0)),
            ],
            out_specs=pl.BlockSpec((1, C, HW), lambda b: (b, 0, 0)),
            scratch_shapes=[
                pltpu.VMEM((H + 2, Wp, C), jnp.float32),   # shared padded activation
                pltpu.VMEM((HW, 9 * C), jnp.bfloat16),     # shared im2col slab
            ],
        ),
        compiler_params=pltpu.CompilerParams(
            dimension_semantics=("parallel",),
            vmem_limit_bytes=32 * 1024 * 1024,
        ),
        cost_estimate=pl.CostEstimate(
            flops=flops, transcendentals=0, bytes_accessed=int(bytes_accessed)),
    )(x, w1f, bb1, w2f, bb2)

    return out.reshape(B, C, H, W)   # free reshape back to NCHW


# --------------------------------------------------------------------------
# Pure-JAX reference (for the correctness check)
# --------------------------------------------------------------------------
def _reference_forward(x_nchw, params, *, eps=1e-5):
    w1, g1, b1, m1, v1, w2, g2, b2, m2, v2 = params
    x = jnp.transpose(x_nchw, (0, 2, 3, 1)).astype(jnp.float32)   # NHWC

    def conv(inp, w):
        return lax.conv_general_dilated(
            inp, w, window_strides=(1, 1), padding="SAME",
            dimension_numbers=("NHWC", "HWIO", "NHWC"))

    def bn(inp, g, b, m, v):
        return (inp - m) / jnp.sqrt(v + eps) * g + b

    out = jax.nn.relu(bn(conv(x, w1), g1, b1, m1, v1))
    out = bn(conv(out, w2), g2, b2, m2, v2) + x
    return jnp.transpose(out, (0, 3, 1, 2))


if __name__ == "__main__":
    key = jax.random.PRNGKey(0)
    ks = jax.random.split(key, 12)
    B, C, H, W = 2, 64, 16, 16
    eps = 1e-5

    x = jax.random.normal(ks[0], (B, C, H, W), jnp.float32)
    w1 = jax.random.normal(ks[1], (3, 3, C, C), jnp.float32) / np.sqrt(9 * C)
    w2 = jax.random.normal(ks[2], (3, 3, C, C), jnp.float32) / np.sqrt(9 * C)
    g1 = 1.0 + 0.1 * jax.random.normal(ks[3], (C,), jnp.float32)
    b1 = 0.1 * jax.random.normal(ks[4], (C,), jnp.float32)
    m1 = 0.1 * jax.random.normal(ks[5], (C,), jnp.float32)
    v1 = 1.0 + 0.1 * jax.random.uniform(ks[6], (C,), jnp.float32)
    g2 = 1.0 + 0.1 * jax.random.normal(ks[7], (C,), jnp.float32)
    b2 = 0.1 * jax.random.normal(ks[8], (C,), jnp.float32)
    m2 = 0.1 * jax.random.normal(ks[9], (C,), jnp.float32)
    v2 = 1.0 + 0.1 * jax.random.uniform(ks[10], (C,), jnp.float32)
    params = (w1, g1, b1, m1, v1, w2, g2, b2, m2, v2)

    fwd = jax.jit(functools.partial(basic_block_forward, eps=eps))
    out = fwd(x, params)
    jax.block_until_ready(out)

    ref = jax.jit(functools.partial(_reference_forward, eps=eps))(x, params)
    jax.block_until_ready(ref)

    assert out.shape == (B, C, H, W)
    out_np = np.asarray(out)
    assert np.isfinite(out_np).all()
    np.testing.assert_allclose(out_np, np.asarray(ref), atol=5e-2, rtol=5e-2)
    print("KERNEL_OK")
</pallas_src>

<mosaic_0001>
module attributes {stable_mosaic.version = 11 : i64} {
  func.func @_basic_block_kernel(%arg0: i32, %arg1: memref<1x64x256xf32, #tpu.memory_space<vmem>>, %arg2: memref<576x64xbf16, #tpu.memory_space<vmem>>, %arg3: memref<1x64xf32, #tpu.memory_space<vmem>>, %arg4: memref<576x64xbf16, #tpu.memory_space<vmem>>, %arg5: memref<1x64xf32, #tpu.memory_space<vmem>>, %arg6: memref<1x64x256xf32, #tpu.memory_space<vmem>>, %arg7: memref<18x24x64xf32, #tpu.memory_space<vmem>>, %arg8: memref<256x576xbf16, #tpu.memory_space<vmem>>) attributes {dimension_semantics = [#tpu.dimension_semantics<parallel>], iteration_bounds = array<i64: 2>, scalar_prefetch = 0 : i64, scratch_operands = 2 : i64, tpu.core_type = #tpu.core_type<tc>, window_params = [{transform_indices = @transform_0, window_bounds = array<i64: 1, 64, 256>}, {pipeline_mode = #tpu.pipeline_mode<synchronous>, transform_indices = @transform_1, window_bounds = array<i64: 576, 64>}, {pipeline_mode = #tpu.pipeline_mode<synchronous>, transform_indices = @transform_2, window_bounds = array<i64: 1, 64>}, {pipeline_mode = #tpu.pipeline_mode<synchronous>, transform_indices = @transform_3, window_bounds = array<i64: 576, 64>}, {pipeline_mode = #tpu.pipeline_mode<synchronous>, transform_indices = @transform_4, window_bounds = array<i64: 1, 64>}, {transform_indices = @transform_5, window_bounds = array<i64: 1, 64, 256>}]} {
    %cst = arith.constant 0.000000e+00 : f32
    %0 = vector.broadcast %cst : f32 to vector<1x24x64xf32>
    %c0 = arith.constant 0 : index
    %c0_0 = arith.constant 0 : index
    %c0_1 = arith.constant 0 : index
    %1 = vector.load %arg7[%c0, %c0_0, %c0_1] : memref<18x24x64xf32, #tpu.memory_space<vmem>>, vector<1x24x64xf32>
    tpu.vector_store %arg7[%c0, %c0_0, %c0_1], %0 {strides = array<i32>} : memref<18x24x64xf32, #tpu.memory_space<vmem>>, vector<1x24x64xf32>,
    %cst_2 = arith.constant 0.000000e+00 : f32
    %2 = vector.broadcast %cst_2 : f32 to vector<1x24x64xf32>
    %c17 = arith.constant 17 : index
    %c0_3 = arith.constant 0 : index
    %c0_4 = arith.constant 0 : index
    %3 = vector.load %arg7[%c17, %c0_3, %c0_4] : memref<18x24x64xf32, #tpu.memory_space<vmem>>, vector<1x24x64xf32>
    tpu.vector_store %arg7[%c17, %c0_3, %c0_4], %2 {strides = array<i32>} : memref<18x24x64xf32, #tpu.memory_space<vmem>>, vector<1x24x64xf32>,
    %cst_5 = arith.constant 0.000000e+00 : f32
    %4 = vector.broadcast %cst_5 : f32 to vector<18x1x64xf32>
    %c0_6 = arith.constant 0 : index
    %c0_7 = arith.constant 0 : index
    %c0_8 = arith.constant 0 : index
    %5 = vector.load %arg7[%c0_6, %c0_7, %c0_8] : memref<18x24x64xf32, #tpu.memory_space<vmem>>, vector<18x1x64xf32>
    tpu.vector_store %arg7[%c0_6, %c0_7, %c0_8], %4 {strides = array<i32>} : memref<18x24x64xf32, #tpu.memory_space<vmem>>, vector<18x1x64xf32>,
    %cst_9 = arith.constant 0.000000e+00 : f32
    %6 = vector.broadcast %cst_9 : f32 to vector<18x1x64xf32>
    %c0_10 = arith.constant 0 : index
    %c17_11 = arith.constant 17 : index
    %c0_12 = arith.constant 0 : index
    %7 = vector.load %arg7[%c0_10, %c17_11, %c0_12] : memref<18x24x64xf32, #tpu.memory_space<vmem>>, vector<18x1x64xf32>
    tpu.vector_store %arg7[%c0_10, %c17_11, %c0_12], %6 {strides = array<i32>} : memref<18x24x64xf32, #tpu.memory_space<vmem>>, vector<18x1x64xf32>,
    %c0_13 = arith.constant 0 : index
    %c0_14 = arith.constant 0 : index
    %c0_15 = arith.constant 0 : index
    %8 = vector.load %arg1[%c0_13, %c0_14, %c0_15] : memref<1x64x256xf32, #tpu.memory_space<vmem>>, vector<1x64x256xf32>
    %9 = vector.shape_cast %8 : vector<1x64x256xf32> to vector<64x256xf32>
    %10 = tpu.transpose %9, [1, 0] : vector<64x256xf32> -> vector<256x64xf32>
    %11 = vector.shape_cast %10 : vector<256x64xf32> to vector<16x16x64xf32>
    %c1 = arith.constant 1 : index
    %c1_16 = arith.constant 1 : index
    %c0_17 = arith.constant 0 : index
    %12 = vector.load %arg7[%c1, %c1_16, %c0_17] : memref<18x24x64xf32, #tpu.memory_space<vmem>>, vector<16x16x64xf32>
    tpu.vector_store %arg7[%c1, %c1_16, %c0_17], %11 {strides = array<i32>} : memref<18x24x64xf32, #tpu.memory_space<vmem>>, vector<16x16x64xf32>,
    %c0_18 = arith.constant 0 : index
    %c0_19 = arith.constant 0 : index
    %c0_20 = arith.constant 0 : index
    %13 = vector.load %arg7[%c0_18, %c0_19, %c0_20] : memref<18x24x64xf32, #tpu.memory_space<vmem>>, vector<16x16x64xf32>
    %14 = vector.shape_cast %13 : vector<16x16x64xf32> to vector<256x64xf32>
    %15 = arith.truncf %14 : vector<256x64xf32> to vector<256x64xbf16>
    %c0_21 = arith.constant 0 : index
    %c0_22 = arith.constant 0 : index
    %16 = vector.load %arg8[%c0_21, %c0_22] : memref<256x576xbf16, #tpu.memory_space<vmem>>, vector<256x64xbf16>
    tpu.vector_store %arg8[%c0_21, %c0_22], %15 {strides = array<i32>} : memref<256x576xbf16, #tpu.memory_space<vmem>>, vector<256x64xbf16>,
    %c0_23 = arith.constant 0 : index
    %c1_24 = arith.constant 1 : index
    %c0_25 = arith.constant 0 : index
    %17 = vector.load %arg7[%c0_23, %c1_24, %c0_25] : memref<18x24x64xf32, #tpu.memory_space<vmem>>, vector<16x16x64xf32>
    %18 = vector.shape_cast %17 : vector<16x16x64xf32> to vector<256x64xf32>
    %19 = arith.truncf %18 : vector<256x64xf32> to vector<256x64xbf16>
    %c0_26 = arith.constant 0 : index
    %c64 = arith.constant 64 : index
    %20 = vector.load %arg8[%c0_26, %c64] : memref<256x576xbf16, #tpu.memory_space<vmem>>, vector<256x64xbf16>
    tpu.vector_store %arg8[%c0_26, %c64], %19 {strides = array<i32>} : memref<256x576xbf16, #tpu.memory_space<vmem>>, vector<256x64xbf16>,
    %c0_27 = arith.constant 0 : index
    %c2 = arith.constant 2 : index
    %c0_28 = arith.constant 0 : index
    %21 = vector.load %arg7[%c0_27, %c2, %c0_28] : memref<18x24x64xf32, #tpu.memory_space<vmem>>, vector<16x16x64xf32>
    %22 = vector.shape_cast %21 : vector<16x16x64xf32> to vector<256x64xf32>
    %23 = arith.truncf %22 : vector<256x64xf32> to vector<256x64xbf16>
    %c0_29 = arith.constant 0 : index
    %c128 = arith.constant 128 : index
    %24 = vector.load %arg8[%c0_29, %c128] : memref<256x576xbf16, #tpu.memory_space<vmem>>, vector<256x64xbf16>
    tpu.vector_store %arg8[%c0_29, %c128], %23 {strides = array<i32>} : memref<256x576xbf16, #tpu.memory_space<vmem>>, vector<256x64xbf16>,
    %c1_30 = arith.constant 1 : index
    %c0_31 = arith.constant 0 : index
    %c0_32 = arith.constant 0 : index
    %25 = vector.load %arg7[%c1_30, %c0_31, %c0_32] : memref<18x24x64xf32, #tpu.memory_space<vmem>>, vector<16x16x64xf32>
    %26 = vector.shape_cast %25 : vector<16x16x64xf32> to vector<256x64xf32>
    %27 = arith.truncf %26 : vector<256x64xf32> to vector<256x64xbf16>
    %c0_33 = arith.constant 0 : index
    %c192 = arith.constant 192 : index
    %28 = vector.load %arg8[%c0_33, %c192] : memref<256x576xbf16, #tpu.memory_space<vmem>>, vector<256x64xbf16>
    tpu.vector_store %arg8[%c0_33, %c192], %27 {strides = array<i32>} : memref<256x576xbf16, #tpu.memory_space<vmem>>, vector<256x64xbf16>,
    %c1_34 = arith.constant 1 : index
    %c1_35 = arith.constant 1 : index
    %c0_36 = arith.constant 0 : index
    %29 = vector.load %arg7[%c1_34, %c1_35, %c0_36] : memref<18x24x64xf32, #tpu.memory_space<vmem>>, vector<16x16x64xf32>
    %30 = vector.shape_cast %29 : vector<16x16x64xf32> to vector<256x64xf32>
    %31 = arith.truncf %30 : vector<256x64xf32> to vector<256x64xbf16>
    %c0_37 = arith.constant 0 : index
    %c256 = arith.constant 256 : index
    %32 = vector.load %arg8[%c0_37, %c256] : memref<256x576xbf16, #tpu.memory_space<vmem>>, vector<256x64xbf16>
    tpu.vector_store %arg8[%c0_37, %c256], %31 {strides = array<i32>} : memref<256x576xbf16, #tpu.memory_space<vmem>>, vector<256x64xbf16>,
    %c1_38 = arith.constant 1 : index
    %c2_39 = arith.constant 2 : index
    %c0_40 = arith.constant 0 : index
    %33 = vector.load %arg7[%c1_38, %c2_39, %c0_40] : memref<18x24x64xf32, #tpu.memory_space<vmem>>, vector<16x16x64xf32>
    %34 = vector.shape_cast %33 : vector<16x16x64xf32> to vector<256x64xf32>
    %35 = arith.truncf %34 : vector<256x64xf32> to vector<256x64xbf16>
    %c0_41 = arith.constant 0 : index
    %c320 = arith.constant 320 : index
    %36 = vector.load %arg8[%c0_41, %c320] : memref<256x576xbf16, #tpu.memory_space<vmem>>, vector<256x64xbf16>
    tpu.vector_store %arg8[%c0_41, %c320], %35 {strides = array<i32>} : memref<256x576xbf16, #tpu.memory_space<vmem>>, vector<256x64xbf16>,
    %c2_42 = arith.constant 2 : index
    %c0_43 = arith.constant 0 : index
    %c0_44 = arith.constant 0 : index
    %37 = vector.load %arg7[%c2_42, %c0_43, %c0_44] : memref<18x24x64xf32, #tpu.memory_space<vmem>>, vector<16x16x64xf32>
    %38 = vector.shape_cast %37 : vector<16x16x64xf32> to vector<256x64xf32>
    %39 = arith.truncf %38 : vector<256x64xf32> to vector<256x64xbf16>
    %c0_45 = arith.constant 0 : index
    %c384 = arith.constant 384 : index
    %40 = vector.load %arg8[%c0_45, %c384] : memref<256x576xbf16, #tpu.memory_space<vmem>>, vector<256x64xbf16>
    tpu.vector_store %arg8[%c0_45, %c384], %39 {strides = array<i32>} : memref<256x576xbf16, #tpu.memory_space<vmem>>, vector<256x64xbf16>,
    %c2_46 = arith.constant 2 : index
    %c1_47 = arith.constant 1 : index
    %c0_48 = arith.constant 0 : index
    %41 = vector.load %arg7[%c2_46, %c1_47, %c0_48] : memref<18x24x64xf32, #tpu.memory_space<vmem>>, vector<16x16x64xf32>
    %42 = vector.shape_cast %41 : vector<16x16x64xf32> to vector<256x64xf32>
    %43 = arith.truncf %42 : vector<256x64xf32> to vector<256x64xbf16>
    %c0_49 = arith.constant 0 : index
    %c448 = arith.constant 448 : index
    %44 = vector.load %arg8[%c0_49, %c448] : memref<256x576xbf16, #tpu.memory_space<vmem>>, vector<256x64xbf16>
    tpu.vector_store %arg8[%c0_49, %c448], %43 {strides = array<i32>} : memref<256x576xbf16, #tpu.memory_space<vmem>>, vector<256x64xbf16>,
    %c2_50 = arith.constant 2 : index
    %c2_51 = arith.constant 2 : index
    %c0_52 = arith.constant 0 : index
    %45 = vector.load %arg7[%c2_50, %c2_51, %c0_52] : memref<18x24x64xf32, #tpu.memory_space<vmem>>, vector<16x16x64xf32>
    %46 = vector.shape_cast %45 : vector<16x16x64xf32> to vector<256x64xf32>
    %47 = arith.truncf %46 : vector<256x64xf32> to vector<256x64xbf16>
    %c0_53 = arith.constant 0 : index
    %c512 = arith.constant 512 : index
    %48 = vector.load %arg8[%c0_53, %c512] : memref<256x576xbf16, #tpu.memory_space<vmem>>, vector<256x64xbf16>
    tpu.vector_store %arg8[%c0_53, %c512], %47 {strides = array<i32>} : memref<256x576xbf16, #tpu.memory_space<vmem>>, vector<256x64xbf16>,
    %c0_54 = arith.constant 0 : index
    %c0_55 = arith.constant 0 : index
    %49 = vector.load %arg8[%c0_54, %c0_55] : memref<256x576xbf16, #tpu.memory_space<vmem>>, vector<256x576xbf16>
    %c0_56 = arith.constant 0 : index
    %c0_57 = arith.constant 0 : index
    %50 = vector.load %arg2[%c0_56, %c0_57] : memref<576x64xbf16, #tpu.memory_space<vmem>>, vector<576x64xbf16>
    %cst_58 = arith.constant dense<0.000000e+00> : vector<256x64xf32>
    %51 = tpu.matmul %49, %50, %cst_58 {dimension_numbers = #tpu.dot_dimension_numbers<[1], [0], [0], [1], [0, 0, 1, 1], [], []>} : vector<256x576xbf16>, vector<576x64xbf16>, vector<256x64xf32> -> vector<256x64xf32>
    %c0_59 = arith.constant 0 : index
    %c0_60 = arith.constant 0 : index
    %52 = vector.load %arg3[%c0_59, %c0_60] : memref<1x64xf32, #tpu.memory_space<vmem>>, vector<1x64xf32>
    %53 = vector.broadcast %52 : vector<1x64xf32> to vector<256x64xf32>
    %54 = arith.addf %51, %53 : vector<256x64xf32>
    %cst_61 = arith.constant 0.000000e+00 : f32
    %55 = vector.broadcast %cst_61 : f32 to vector<256x64xf32>
    %56 = arith.maximumf %54, %55 : vector<256x64xf32>
    %57 = vector.shape_cast %56 : vector<256x64xf32> to vector<16x16x64xf32>
    %c1_62 = arith.constant 1 : index
    %c1_63 = arith.constant 1 : index
    %c0_64 = arith.constant 0 : index
    %58 = vector.load %arg7[%c1_62, %c1_63, %c0_64] : memref<18x24x64xf32, #tpu.memory_space<vmem>>, vector<16x16x64xf32>
    tpu.vector_store %arg7[%c1_62, %c1_63, %c0_64], %57 {strides = array<i32>} : memref<18x24x64xf32, #tpu.memory_space<vmem>>, vector<16x16x64xf32>,
    %c0_65 = arith.constant 0 : index
    %c0_66 = arith.constant 0 : index
    %c0_67 = arith.constant 0 : index
    %59 = vector.load %arg7[%c0_65, %c0_66, %c0_67] : memref<18x24x64xf32, #tpu.memory_space<vmem>>, vector<16x16x64xf32>
    %60 = vector.shape_cast %59 : vector<16x16x64xf32> to vector<256x64xf32>
    %61 = arith.truncf %60 : vector<256x64xf32> to vector<256x64xbf16>
    %c0_68 = arith.constant 0 : index
    %c0_69 = arith.constant 0 : index
    %62 = vector.load %arg8[%c0_68, %c0_69] : memref<256x576xbf16, #tpu.memory_space<vmem>>, vector<256x64xbf16>
    tpu.vector_store %arg8[%c0_68, %c0_69], %61 {strides = array<i32>} : memref<256x576xbf16, #tpu.memory_space<vmem>>, vector<256x64xbf16>,
    %c0_70 = arith.constant 0 : index
    %c1_71 = arith.constant 1 : index
    %c0_72 = arith.constant 0 : index
    %63 = vector.load %arg7[%c0_70, %c1_71, %c0_72] : memref<18x24x64xf32, #tpu.memory_space<vmem>>, vector<16x16x64xf32>
    %64 = vector.shape_cast %63 : vector<16x16x64xf32> to vector<256x64xf32>
    %65 = arith.truncf %64 : vector<256x64xf32> to vector<256x64xbf16>
    %c0_73 = arith.constant 0 : index
    %c64_74 = arith.constant 64 : index
    %66 = vector.load %arg8[%c0_73, %c64_74] : memref<256x576xbf16, #tpu.memory_space<vmem>>, vector<256x64xbf16>
    tpu.vector_store %arg8[%c0_73, %c64_74], %65 {strides = array<i32>} : memref<256x576xbf16, #tpu.memory_space<vmem>>, vector<256x64xbf16>,
    %c0_75 = arith.constant 0 : index
    %c2_76 = arith.constant 2 : index
    %c0_77 = arith.constant 0 : index
    %67 = vector.load %arg7[%c0_75, %c2_76, %c0_77] : memref<18x24x64xf32, #tpu.memory_space<vmem>>, vector<16x16x64xf32>
    %68 = vector.shape_cast %67 : vector<16x16x64xf32> to vector<256x64xf32>
    %69 = arith.truncf %68 : vector<256x64xf32> to vector<256x64xbf16>
    %c0_78 = arith.constant 0 : index
    %c128_79 = arith.constant 128 : index
    %70 = vector.load %arg8[%c0_78, %c128_79] : memref<256x576xbf16, #tpu.memory_space<vmem>>, vector<256x64xbf16>
    tpu.vector_store %arg8[%c0_78, %c128_79], %69 {strides = array<i32>} : memref<256x576xbf16, #tpu.memory_space<vmem>>, vector<256x64xbf16>,
    %c1_80 = arith.constant 1 : index
    %c0_81 = arith.constant 0 : index
    %c0_82 = arith.constant 0 : index
    %71 = vector.load %arg7[%c1_80, %c0_81, %c0_82] : memref<18x24x64xf32, #tpu.memory_space<vmem>>, vector<16x16x64xf32>
    %72 = vector.shape_cast %71 : vector<16x16x64xf32> to vector<256x64xf32>
    %73 = arith.truncf %72 : vector<256x64xf32> to vector<256x64xbf16>
    %c0_83 = arith.constant 0 : index
    %c192_84 = arith.constant 192 : index
    %74 = vector.load %arg8[%c0_83, %c192_84] : memref<256x576xbf16, #tpu.memory_space<vmem>>, vector<256x64xbf16>
    tpu.vector_store %arg8[%c0_83, %c192_84], %73 {strides = array<i32>} : memref<256x576xbf16, #tpu.memory_space<vmem>>, vector<256x64xbf16>,
    %c1_85 = arith.constant 1 : index
    %c1_86 = arith.constant 1 : index
    %c0_87 = arith.constant 0 : index
    %75 = vector.load %arg7[%c1_85, %c1_86, %c0_87] : memref<18x24x64xf32, #tpu.memory_space<vmem>>, vector<16x16x64xf32>
    %76 = vector.shape_cast %75 : vector<16x16x64xf32> to vector<256x64xf32>
    %77 = arith.truncf %76 : vector<256x64xf32> to vector<256x64xbf16>
    %c0_88 = arith.constant 0 : index
    %c256_89 = arith.constant 256 : index
    %78 = vector.load %arg8[%c0_88, %c256_89] : memref<256x576xbf16, #tpu.memory_space<vmem>>, vector<256x64xbf16>
    tpu.vector_store %arg8[%c0_88, %c256_89], %77 {strides = array<i32>} : memref<256x576xbf16, #tpu.memory_space<vmem>>, vector<256x64xbf16>,
    %c1_90 = arith.constant 1 : index
    %c2_91 = arith.constant 2 : index
    %c0_92 = arith.constant 0 : index
    %79 = vector.load %arg7[%c1_90, %c2_91, %c0_92] : memref<18x24x64xf32, #tpu.memory_space<vmem>>, vector<16x16x64xf32>
    %80 = vector.shape_cast %79 : vector<16x16x64xf32> to vector<256x64xf32>
    %81 = arith.truncf %80 : vector<256x64xf32> to vector<256x64xbf16>
    %c0_93 = arith.constant 0 : index
    %c320_94 = arith.constant 320 : index
    %82 = vector.load %arg8[%c0_93, %c320_94] : memref<256x576xbf16, #tpu.memory_space<vmem>>, vector<256x64xbf16>
    tpu.vector_store %arg8[%c0_93, %c320_94], %81 {strides = array<i32>} : memref<256x576xbf16, #tpu.memory_space<vmem>>, vector<256x64xbf16>,
    %c2_95 = arith.constant 2 : index
    %c0_96 = arith.constant 0 : index
    %c0_97 = arith.constant 0 : index
    %83 = vector.load %arg7[%c2_95, %c0_96, %c0_97] : memref<18x24x64xf32, #tpu.memory_space<vmem>>, vector<16x16x64xf32>
    %84 = vector.shape_cast %83 : vector<16x16x64xf32> to vector<256x64xf32>
    %85 = arith.truncf %84 : vector<256x64xf32> to vector<256x64xbf16>
    %c0_98 = arith.constant 0 : index
    %c384_99 = arith.constant 384 : index
    %86 = vector.load %arg8[%c0_98, %c384_99] : memref<256x576xbf16, #tpu.memory_space<vmem>>, vector<256x64xbf16>
    tpu.vector_store %arg8[%c0_98, %c384_99], %85 {strides = array<i32>} : memref<256x576xbf16, #tpu.memory_space<vmem>>, vector<256x64xbf16>,
    %c2_100 = arith.constant 2 : index
    %c1_101 = arith.constant 1 : index
    %c0_102 = arith.constant 0 : index
    %87 = vector.load %arg7[%c2_100, %c1_101, %c0_102] : memref<18x24x64xf32, #tpu.memory_space<vmem>>, vector<16x16x64xf32>
    %88 = vector.shape_cast %87 : vector<16x16x64xf32> to vector<256x64xf32>
    %89 = arith.truncf %88 : vector<256x64xf32> to vector<256x64xbf16>
    %c0_103 = arith.constant 0 : index
    %c448_104 = arith.constant 448 : index
    %90 = vector.load %arg8[%c0_103, %c448_104] : memref<256x576xbf16, #tpu.memory_space<vmem>>, vector<256x64xbf16>
    tpu.vector_store %arg8[%c0_103, %c448_104], %89 {strides = array<i32>} : memref<256x576xbf16, #tpu.memory_space<vmem>>, vector<256x64xbf16>,
    %c2_105 = arith.constant 2 : index
    %c2_106 = arith.constant 2 : index
    %c0_107 = arith.constant 0 : index
    %91 = vector.load %arg7[%c2_105, %c2_106, %c0_107] : memref<18x24x64xf32, #tpu.memory_space<vmem>>, vector<16x16x64xf32>
    %92 = vector.shape_cast %91 : vector<16x16x64xf32> to vector<256x64xf32>
    %93 = arith.truncf %92 : vector<256x64xf32> to vector<256x64xbf16>
    %c0_108 = arith.constant 0 : index
    %c512_109 = arith.constant 512 : index
    %94 = vector.load %arg8[%c0_108, %c512_109] : memref<256x576xbf16, #tpu.memory_space<vmem>>, vector<256x64xbf16>
    tpu.vector_store %arg8[%c0_108, %c512_109], %93 {strides = array<i32>} : memref<256x576xbf16, #tpu.memory_space<vmem>>, vector<256x64xbf16>,
    %c0_110 = arith.constant 0 : index
    %c0_111 = arith.constant 0 : index
    %95 = vector.load %arg8[%c0_110, %c0_111] : memref<256x576xbf16, #tpu.memory_space<vmem>>, vector<256x576xbf16>
    %c0_112 = arith.constant 0 : index
    %c0_113 = arith.constant 0 : index
    %96 = vector.load %arg4[%c0_112, %c0_113] : memref<576x64xbf16, #tpu.memory_space<vmem>>, vector<576x64xbf16>
    %cst_114 = arith.constant dense<0.000000e+00> : vector<256x64xf32>
    %97 = tpu.matmul %95, %96, %cst_114 {dimension_numbers = #tpu.dot_dimension_numbers<[1], [0], [0], [1], [0, 0, 1, 1], [], []>} : vector<256x576xbf16>, vector<576x64xbf16>, vector<256x64xf32> -> vector<256x64xf32>
    %c0_115 = arith.constant 0 : index
    %c0_116 = arith.constant 0 : index
    %98 = vector.load %arg5[%c0_115, %c0_116] : memref<1x64xf32, #tpu.memory_space<vmem>>, vector<1x64xf32>
    %99 = vector.broadcast %98 : vector<1x64xf32> to vector<256x64xf32>
    %100 = arith.addf %97, %99 : vector<256x64xf32>
    %101 = tpu.transpose %100, [1, 0] : vector<256x64xf32> -> vector<64x256xf32>
    %c0_117 = arith.constant 0 : index
    %c0_118 = arith.constant 0 : index
    %c0_119 = arith.constant 0 : index
    %102 = vector.load %arg1[%c0_117, %c0_118, %c0_119] : memref<1x64x256xf32, #tpu.memory_space<vmem>>, vector<1x64x256xf32>
    %103 = vector.shape_cast %102 : vector<1x64x256xf32> to vector<64x256xf32>
    %104 = arith.addf %101, %103 : vector<64x256xf32>
    %c0_120 = arith.constant 0 : index
    %c0_121 = arith.constant 0 : index
    %c0_122 = arith.constant 0 : index
    %105 = vector.load %arg6[%c0_120, %c0_121, %c0_122] : memref<1x64x256xf32, #tpu.memory_space<vmem>>, vector<1x64x256xf32>
    %106 = vector.shape_cast %105 : vector<1x64x256xf32> to vector<64x256xf32>
    %107 = vector.shape_cast %104 : vector<64x256xf32> to vector<1x64x256xf32>
    tpu.vector_store %arg6[%c0_120, %c0_121, %c0_122], %107 {strides = array<i32>} : memref<1x64x256xf32, #tpu.memory_space<vmem>>, vector<1x64x256xf32>,
    return
  }
  func.func @transform_0(%arg0: i32) -> (i32, i32, i32) {
    %c0_i32 = arith.constant 0 : i32
    %c0_i32_0 = arith.constant 0 : i32
    %c0_i32_1 = arith.constant 0 : i32
    return %arg0, %c0_i32, %c0_i32_0 : i32, i32, i32
  }
  func.func @transform_1(%arg0: i32) -> (i32, i32) {
    %c0_i32 = arith.constant 0 : i32
    %c0_i32_0 = arith.constant 0 : i32
    %c0_i32_1 = arith.constant 0 : i32
    return %c0_i32, %c0_i32_0 : i32, i32
  }
  func.func @transform_2(%arg0: i32) -> (i32, i32) {
    %c0_i32 = arith.constant 0 : i32
    %c0_i32_0 = arith.constant 0 : i32
    %c0_i32_1 = arith.constant 0 : i32
    return %c0_i32, %c0_i32_0 : i32, i32
  }
  func.func @transform_3(%arg0: i32) -> (i32, i32) {
    %c0_i32 = arith.constant 0 : i32
    %c0_i32_0 = arith.constant 0 : i32
    %c0_i32_1 = arith.constant 0 : i32
    return %c0_i32, %c0_i32_0 : i32, i32
  }
  func.func @transform_4(%arg0: i32) -> (i32, i32) {
    %c0_i32 = arith.constant 0 : i32
    %c0_i32_0 = arith.constant 0 : i32
    %c0_i32_1 = arith.constant 0 : i32
    return %c0_i32, %c0_i32_0 : i32, i32
  }
  func.func @transform_5(%arg0: i32) -> (i32, i32, i32) {
    %c0_i32 = arith.constant 0 : i32
    %c0_i32_0 = arith.constant 0 : i32
    %c0_i32_1 = arith.constant 0 : i32
    return %arg0, %c0_i32, %c0_i32_0 : i32, i32, i32
  }
}

</mosaic_0001>

<bundles_post_ra>
// kernel: basic_block_forward.1
= control target key start
LH: loop header
LB: loop body
LE: loop exit
PB: predicated region body
PF: predicated region fallthrough
CT: control target
= control target key end

     0   :  { %s7206_s18 = smov 0   ;;  %s9611_s0 = inlined_call_operand.vmem [shape: f32[2,64,256], index: 0, kind: input, shape index: {}]   ;;  %s9612_s1 = inlined_call_operand.vmem [shape: bf16[576,64], index: 1, kind: input, shape index: {}]   ;;  %s9613_s2 = inlined_call_operand.vmem [shape: f32[1,64], index: 2, kind: input, shape index: {}]   ;;  %s9614_s3 = inlined_call_operand.vmem [shape: bf16[576,64], index: 3, kind: input, shape index: {}]   ;;  %s9615_s4 = inlined_call_operand.vmem [shape: f32[1,64], index: 4, kind: input, shape index: {}]   ;;  %s9616_s5 = inlined_call_operand.vmem [shape: f32[2,64,256], index: 5, kind: output, shape index: {}]  }
   0x1 LB: > { %s5932_s19 = sadd.s32 4294967295, %s7172_s18   ;;  %p5936_p0 = scmp.ge.s32.totalorder %s7172_s18, 1  ;;  %s7172_s18 = sphi %s7206_s18, %s15_s18  }
   0x2   : > { %p187_p1 = scmp.lt.s32.totalorder %s7172_s18, 3 }
   0x4   : > { %p188_p2 = pnand %p5936_p0, %p187_p1 }
   0x6   : > { %191 = sbr.rel (%p188_p2) target bundleno = 1666 (0x682), region = 40 }
   0xb   : > { %p215_p3 = scmp.lt.s32.totalorder %s5932_s19, 1  ;;  %vm226_vm0 = vcmask 523264   ;;  %v7174_v8 = vmov 0.0   ;;  %s7175_s24 = smov 64   ;;  %vm234_vm1 = vcmask 516096   ;;  %vm448_vm2 = vcmask 519168  }
   0xc   : > { %227 = vst.msk [vmem:[#allocation2] sm:$0xff] %vm226_vm0, %v7174_v8  ;;  %v6992_v48 = vld [vmem:[%s9612_s1 + $0x38] sm:$0xff]  ;;  %v6991_v55 = vld [vmem:[%s9612_s1 + $0x30] sm:$0xff]  ;;  %vm673_vm3 = vcmask 1043968  }
   0xd   : > { %s9679_s19 = smov (!%p215_p3, %s5932_s19), 1  ;;  %228 = vst.msk [vmem:[#allocation2 + $0x8] sm:$0xff] %vm226_vm0, %v7174_v8  ;;  %2599 = vmatpush.bf16.msra.mxu0 %v6992_v48  ;;  %7137 = vmatpush.bf16.msra.mxu2 %v6992_v48 }
   0xe   : > { %s6903_s20 = sshll.u32 %s9679_s19, 7  ;;  %229 = vst.msk [vmem:[#allocation2 + $0x10] sm:$0xff] %vm226_vm0, %v7174_v8 }
   0xf   : > { %s7222_s23 = scalar_lea.vmem %s9611_s0, %s6903_s20  ;;  %231 = vst.msk [vmem:[#allocation2 + $0x198] sm:$0xff] %vm226_vm0, %v7174_v8  ;;  %s9568_s11 = scalar_lea.vmem %s9616_s5, %s6903_s20 }
  0x10   : > { %v272_v0 = vld [vmem:[%s7222_s23 + $0x8] sm:$0xff]  ;;  %v271_v1 = vld [vmem:[%s7222_s23] sm:$0xff]  ;;  %v274_v2 = vld [vmem:[%s7222_s23 + $0x18] sm:$0xff]  ;;  %232 = vst.msk [vmem:[#allocation2 + $0x1a0] sm:$0xff] %vm226_vm0, %v7174_v8 }
  0x11   : > { %319 = vxpose.xlu1.b32.start [1/8] (short) %v272_v0, 128  ;;  %287 = vxpose.xlu0.b32.start [1/8] (short) %v271_v1, 128  ;;  %v273_v3 = vld [vmem:[%s7222_s23 + $0x10] sm:$0xff]  ;;  %v276_v4 = vld [vmem:[%s7222_s23 + $0x28] sm:$0xff]  ;;  %v275_v5 = vld [vmem:[%s7222_s23 + $0x20] sm:$0xff]  ;;  %233 = vst.msk [vmem:[#allocation2 + $0x1a8] sm:$0xff] %vm226_vm0, %v7174_v8 }
  0x12   : > { %v278_v6 = vld [vmem:[%s7222_s23 + $0x38] sm:$0xff]  ;;  %v277_v7 = vld [vmem:[%s7222_s23 + $0x30] sm:$0xff]  ;;  %v280_v9 = vld [vmem:[%s7222_s23 + $0x48] sm:$0xff]  ;;  %262 = vst.msk [vmem:[#allocation2 + $0xe9] sm:$0x1] %vm234_vm1, %v7174_v8  ;;  %2600 = vmatpush.bf16.msra.mxu0 %v6991_v55  ;;  %7138 = vmatpush.bf16.msra.mxu2 %v6991_v55 }
  0x13   : > { %v279_v10 = vld [vmem:[%s7222_s23 + $0x40] sm:$0xff]  ;;  %v282_v13 = vld [vmem:[%s7222_s23 + $0x58] sm:$0xff]  ;;  %v281_v14 = vld [vmem:[%s7222_s23 + $0x50] sm:$0xff]  ;;  %235 = vst.msk [vmem:[#allocation2] sm:$0x1] %vm234_vm1, %v7174_v8 }
  0x14   : > { %v481_v11 = vld [vmem:[#allocation2 + $0x1] sm:$0xff]  ;;  %v286_v19 = vld [vmem:[%s7222_s23 + $0x78] sm:$0xff]  ;;  %v285_v20 = vld [vmem:[%s7222_s23 + $0x70] sm:$0xff]  ;;  %236 = vst.msk [vmem:[#allocation2 + $0x18] sm:$0x1] %vm234_vm1, %v7174_v8 }
  0x15   : > { %v513_v12 = vpack.c.bf16 %v481_v11, %v481_v11  ;;  %v482_v15 = vld [vmem:[#allocation2 + $0x9] sm:$0xff]  ;;  %v283_v18 = vld [vmem:[%s7222_s23 + $0x60] sm:$0xff]  ;;  %237 = vst.msk [vmem:[#allocation2 + $0x30] sm:$0x1] %vm234_vm1, %v7174_v8 }
  0x16   : > { %v514_v16 = vpack.c.bf16 %v482_v15, %v482_v15  ;;  %v284_v17 = vld [vmem:[%s7222_s23 + $0x68] sm:$0xff]  ;;  %238 = vst.msk [vmem:[#allocation2 + $0x48] sm:$0x1] %vm234_vm1, %v7174_v8 }
  0x17   : > { %577 = vrot.lane.b32.xlu2 %v513_v12, %s7175_s24  ;;  %239 = vst.msk [vmem:[#allocation2 + $0x60] sm:$0x1] %vm234_vm1, %v7174_v8 }
  0x18   : > { %240 = vst.msk [vmem:[#allocation2 + $0x78] sm:$0x1] %vm234_vm1, %v7174_v8 }
  0x19   : > { %320 = vxpose.xlu1.b32.cont [2/8] (short) %v274_v2, 128  ;;  %288 = vxpose.xlu0.b32.cont [2/8] (short) %v273_v3, 128  ;;  %241 = vst.msk [vmem:[#allocation2 + $0x90] sm:$0x1] %vm234_vm1, %v7174_v8 }
  0x1a   : > { %242 = vst.msk [vmem:[#allocation2 + $0xa8] sm:$0x1] %vm234_vm1, %v7174_v8 }
  0x1b   : > { %243 = vst.msk [vmem:[#allocation2 + $0xc0] sm:$0x1] %vm234_vm1, %v7174_v8 }
  0x1c   : > { %244 = vst.msk [vmem:[#allocation2 + $0xd8] sm:$0x1] %vm234_vm1, %v7174_v8 }
  0x1d   : > { %245 = vst.msk [vmem:[#allocation2 + $0xf0] sm:$0x1] %vm234_vm1, %v7174_v8 }
  0x1e   : > { %246 = vst.msk [vmem:[#allocation2 + $0x108] sm:$0x1] %vm234_vm1, %v7174_v8 }
  0x1f   : > { %579 = vrot.lane.b32.xlu2 %v514_v16, %s7175_s24  ;;  %247 = vst.msk [vmem:[#allocation2 + $0x120] sm:$0x1] %vm234_vm1, %v7174_v8 }
  0x20   : > { %248 = vst.msk [vmem:[#allocation2 + $0x138] sm:$0x1] %vm234_vm1, %v7174_v8 }
  0x21   : > { %321 = vxpose.xlu1.b32.cont [3/8] (short) %v276_v4, 128  ;;  %289 = vxpose.xlu0.b32.cont [3/8] (short) %v275_v5, 128  ;;  %249 = vst.msk [vmem:[#allocation2 + $0x150] sm:$0x1] %vm234_vm1, %v7174_v8  ;;  %v6990_v4 = vld [vmem:[%s9612_s1 + $0x28] sm:$0xff] }
  0x22   : > { %250 = vst.msk [vmem:[#allocation2 + $0x168] sm:$0x1] %vm234_vm1, %v7174_v8  ;;  %2601 = vmatpush.bf16.msra.mxu0 %v6990_v4  ;;  %7139 = vmatpush.bf16.msra.mxu2 %v6990_v4 }
  0x23   : > { %251 = vst.msk [vmem:[#allocation2 + $0x180] sm:$0x1] %vm234_vm1, %v7174_v8 }
  0x24   : > { %252 = vst.msk [vmem:[#allocation2 + $0x198] sm:$0x1] %vm234_vm1, %v7174_v8 }
  0x25   : > { %253 = vst.msk [vmem:[#allocation2 + $0x11] sm:$0x1] %vm234_vm1, %v7174_v8 }
  0x26   : > { %254 = vst.msk [vmem:[#allocation2 + $0x29] sm:$0x1] %vm234_vm1, %v7174_v8 }
  0x27   : > { %255 = vst.msk [vmem:[#allocation2 + $0x41] sm:$0x1] %vm234_vm1, %v7174_v8 }
  0x28   : > { %256 = vst.msk [vmem:[#allocation2 + $0x59] sm:$0x1] %vm234_vm1, %v7174_v8 }
  0x29   : > { %322 = vxpose.xlu1.b32.cont [4/8] (short) %v278_v6, 128  ;;  %290 = vxpose.xlu0.b32.cont [4/8] (short) %v277_v7, 128  ;;  %257 = vst.msk [vmem:[#allocation2 + $0x71] sm:$0x1] %vm234_vm1, %v7174_v8 }
  0x2a   : > { %258 = vst.msk [vmem:[#allocation2 + $0x89] sm:$0x1] %vm234_vm1, %v7174_v8 }
  0x2b   : > { %259 = vst.msk [vmem:[#allocation2 + $0xa1] sm:$0x1] %vm234_vm1, %v7174_v8 }
  0x2c   : > { %260 = vst.msk [vmem:[#allocation2 + $0xb9] sm:$0x1] %vm234_vm1, %v7174_v8 }
  0x2d   : > { %261 = vst.msk [vmem:[#allocation2 + $0xd1] sm:$0x1] %vm234_vm1, %v7174_v8 }
  0x2e   : > { %263 = vst.msk [vmem:[#allocation2 + $0x101] sm:$0x1] %vm234_vm1, %v7174_v8 }
  0x2f   : > { %264 = vst.msk [vmem:[#allocation2 + $0x119] sm:$0x1] %vm234_vm1, %v7174_v8 }
  0x30   : > { %265 = vst.msk [vmem:[#allocation2 + $0x131] sm:$0x1] %vm234_vm1, %v7174_v8 }
  0x31   : > { %323 = vxpose.xlu1.b32.cont [5/8] (short) %v280_v9, 128  ;;  %291 = vxpose.xlu0.b32.cont [5/8] (short) %v279_v10, 128  ;;  %266 = vst.msk [vmem:[#allocation2 + $0x149] sm:$0x1] %vm234_vm1, %v7174_v8  ;;  %v6989_v9 = vld [vmem:[%s9612_s1 + $0x20] sm:$0xff] }
  0x32   : > { %267 = vst.msk [vmem:[#allocation2 + $0x161] sm:$0x1] %vm234_vm1, %v7174_v8  ;;  %v384_v10 = vld [vmem:[#allocation2] sm:$0xff]  ;;  %2602 = vmatpush.bf16.msra.mxu0 %v6989_v9  ;;  %7140 = vmatpush.bf16.msra.mxu2 %v6989_v9 }
  0x33   : > { %268 = vst.msk [vmem:[#allocation2 + $0x179] sm:$0x1] %vm234_vm1, %v7174_v8  ;;  %v416_v11 = vpack.c.bf16 %v384_v10, %v384_v10 }
  0x34   : > { %269 = vst.msk [vmem:[#allocation2 + $0x191] sm:$0x1] %vm234_vm1, %v7174_v8 }
  0x35   : > { %270 = vst.msk [vmem:[#allocation2 + $0x1a9] sm:$0x1] %vm234_vm1, %v7174_v8 }
  0x36   : > { %449 = vst.msk [vmem:[#allocation3] sm:$0xf] %vm448_vm2, %v416_v11 }
  0x39   : > { %324 = vxpose.xlu1.b32.cont [6/8] (short) %v282_v13, 128  ;;  %292 = vxpose.xlu0.b32.cont [6/8] (short) %v281_v14, 128 }
  0x41   : > { %325 = vxpose.xlu1.b32.cont [7/8] (short) %v284_v17, 128  ;;  %293 = vxpose.xlu0.b32.cont [7/8] (short) %v283_v18, 128  ;;  %v6988_v17 = vld [vmem:[%s9612_s1 + $0x18] sm:$0xff] }
  0x42   : > { %2603 = vmatpush.bf16.msra.mxu0 %v6988_v17  ;;  %7141 = vmatpush.bf16.msra.mxu2 %v6988_v17 }
  0x49   : > { %326 = vxpose.xlu1.b32.end [8/8] (short) %v286_v19, 128  ;;  %294 = vxpose.xlu0.b32.end [8/8] (short) %v285_v20, 128  ;;  %v385_v19 = vld [vmem:[#allocation2 + $0x8] sm:$0xff] }
  0x71   : > { %v578_v16 = vpop.permute.xlu2 %577 }
  0x72   : > { %674 = vst.msk [vmem:[#allocation3] sm:$0xf] %vm673_vm3, %v578_v16 }
  0xb5   : > { %v335_v21 = vpop.trf.xlu1  ;;  %v303_v22 = vpop.trf.xlu0 }
  0xb6   : > { %368 = vst.msk [vmem:[#allocation2 + $0xd9] sm:$0xff] %vm226_vm0, %v335_v21  ;;  %v6987_v21 = vld [vmem:[%s9612_s1 + $0x10] sm:$0xff] }
  0xb7   : > { %352 = vst.msk [vmem:[#allocation2 + $0x19] sm:$0xff] %vm226_vm0, %v303_v22  ;;  %v417_v22 = vpack.c.bf16 %v385_v19, %v385_v19  ;;  %2604 = vmatpush.bf16.msra.mxu0 %v6987_v21  ;;  %7142 = vmatpush.bf16.msra.mxu2 %v6987_v21 }
  0xb9   : > { %450 = vst.msk [vmem:[#allocation3 + $0x14] sm:$0xf] %vm448_vm2, %v417_v22 }
  0xbd   : > { %v336_v23 = vpop.trf.xlu1  ;;  %v304_v24 = vpop.trf.xlu0  ;;  %v818_v25 = vld [vmem:[#allocation2 + $0xd8] sm:$0xff] }
  0xbe   : > { %369 = vst.msk [vmem:[#allocation2 + $0xe1] sm:$0xff] %vm226_vm0, %v336_v23  ;;  %v850_v26 = vpack.c.bf16 %v818_v25, %v818_v25  ;;  %v386_v27 = vld [vmem:[#allocation2 + $0x18] sm:$0xff] }
  0xbf   : > { %353 = vst.msk [vmem:[#allocation2 + $0x21] sm:$0xff] %vm226_vm0, %v304_v24  ;;  %v7330_v28 = vpack.c.bf16 %v386_v27, %v386_v27  ;;  %v499_v29 = vld [vmem:[#allocation2 + $0xd9] sm:$0xff] }
  0xc0   : > { %930 = vrot.lane.b32.xlu2 %v850_v26, %s7175_s24  ;;  %467 = vst.msk [vmem:[#allocation3 + $0x168] sm:$0xf] %vm448_vm2, %v850_v26  ;;  %v531_v37 = vpack.c.bf16 %v499_v29, %v499_v29  ;;  %v483_v8 = vld [vmem:[#allocation2 + $0x19] sm:$0xff] }
  0xc1   : > { %451 = vst.msk [vmem:[#allocation3 + $0x28] sm:$0xf] %vm448_vm2, %v7330_v28  ;;  %v515_v14 = vpack.c.bf16 %v483_v8, %v483_v8 }
  0xc5   : > { %v1681_v30 = vld [vmem:[#allocation2 + $0xda] sm:$0xff]  ;;  %v1682_v31 = vld [vmem:[#allocation2 + $0xe2] sm:$0xff]  ;;  %v337_v32 = vpop.trf.xlu1  ;;  %v305_v33 = vpop.trf.xlu0 }
  0xc6   : > { %v819_v34 = vld [vmem:[#allocation2 + $0xe0] sm:$0xff]  ;;  %v1713_v35 = vpack.c.bf16 %v1681_v30, %v1681_v30  ;;  %v1714_v36 = vpack.c.bf16 %v1682_v31, %v1682_v31  ;;  %370 = vst.msk [vmem:[#allocation2 + $0xf1] sm:$0xff] %vm226_vm0, %v337_v32 }
  0xc7   : > { %v851_v38 = vpack.c.bf16 %v819_v34, %v819_v34  ;;  %354 = vst.msk [vmem:[#allocation2 + $0x31] sm:$0xff] %vm226_vm0, %v305_v33  ;;  %v387_v39 = vld [vmem:[#allocation2 + $0x20] sm:$0xff] }
  0xc8   : > { %1745 = vst.msk [vmem:[#allocation3 + $0x128] sm:$0xf] %vm448_vm2, %v1713_v35  ;;  %613 = vrot.lane.b32.xlu2 %v531_v37, %s7175_s24  ;;  %v7340_v40 = vpack.c.bf16 %v387_v39, %v387_v39  ;;  %v1027_v41 = vld [vmem:[#allocation2 + $0x21] sm:$0xff]  ;;  %v580_v37 = vpop.permute.xlu2 %579 }
  0xc9   : > { %1746 = vst.msk [vmem:[#allocation3 + $0x13c] sm:$0xf] %vm448_vm2, %v1714_v36  ;;  %v1059_v42 = vpack.c.bf16 %v1027_v41, %v1027_v41  ;;  %v1122_v45 = vld [vmem:[#allocation2 + $0x1a] sm:$0xff]  ;;  %v1123_v46 = vld [vmem:[#allocation2 + $0x22] sm:$0xff] }
  0xca   : > { %468 = vst.msk [vmem:[#allocation3 + $0x17c] sm:$0xf] %vm448_vm2, %v851_v38  ;;  %v7357_v51 = vpack.c.bf16 %v1122_v45, %v1122_v45  ;;  %v7361_v53 = vpack.c.bf16 %v1123_v46, %v1123_v46  ;;  %v500_v54 = vld [vmem:[#allocation2 + $0xe1] sm:$0xff] }
  0xcb   : > { %452 = vst.msk [vmem:[#allocation3 + $0x3c] sm:$0xf] %vm448_vm2, %v7340_v40  ;;  %v532_v1 = vpack.c.bf16 %v500_v54, %v500_v54  ;;  %v484_v20 = vld [vmem:[#allocation2 + $0x21] sm:$0xff]  ;;  %v5943_v54 = vld [vmem:[#allocation3] sm:$0xf] }
  0xcc   : > { %789 = vst.msk [vmem:[#allocation3 + $0x180] sm:$0xf] %vm448_vm2, %v1714_v36  ;;  %v516_v32 = vpack.c.bf16 %v484_v20, %v484_v20  ;;  %v6985_v41 = vld [vmem:[%s9612_s1] sm:$0xff] }
  0xcd   : > { %v338_v43 = vpop.trf.xlu1  ;;  %v306_v44 = vpop.trf.xlu0  ;;  %788 = vst.msk [vmem:[#allocation3 + $0x16c] sm:$0xf] %vm448_vm2, %v1713_v35  ;;  %v820_v50 = vld [vmem:[#allocation2 + $0xf0] sm:$0xff]  ;;  %v6986_v35 = vld [vmem:[%s9612_s1 + $0x8] sm:$0xff] }
  0xce   : > { %371 = vst.msk [vmem:[#allocation2 + $0xf9] sm:$0xff] %vm226_vm0, %v338_v43  ;;  %v388_v47 = vld [vmem:[#allocation2 + $0x30] sm:$0xff]  ;;  %v7359_v52 = vpack.c.bf16 %v820_v50, %v820_v50  ;;  %2605 = vmatpush.bf16.msra.mxu0 %v6986_v35  ;;  %7143 = vmatpush.bf16.msra.mxu2 %v6986_v35  ;;  %v7000_v35 = vld [vmem:[%s9612_s1 + $0x78] sm:$0xff] }
  0xcf   : > { %355 = vst.msk [vmem:[#allocation2 + $0x39] sm:$0xff] %vm226_vm0, %v306_v44  ;;  %v7353_v49 = vpack.c.bf16 %v388_v47, %v388_v47  ;;  %v501_v36 = vld [vmem:[#allocation2 + $0xf1] sm:$0xff]  ;;  %7145 = vmatpush.bf16.msra.mxu3 %v7000_v35  ;;  %2688 = vmatpush.bf16.msra.mxu1 %v7000_v35 }
  0xd0   : > { %932 = vrot.lane.b32.xlu2 %v851_v38, %s7175_s24  ;;  %1091 = vst.msk [vmem:[#allocation3 + $0x1c] sm:$0xf] %vm448_vm2, %v1059_v42  ;;  %v533_v42 = vpack.c.bf16 %v501_v36, %v501_v36 }
  0xd1   : > { %453 = vst.msk [vmem:[#allocation3 + $0x50] sm:$0xf] %vm448_vm2, %v7353_v49 }
  0xd2   : > { %1411 = vst.msk [vmem:[#allocation3 + $0xc] sm:$0xf] %vm448_vm2, %v7353_v49  ;;  %2606 = vmatpush.bf16.msra.mxu0 %v6985_v41  ;;  %7144 = vmatpush.bf16.msra.mxu2 %v6985_v41 }
  0xd3   : > { %469 = vst.msk [vmem:[#allocation3 + $0x190] sm:$0xf] %vm448_vm2, %v7359_v52 }
  0xd4   : > { %772 = vst.msk [vmem:[#allocation3 + $0x2c] sm:$0xf] %vm448_vm2, %v7357_v51 }
  0xd5   : > { %v1683_v56 = vld [vmem:[#allocation2 + $0xf2] sm:$0xff]  ;;  %v1684_v57 = vld [vmem:[#allocation2 + $0xfa] sm:$0xff]  ;;  %v339_v58 = vpop.trf.xlu1  ;;  %v307_v59 = vpop.trf.xlu0  ;;  %773 = vst.msk [vmem:[#allocation3 + $0x40] sm:$0xf] %vm448_vm2, %v7361_v53 }
  0xd6   : > { %v821_v60 = vld [vmem:[#allocation2 + $0xf8] sm:$0xff]  ;;  %v1715_v61 = vpack.c.bf16 %v1683_v56, %v1683_v56  ;;  %v1716_v62 = vpack.c.bf16 %v1684_v57, %v1684_v57  ;;  %372 = vst.msk [vmem:[#allocation2 + $0x109] sm:$0xff] %vm226_vm0, %v339_v58 }
  0xd7   : > { %v1667_v63 = vld [vmem:[#allocation2 + $0x32] sm:$0xff]  ;;  %v1668_v0 = vld [vmem:[#allocation2 + $0x3a] sm:$0xff]  ;;  %356 = vst.msk [vmem:[#allocation2 + $0x49] sm:$0xff] %vm226_vm0, %v307_v59  ;;  %v853_v6 = vpack.c.bf16 %v821_v60, %v821_v60 }
  0xd8   : > { %v1699_v2 = vpack.c.bf16 %v1667_v63, %v1667_v63  ;;  %v7377_v3 = vpack.c.bf16 %v1668_v0, %v1668_v0  ;;  %v805_v5 = vld [vmem:[#allocation2 + $0x38] sm:$0xff]  ;;  %1747 = vst.msk [vmem:[#allocation3 + $0x150] sm:$0xf] %vm448_vm2, %v1715_v61  ;;  %615 = vrot.lane.b32.xlu2 %v532_v1, %s7175_s24 }
  0xd9   : > { %1748 = vst.msk [vmem:[#allocation3 + $0x164] sm:$0xf] %vm448_vm2, %v1716_v62  ;;  %v7386_v7 = vpack.c.bf16 %v805_v5, %v805_v5  ;;  %v1029_v39 = vld [vmem:[#allocation2 + $0x39] sm:$0xff]  ;;  %v485_v58 = vld [vmem:[#allocation2 + $0x31] sm:$0xff] }
  0xda   : > { %1731 = vst.msk [vmem:[#allocation3 + $0x10] sm:$0xf] %vm448_vm2, %v1699_v2  ;;  %v7436_v46 = vpack.c.bf16 %v1029_v39, %v1029_v39  ;;  %v7460_v8 = vpack.c.bf16 %v485_v58, %v485_v58  ;;  %v1124_v9 = vld [vmem:[#allocation2 + $0x32] sm:$0xff] }
  0xdb   : > { %1732 = vst.msk [vmem:[#allocation3 + $0x24] sm:$0xf] %vm448_vm2, %v7377_v3 }
  0xdc   : > { %470 = vst.msk [vmem:[#allocation3 + $0x1a4] sm:$0xf] %vm448_vm2, %v853_v6 }
  0xdd   : > { %v340_v12 = vpop.trf.xlu1  ;;  %v308_v13 = vpop.trf.xlu0  ;;  %454 = vst.msk [vmem:[#allocation3 + $0x64] sm:$0xf] %vm448_vm2, %v7386_v7  ;;  %v822_v48 = vld [vmem:[#allocation2 + $0x108] sm:$0xff] }
  0xde   : > { %373 = vst.msk [vmem:[#allocation2 + $0x111] sm:$0xff] %vm226_vm0, %v340_v12  ;;  %v806_v15 = vld [vmem:[#allocation2 + $0x48] sm:$0xff]  ;;  %v7443_v55 = vpack.c.bf16 %v822_v48, %v822_v48 }
  0xdf   : > { %357 = vst.msk [vmem:[#allocation2 + $0x51] sm:$0xff] %vm226_vm0, %v308_v13  ;;  %v7404_v18 = vpack.c.bf16 %v806_v15, %v806_v15  ;;  %v502_v13 = vld [vmem:[#allocation2 + $0xf9] sm:$0xff] }
  0xe0   : > { %581 = vrot.lane.b32.xlu2 %v515_v14, %s7175_s24  ;;  %790 = vst.msk [vmem:[#allocation3 + $0x194] sm:$0xf] %vm448_vm2, %v1715_v61  ;;  %v7473_v14 = vpack.c.bf16 %v1124_v9, %v1124_v9  ;;  %v711_v15 = vld [vmem:[#allocation2 + $0x3a] sm:$0xff]  ;;  %v534_v16 = vpack.c.bf16 %v502_v13, %v502_v13 }
  0xe1   : > { %791 = vst.msk [vmem:[#allocation3 + $0x1a8] sm:$0xf] %vm448_vm2, %v1716_v62 }
  0xe2   : > { %455 = vst.msk [vmem:[#allocation3 + $0x78] sm:$0xf] %vm448_vm2, %v7404_v18 }
  0xe3   : > { %936 = vrot.lane.b32.xlu1 %v853_v6, %s7175_s24  ;;  %675 = vst.msk [vmem:[#allocation3 + $0x14] sm:$0xf] %vm673_vm3, %v580_v37 }
  0xe4   : > { %1093 = vst.msk [vmem:[#allocation3 + $0x44] sm:$0xf] %vm448_vm2, %v7436_v46 }
  0xe5   : > { %v1685_v23 = vld [vmem:[#allocation2 + $0x10a] sm:$0xff]  ;;  %v1686_v24 = vld [vmem:[#allocation2 + $0x112] sm:$0xff]  ;;  %v341_v25 = vpop.trf.xlu1  ;;  %v309_v26 = vpop.trf.xlu0  ;;  %1413 = vst.msk [vmem:[#allocation3 + $0x34] sm:$0xf] %vm448_vm2, %v7404_v18 }
  0xe6   : > { %v1717_v27 = vpack.c.bf16 %v1685_v23, %v1685_v23  ;;  %v1718_v29 = vpack.c.bf16 %v1686_v24, %v1686_v24  ;;  %v1669_v30 = vld [vmem:[#allocation2 + $0x4a] sm:$0xff]  ;;  %v1670_v31 = vld [vmem:[#allocation2 + $0x52] sm:$0xff]  ;;  %374 = vst.msk [vmem:[#allocation2 + $0x121] sm:$0xff] %vm226_vm0, %v341_v25  ;;  %v743_v24 = vpack.c.bf16 %v711_v15, %v711_v15 }
  0xe7   : > { %v1701_v33 = vpack.c.bf16 %v1669_v30, %v1669_v30  ;;  %v7417_v34 = vpack.c.bf16 %v1670_v31, %v1670_v31  ;;  %358 = vst.msk [vmem:[#allocation2 + $0x61] sm:$0xff] %vm226_vm0, %v309_v26  ;;  %v807_v38 = vld [vmem:[#allocation2 + $0x50] sm:$0xff] }
  0xe8   : > { %1749 = vst.msk [vmem:[#allocation3 + $0x178] sm:$0xf] %vm448_vm2, %v1717_v27  ;;  %583 = vrot.lane.b32.xlu2 %v516_v32, %s7175_s24  ;;  %v7433_v43 = vpack.c.bf16 %v807_v38, %v807_v38  ;;  %v488_v47 = vld [vmem:[#allocation2 + $0x51] sm:$0xff] }
  0xe9   : > { %1750 = vst.msk [vmem:[#allocation3 + $0x18c] sm:$0xf] %vm448_vm2, %v1718_v29  ;;  %v823_v50 = vld [vmem:[#allocation2 + $0x110] sm:$0xff]  ;;  %v7447_v57 = vpack.c.bf16 %v488_v47, %v488_v47  ;;  %v486_v29 = vld [vmem:[#allocation2 + $0x39] sm:$0xff] }
  0xea   : > { %1734 = vst.msk [vmem:[#allocation3 + $0x4c] sm:$0xf] %vm448_vm2, %v7417_v34  ;;  %v7445_v56 = vpack.c.bf16 %v823_v50, %v823_v50  ;;  %v6907_v59 = vld [vmem:[#allocation3 + $0x10] sm:$0xf0]  ;;  %v518_v41 = vpack.c.bf16 %v486_v29, %v486_v29  ;;  %v6999_v50 = vld [vmem:[%s9612_s1 + $0x70] sm:$0xff] }
  0xeb   : > { %1733 = vst.msk [vmem:[#allocation3 + $0x38] sm:$0xf] %vm448_vm2, %v1701_v33  ;;  %v5944_v60 = vor.u32 %v6907_v59, %v5943_v54  ;;  %v729_v58 = vld [vmem:[#allocation2 + $0x112] sm:$0xff]  ;;  %7146 = vmatpush.bf16.msra.mxu3 %v6999_v50  ;;  %v6998_v59 = vld [vmem:[%s9612_s1 + $0x68] sm:$0xff]  ;;  %2689 = vmatpush.bf16.msra.mxu1 %v6999_v50 }
  0xec   : > { %792 = vst.msk [vmem:[#allocation3 + $0x1bc] sm:$0xf] %vm448_vm2, %v1717_v27 }
  0xed   : > { %v342_v44 = vpop.trf.xlu1  ;;  %v310_v45 = vpop.trf.xlu0  ;;  %456 = vst.msk [vmem:[#allocation3 + $0x8c] sm:$0xf] %vm448_vm2, %v7433_v43  ;;  %2607 = vmatmul.bf16.vlgmr.msra.gmra.mxu0 %v5944_v60  ;;  %v1126_v60 = vld [vmem:[#allocation2 + $0x4a] sm:$0xff]  ;;  %v824_v13 = vld [vmem:[#allocation2 + $0x120] sm:$0xff] }
  0xee   : > { %375 = vst.msk [vmem:[#allocation2 + $0x129] sm:$0xff] %vm226_vm0, %v342_v44  ;;  %v808_v1 = vld [vmem:[#allocation2 + $0x60] sm:$0xff] }
  0xef   : > { %359 = vst.msk [vmem:[#allocation2 + $0x69] sm:$0xff] %vm226_vm0, %v310_v45  ;;  %v7470_v12 = vpack.c.bf16 %v808_v1, %v808_v1  ;;  %7147 = vmatpush.bf16.msra.mxu3 %v6998_v59  ;;  %2690 = vmatpush.bf16.msra.mxu1 %v6998_v59 }
  0xf0   : > { %617 = vrot.lane.b32.xlu2 %v533_v42, %s7175_s24  ;;  %471 = vst.msk [vmem:[#allocation3 + $0x1b8] sm:$0xf] %vm448_vm2, %v7443_v55 }
  0xf1   : > { %472 = vst.msk [vmem:[#allocation3 + $0x1cc] sm:$0xf] %vm448_vm2, %v7445_v56 }
  0xf2   : > { %1095 = vst.msk [vmem:[#allocation3 + $0x6c] sm:$0xf] %vm448_vm2, %v7447_v57 }
  0xf3   : > { %1415 = vst.msk [vmem:[#allocation3 + $0x5c] sm:$0xf] %vm448_vm2, %v7470_v12 }
  0xf4   : > { %774 = vst.msk [vmem:[#allocation3 + $0x54] sm:$0xf] %vm448_vm2, %v7473_v14 }
  0xf5   : > { %v1687_v61 = vld [vmem:[#allocation2 + $0x122] sm:$0xff]  ;;  %v1688_v62 = vld [vmem:[#allocation2 + $0x12a] sm:$0xff]  ;;  %v343_v63 = vpop.trf.xlu1  ;;  %v311_v0 = vpop.trf.xlu0  ;;  %457 = vst.msk [vmem:[#allocation3 + $0xa0] sm:$0xf] %vm448_vm2, %v7470_v12 }
  0xf6   : > { %v1719_v2 = vpack.c.bf16 %v1687_v61, %v1687_v61  ;;  %v1720_v4 = vpack.c.bf16 %v1688_v62, %v1688_v62  ;;  %v1671_v5 = vld [vmem:[#allocation2 + $0x62] sm:$0xff]  ;;  %v1672_v6 = vld [vmem:[#allocation2 + $0x6a] sm:$0xff]  ;;  %376 = vst.msk [vmem:[#allocation2 + $0x139] sm:$0xff] %vm226_vm0, %v343_v63  ;;  %v761_v61 = vpack.c.bf16 %v729_v58, %v729_v58  ;;  %v713_v62 = vld [vmem:[#allocation2 + $0x52] sm:$0xff] }
  0xf7   : > { %v1703_v10 = vpack.c.bf16 %v1671_v5, %v1671_v5  ;;  %v7462_v11 = vpack.c.bf16 %v1672_v6, %v1672_v6  ;;  %360 = vst.msk [vmem:[#allocation2 + $0x79] sm:$0xff] %vm226_vm0, %v311_v0  ;;  %934 = vrot.lane.b32.xlu0 %v7359_v52, %s7175_s24  ;;  %v490_v52 = vld [vmem:[#allocation2 + $0x69] sm:$0xff]  ;;  %v7529_v5 = vpack.c.bf16 %v1126_v60, %v1126_v60 }
  0xf8   : > { %1751 = vst.msk [vmem:[#allocation3 + $0x1a0] sm:$0xf] %vm448_vm2, %v1719_v2  ;;  %585 = vrot.lane.b32.xlu2 %v7460_v8, %s7175_s24  ;;  %v809_v21 = vld [vmem:[#allocation2 + $0x68] sm:$0xff]  ;;  %v7486_v26 = vpack.c.bf16 %v490_v52, %v490_v52  ;;  %v745_v9 = vpack.c.bf16 %v713_v62, %v713_v62 }
  0xf9   : > { %1752 = vst.msk [vmem:[#allocation3 + $0x1b4] sm:$0xf] %vm448_vm2, %v1720_v4  ;;  %v7490_v27 = vpack.c.bf16 %v809_v21, %v809_v21  ;;  %v825_v15 = vld [vmem:[#allocation2 + $0x128] sm:$0xff] }
  0xfa   : > { %1736 = vst.msk [vmem:[#allocation3 + $0x74] sm:$0xf] %vm448_vm2, %v7462_v11  ;;  %v7545_v52 = vpack.c.bf16 %v825_v15, %v825_v15  ;;  %v1128_v62 = vld [vmem:[#allocation2 + $0x62] sm:$0xff] }
  0xfb   : > { %1735 = vst.msk [vmem:[#allocation3 + $0x60] sm:$0xf] %vm448_vm2, %v1703_v10  ;;  %v6997_v10 = vld [vmem:[%s9612_s1 + $0x60] sm:$0xff] }
  0xfc   : > { %775 = vst.msk [vmem:[#allocation3 + $0x68] sm:$0xf] %vm448_vm2, %v743_v24  ;;  %7148 = vmatpush.bf16.msra.mxu3 %v6997_v10  ;;  %2691 = vmatpush.bf16.msra.mxu1 %v6997_v10  ;;  %v504_v10 = vld [vmem:[#allocation2 + $0x111] sm:$0xff] }
  0xfd   : > { %v344_v17 = vpop.trf.xlu1  ;;  %v312_v19 = vpop.trf.xlu0  ;;  %v507_v20 = vld [vmem:[#allocation2 + $0x139] sm:$0xff]  ;;  %1097 = vst.msk [vmem:[#allocation3 + $0x94] sm:$0xf] %vm448_vm2, %v7486_v26 }
  0xfe   : > { %377 = vst.msk [vmem:[#allocation2 + $0x141] sm:$0xff] %vm226_vm0, %v344_v17  ;;  %v539_v22 = vpack.c.bf16 %v507_v20, %v507_v20  ;;  %v810_v23 = vld [vmem:[#allocation2 + $0x78] sm:$0xff]  ;;  %v503_v17 = vld [vmem:[#allocation2 + $0x109] sm:$0xff] }
  0xff   : > { %361 = vst.msk [vmem:[#allocation2 + $0x81] sm:$0xff] %vm226_vm0, %v312_v19  ;;  %v7484_v25 = vpack.c.bf16 %v810_v23, %v810_v23 }
 0x100   : > { %619 = vrot.lane.b32.xlu2 %v534_v16, %s7175_s24  ;;  %629 = vrot.lane.b32.xlu1 %v539_v22, %s7175_s24  ;;  %458 = vst.msk [vmem:[#allocation3 + $0xb4] sm:$0xf] %vm448_vm2, %v7490_v27  ;;  %v7543_v16 = vpack.c.bf16 %v824_v13, %v824_v13 }
 0x101   : > { %459 = vst.msk [vmem:[#allocation3 + $0xc8] sm:$0xf] %vm448_vm2, %v7484_v25 }
 0x102   : > { %1417 = vst.msk [vmem:[#allocation3 + $0x84] sm:$0xf] %vm448_vm2, %v7484_v25 }
 0x103   : > { %793 = vst.msk [vmem:[#allocation3 + $0x1d0] sm:$0xf] %vm448_vm2, %v761_v61  ;;  %v6994_v61 = vld [vmem:[%s9612_s1 + $0x48] sm:$0xff] }
 0x104   : > { %776 = vst.msk [vmem:[#allocation3 + $0x7c] sm:$0xf] %vm448_vm2, %v7529_v5 }
 0x105   : > { %v1689_v30 = vld [vmem:[#allocation2 + $0x13a] sm:$0xff]  ;;  %v1690_v31 = vld [vmem:[#allocation2 + $0x142] sm:$0xff]  ;;  %v345_v32 = vpop.trf.xlu1  ;;  %v313_v33 = vpop.trf.xlu0  ;;  %777 = vst.msk [vmem:[#allocation3 + $0x90] sm:$0xf] %vm448_vm2, %v745_v9  ;;  %v7599_v9 = vpack.c.bf16 %v1128_v62, %v1128_v62 }
 0x106   : > { %v1721_v36 = vpack.c.bf16 %v1689_v30, %v1689_v30  ;;  %v1722_v37 = vpack.c.bf16 %v1690_v31, %v1690_v31  ;;  %v1673_v38 = vld [vmem:[#allocation2 + $0x7a] sm:$0xff]  ;;  %v1674_v39 = vld [vmem:[#allocation2 + $0x82] sm:$0xff]  ;;  %378 = vst.msk [vmem:[#allocation2 + $0x151] sm:$0xff] %vm226_vm0, %v345_v32  ;;  %v535_v31 = vpack.c.bf16 %v503_v17, %v503_v17 }
 0x107   : > { %v492_v42 = vld [vmem:[#allocation2 + $0x81] sm:$0xff]  ;;  %v1705_v44 = vpack.c.bf16 %v1673_v38, %v1673_v38  ;;  %v7507_v45 = vpack.c.bf16 %v1674_v39, %v1674_v39  ;;  %362 = vst.msk [vmem:[#allocation2 + $0x91] sm:$0xff] %vm226_vm0, %v313_v33 }
 0x108   : > { %v524_v47 = vpack.c.bf16 %v492_v42, %v492_v42  ;;  %v395_v48 = vld [vmem:[#allocation2 + $0x80] sm:$0xff]  ;;  %1753 = vst.msk [vmem:[#allocation3 + $0x1c8] sm:$0xf] %vm448_vm2, %v1721_v36  ;;  %587 = vrot.lane.b32.xlu2 %v518_v41, %s7175_s24 }
 0x109   : > { %1754 = vst.msk [vmem:[#allocation3 + $0x1dc] sm:$0xf] %vm448_vm2, %v1722_v37  ;;  %v7517_v54 = vpack.c.bf16 %v395_v48, %v395_v48  ;;  %v1035_v41 = vld [vmem:[#allocation2 + $0x81] sm:$0xff] }
 0x10a   : > { %599 = vrot.lane.b32.xlu0 %v524_v47, %s7175_s24  ;;  %1738 = vst.msk [vmem:[#allocation3 + $0x9c] sm:$0xf] %vm448_vm2, %v7507_v45  ;;  %v7579_v48 = vpack.c.bf16 %v1035_v41, %v1035_v41  ;;  %v1130_v62 = vld [vmem:[#allocation2 + $0x7a] sm:$0xff] }
 0x10b   : > { %1737 = vst.msk [vmem:[#allocation3 + $0x88] sm:$0xf] %vm448_vm2, %v1705_v44  ;;  %v6995_v44 = vld [vmem:[%s9612_s1 + $0x50] sm:$0xff] }
 0x10c   : > { %796 = vst.msk [vmem:[#allocation3 + $0x20c] sm:$0xf] %vm448_vm2, %v1721_v36  ;;  %v6996_v36 = vld [vmem:[%s9612_s1 + $0x58] sm:$0xff] }
 0x10d   : > { %v346_v63 = vpop.trf.xlu1  ;;  %v314_v0 = vpop.trf.xlu0  ;;  %v828_v1 = vld [vmem:[#allocation2 + $0x150] sm:$0xff]  ;;  %460 = vst.msk [vmem:[#allocation3 + $0xdc] sm:$0xf] %vm448_vm2, %v7517_v54  ;;  %7149 = vmatpush.bf16.msra.mxu3 %v6996_v36  ;;  %2692 = vmatpush.bf16.msra.mxu1 %v6996_v36 }
 0x10e   : > { %379 = vst.msk [vmem:[#allocation2 + $0x159] sm:$0xff] %vm226_vm0, %v346_v63  ;;  %v860_v2 = vpack.c.bf16 %v828_v1, %v828_v1  ;;  %v812_v4 = vld [vmem:[#allocation2 + $0x90] sm:$0xff] }
 0x10f   : > { %363 = vst.msk [vmem:[#allocation2 + $0x99] sm:$0xff] %vm226_vm0, %v314_v0  ;;  %v7532_v6 = vpack.c.bf16 %v812_v4, %v812_v4  ;;  %v730_v0 = vld [vmem:[#allocation2 + $0x122] sm:$0xff]  ;;  %v493_v13 = vld [vmem:[#allocation2 + $0x91] sm:$0xff] }
 0x110   : > { %950 = vrot.lane.b32.xlu1 %v860_v2, %s7175_s24  ;;  %938 = vrot.lane.b32.xlu2 %v7443_v55, %s7175_s24  ;;  %v491_v55 = vld [vmem:[#allocation2 + $0x79] sm:$0xff]  ;;  %473 = vst.msk [vmem:[#allocation3 + $0x1e0] sm:$0xf] %vm448_vm2, %v7543_v16  ;;  %v762_v2 = vpack.c.bf16 %v730_v0, %v730_v0 }
 0x111   : > { %461 = vst.msk [vmem:[#allocation3 + $0xf0] sm:$0xf] %vm448_vm2, %v7532_v6  ;;  %v7555_v32 = vpack.c.bf16 %v491_v55, %v491_v55  ;;  %7150 = vmatpush.bf16.msra.mxu3 %v6995_v44  ;;  %2693 = vmatpush.bf16.msra.mxu1 %v6995_v44  ;;  %v6993_v4 = vld [vmem:[%s9612_s1 + $0x40] sm:$0xff] }
 0x112   : > { %474 = vst.msk [vmem:[#allocation3 + $0x1f4] sm:$0xf] %vm448_vm2, %v7545_v52 }
 0x113   : > { %1099 = vst.msk [vmem:[#allocation3 + $0xbc] sm:$0xf] %vm448_vm2, %v7579_v48 }
 0x114   : > { %1419 = vst.msk [vmem:[#allocation3 + $0xac] sm:$0xf] %vm448_vm2, %v7532_v6 }
 0x115   : > { %v1691_v19 = vld [vmem:[#allocation2 + $0x152] sm:$0xff]  ;;  %v1692_v20 = vld [vmem:[#allocation2 + $0x15a] sm:$0xff]  ;;  %v347_v21 = vpop.trf.xlu1  ;;  %v315_v22 = vpop.trf.xlu0  ;;  %7151 = vmatpush.bf16.msra.mxu3 %v6994_v61  ;;  %2694 = vmatpush.bf16.msra.mxu1 %v6994_v61  ;;  %794 = vst.msk [vmem:[#allocation3 + $0x1e4] sm:$0xf] %vm448_vm2, %v762_v2 }
 0x116   : > { %v1723_v23 = vpack.c.bf16 %v1691_v19, %v1691_v19  ;;  %v1724_v24 = vpack.c.bf16 %v1692_v20, %v1692_v20  ;;  %v1675_v29 = vld [vmem:[#allocation2 + $0x92] sm:$0xff]  ;;  %v1676_v30 = vld [vmem:[#allocation2 + $0x9a] sm:$0xff]  ;;  %380 = vst.msk [vmem:[#allocation2 + $0x169] sm:$0xff] %vm226_vm0, %v347_v21  ;;  %v536_v21 = vpack.c.bf16 %v504_v10, %v504_v10 }
 0x117   : > { %v1707_v33 = vpack.c.bf16 %v1675_v29, %v1675_v29  ;;  %v7557_v35 = vpack.c.bf16 %v1676_v30, %v1676_v30  ;;  %364 = vst.msk [vmem:[#allocation2 + $0xa9] sm:$0xff] %vm226_vm0, %v315_v22  ;;  %v813_v37 = vld [vmem:[#allocation2 + $0x98] sm:$0xff]  ;;  %v7610_v30 = vpack.c.bf16 %v493_v13, %v493_v13  ;;  %v7638_v13 = vpack.c.bf16 %v1130_v62, %v1130_v62 }
 0x118   : > { %1755 = vst.msk [vmem:[#allocation3 + $0x1f0] sm:$0xf] %vm448_vm2, %v1723_v23  ;;  %621 = vrot.lane.b32.xlu2 %v535_v31, %s7175_s24  ;;  %597 = vrot.lane.b32.xlu1 %v7555_v32, %s7175_s24  ;;  %v510_v38 = vld [vmem:[#allocation2 + $0x159] sm:$0xff]  ;;  %v7568_v39 = vpack.c.bf16 %v813_v37, %v813_v37 }
 0x119   : > { %1756 = vst.msk [vmem:[#allocation3 + $0x204] sm:$0xf] %vm448_vm2, %v1724_v24  ;;  %v542_v47 = vpack.c.bf16 %v510_v38, %v510_v38  ;;  %v494_v15 = vld [vmem:[#allocation2 + $0x99] sm:$0xff]  ;;  %7152 = vmatpush.bf16.msra.mxu3 %v6993_v4  ;;  %2695 = vmatpush.bf16.msra.mxu1 %v6993_v4  ;;  %v715_v38 = vld [vmem:[#allocation2 + $0x6a] sm:$0xff]  ;;  %v717_v4 = vld [vmem:[#allocation2 + $0x82] sm:$0xff] }
 0x11a   : > { %1739 = vst.msk [vmem:[#allocation3 + $0xb0] sm:$0xf] %vm448_vm2, %v1707_v33  ;;  %v7571_v42 = vpop.permute.xlu2 %930  ;;  %v526_v36 = vpack.c.bf16 %v494_v15, %v494_v15  ;;  %v1132_v10 = vld [vmem:[#allocation2 + $0x92] sm:$0xff] }
 0x11b   : > { %1740 = vst.msk [vmem:[#allocation3 + $0xc4] sm:$0xf] %vm448_vm2, %v7557_v35  ;;  %v1026_v15 = vld [vmem:[#allocation2 + $0x19] sm:$0xff] }
 0x11c   : > { %798 = vst.msk [vmem:[#allocation3 + $0x234] sm:$0xf] %vm448_vm2, %v1723_v23 }
 0x11d   : > { %v348_v50 = vpop.trf.xlu1  ;;  %v316_v58 = vpop.trf.xlu0  ;;  %v830_v59 = vld [vmem:[#allocation2 + $0x168] sm:$0xff]  ;;  %462 = vst.msk [vmem:[#allocation3 + $0x104] sm:$0xf] %vm448_vm2, %v7568_v39 }
 0x11e   : > { %381 = vst.msk [vmem:[#allocation2 + $0x171] sm:$0xff] %vm226_vm0, %v348_v50  ;;  %v862_v60 = vpack.c.bf16 %v830_v59, %v830_v59  ;;  %v814_v63 = vld [vmem:[#allocation2 + $0xa8] sm:$0xff]  ;;  %v747_v50 = vpack.c.bf16 %v715_v38, %v715_v38  ;;  %v1037_v59 = vld [vmem:[#allocation2 + $0x99] sm:$0xff] }
 0x11f   : > { %365 = vst.msk [vmem:[#allocation2 + $0xb1] sm:$0xff] %vm226_vm0, %v316_v58  ;;  %v7591_v1 = vpack.c.bf16 %v814_v63, %v814_v63  ;;  %v7629_v63 = vpack.c.bf16 %v1037_v59, %v1037_v59  ;;  %v731_v59 = vld [vmem:[#allocation2 + $0x12a] sm:$0xff] }
 0x120   : > { %940 = vrot.lane.b32.xlu2 %v7445_v56, %s7175_s24  ;;  %635 = vrot.lane.b32.xlu1 %v542_v47, %s7175_s24  ;;  %778 = vst.msk [vmem:[#allocation3 + $0xa4] sm:$0xf] %vm448_vm2, %v7599_v9 }
 0x121   : > { %954 = vrot.lane.b32.xlu0 %v862_v60, %s7175_s24  ;;  %463 = vst.msk [vmem:[#allocation3 + $0x118] sm:$0xf] %vm448_vm2, %v7591_v1 }
 0x122   : > { %v614_v56 = vpop.permute.xlu2 %613  ;;  %779 = vst.msk [vmem:[#allocation3 + $0xb8] sm:$0xf] %vm448_vm2, %v747_v50 }
 0x123   : > { %692 = vst.msk [vmem:[#allocation3 + $0x168] sm:$0xf] %vm673_vm3, %v614_v56 }
 0x124   : > { %1101 = vst.msk [vmem:[#allocation3 + $0xe4] sm:$0xf] %vm448_vm2, %v7629_v63 }
 0x125   : > { %v1693_v17 = vld [vmem:[#allocation2 + $0x16a] sm:$0xff]  ;;  %v1694_v55 = vld [vmem:[#allocation2 + $0x172] sm:$0xff]  ;;  %v349_v19 = vpop.trf.xlu1  ;;  %v317_v20 = vpop.trf.xlu0  ;;  %1421 = vst.msk [vmem:[#allocation3 + $0xd4] sm:$0xf] %vm448_vm2, %v7591_v1 }
 0x126   : > { %v1725_v22 = vpack.c.bf16 %v1693_v17, %v1693_v17  ;;  %v1726_v23 = vpack.c.bf16 %v1694_v55, %v1694_v55  ;;  %v1677_v24 = vld [vmem:[#allocation2 + $0xaa] sm:$0xff]  ;;  %v1678_v29 = vld [vmem:[#allocation2 + $0xb2] sm:$0xff]  ;;  %382 = vst.msk [vmem:[#allocation2 + $0x181] sm:$0xff] %vm226_vm0, %v349_v19  ;;  %v749_v55 = vpack.c.bf16 %v717_v4, %v717_v4 }
 0x127   : > { %v1709_v31 = vpack.c.bf16 %v1677_v24, %v1677_v24  ;;  %v7612_v33 = vpack.c.bf16 %v1678_v29, %v1678_v29  ;;  %366 = vst.msk [vmem:[#allocation2 + $0xc1] sm:$0xff] %vm226_vm0, %v317_v20  ;;  %v815_v37 = vld [vmem:[#allocation2 + $0xb0] sm:$0xff] }
 0x128   : > { %1757 = vst.msk [vmem:[#allocation3 + $0x218] sm:$0xf] %vm448_vm2, %v1725_v22  ;;  %623 = vrot.lane.b32.xlu2 %v536_v21, %s7175_s24  ;;  %601 = vrot.lane.b32.xlu1 %v7610_v30, %s7175_s24  ;;  %v512_v41 = vld [vmem:[#allocation2 + $0x171] sm:$0xff]  ;;  %v7621_v44 = vpack.c.bf16 %v815_v37, %v815_v37  ;;  %v495_v20 = vld [vmem:[#allocation2 + $0xa9] sm:$0xff]  ;;  %v1058_v21 = vpack.c.bf16 %v1026_v15, %v1026_v15 }
 0x129   : > { %1758 = vst.msk [vmem:[#allocation3 + $0x22c] sm:$0xf] %vm448_vm2, %v1726_v23  ;;  %603 = vrot.lane.b32.xlu0 %v526_v36, %s7175_s24  ;;  %v544_v58 = vpack.c.bf16 %v512_v41, %v512_v41  ;;  %v7657_v37 = vpack.c.bf16 %v495_v20, %v495_v20  ;;  %v1039_v62 = vld [vmem:[#allocation2 + $0xb1] sm:$0xff] }
 0x12a   : > { %1741 = vst.msk [vmem:[#allocation3 + $0xd8] sm:$0xf] %vm448_vm2, %v1709_v31  ;;  %v933_v47 = vpop.permute.xlu2 %932  ;;  %v1361_v15 = vld [vmem:[#allocation2 + $0xd8] sm:$0xff] }
 0x12b   : > { %1742 = vst.msk [vmem:[#allocation3 + $0xec] sm:$0xf] %vm448_vm2, %v7612_v33 }
 0x12c   : > { %800 = vst.msk [vmem:[#allocation3 + $0x25c] sm:$0xf] %vm448_vm2, %v1725_v22  ;;  %v496_v22 = vld [vmem:[#allocation2 + $0xb1] sm:$0xff] }
 0x12d   : > { %v318_v60 = vpop.trf.xlu0  ;;  %v832_v61 = vld [vmem:[#allocation2 + $0x180] sm:$0xff]  ;;  %464 = vst.msk [vmem:[#allocation3 + $0x12c] sm:$0xf] %vm448_vm2, %v7621_v44  ;;  %v528_v38 = vpack.c.bf16 %v496_v22, %v496_v22  ;;  %v350_v4 = vpop.trf.xlu1 }
 0x12e   : > { %367 = vst.msk [vmem:[#allocation2 + $0xc9] sm:$0xff] %vm226_vm0, %v318_v60  ;;  %v864_v0 = vpack.c.bf16 %v832_v61, %v832_v61  ;;  %v400_v2 = vld [vmem:[#allocation2 + $0xc0] sm:$0xff] }
 0x12f   : > { %v7632_v56 = vpack.c.bf16 %v400_v2, %v400_v2  ;;  %v497_v17 = vld [vmem:[#allocation2 + $0xc1] sm:$0xff]  ;;  %780 = vst.msk [vmem:[#allocation3 + $0xcc] sm:$0xf] %vm448_vm2, %v7638_v13  ;;  %v1348_v2 = vld [vmem:[#allocation2 + $0x38] sm:$0xff] }
 0x130   : > { %942 = vrot.lane.b32.xlu2 %v7543_v16, %s7175_s24  ;;  %639 = vrot.lane.b32.xlu1 %v544_v58, %s7175_s24  ;;  %v7647_v16 = vpack.c.bf16 %v1132_v10, %v1132_v10  ;;  %v7650_v23 = vpack.c.bf16 %v497_v17, %v497_v17  ;;  %781 = vst.msk [vmem:[#allocation3 + $0xe0] sm:$0xf] %vm448_vm2, %v749_v55  ;;  %v1028_v17 = vld [vmem:[#allocation2 + $0x31] sm:$0xff]  ;;  %v1043_v55 = vld [vmem:[#allocation2 + $0xe1] sm:$0xff] }
 0x131   : > { %958 = vrot.lane.b32.xlu0 %v864_v0, %s7175_s24  ;;  %465 = vst.msk [vmem:[#allocation3 + $0x140] sm:$0xf] %vm448_vm2, %v7632_v56  ;;  %v7678_v0 = vpack.c.bf16 %v731_v59, %v731_v59  ;;  %v7681_v10 = vpack.c.bf16 %v1039_v62, %v1039_v62  ;;  %v1060_v20 = vpack.c.bf16 %v1028_v17, %v1028_v17  ;;  %v1359_v22 = vld [vmem:[#allocation2 + $0xc0] sm:$0xff]  ;;  %v1445_v17 = vld [vmem:[#allocation2 + $0x49] sm:$0xff] }
 0x132   : > { %v616_v19 = vpop.permute.xlu2 %615  ;;  %782 = vst.msk [vmem:[#allocation3 + $0xf4] sm:$0xf] %vm448_vm2, %v7647_v16  ;;  %v1362_v62 = vld [vmem:[#allocation2 + $0xe0] sm:$0xff] }
 0x133   : > { %693 = vst.msk [vmem:[#allocation3 + $0x17c] sm:$0xf] %vm673_vm3, %v616_v19 }
 0x134   : > { %1090 = vst.msk [vmem:[#allocation3 + $0x8] sm:$0xf] %vm448_vm2, %v1058_v21 }
 0x135   : > { %v722_v24 = vld [vmem:[#allocation2 + $0xc2] sm:$0xff]  ;;  %v723_v29 = vld [vmem:[#allocation2 + $0xca] sm:$0xff]  ;;  %383 = vst.msk [vmem:[#allocation2 + $0x189] sm:$0xff] %vm226_vm0, %v350_v4 }
 0x136   : > { %v754_v31 = vpack.c.bf16 %v722_v24, %v722_v24  ;;  %v7655_v36 = vpack.c.bf16 %v723_v29, %v723_v29  ;;  %v498_v41 = vld [vmem:[#allocation2 + $0xc9] sm:$0xff]  ;;  %795 = vst.msk [vmem:[#allocation3 + $0x1f8] sm:$0xf] %vm448_vm2, %v7678_v0  ;;  %v7697_v24 = vpack.c.bf16 %v1043_v55, %v1043_v55  ;;  %v1459_v29 = vld [vmem:[#allocation2 + $0xf1] sm:$0xff]  ;;  %v1042_v55 = vld [vmem:[#allocation2 + $0xd9] sm:$0xff] }
 0x137   : > { %v401_v50 = vld [vmem:[#allocation2 + $0xc8] sm:$0xff]  ;;  %v530_v60 = vpack.c.bf16 %v498_v41, %v498_v41  ;;  %1103 = vst.msk [vmem:[#allocation3 + $0x10c] sm:$0xf] %vm448_vm2, %v7681_v10  ;;  %v7706_v59 = vpack.c.bf16 %v1459_v29, %v1459_v29 }
 0x138   : > { %787 = vst.msk [vmem:[#allocation3 + $0x158] sm:$0xf] %vm448_vm2, %v7655_v36  ;;  %605 = vrot.lane.b32.xlu1 %v7657_v37, %s7175_s24  ;;  %609 = vrot.lane.b32.xlu2 %v7650_v23, %s7175_s24  ;;  %v7674_v61 = vpack.c.bf16 %v401_v50, %v401_v50 }
 0x139   : > { %1743 = vst.msk [vmem:[#allocation3 + $0x100] sm:$0xf] %vm448_vm2, %v754_v31  ;;  %607 = vrot.lane.b32.xlu0 %v528_v38, %s7175_s24 }
 0x13a   : > { %1744 = vst.msk [vmem:[#allocation3 + $0x114] sm:$0xf] %vm448_vm2, %v7655_v36  ;;  %v582_v58 = vpop.permute.xlu2 %581 }
 0x13b   : > { %786 = vst.msk [vmem:[#allocation3 + $0x144] sm:$0xf] %vm448_vm2, %v754_v31  ;;  %v1391_v31 = vpack.c.bf16 %v1359_v22, %v1359_v22  ;;  %v1477_v22 = vpack.c.bf16 %v1445_v17, %v1445_v17 }
 0x13c   : > { %1011 = vst.msk [vmem:[#allocation3 + $0x158] sm:$0xf] %vm673_vm3, %v933_v47  ;;  %v1393_v47 = vpack.c.bf16 %v1361_v15, %v1361_v15  ;;  %v1695_v38 = vld [vmem:[#allocation2 + $0x182] sm:$0xff]  ;;  %v1696_v41 = vld [vmem:[#allocation2 + $0x18a] sm:$0xff] }
 0x13d   : > { %1010 = vst.msk [vmem:[#allocation3 + $0x144] sm:$0xf] %vm673_vm3, %v7571_v42  ;;  %v1380_v42 = vpack.c.bf16 %v1348_v2, %v1348_v2  ;;  %v1727_v50 = vpack.c.bf16 %v1695_v38, %v1695_v38  ;;  %v1030_v15 = vld [vmem:[#allocation2 + $0x49] sm:$0xff] }
 0x13e   : > { %676 = vst.msk [vmem:[#allocation3 + $0x28] sm:$0xf] %vm673_vm3, %v582_v58  ;;  %v1728_v58 = vpack.c.bf16 %v1696_v41, %v1696_v41 }
 0x13f   : > { %466 = vst.msk [vmem:[#allocation3 + $0x154] sm:$0xf] %vm448_vm2, %v7674_v61 }
 0x140   : > { %1220 = vrot.lane.b32.xlu1 %v7361_v53, %s7175_s24  ;;  %611 = vrot.lane.b32.xlu2 %v530_v60, %s7175_s24  ;;  %1412 = vst.msk [vmem:[#allocation3 + $0x20] sm:$0xf] %vm448_vm2, %v1380_v42 }
 0x141   : > { %1539 = vrot.lane.b32.xlu0 %v7460_v8, %s7175_s24  ;;  %1425 = vst.msk [vmem:[#allocation3 + $0x124] sm:$0xf] %vm448_vm2, %v1393_v47  ;;  %v1062_v47 = vpack.c.bf16 %v1030_v15, %v1030_v15 }
 0x142   : > { %v584_v19 = vpop.permute.xlu2 %583  ;;  %1092 = vst.msk [vmem:[#allocation3 + $0x30] sm:$0xf] %vm448_vm2, %v1060_v20  ;;  %v827_v20 = vld [vmem:[#allocation2 + $0x140] sm:$0xff] }
 0x143   : > { %677 = vst.msk [vmem:[#allocation3 + $0x3c] sm:$0xf] %vm673_vm3, %v584_v19  ;;  %v6105_v53 = vld [vmem:[#allocation3 + $0x154] sm:$0xf0]  ;;  %v826_v19 = vld [vmem:[#allocation2 + $0x138] sm:$0xff] }
 0x144   : > { %v6945_v21 = vld [vmem:[#allocation3 + $0x144] sm:$0xf]  ;;  %1423 = vst.msk [vmem:[#allocation3 + $0xfc] sm:$0xf] %vm448_vm2, %v1391_v31 }
 0x145   : > { %v6108_v8 = vor.u32 %v6945_v21, %v6105_v53  ;;  %1107 = vst.msk [vmem:[#allocation3 + $0x15c] sm:$0xf] %vm448_vm2, %v7697_v24  ;;  %v5963_v60 = vld [vmem:[#allocation3 + $0x28] sm:$0xf]  ;;  %v7719_v53 = vpack.c.bf16 %v827_v20, %v827_v20  ;;  %v1394_v21 = vpack.c.bf16 %v1362_v62, %v1362_v62  ;;  %v1363_v31 = vld [vmem:[#allocation2 + $0xf0] sm:$0xff] }
 0x146   : > { %1759 = vst.msk [vmem:[#allocation3 + $0x240] sm:$0xf] %vm448_vm2, %v1727_v50  ;;  %v1395_v38 = vpack.c.bf16 %v1363_v31, %v1363_v31  ;;  %v1352_v50 = vld [vmem:[#allocation2 + $0x68] sm:$0xff]  ;;  %v1034_v31 = vld [vmem:[#allocation2 + $0x79] sm:$0xff] }
 0x147   : > { %2736 = vmatmul.bf16.vlgmr.msra.gmra.mxu3 %v6108_v8  ;;  %1760 = vst.msk [vmem:[#allocation3 + $0x254] sm:$0xf] %vm448_vm2, %v1728_v58  ;;  %v1074_v8 = vpack.c.bf16 %v1042_v55, %v1042_v55  ;;  %v1032_v58 = vld [vmem:[#allocation2 + $0x61] sm:$0xff]  ;;  %v1384_v62 = vpack.c.bf16 %v1352_v50, %v1352_v50  ;;  %v506_v55 = vld [vmem:[#allocation2 + $0x129] sm:$0xff] }
 0x148   : > { %898 = vrot.lane.b32.xlu1 %v7330_v28, %s7175_s24  ;;  %944 = vrot.lane.b32.xlu2 %v7545_v52, %s7175_s24  ;;  %v1350_v28 = vld [vmem:[#allocation2 + $0x50] sm:$0xff]  ;;  %1108 = vst.msk [vmem:[#allocation3 + $0x170] sm:$0xf] %vm448_vm2, %v7706_v59 }
 0x149   : > { %900 = vrot.lane.b32.xlu0 %v7340_v40, %s7175_s24  ;;  %v1382_v42 = vpack.c.bf16 %v1350_v28, %v1350_v28  ;;  %v7717_v40 = vpack.c.bf16 %v826_v19, %v826_v19  ;;  %1094 = vst.msk [vmem:[#allocation3 + $0x58] sm:$0xf] %vm448_vm2, %v1062_v47  ;;  %v413_v28 = vld [vmem:[#allocation2 + $0x158] sm:$0xff] }
 0x14a   : > { %v618_v2 = vpop.permute.xlu2 %617  ;;  %v6912_v4 = vld [vmem:[#allocation3 + $0x38] sm:$0xf0]  ;;  %476 = vst.msk [vmem:[#allocation3 + $0x21c] sm:$0xf] %vm448_vm2, %v7719_v53  ;;  %v7743_v15 = vpack.c.bf16 %v413_v28, %v413_v28  ;;  %v1045_v47 = vld [vmem:[#allocation2 + $0xf9] sm:$0xff]  ;;  %v1366_v28 = vld [vmem:[#allocation2 + $0x110] sm:$0xff] }
 0x14b   : > { %694 = vst.msk [vmem:[#allocation3 + $0x190] sm:$0xf] %vm673_vm3, %v618_v2  ;;  %v5964_v52 = vor.u32 %v6912_v4, %v5963_v60  ;;  %v505_v60 = vld [vmem:[#allocation2 + $0x121] sm:$0xff]  ;;  %v1064_v2 = vpack.c.bf16 %v1032_v58, %v1032_v58  ;;  %v7761_v19 = vpack.c.bf16 %v1045_v47, %v1045_v47 }
 0x14c   : > { %1414 = vst.msk [vmem:[#allocation3 + $0x48] sm:$0xf] %vm448_vm2, %v1382_v42  ;;  %v1447_v4 = vld [vmem:[#allocation2 + $0x61] sm:$0xff] }
 0x14d   : > { %2612 = vmatmul.bf16.gmra.mxu0 %v5964_v52  ;;  %475 = vst.msk [vmem:[#allocation3 + $0x208] sm:$0xf] %vm448_vm2, %v7717_v40  ;;  %v7749_v52 = vpack.c.bf16 %v1447_v4, %v1447_v4  ;;  %v1147_v47 = vld [vmem:[#allocation2 + $0x142] sm:$0xff] }
 0x14e   : > { %1426 = vst.msk [vmem:[#allocation3 + $0x138] sm:$0xf] %vm448_vm2, %v1394_v21 }
 0x14f   : > { %1106 = vst.msk [vmem:[#allocation3 + $0x148] sm:$0xf] %vm448_vm2, %v1074_v8 }
 0x150   : > { %1224 = vrot.lane.b32.xlu1 %v7377_v3, %s7175_s24  ;;  %589 = vrot.lane.b32.xlu2 %v1477_v22, %s7175_s24  ;;  %1427 = vst.msk [vmem:[#allocation3 + $0x14c] sm:$0xf] %vm448_vm2, %v1395_v38 }
 0x151   : > { %1543 = vrot.lane.b32.xlu0 %v1477_v22, %s7175_s24  ;;  %1416 = vst.msk [vmem:[#allocation3 + $0x70] sm:$0xf] %vm448_vm2, %v1384_v62 }
 0x152   : > { %v586_v29 = vpop.permute.xlu2 %585  ;;  %1096 = vst.msk [vmem:[#allocation3 + $0x80] sm:$0xf] %vm448_vm2, %v1064_v2 }
 0x153   : > { %678 = vst.msk [vmem:[#allocation3 + $0x50] sm:$0xf] %vm673_vm3, %v586_v29  ;;  %v1354_v29 = vld [vmem:[#allocation2 + $0x80] sm:$0xff] }
 0x154   : > { %478 = vst.msk [vmem:[#allocation3 + $0x244] sm:$0xf] %vm448_vm2, %v7743_v15 }
 0x155   : > { %v937_v41 = vpop.permute.xlu1 %936  ;;  %1109 = vst.msk [vmem:[#allocation3 + $0x184] sm:$0xf] %vm448_vm2, %v7761_v19 }
 0x156   : > { %1013 = vst.msk [vmem:[#allocation3 + $0x180] sm:$0xf] %vm673_vm3, %v937_v41  ;;  %v1386_v41 = vpack.c.bf16 %v1354_v29, %v1354_v29 }
 0x158   : > { %902 = vrot.lane.b32.xlu1 %v7353_v49, %s7175_s24  ;;  %591 = vrot.lane.b32.xlu2 %v7447_v57, %s7175_s24  ;;  %v7746_v49 = vpack.c.bf16 %v505_v60, %v505_v60  ;;  %1418 = vst.msk [vmem:[#allocation3 + $0x98] sm:$0xf] %vm448_vm2, %v1386_v41 }
 0x159   : > { %904 = vrot.lane.b32.xlu0 %v7386_v7, %s7175_s24  ;;  %v1364_v7 = vld [vmem:[#allocation2 + $0xf8] sm:$0xff] }
 0x15a   : > { %v620_v3 = vpop.permute.xlu2 %619  ;;  %v1396_v17 = vpack.c.bf16 %v1364_v7, %v1364_v7  ;;  %v5983_v21 = vld [vmem:[#allocation3 + $0x50] sm:$0xf]  ;;  %v1046_v7 = vld [vmem:[#allocation2 + $0x109] sm:$0xff] }
 0x15b   : > { %695 = vst.msk [vmem:[#allocation3 + $0x1a4] sm:$0xf] %vm673_vm3, %v620_v3  ;;  %v1066_v3 = vpack.c.bf16 %v1034_v31, %v1034_v31 }
 0x15c   : > { %1428 = vst.msk [vmem:[#allocation3 + $0x160] sm:$0xf] %vm448_vm2, %v1396_v17  ;;  %v1398_v17 = vpack.c.bf16 %v1366_v28, %v1366_v28  ;;  %v7008_v28 = vld [vmem:[%s9612_s1 + $0xb8] sm:$0xff] }
 0x15d   : > { %1098 = vst.msk [vmem:[#allocation3 + $0xa8] sm:$0xf] %vm448_vm2, %v1066_v3  ;;  %v6125_v62 = vld [vmem:[#allocation3 + $0x17c] sm:$0xf0]  ;;  %2777 = vmatpush.bf16.msrb.mxu2 %v7008_v28 }
 0x15e   : > { %1430 = vst.msk [vmem:[#allocation3 + $0x188] sm:$0xf] %vm448_vm2, %v1398_v17  ;;  %v735_v17 = vld [vmem:[#allocation2 + $0x15a] sm:$0xff] }
 0x160   : > { %1228 = vrot.lane.b32.xlu1 %v7417_v34, %s7175_s24  ;;  %625 = vrot.lane.b32.xlu2 %v7746_v49, %s7175_s24  ;;  %v7765_v34 = vpack.c.bf16 %v506_v55, %v506_v55 }
 0x161   : > { %1547 = vrot.lane.b32.xlu0 %v7749_v52, %s7175_s24 }
 0x162   : > { %v588_v42 = vpop.permute.xlu2 %587 }
 0x163   : > { %679 = vst.msk [vmem:[#allocation3 + $0x64] sm:$0xf] %vm673_vm3, %v588_v42  ;;  %v7789_v42 = vpack.c.bf16 %v1046_v7, %v1046_v7 }
 0x165   : > { %1110 = vst.msk [vmem:[#allocation3 + $0x198] sm:$0xf] %vm448_vm2, %v7789_v42 }
 0x168   : > { %906 = vrot.lane.b32.xlu1 %v7404_v18, %s7175_s24  ;;  %627 = vrot.lane.b32.xlu2 %v7765_v34, %s7175_s24  ;;  %v719_v18 = vld [vmem:[#allocation2 + $0x9a] sm:$0xff] }
 0x169   : > { %908 = vrot.lane.b32.xlu0 %v7433_v43, %s7175_s24  ;;  %v935_v20 = vpop.permute.xlu0 %934  ;;  %v751_v50 = vpack.c.bf16 %v719_v18, %v719_v18  ;;  %v415_v43 = vld [vmem:[#allocation2 + $0x170] sm:$0xff] }
 0x16a   : > { %1012 = vst.msk [vmem:[#allocation3 + $0x16c] sm:$0xf] %vm673_vm3, %v935_v20  ;;  %v939_v22 = vpop.permute.xlu2 %938  ;;  %v6917_v8 = vld [vmem:[#allocation3 + $0x60] sm:$0xf0]  ;;  %v7782_v58 = vpack.c.bf16 %v415_v43, %v415_v43  ;;  %v7805_v20 = vpack.c.bf16 %v1147_v47, %v1147_v47 }
 0x16b   : > { %1014 = vst.msk [vmem:[#allocation3 + $0x194] sm:$0xf] %vm673_vm3, %v939_v22  ;;  %v5984_v38 = vor.u32 %v6917_v8, %v5983_v21  ;;  %v1356_v21 = vld [vmem:[#allocation2 + $0x98] sm:$0xff]  ;;  %v1358_v43 = vld [vmem:[#allocation2 + $0xb0] sm:$0xff] }
 0x16c   : > { %783 = vst.msk [vmem:[#allocation3 + $0x108] sm:$0xf] %vm448_vm2, %v751_v50  ;;  %v1036_v22 = vld [vmem:[#allocation2 + $0x91] sm:$0xff]  ;;  %v1388_v29 = vpack.c.bf16 %v1356_v21, %v1356_v21 }
 0x16d   : > { %2617 = vmatmul.bf16.gmra.mxu0 %v5984_v38  ;;  %480 = vst.msk [vmem:[#allocation3 + $0x26c] sm:$0xf] %vm448_vm2, %v7782_v58  ;;  %v1068_v31 = vpack.c.bf16 %v1036_v22, %v1036_v22  ;;  %v412_v50 = vld [vmem:[#allocation2 + $0x150] sm:$0xff] }
 0x16e   : > { %797 = vst.msk [vmem:[#allocation3 + $0x220] sm:$0xf] %vm448_vm2, %v7805_v20  ;;  %v1047_v47 = vld [vmem:[#allocation2 + $0x111] sm:$0xff] }
 0x16f   : > { %1420 = vst.msk [vmem:[#allocation3 + $0xc0] sm:$0xf] %vm448_vm2, %v1388_v29  ;;  %v1367_v29 = vld [vmem:[#allocation2 + $0x120] sm:$0xff] }
 0x170   : > { %1232 = vrot.lane.b32.xlu1 %v7462_v11, %s7175_s24  ;;  %946 = vrot.lane.b32.xlu2 %v7717_v40, %s7175_s24  ;;  %v1134_v40 = vld [vmem:[#allocation2 + $0xaa] sm:$0xff]  ;;  %1100 = vst.msk [vmem:[#allocation3 + $0xd0] sm:$0xf] %vm448_vm2, %v1068_v31 }
 0x171   : > { %1551 = vrot.lane.b32.xlu0 %v7555_v32, %s7175_s24  ;;  %v6950_v60 = vld [vmem:[#allocation3 + $0x16c] sm:$0xf]  ;;  %v7792_v32 = vpack.c.bf16 %v1134_v40, %v1134_v40  ;;  %v767_v40 = vpack.c.bf16 %v735_v17, %v735_v17 }
 0x172   : > { %v622_v2 = vpop.permute.xlu2 %621  ;;  %v6128_v4 = vor.u32 %v6950_v60, %v6125_v62  ;;  %v630_v11 = vpop.permute.xlu1 %629  ;;  %v6955_v41 = vld [vmem:[#allocation3 + $0x194] sm:$0xf]  ;;  %v1038_v60 = vld [vmem:[#allocation2 + $0xa9] sm:$0xff] }
 0x173   : > { %696 = vst.msk [vmem:[#allocation3 + $0x1b8] sm:$0xf] %vm673_vm3, %v622_v2  ;;  %v508_v62 = vld [vmem:[#allocation2 + $0x141] sm:$0xff]  ;;  %v1390_v2 = vpack.c.bf16 %v1358_v43, %v1358_v43 }
 0x174   : > { %2741 = vmatmul.bf16.gmra.mxu3 %v6128_v4  ;;  %700 = vst.msk [vmem:[#allocation3 + $0x208] sm:$0xf] %vm673_vm3, %v630_v11  ;;  %v1070_v4 = vpack.c.bf16 %v1038_v60, %v1038_v60  ;;  %v7016_v11 = vld [vmem:[%s9612_s1 + $0xf8] sm:$0xff]  ;;  %v1040_v43 = vld [vmem:[#allocation2 + $0xc1] sm:$0xff] }
 0x175   : > { %784 = vst.msk [vmem:[#allocation3 + $0x11c] sm:$0xf] %vm448_vm2, %v7792_v32  ;;  %2866 = vmatpush.bf16.msrb.mxu3 %v7016_v11  ;;  %v1072_v28 = vpack.c.bf16 %v1040_v43, %v1040_v43  ;;  %v1048_v11 = vld [vmem:[#allocation2 + $0x121] sm:$0xff]  ;;  %v7019_v43 = vld [vmem:[%s9612_s1 + $0x110] sm:$0xff] }
 0x176   : > { %1422 = vst.msk [vmem:[#allocation3 + $0xe8] sm:$0xf] %vm448_vm2, %v1390_v2 }
 0x177   : > { %1102 = vst.msk [vmem:[#allocation3 + $0xf8] sm:$0xf] %vm448_vm2, %v1070_v4  ;;  %v7015_v4 = vld [vmem:[%s9612_s1 + $0xf0] sm:$0xff] }
 0x178   : > { %910 = vrot.lane.b32.xlu1 %v7470_v12, %s7175_s24  ;;  %948 = vrot.lane.b32.xlu2 %v7719_v53, %s7175_s24  ;;  %v1365_v12 = vld [vmem:[#allocation2 + $0x108] sm:$0xff]  ;;  %799 = vst.msk [vmem:[#allocation3 + $0x248] sm:$0xf] %vm448_vm2, %v767_v40 }
 0x179   : > { %912 = vrot.lane.b32.xlu0 %v7490_v27, %s7175_s24  ;;  %v1397_v27 = vpack.c.bf16 %v1365_v12, %v1365_v12  ;;  %2867 = vmatpush.bf16.msrb.mxu3 %v7015_v4  ;;  %1104 = vst.msk [vmem:[#allocation3 + $0x120] sm:$0xf] %vm448_vm2, %v1072_v28 }
 0x17a   : > { %v941_v55 = vpop.permute.xlu2 %940 }
 0x17b   : > { %1015 = vst.msk [vmem:[#allocation3 + $0x1a8] sm:$0xf] %vm673_vm3, %v941_v55  ;;  %v1079_v55 = vpack.c.bf16 %v1047_v47, %v1047_v47  ;;  %v1080_v47 = vpack.c.bf16 %v1048_v11, %v1048_v11  ;;  %v6957_v11 = vld [vmem:[#allocation3 + $0x1a0] sm:$0xf0] }
 0x17c   : > { %v600_v8 = vpop.permute.xlu0 %599  ;;  %1429 = vst.msk [vmem:[#allocation3 + $0x174] sm:$0xf] %vm448_vm2, %v1397_v27  ;;  %v1368_v27 = vld [vmem:[#allocation2 + $0x128] sm:$0xff] }
 0x17d   : > { %685 = vst.msk [vmem:[#allocation3 + $0xdc] sm:$0xf] %vm673_vm3, %v600_v8  ;;  %v721_v8 = vld [vmem:[#allocation2 + $0xb2] sm:$0xff] }
 0x17e   : > { %1111 = vst.msk [vmem:[#allocation3 + $0x1ac] sm:$0xf] %vm448_vm2, %v1079_v55  ;;  %v753_v12 = vpack.c.bf16 %v721_v8, %v721_v8 }
 0x17f   : > { %1112 = vst.msk [vmem:[#allocation3 + $0x1c0] sm:$0xf] %vm448_vm2, %v1080_v47 }
 0x180   : > { %1236 = vrot.lane.b32.xlu1 %v7507_v45, %s7175_s24  ;;  %593 = vrot.lane.b32.xlu2 %v7749_v52, %s7175_s24  ;;  %v444_v45 = vpack.c.bf16 %v412_v50, %v412_v50  ;;  %785 = vst.msk [vmem:[#allocation3 + $0x130] sm:$0xf] %vm448_vm2, %v753_v12 }
 0x181   : > { %1555 = vrot.lane.b32.xlu0 %v7610_v30, %s7175_s24 }
 0x182   : > { %v951_v53 = vpop.permute.xlu1 %950  ;;  %v624_v38 = vpop.permute.xlu2 %623  ;;  %v6145_v3 = vld [vmem:[#allocation3 + $0x1a4] sm:$0xf0]  ;;  %477 = vst.msk [vmem:[#allocation3 + $0x230] sm:$0xf] %vm448_vm2, %v444_v45 }
 0x183   : > { %1020 = vst.msk [vmem:[#allocation3 + $0x20c] sm:$0xf] %vm673_vm3, %v951_v53  ;;  %v6148_v18 = vor.u32 %v6955_v41, %v6145_v3  ;;  %v1400_v53 = vpack.c.bf16 %v1368_v27, %v1368_v27  ;;  %v706_v3 = vld [vmem:[#allocation2 + $0x2] sm:$0xff] }
 0x184   : > { %697 = vst.msk [vmem:[#allocation3 + $0x1cc] sm:$0xf] %vm673_vm3, %v624_v38  ;;  %v414_v38 = vld [vmem:[#allocation2 + $0x168] sm:$0xff] }
 0x185   : > { %2746 = vmatmul.bf16.gmra.mxu3 %v6148_v18  ;;  %1435 = vst.msk [vmem:[#allocation3 + $0x1ec] sm:$0xf] %vm448_vm2, %v444_v45  ;;  %v446_v41 = vpack.c.bf16 %v414_v38, %v414_v38  ;;  %v738_v45 = vpack.c.bf16 %v706_v3, %v706_v3  ;;  %v7014_v38 = vld [vmem:[%s9612_s1 + $0xe8] sm:$0xff] }
 0x186   : > { %1432 = vst.msk [vmem:[#allocation3 + $0x1b0] sm:$0xf] %vm448_vm2, %v1400_v53  ;;  %v6952_v3 = vld [vmem:[#allocation3 + $0x178] sm:$0xf0]  ;;  %2868 = vmatpush.bf16.msrb.mxu3 %v7014_v38  ;;  %v7012_v38 = vld [vmem:[%s9612_s1 + $0xd8] sm:$0xff] }
 0x187   : > { %479 = vst.msk [vmem:[#allocation3 + $0x258] sm:$0xf] %vm448_vm2, %v446_v41 }
 0x188   : > { %914 = vrot.lane.b32.xlu1 %v7484_v25, %s7175_s24  ;;  %595 = vrot.lane.b32.xlu2 %v7486_v26, %s7175_s24  ;;  %v1041_v25 = vld [vmem:[#allocation2 + $0xc9] sm:$0xff]  ;;  %770 = vst.msk [vmem:[#allocation3 + $0x4] sm:$0xf] %vm448_vm2, %v738_v45 }
 0x189   : > { %916 = vrot.lane.b32.xlu0 %v7517_v54, %s7175_s24  ;;  %v7835_v7 = vpack.c.bf16 %v1041_v25, %v1041_v25  ;;  %v540_v54 = vpack.c.bf16 %v508_v62, %v508_v62  ;;  %v7007_v62 = vld [vmem:[%s9612_s1 + $0xb0] sm:$0xff] }
 0x18a   : > { %v943_v30 = vpop.permute.xlu2 %942  ;;  %v598_v52 = vpop.permute.xlu1 %597  ;;  %v737_v25 = vld [vmem:[#allocation2 + $0x172] sm:$0xff]  ;;  %2778 = vmatpush.bf16.msrb.mxu2 %v7007_v62 }
 0x18b   : > { %1016 = vst.msk [vmem:[#allocation3 + $0x1bc] sm:$0xf] %vm673_vm3, %v943_v30  ;;  %v1360_v30 = vld [vmem:[#allocation2 + $0xc8] sm:$0xff] }
 0x18c   : > { %684 = vst.msk [vmem:[#allocation3 + $0xc8] sm:$0xf] %vm673_vm3, %v598_v52  ;;  %v1392_v60 = vpack.c.bf16 %v1360_v30, %v1360_v30  ;;  %v6123_v30 = vld [vmem:[#allocation3 + $0x168] sm:$0xf] }
 0x18d   : > { %1105 = vst.msk [vmem:[#allocation3 + $0x134] sm:$0xf] %vm448_vm2, %v7835_v7 }
 0x18e   : > { %1424 = vst.msk [vmem:[#allocation3 + $0x110] sm:$0xf] %vm448_vm2, %v1392_v60 }
 0x190   : > { %1240 = vrot.lane.b32.xlu1 %v7557_v35, %s7175_s24  ;;  %631 = vrot.lane.b32.xlu2 %v540_v54, %s7175_s24  ;;  %v1399_v35 = vpack.c.bf16 %v1367_v29, %v1367_v29  ;;  %v769_v54 = vpack.c.bf16 %v737_v25, %v737_v25  ;;  %v511_v29 = vld [vmem:[#allocation2 + $0x169] sm:$0xff] }
 0x191   : > { %1559 = vrot.lane.b32.xlu0 %v7657_v37, %s7175_s24  ;;  %v7020_v37 = vld [vmem:[%s9612_s1 + $0x118] sm:$0xff] }
 0x192   : > { %v636_v21 = vpop.permute.xlu1 %635  ;;  %v610_v22 = vpop.permute.xlu2 %609  ;;  %1431 = vst.msk [vmem:[#allocation3 + $0x19c] sm:$0xf] %vm448_vm2, %v1399_v35  ;;  %2959 = vmatpush.bf16.msrb.mxu0 %v7020_v37  ;;  %v6960_v35 = vld [vmem:[#allocation3 + $0x1bc] sm:$0xf] }
 0x193   : > { %703 = vst.msk [vmem:[#allocation3 + $0x244] sm:$0xf] %vm673_vm3, %v636_v21  ;;  %v955_v31 = vpop.permute.xlu0 %954 }
 0x194   : > { %690 = vst.msk [vmem:[#allocation3 + $0x140] sm:$0xf] %vm673_vm3, %v610_v22 }
 0x195   : > { %1022 = vst.msk [vmem:[#allocation3 + $0x234] sm:$0xf] %vm673_vm3, %v955_v31  ;;  %v1049_v31 = vld [vmem:[#allocation2 + $0x129] sm:$0xff] }
 0x196   : > { %801 = vst.msk [vmem:[#allocation3 + $0x270] sm:$0xf] %vm448_vm2, %v769_v54  ;;  %v1081_v53 = vpack.c.bf16 %v1049_v31, %v1049_v31  ;;  %2960 = vmatpush.bf16.msrb.mxu0 %v7019_v43  ;;  %v7013_v54 = vld [vmem:[%s9612_s1 + $0xe0] sm:$0xff] }
 0x197   : > { %2869 = vmatpush.bf16.msrb.mxu3 %v7013_v54 }
 0x198   : > { %918 = vrot.lane.b32.xlu1 %v7532_v6, %s7175_s24  ;;  %952 = vrot.lane.b32.xlu2 %v7743_v15, %s7175_s24  ;;  %v509_v6 = vld [vmem:[#allocation2 + $0x151] sm:$0xff]  ;;  %1113 = vst.msk [vmem:[#allocation3 + $0x1d4] sm:$0xf] %vm448_vm2, %v1081_v53 }
 0x199   : > { %920 = vrot.lane.b32.xlu0 %v7568_v39, %s7175_s24  ;;  %v707_v15 = vld [vmem:[#allocation2 + $0xa] sm:$0xff]  ;;  %v7873_v2 = vpack.c.bf16 %v509_v6, %v509_v6  ;;  %v6124_v6 = vor.u32 %v6952_v3, %v6123_v30 }
 0x19a   : > { %v602_v18 = vpop.permute.xlu1 %601  ;;  %v612_v50 = vpop.permute.xlu2 %611  ;;  %v739_v39 = vpack.c.bf16 %v707_v15, %v707_v15  ;;  %v1142_v53 = vld [vmem:[#allocation2 + $0x10a] sm:$0xff] }
 0x19b   : > { %686 = vst.msk [vmem:[#allocation3 + $0xf0] sm:$0xf] %vm673_vm3, %v602_v18  ;;  %v604_v52 = vpop.permute.xlu0 %603  ;;  %2870 = vmatpush.bf16.msrb.mxu3 %v7012_v38 }
 0x19c   : > { %691 = vst.msk [vmem:[#allocation3 + $0x154] sm:$0xf] %vm673_vm3, %v612_v50 }
 0x19d   : > { %687 = vst.msk [vmem:[#allocation3 + $0x104] sm:$0xf] %vm673_vm3, %v604_v52  ;;  %v833_v52 = vld [vmem:[#allocation2 + $0x188] sm:$0xff] }
 0x19e   : > { %771 = vst.msk [vmem:[#allocation3 + $0x18] sm:$0xf] %vm448_vm2, %v739_v39  ;;  %v1139_v39 = vld [vmem:[#allocation2 + $0xe2] sm:$0xff] }
 0x19f   : > { %v1171_v28 = vpack.c.bf16 %v1139_v39, %v1139_v39  ;;  %v1050_v39 = vld [vmem:[#allocation2 + $0x139] sm:$0xff] }
 0x1a0   : > { %1244 = vrot.lane.b32.xlu1 %v7612_v33, %s7175_s24  ;;  %633 = vrot.lane.b32.xlu2 %v7873_v2, %s7175_s24  ;;  %v6103_v33 = vld [vmem:[#allocation3 + $0x140] sm:$0xf]  ;;  %v1082_v54 = vpack.c.bf16 %v1050_v39, %v1050_v39  ;;  %v6043_v39 = vld [vmem:[#allocation3 + $0xc8] sm:$0xf] }
 0x1a1   : > { %1563 = vrot.lane.b32.xlu0 %v7650_v23, %s7175_s24 }
 0x1a2   : > { %v640_v17 = vpop.permute.xlu1 %639  ;;  %v945_v40 = vpop.permute.xlu2 %944  ;;  %1114 = vst.msk [vmem:[#allocation3 + $0x1e8] sm:$0xf] %vm448_vm2, %v1082_v54 }
 0x1a3   : > { %705 = vst.msk [vmem:[#allocation3 + $0x26c] sm:$0xf] %vm673_vm3, %v640_v17  ;;  %v959_v55 = vpop.permute.xlu0 %958  ;;  %v6947_v21 = vld [vmem:[#allocation3 + $0x150] sm:$0xf0] }
 0x1a4   : > { %1017 = vst.msk [vmem:[#allocation3 + $0x1d0] sm:$0xf] %vm673_vm3, %v945_v40  ;;  %v6104_v22 = vor.u32 %v6947_v21, %v6103_v33  ;;  %v6143_v33 = vld [vmem:[#allocation3 + $0x190] sm:$0xf]  ;;  %v1140_v21 = vld [vmem:[#allocation2 + $0xf2] sm:$0xff] }
 0x1a5   : > { %1024 = vst.msk [vmem:[#allocation3 + $0x25c] sm:$0xf] %vm673_vm3, %v959_v55 }
 0x1a6   : > { %2647 = vmatmul.bf16.vlgmr.msra.gmra.mxu2 %v6104_v22  ;;  %v6144_v22 = vor.u32 %v6957_v11, %v6143_v33 }
 0x1a8   : > { %922 = vrot.lane.b32.xlu1 %v7591_v1, %s7175_s24  ;;  %956 = vrot.lane.b32.xlu2 %v7782_v58, %s7175_s24  ;;  %v1457_v1 = vld [vmem:[#allocation2 + $0xd9] sm:$0xff]  ;;  %v543_v58 = vpack.c.bf16 %v511_v29, %v511_v29 }
 0x1a9   : > { %924 = vrot.lane.b32.xlu0 %v7621_v44, %s7175_s24  ;;  %v7006_v44 = vld [vmem:[%s9612_s1 + $0xa8] sm:$0xff]  ;;  %v1489_v41 = vpack.c.bf16 %v1457_v1, %v1457_v1 }
 0x1aa   : > { %v606_v23 = vpop.permute.xlu1 %605  ;;  %v590_v8 = vpop.permute.xlu2 %589  ;;  %2779 = vmatpush.bf16.msrb.mxu2 %v7006_v44  ;;  %v1174_v44 = vpack.c.bf16 %v1142_v53, %v1142_v53 }
 0x1ab   : > { %688 = vst.msk [vmem:[#allocation3 + $0x118] sm:$0xf] %vm673_vm3, %v606_v23  ;;  %v608_v12 = vpop.permute.xlu0 %607  ;;  %v6165_v27 = vld [vmem:[#allocation3 + $0x1cc] sm:$0xf0] }
 0x1ac   : > { %680 = vst.msk [vmem:[#allocation3 + $0x78] sm:$0xf] %vm673_vm3, %v590_v8  ;;  %v6168_v37 = vor.u32 %v6960_v35, %v6165_v27  ;;  %v1141_v8 = vld [vmem:[#allocation2 + $0xfa] sm:$0xff]  ;;  %v1462_v35 = vld [vmem:[#allocation2 + $0x111] sm:$0xff] }
 0x1ad   : > { %689 = vst.msk [vmem:[#allocation3 + $0x12c] sm:$0xf] %vm673_vm3, %v608_v12  ;;  %v1173_v29 = vpack.c.bf16 %v1141_v8, %v1141_v8 }
 0x1ae   : > { %2751 = vmatmul.bf16.gmra.mxu3 %v6168_v37  ;;  %v1369_v37 = vld [vmem:[#allocation2 + $0x138] sm:$0xff] }
 0x1af   : > { %v1401_v1 = vpack.c.bf16 %v1369_v37, %v1369_v37 }
 0x1b0   : > { %1248 = vrot.lane.b32.xlu1 %v7655_v36, %s7175_s24  ;;  %637 = vrot.lane.b32.xlu2 %v543_v58, %s7175_s24  ;;  %v865_v36 = vpack.c.bf16 %v833_v52, %v833_v52  ;;  %v1494_v58 = vpack.c.bf16 %v1462_v35, %v1462_v35  ;;  %v1372_v35 = vld [vmem:[#allocation2 + $0x158] sm:$0xff] }
 0x1b1   : > { %1567 = vrot.lane.b32.xlu0 %v1489_v41, %s7175_s24  ;;  %1433 = vst.msk [vmem:[#allocation3 + $0x1c4] sm:$0xf] %vm448_vm2, %v1401_v1  ;;  %v6962_v41 = vld [vmem:[#allocation3 + $0x1c8] sm:$0xf0]  ;;  %v1404_v1 = vpack.c.bf16 %v1372_v35, %v1372_v35  ;;  %v1056_v35 = vld [vmem:[#allocation2 + $0x181] sm:$0xff] }
 0x1b2   : > { %v1221_v18 = vpop.permute.xlu1 %1220  ;;  %v592_v50 = vpop.permute.xlu2 %591 }
 0x1b3   : > { %1315 = vst.msk [vmem:[#allocation3 + $0x1c] sm:$0xf] %vm673_vm3, %v1221_v18  ;;  %v1540_v45 = vpop.permute.xlu0 %1539  ;;  %v6003_v4 = vld [vmem:[#allocation3 + $0x78] sm:$0xf] }
 0x1b4   : > { %681 = vst.msk [vmem:[#allocation3 + $0x8c] sm:$0xf] %vm673_vm3, %v592_v50  ;;  %v6163_v50 = vld [vmem:[#allocation3 + $0x1b8] sm:$0xf] }
 0x1b5   : > { %1635 = vst.msk [vmem:[#allocation3 + $0xc] sm:$0xf] %vm673_vm3, %v1540_v45  ;;  %v6164_v52 = vor.u32 %v6962_v41, %v6163_v50 }
 0x1b6   : > { %2652 = vmatmul.bf16.gmra.mxu2 %v6124_v6  ;;  %v1051_v6 = vld [vmem:[#allocation2 + $0x141] sm:$0xff]  ;;  %1436 = vst.msk [vmem:[#allocation3 + $0x200] sm:$0xf] %vm448_vm2, %v1404_v1 }
 0x1b7   : > { %v7961_v43 = vpack.c.bf16 %v1051_v6, %v1051_v6 }
 0x1b8   : > { %926 = vrot.lane.b32.xlu1 %v7632_v56, %s7175_s24  ;;  %960 = vrot.lane.b32.xlu2 %v865_v36, %s7175_s24 }
 0x1b9   : > { %928 = vrot.lane.b32.xlu0 %v7674_v61, %s7175_s24  ;;  %v7005_v61 = vld [vmem:[%s9612_s1 + $0xa0] sm:$0xff]  ;;  %1115 = vst.msk [vmem:[#allocation3 + $0x1fc] sm:$0xf] %vm448_vm2, %v7961_v43 }
 0x1ba   : > { %v899_v15 = vpop.permute.xlu1 %898  ;;  %v626_v60 = vpop.permute.xlu2 %625  ;;  %2780 = vmatpush.bf16.msrb.mxu2 %v7005_v61 }
 0x1bb   : > { %994 = vst.msk [vmem:[#allocation3 + $0x4] sm:$0xf] %vm673_vm3, %v899_v15  ;;  %v901_v62 = vpop.permute.xlu0 %900  ;;  %v6922_v25 = vld [vmem:[#allocation3 + $0x88] sm:$0xf0]  ;;  %v7018_v15 = vld [vmem:[%s9612_s1 + $0x108] sm:$0xff] }
 0x1bc   : > { %698 = vst.msk [vmem:[#allocation3 + $0x1e0] sm:$0xf] %vm673_vm3, %v626_v60  ;;  %v6004_v56 = vor.u32 %v6922_v25, %v6003_v4  ;;  %v1370_v60 = vld [vmem:[#allocation2 + $0x140] sm:$0xff]  ;;  %2961 = vmatpush.bf16.msrb.mxu0 %v7018_v15 }
 0x1bd   : > { %995 = vst.msk [vmem:[#allocation3 + $0x18] sm:$0xf] %vm673_vm3, %v901_v62  ;;  %v1465_v25 = vld [vmem:[#allocation2 + $0x139] sm:$0xff] }
 0x1be   : > { %2622 = vmatmul.bf16.gmra.mxu0 %v6004_v56  ;;  %v1402_v56 = vpack.c.bf16 %v1370_v60, %v1370_v60  ;;  %v1374_v60 = vld [vmem:[#allocation2 + $0x170] sm:$0xff] }
 0x1c0   : > { %1252 = vrot.lane.b32.xlu1 %v1171_v28, %s7175_s24  ;;  %1218 = vrot.lane.b32.xlu2 %v7357_v51, %s7175_s24  ;;  %1434 = vst.msk [vmem:[#allocation3 + $0x1d8] sm:$0xf] %vm448_vm2, %v1402_v56  ;;  %v6932_v56 = vld [vmem:[#allocation3 + $0xd8] sm:$0xf0] }
 0x1c1   : > { %1571 = vrot.lane.b32.xlu0 %v7706_v59, %s7175_s24  ;;  %v1172_v59 = vpack.c.bf16 %v1140_v21, %v1140_v21 }
 0x1c2   : > { %v1225_v17 = vpop.permute.xlu1 %1224  ;;  %v628_v40 = vpop.permute.xlu2 %627  ;;  %v6905_v47 = vld [vmem:[#allocation3 + $0x4] sm:$0xf] }
 0x1c3   : > { %1317 = vst.msk [vmem:[#allocation3 + $0x44] sm:$0xf] %vm673_vm3, %v1225_v17  ;;  %v1544_v55 = vpop.permute.xlu0 %1543  ;;  %v7011_v17 = vld [vmem:[%s9612_s1 + $0xd0] sm:$0xff] }
 0x1c4   : > { %699 = vst.msk [vmem:[#allocation3 + $0x1f4] sm:$0xf] %vm673_vm3, %v628_v40  ;;  %v5945_v23 = vld [vmem:[#allocation3 + $0x14] sm:$0xf0]  ;;  %2871 = vmatpush.bf16.msrb.mxu3 %v7011_v17 }
 0x1c5   : > { %1637 = vst.msk [vmem:[#allocation3 + $0x34] sm:$0xf] %vm673_vm3, %v1544_v55  ;;  %v5948_v51 = vor.u32 %v6905_v47, %v5945_v23  ;;  %v3204_v47 = vld [vmem:[#allocation2 + $0x1] sm:$0xff]  ;;  %v3205_v55 = vld [vmem:[#allocation2 + $0x9] sm:$0xff] }
 0x1c6   : > { %2657 = vmatmul.bf16.gmra.mxu2 %v6144_v22  ;;  %v6183_v22 = vld [vmem:[#allocation3 + $0x1e0] sm:$0xf] }
 0x1c7   : > { %2696 = vmatmul.bf16.vlgmr.msra.gmra.mxu1 %v5948_v51  ;;  %v3236_v51 = vpack.c.bf16 %v3204_v47, %v3204_v47  ;;  %v7009_v47 = vld [vmem:[%s9612_s1 + $0xc0] sm:$0xff] }
 0x1c8   : > { %1254 = vrot.lane.b32.xlu1 %v1172_v59, %s7175_s24  ;;  %1541 = vrot.lane.b32.xlu2 %v7436_v46, %s7175_s24  ;;  %v7004_v46 = vld [vmem:[%s9612_s1 + $0x98] sm:$0xff] }
 0x1c9   : > { %1256 = vrot.lane.b32.xlu0 %v1173_v29, %s7175_s24  ;;  %2781 = vmatpush.bf16.msrb.mxu2 %v7004_v46  ;;  %v1468_v59 = vld [vmem:[#allocation2 + $0x159] sm:$0xff] }
 0x1ca   : > { %v903_v31 = vpop.permute.xlu1 %902  ;;  %v947_v12 = vpop.permute.xlu2 %946 }
 0x1cb   : > { %996 = vst.msk [vmem:[#allocation3 + $0x2c] sm:$0xf] %vm673_vm3, %v903_v31  ;;  %v905_v27 = vpop.permute.xlu0 %904  ;;  %v6967_v40 = vld [vmem:[#allocation3 + $0x1f0] sm:$0xf0]  ;;  %v3237_v31 = vpack.c.bf16 %v3205_v55, %v3205_v55 }
 0x1cc   : > { %1018 = vst.msk [vmem:[#allocation3 + $0x1e4] sm:$0xf] %vm673_vm3, %v947_v12  ;;  %v7993_v12 = vpack.c.bf16 %v1468_v59, %v1468_v59  ;;  %v1376_v59 = vld [vmem:[#allocation2 + $0x188] sm:$0xff] }
 0x1cd   : > { %997 = vst.msk [vmem:[#allocation3 + $0x40] sm:$0xf] %vm673_vm3, %v905_v27  ;;  %v1052_v27 = vld [vmem:[#allocation2 + $0x151] sm:$0xff] }
 0x1ce   : > { %1117 = vst.msk [vmem:[#allocation3 + $0x224] sm:$0xf] %vm448_vm2, %v7993_v12  ;;  %v1084_v38 = vpack.c.bf16 %v1052_v27, %v1052_v27 }
 0x1d0   : > { %1577 = vrot.lane.b32.xlu1 %v1494_v58, %s7175_s24  ;;  %1222 = vrot.lane.b32.xlu2 %v7473_v14, %s7175_s24  ;;  %1116 = vst.msk [vmem:[#allocation3 + $0x210] sm:$0xf] %vm448_vm2, %v1084_v38 }
 0x1d1   : > { %1258 = vrot.lane.b32.xlu0 %v1174_v44, %s7175_s24 }
 0x1d2   : > { %v1229_v3 = vpop.permute.xlu1 %1228  ;;  %v949_v18 = vpop.permute.xlu2 %948  ;;  %v6910_v45 = vld [vmem:[#allocation3 + $0x2c] sm:$0xf] }
 0x1d3   : > { %1319 = vst.msk [vmem:[#allocation3 + $0x6c] sm:$0xf] %vm673_vm3, %v1229_v3  ;;  %v1548_v30 = vpop.permute.xlu0 %1547  ;;  %v6965_v28 = vld [vmem:[#allocation3 + $0x1e4] sm:$0xf]  ;;  %v7010_v3 = vld [vmem:[%s9612_s1 + $0xc8] sm:$0xff] }
 0x1d4   : > { %1019 = vst.msk [vmem:[#allocation3 + $0x1f8] sm:$0xf] %vm673_vm3, %v949_v18  ;;  %v5965_v36 = vld [vmem:[#allocation3 + $0x3c] sm:$0xf0]  ;;  %2872 = vmatpush.bf16.msrb.mxu3 %v7010_v3 }
 0x1d5   : > { %1639 = vst.msk [vmem:[#allocation3 + $0x5c] sm:$0xf] %vm673_vm3, %v1548_v30  ;;  %v5968_v14 = vor.u32 %v6910_v45, %v5965_v36  ;;  %v6203_v45 = vld [vmem:[#allocation3 + $0x208] sm:$0xf] }
 0x1d6   : > { %2662 = vmatmul.bf16.gmra.mxu2 %v6164_v52  ;;  %v1470_v36 = vld [vmem:[#allocation2 + $0x171] sm:$0xff] }
 0x1d7   : > { %2701 = vmatmul.bf16.gmra.mxu1 %v5968_v14  ;;  %v8021_v15 = vpack.c.bf16 %v1470_v36, %v1470_v36 }
 0x1d8   : > { %1579 = vrot.lane.b32.xlu1 %v7746_v49, %s7175_s24  ;;  %1545 = vrot.lane.b32.xlu2 %v7447_v57, %s7175_s24  ;;  %v7003_v57 = vld [vmem:[%s9612_s1 + $0x90] sm:$0xff] }
 0x1d9   : > { %1581 = vrot.lane.b32.xlu0 %v7765_v34, %s7175_s24  ;;  %v1497_v34 = vpack.c.bf16 %v1465_v25, %v1465_v25  ;;  %2782 = vmatpush.bf16.msrb.mxu2 %v7003_v57  ;;  %1119 = vst.msk [vmem:[#allocation3 + $0x24c] sm:$0xf] %vm448_vm2, %v8021_v15  ;;  %v6044_v57 = vor.u32 %v6932_v56, %v6043_v39 }
 0x1da   : > { %v907_v62 = vpop.permute.xlu1 %906  ;;  %v594_v4 = vpop.permute.xlu2 %593  ;;  %2873 = vmatpush.bf16.msrb.mxu3 %v7009_v47 }
 0x1db   : > { %998 = vst.msk [vmem:[#allocation3 + $0x54] sm:$0xf] %vm673_vm3, %v907_v62  ;;  %v909_v49 = vpop.permute.xlu0 %908  ;;  %v6185_v61 = vld [vmem:[#allocation3 + $0x1f4] sm:$0xf0] }
 0x1dc   : > { %682 = vst.msk [vmem:[#allocation3 + $0xa0] sm:$0xf] %vm673_vm3, %v594_v4  ;;  %v6188_v11 = vor.u32 %v6965_v28, %v6185_v61  ;;  %v1469_v62 = vld [vmem:[#allocation2 + $0x169] sm:$0xff]  ;;  %v6970_v61 = vld [vmem:[#allocation3 + $0x20c] sm:$0xf] }
 0x1dd   : > { %999 = vst.msk [vmem:[#allocation3 + $0x68] sm:$0xf] %vm673_vm3, %v909_v49  ;;  %v1373_v49 = vld [vmem:[#allocation2 + $0x168] sm:$0xff]  ;;  %v8033_v17 = vpack.c.bf16 %v1469_v62, %v1469_v62 }
 0x1de   : > { %2756 = vmatmul.bf16.gmra.mxu3 %v6188_v11  ;;  %v1406_v11 = vpack.c.bf16 %v1374_v60, %v1374_v60  ;;  %v6980_v60 = vld [vmem:[#allocation3 + $0x25c] sm:$0xf] }
 0x1df   : > { %1118 = vst.msk [vmem:[#allocation3 + $0x238] sm:$0xf] %vm448_vm2, %v8033_v17 }
 0x1e0   : > { %1264 = vrot.lane.b32.xlu1 %v7678_v0, %s7175_s24  ;;  %1226 = vrot.lane.b32.xlu2 %v7529_v5, %s7175_s24  ;;  %v6184_v0 = vor.u32 %v6967_v40, %v6183_v22  ;;  %v1405_v40 = vpack.c.bf16 %v1373_v49, %v1373_v49  ;;  %1438 = vst.msk [vmem:[#allocation3 + $0x228] sm:$0xf] %vm448_vm2, %v1406_v11  ;;  %v6908_v49 = vld [vmem:[#allocation3 + $0x18] sm:$0xf0] }
 0x1e1   : > { %1583 = vrot.lane.b32.xlu0 %v1497_v34, %s7175_s24  ;;  %v1057_v11 = vld [vmem:[#allocation2 + $0x189] sm:$0xff] }
 0x1e2   : > { %v1233_v33 = vpop.permute.xlu1 %1232  ;;  %v596_v21 = vpop.permute.xlu2 %595  ;;  %v6915_v23 = vld [vmem:[#allocation3 + $0x54] sm:$0xf]  ;;  %1437 = vst.msk [vmem:[#allocation3 + $0x214] sm:$0xf] %vm448_vm2, %v1405_v40 }
 0x1e3   : > { %1321 = vst.msk [vmem:[#allocation3 + $0x94] sm:$0xf] %vm673_vm3, %v1233_v33  ;;  %v1552_v8 = vpop.permute.xlu0 %1551  ;;  %v6023_v46 = vld [vmem:[#allocation3 + $0xa0] sm:$0xf]  ;;  %v8075_v40 = vpop.f32.mrf.mxu3 }
 0x1e4   : > { %683 = vst.msk [vmem:[#allocation3 + $0xb4] sm:$0xf] %vm673_vm3, %v596_v21  ;;  %v5985_v29 = vld [vmem:[#allocation3 + $0x64] sm:$0xf0] }
 0x1e5   : > { %1641 = vst.msk [vmem:[#allocation3 + $0x84] sm:$0xf] %vm673_vm3, %v1552_v8  ;;  %v5988_v5 = vor.u32 %v6915_v23, %v5985_v29  ;;  %v6977_v8 = vld [vmem:[#allocation3 + $0x240] sm:$0xf0]  ;;  %v1375_v29 = vld [vmem:[#allocation2 + $0x180] sm:$0xff] }
 0x1e6   : > { %2667 = vmatmul.bf16.gmra.mxu2 %v6184_v0 }
 0x1e7   : > { %2706 = vmatmul.bf16.gmra.mxu1 %v5988_v5  ;;  %v6937_v5 = vld [vmem:[#allocation3 + $0x100] sm:$0xf0] }
 0x1e8   : > { %3300 = vrot.lane.b32.xlu1 %v3236_v51, %s7175_s24  ;;  %1549 = vrot.lane.b32.xlu2 %v7486_v26, %s7175_s24  ;;  %v7002_v26 = vld [vmem:[%s9612_s1 + $0x88] sm:$0xff] }
 0x1e9   : > { %3302 = vrot.lane.b32.xlu0 %v3237_v31, %s7175_s24  ;;  %2783 = vmatpush.bf16.msrb.mxu2 %v7002_v26  ;;  %v6063_v31 = vld [vmem:[#allocation3 + $0xf0] sm:$0xf]  ;;  %v1088_v26 = vpack.c.bf16 %v1056_v35, %v1056_v35 }
 0x1ea   : > { %v911_v53 = vpop.permute.xlu1 %910  ;;  %v632_v37 = vpop.permute.xlu2 %631  ;;  %v6064_v38 = vor.u32 %v6937_v5, %v6063_v31 }
 0x1eb   : > { %1000 = vst.msk [vmem:[#allocation3 + $0x7c] sm:$0xf] %vm673_vm3, %v911_v53  ;;  %v913_v58 = vpop.permute.xlu0 %912  ;;  %v6927_v44 = vld [vmem:[#allocation3 + $0xb0] sm:$0xf0]  ;;  %v8089_v31 = vpop.f32.mrf.mxu3 }
 0x1ec   : > { %701 = vst.msk [vmem:[#allocation3 + $0x21c] sm:$0xf] %vm673_vm3, %v632_v37  ;;  %v6024_v41 = vor.u32 %v6927_v44, %v6023_v46  ;;  %v1408_v37 = vpack.c.bf16 %v1376_v59, %v1376_v59  ;;  %v1407_v44 = vpack.c.bf16 %v1375_v29, %v1375_v29 }
 0x1ed   : > { %1001 = vst.msk [vmem:[#allocation3 + $0x90] sm:$0xf] %vm673_vm3, %v913_v58  ;;  %v6975_v58 = vld [vmem:[#allocation3 + $0x234] sm:$0xf] }
 0x1ee   : > { %2627 = vmatmul.bf16.gmra.mxu0 %v6024_v41  ;;  %1440 = vst.msk [vmem:[#allocation3 + $0x250] sm:$0xf] %vm448_vm2, %v1408_v37 }
 0x1ef   : > { %1439 = vst.msk [vmem:[#allocation3 + $0x23c] sm:$0xf] %vm448_vm2, %v1407_v44 }
 0x1f0   : > { %1268 = vrot.lane.b32.xlu1 %v7805_v20, %s7175_s24  ;;  %1230 = vrot.lane.b32.xlu2 %v7599_v9, %s7175_s24  ;;  %v7017_v9 = vld [vmem:[%s9612_s1 + $0x100] sm:$0xff]  ;;  %1120 = vst.msk [vmem:[#allocation3 + $0x260] sm:$0xf] %vm448_vm2, %v1088_v26 }
 0x1f1   : > { %1587 = vrot.lane.b32.xlu0 %v7873_v2, %s7175_s24  ;;  %2962 = vmatpush.bf16.msrb.mxu0 %v7017_v9 }
 0x1f2   : > { %v1237_v18 = vpop.permute.xlu1 %1236  ;;  %v953_v50 = vpop.permute.xlu2 %952  ;;  %v6920_v30 = vld [vmem:[#allocation3 + $0x7c] sm:$0xf] }
 0x1f3   : > { %1323 = vst.msk [vmem:[#allocation3 + $0xbc] sm:$0xf] %vm673_vm3, %v1237_v18  ;;  %v1556_v52 = vpop.permute.xlu0 %1555  ;;  %v6972_v6 = vld [vmem:[#allocation3 + $0x218] sm:$0xf0] }
 0x1f4   : > { %1021 = vst.msk [vmem:[#allocation3 + $0x220] sm:$0xf] %vm673_vm3, %v953_v50  ;;  %v6204_v20 = vor.u32 %v6972_v6, %v6203_v45  ;;  %v6005_v14 = vld [vmem:[#allocation3 + $0x8c] sm:$0xf0] }
 0x1f5   : > { %1643 = vst.msk [vmem:[#allocation3 + $0xac] sm:$0xf] %vm673_vm3, %v1556_v52  ;;  %v6008_v2 = vor.u32 %v6920_v30, %v6005_v14  ;;  %v6982_v30 = vld [vmem:[#allocation3 + $0x268] sm:$0xf0] }
 0x1f6   : > { %2672 = vmatmul.bf16.gmra.mxu2 %v6204_v20  ;;  %v6942_v20 = vld [vmem:[#allocation3 + $0x128] sm:$0xf0] }
 0x1f7   : > { %2711 = vmatmul.bf16.gmra.mxu1 %v6008_v2  ;;  %v8099_v26 = vpop.f32.mrf.mxu3 }
 0x1f8   : > { %1553 = vrot.lane.b32.xlu2 %v7579_v48, %s7175_s24  ;;  %v7001_v48 = vld [vmem:[%s9612_s1 + $0x80] sm:$0xff] }
 0x1f9   : > { %2784 = vmatpush.bf16.msrb.mxu2 %v7001_v48  ;;  %v1089_v48 = vpack.c.bf16 %v1057_v11, %v1057_v11 }
 0x1fa   : > { %v915_v4 = vpop.permute.xlu1 %914  ;;  %v634_v25 = vpop.permute.xlu2 %633 }
 0x1fb   : > { %1002 = vst.msk [vmem:[#allocation3 + $0xa4] sm:$0xf] %vm673_vm3, %v915_v4  ;;  %v917_v28 = vpop.permute.xlu0 %916  ;;  %v6205_v54 = vld [vmem:[#allocation3 + $0x21c] sm:$0xf0] }
 0x1fc   : > { %702 = vst.msk [vmem:[#allocation3 + $0x230] sm:$0xf] %vm673_vm3, %v634_v25  ;;  %v6208_v34 = vor.u32 %v6970_v61, %v6205_v54 }
 0x1fd   : > { %1003 = vst.msk [vmem:[#allocation3 + $0xb8] sm:$0xf] %vm673_vm3, %v917_v28  ;;  %v8071_v28 = vpop.f32.mrf.mxu0 }
 0x1fe   : > { %2632 = vmatmul.bf16.gmra.mxu0 %v6044_v57  ;;  %2761 = vmatmul.bf16.gmra.mxu3 %v6208_v34  ;;  %1121 = vst.msk [vmem:[#allocation3 + $0x274] sm:$0xf] %vm448_vm2, %v1089_v48  ;;  %v6919_v48 = vld [vmem:[#allocation3 + $0x70] sm:$0xf0] }
 0x200   : > { %1234 = vrot.lane.b32.xlu2 %v7638_v13, %s7175_s24 }
 0x202   : > { %v1241_v55 = vpop.permute.xlu1 %1240  ;;  %v957_v33 = vpop.permute.xlu2 %956  ;;  %v6925_v21 = vld [vmem:[#allocation3 + $0xa4] sm:$0xf] }
 0x203   : > { %1325 = vst.msk [vmem:[#allocation3 + $0xe4] sm:$0xf] %vm673_vm3, %v1241_v55  ;;  %v1560_v22 = vpop.permute.xlu0 %1559  ;;  %v6223_v23 = vld [vmem:[#allocation3 + $0x230] sm:$0xf] }
 0x204   : > { %1023 = vst.msk [vmem:[#allocation3 + $0x248] sm:$0xf] %vm673_vm3, %v957_v33  ;;  %v6224_v0 = vor.u32 %v6977_v8, %v6223_v23  ;;  %v6025_v51 = vld [vmem:[#allocation3 + $0xb4] sm:$0xf0]  ;;  %v5959_v55 = vld [vmem:[#allocation3 + $0x10] sm:$0xf] }
 0x205   : > { %1645 = vst.msk [vmem:[#allocation3 + $0xd4] sm:$0xf] %vm673_vm3, %v1560_v22  ;;  %v6028_v13 = vor.u32 %v6925_v21, %v6025_v51  ;;  %v6909_v33 = vld [vmem:[#allocation3 + $0x20] sm:$0xf0]  ;;  %v1136_v23 = vld [vmem:[#allocation2 + $0xc2] sm:$0xff]  ;;  %v8085_v29 = vpop.f32.mrf.mxu0 }
 0x206   : > { %2677 = vmatmul.bf16.gmra.mxu2 %v6224_v0  ;;  %v6906_v0 = vld [vmem:[#allocation3 + $0xc] sm:$0xf]  ;;  %v5960_v59 = vor.u32 %v6909_v33, %v5959_v55 }
 0x207   : > { %2716 = vmatmul.bf16.gmra.mxu1 %v6028_v13 }
 0x208   : > { %1557 = vrot.lane.b32.xlu2 %v7629_v63, %s7175_s24 }
 0x20a   : > { %v919_v27 = vpop.permute.xlu1 %918  ;;  %v638_v53 = vpop.permute.xlu2 %637 }
 0x20b   : > { %1004 = vst.msk [vmem:[#allocation3 + $0xcc] sm:$0xf] %vm673_vm3, %v919_v27  ;;  %v921_v1 = vpop.permute.xlu0 %920  ;;  %v6225_v46 = vld [vmem:[#allocation3 + $0x244] sm:$0xf0] }
 0x20c   : > { %704 = vst.msk [vmem:[#allocation3 + $0x258] sm:$0xf] %vm673_vm3, %v638_v53  ;;  %v6228_v41 = vor.u32 %v6975_v58, %v6225_v46  ;;  %v6913_v58 = vld [vmem:[#allocation3 + $0x40] sm:$0xf0] }
 0x20d   : > { %1005 = vst.msk [vmem:[#allocation3 + $0xe0] sm:$0xf] %vm673_vm3, %v921_v1 }
 0x20e   : > { %2637 = vmatmul.bf16.gmra.mxu0 %v6064_v38  ;;  %2766 = vmatmul.bf16.gmra.mxu3 %v6228_v41  ;;  %v8096_v38 = vpop.f32.mrf.mxu0 }
 0x210   : > { %1238 = vrot.lane.b32.xlu2 %v7647_v16, %s7175_s24  ;;  %v6083_v16 = vld [vmem:[#allocation3 + $0x118] sm:$0xf] }
 0x211   : > { %v6084_v62 = vor.u32 %v6942_v20, %v6083_v16  ;;  %v6911_v16 = vld [vmem:[#allocation3 + $0x34] sm:$0xf] }
 0x212   : > { %v1245_v63 = vpop.permute.xlu1 %1244  ;;  %v961_v3 = vpop.permute.xlu2 %960  ;;  %v6930_v18 = vld [vmem:[#allocation3 + $0xcc] sm:$0xf] }
 0x213   : > { %1327 = vst.msk [vmem:[#allocation3 + $0x10c] sm:$0xf] %vm673_vm3, %v1245_v63  ;;  %v1564_v50 = vpop.permute.xlu0 %1563  ;;  %v6243_v45 = vld [vmem:[#allocation3 + $0x258] sm:$0xf] }
 0x214   : > { %1025 = vst.msk [vmem:[#allocation3 + $0x270] sm:$0xf] %vm673_vm3, %v961_v3  ;;  %v6244_v52 = vor.u32 %v6982_v30, %v6243_v45  ;;  %v6045_v6 = vld [vmem:[#allocation3 + $0xdc] sm:$0xf0]  ;;  %v5979_v3 = vld [vmem:[#allocation3 + $0x38] sm:$0xf] }
 0x215   : > { %1647 = vst.msk [vmem:[#allocation3 + $0xfc] sm:$0xf] %vm673_vm3, %v1564_v50  ;;  %v6048_v36 = vor.u32 %v6930_v18, %v6045_v6  ;;  %v6914_v18 = vld [vmem:[#allocation3 + $0x48] sm:$0xf0]  ;;  %v3108_v50 = vld [vmem:[#allocation2] sm:$0xff] }
 0x216   : > { %2682 = vmatmul.bf16.gmra.mxu2 %v6244_v52  ;;  %v1138_v30 = vld [vmem:[#allocation2 + $0xda] sm:$0xff]  ;;  %v3140_v52 = vpack.c.bf16 %v3108_v50, %v3108_v50 }
 0x217   : > { %2721 = vmatmul.bf16.gmra.mxu1 %v6048_v36 }
 0x218   : > { %1561 = vrot.lane.b32.xlu2 %v7681_v10, %s7175_s24  ;;  %3172 = vst.msk [vmem:[#allocation3] sm:$0xf] %vm448_vm2, %v3140_v52 }
 0x21a   : > { %v923_v14 = vpop.permute.xlu1 %922  ;;  %v1219_v2 = vpop.permute.xlu2 %1218 }
 0x21b   : > { %1006 = vst.msk [vmem:[#allocation3 + $0xf4] sm:$0xf] %vm673_vm3, %v923_v14  ;;  %v925_v9 = vpop.permute.xlu0 %924  ;;  %v6245_v39 = vld [vmem:[#allocation3 + $0x26c] sm:$0xf0] }
 0x21c   : > { %1314 = vst.msk [vmem:[#allocation3 + $0x8] sm:$0xf] %vm673_vm3, %v1219_v2  ;;  %v6248_v4 = vor.u32 %v6980_v60, %v6245_v39  ;;  %v5980_v2 = vor.u32 %v6914_v18, %v5979_v3  ;;  %v8110_v39 = vpop.f32.mrf.mxu0  ;;  %v1144_v18 = vld [vmem:[#allocation2 + $0x122] sm:$0xff] }
 0x21d   : > { %1007 = vst.msk [vmem:[#allocation3 + $0x108] sm:$0xf] %vm673_vm3, %v925_v9  ;;  %v1170_v9 = vpack.c.bf16 %v1138_v30, %v1138_v30 }
 0x21e   : > { %2642 = vmatmul.bf16.gmra.mxu0 %v6084_v62  ;;  %2771 = vmatmul.bf16.gmra.mxu3 %v6248_v4  ;;  %v8116_v4 = vpop.f32.mrf.mxu3 }
 0x220   : > { %1242 = vrot.lane.b32.xlu2 %v7792_v32, %s7175_s24 }
 0x222   : > { %v1249_v10 = vpop.permute.xlu1 %1248  ;;  %v1542_v25 = vpop.permute.xlu2 %1541  ;;  %v6935_v56 = vld [vmem:[#allocation3 + $0xf4] sm:$0xf] }
 0x223   : > { %1329 = vst.msk [vmem:[#allocation3 + $0x134] sm:$0xf] %vm673_vm3, %v1249_v10  ;;  %v1568_v61 = vpop.permute.xlu0 %1567  ;;  %v5951_v54 = vld [vmem:[#allocation3 + $0x8] sm:$0xf] }
 0x224   : > { %1636 = vst.msk [vmem:[#allocation3 + $0x20] sm:$0xf] %vm673_vm3, %v1542_v25  ;;  %v6065_v57 = vld [vmem:[#allocation3 + $0x104] sm:$0xf0]  ;;  %v5952_v34 = vor.u32 %v6908_v49, %v5951_v54  ;;  %v6918_v49 = vld [vmem:[#allocation3 + $0x68] sm:$0xf0]  ;;  %v8121_v11 = vpop.f32.mrf.mxu0 }
 0x225   : > { %1649 = vst.msk [vmem:[#allocation3 + $0x124] sm:$0xf] %vm673_vm3, %v1568_v61  ;;  %v6068_v32 = vor.u32 %v6935_v56, %v6065_v57 }
 0x226   : > { %2785 = vmatmul.bf16.vlgmr.msrb.gmra.mxu2 %v5952_v34  ;;  %v5999_v34 = vld [vmem:[#allocation3 + $0x60] sm:$0xf]  ;;  %v8127_v55 = vpop.f32.mrf.mxu3 }
 0x227   : > { %2726 = vmatmul.bf16.gmra.mxu1 %v6068_v32 }
 0x228   : > { %1565 = vrot.lane.b32.xlu2 %v7835_v7, %s7175_s24  ;;  %v1168_v7 = vpack.c.bf16 %v1136_v23, %v1136_v23 }
 0x229   : > { %v8081_v47 = vpop.f32.mrf.mxu2 }
 0x22a   : > { %v927_v21 = vpop.permute.xlu1 %926  ;;  %v1223_v22 = vpop.permute.xlu2 %1222 }
 0x22b   : > { %1008 = vst.msk [vmem:[#allocation3 + $0x11c] sm:$0xf] %vm673_vm3, %v927_v21  ;;  %v929_v8 = vpop.permute.xlu0 %928  ;;  %v5953_v51 = vld [vmem:[#allocation3 + $0x1c] sm:$0xf0]  ;;  %v6916_v21 = vld [vmem:[#allocation3 + $0x5c] sm:$0xf] }
 0x22c   : > { %1316 = vst.msk [vmem:[#allocation3 + $0x30] sm:$0xf] %vm673_vm3, %v1223_v22  ;;  %v5956_v13 = vor.u32 %v6906_v0, %v5953_v51  ;;  %v6000_v0 = vor.u32 %v6919_v48, %v5999_v34  ;;  %v8137_v51 = vpop.f32.mrf.mxu0  ;;  %v6929_v34 = vld [vmem:[#allocation3 + $0xc0] sm:$0xf0] }
 0x22d   : > { %1009 = vst.msk [vmem:[#allocation3 + $0x130] sm:$0xf] %vm673_vm3, %v929_v8 }
 0x22e   : > { %2874 = vmatmul.bf16.vlgmr.msrb.gmra.mxu3 %v5956_v13  ;;  %6405 = vmatmul.msk.bf16.vlgmr.msrb.gmra.mxu0 %vm226_vm0, %v5960_v59  ;;  %v1143_v59 = vld [vmem:[#allocation2 + $0x112] sm:$0xff] }
 0x230   : > { %1246 = vrot.lane.b32.xlu2 %v1168_v7, %s7175_s24 }
 0x231   : > { %v8092_v5 = vpop.f32.mrf.mxu2 }
 0x232   : > { %v1253_v35 = vpop.permute.xlu1 %1252  ;;  %v1546_v27 = vpop.permute.xlu2 %1545  ;;  %v6940_v53 = vld [vmem:[#allocation3 + $0x11c] sm:$0xf] }
 0x233   : > { %1331 = vst.msk [vmem:[#allocation3 + $0x15c] sm:$0xf] %vm673_vm3, %v1253_v35  ;;  %v1572_v37 = vpop.permute.xlu0 %1571  ;;  %v5971_v1 = vld [vmem:[#allocation3 + $0x30] sm:$0xf] }
 0x234   : > { %1638 = vst.msk [vmem:[#allocation3 + $0x48] sm:$0xf] %vm673_vm3, %v1546_v27  ;;  %v6085_v46 = vld [vmem:[#allocation3 + $0x12c] sm:$0xf0]  ;;  %v5972_v44 = vor.u32 %v6913_v58, %v5971_v1  ;;  %v6923_v27 = vld [vmem:[#allocation3 + $0x90] sm:$0xf0]  ;;  %v8141_v1 = vpop.f32.mrf.mxu3 }
 0x235   : > { %1651 = vst.msk [vmem:[#allocation3 + $0x14c] sm:$0xf] %vm673_vm3, %v1572_v37  ;;  %v6088_v41 = vor.u32 %v6940_v53, %v6085_v46 }
 0x236   : > { %2790 = vmatmul.bf16.gmra.mxu2 %v5972_v44  ;;  %v6019_v44 = vld [vmem:[#allocation3 + $0x88] sm:$0xf] }
 0x237   : > { %2731 = vmatmul.bf16.gmra.mxu1 %v6088_v41  ;;  %v6924_v41 = vld [vmem:[#allocation3 + $0x98] sm:$0xf0] }
 0x238   : > { %1569 = vrot.lane.b32.xlu2 %v7697_v24, %s7175_s24  ;;  %v3109_v24 = vld [vmem:[#allocation2 + $0x8] sm:$0xff] }
 0x239   : > { %v8103_v63 = vpop.f32.mrf.mxu2  ;;  %v3141_v60 = vpack.c.bf16 %v3109_v24, %v3109_v24 }
 0x23a   : > { %v1255_v45 = vpop.permute.xlu1 %1254  ;;  %v1227_v6 = vpop.permute.xlu2 %1226 }
 0x23b   : > { %1332 = vst.msk [vmem:[#allocation3 + $0x170] sm:$0xf] %vm673_vm3, %v1255_v45  ;;  %v1257_v36 = vpop.permute.xlu0 %1256  ;;  %v5973_v20 = vld [vmem:[#allocation3 + $0x44] sm:$0xf0]  ;;  %v8147_v46 = vpop.f32.mrf.mxu0  ;;  %v6921_v45 = vld [vmem:[#allocation3 + $0x84] sm:$0xf] }
 0x23c   : > { %1318 = vst.msk [vmem:[#allocation3 + $0x58] sm:$0xf] %vm673_vm3, %v1227_v6  ;;  %v5976_v14 = vor.u32 %v6911_v16, %v5973_v20  ;;  %v8151_v16 = vpop.f32.mrf.mxu3  ;;  %v1176_v20 = vpack.c.bf16 %v1144_v18, %v1144_v18 }
 0x23d   : > { %1333 = vst.msk [vmem:[#allocation3 + $0x184] sm:$0xf] %vm673_vm3, %v1257_v36  ;;  %v6020_v36 = vor.u32 %v6924_v41, %v6019_v44  ;;  %v6059_v44 = vld [vmem:[#allocation3 + $0xd8] sm:$0xf]  ;;  %v6934_v41 = vld [vmem:[#allocation3 + $0xe8] sm:$0xf0] }
 0x23e   : > { %2879 = vmatmul.bf16.gmra.mxu3 %v5976_v14  ;;  %6406 = vmatmul.msk.bf16.gmra.mxu0 %vm226_vm0, %v5980_v2  ;;  %3173 = vst.msk [vmem:[#allocation3 + $0x14] sm:$0xf] %vm448_vm2, %v3141_v60 }
 0x240   : > { %1250 = vrot.lane.b32.xlu2 %v1170_v9, %s7175_s24 }
 0x241   : > { %v8113_v62 = vpop.f32.mrf.mxu2 }
 0x242   : > { %v1578_v10 = vpop.permute.xlu1 %1577  ;;  %v1550_v25 = vpop.permute.xlu2 %1549 }
 0x243   : > { %1654 = vst.msk [vmem:[#allocation3 + $0x188] sm:$0xf] %vm673_vm3, %v1578_v10  ;;  %v5991_v56 = vld [vmem:[#allocation3 + $0x58] sm:$0xf]  ;;  %v1259_v61 = vpop.permute.xlu0 %1258  ;;  %v8158_v24 = vpop.f32.mrf.mxu0  ;;  %v6928_v10 = vld [vmem:[#allocation3 + $0xb8] sm:$0xf0] }
 0x244   : > { %1640 = vst.msk [vmem:[#allocation3 + $0x70] sm:$0xf] %vm673_vm3, %v1550_v25  ;;  %v5992_v54 = vor.u32 %v6918_v49, %v5991_v56  ;;  %v8163_v49 = vpop.f32.mrf.mxu3 }
 0x245   : > { %1334 = vst.msk [vmem:[#allocation3 + $0x198] sm:$0xf] %vm673_vm3, %v1259_v61 }
 0x246   : > { %2795 = vmatmul.bf16.gmra.mxu2 %v5992_v54  ;;  %v6039_v54 = vld [vmem:[#allocation3 + $0xb0] sm:$0xf] }
 0x248   : > { %1573 = vrot.lane.b32.xlu2 %v7761_v19, %s7175_s24 }
 0x249   : > { %v8125_v57 = vpop.f32.mrf.mxu2 }
 0x24a   : > { %v1580_v32 = vpop.permute.xlu1 %1579  ;;  %v1231_v33 = vpop.permute.xlu2 %1230 }
 0x24b   : > { %1655 = vst.msk [vmem:[#allocation3 + $0x19c] sm:$0xf] %vm673_vm3, %v1580_v32  ;;  %v5993_v22 = vld [vmem:[#allocation3 + $0x6c] sm:$0xf0]  ;;  %v1582_v23 = vpop.permute.xlu0 %1581 }
 0x24c   : > { %1320 = vst.msk [vmem:[#allocation3 + $0x80] sm:$0xf] %vm673_vm3, %v1231_v33  ;;  %v5996_v8 = vor.u32 %v6916_v21, %v5993_v22  ;;  %v6926_v33 = vld [vmem:[#allocation3 + $0xac] sm:$0xf] }
 0x24d   : > { %1656 = vst.msk [vmem:[#allocation3 + $0x1b0] sm:$0xf] %vm673_vm3, %v1582_v23  ;;  %v1146_v22 = vld [vmem:[#allocation2 + $0x13a] sm:$0xff] }
 0x24e   : > { %2884 = vmatmul.bf16.gmra.mxu3 %v5996_v8  ;;  %6407 = vmatmul.msk.bf16.gmra.mxu0 %vm226_vm0, %v6000_v0  ;;  %v6040_v8 = vor.u32 %v6929_v34, %v6039_v54  ;;  %v1178_v0 = vpack.c.bf16 %v1146_v22, %v1146_v22  ;;  %v6938_v54 = vld [vmem:[#allocation3 + $0x108] sm:$0xf0]  ;;  %v6079_v22 = vld [vmem:[#allocation3 + $0x100] sm:$0xf] }
 0x250   : > { %1575 = vrot.lane.b32.xlu2 %v7789_v42, %s7175_s24  ;;  %v1175_v42 = vpack.c.bf16 %v1143_v59, %v1143_v59 }
 0x251   : > { %v8135_v19 = vpop.f32.mrf.mxu2 }
 0x252   : > { %v1265_v13 = vpop.permute.xlu1 %1264  ;;  %v1554_v7 = vpop.permute.xlu2 %1553 }
 0x253   : > { %1337 = vst.msk [vmem:[#allocation3 + $0x1d4] sm:$0xf] %vm673_vm3, %v1265_v13  ;;  %v6011_v35 = vld [vmem:[#allocation3 + $0x80] sm:$0xf]  ;;  %v1584_v53 = vpop.permute.xlu0 %1583 }
 0x254   : > { %1642 = vst.msk [vmem:[#allocation3 + $0x98] sm:$0xf] %vm673_vm3, %v1554_v7  ;;  %v6012_v37 = vor.u32 %v6923_v27, %v6011_v35  ;;  %v6933_v27 = vld [vmem:[#allocation3 + $0xe0] sm:$0xf0] }
 0x255   : > { %1657 = vst.msk [vmem:[#allocation3 + $0x1c4] sm:$0xf] %vm673_vm3, %v1584_v53 }
 0x256   : > { %2800 = vmatmul.bf16.gmra.mxu2 %v6012_v37 }
 0x258   : > { %1260 = vrot.lane.b32.xlu2 %v1175_v42, %s7175_s24 }
 0x259   : > { %v8145_v58 = vpop.f32.mrf.mxu2 }
 0x25a   : > { %v3301_v3 = vpop.permute.xlu1 %3300  ;;  %v1235_v50 = vpop.permute.xlu2 %1234 }
 0x25b   : > { %3396 = vst.msk [vmem:[#allocation3] sm:$0xf] %vm673_vm3, %v3301_v3  ;;  %v6013_v30 = vld [vmem:[#allocation3 + $0x94] sm:$0xf0]  ;;  %v3303_v52 = vpop.permute.xlu0 %3302 }
 0x25c   : > { %1322 = vst.msk [vmem:[#allocation3 + $0xa8] sm:$0xf] %vm673_vm3, %v1235_v50  ;;  %v6016_v6 = vor.u32 %v6921_v45, %v6013_v30  ;;  %v6931_v50 = vld [vmem:[#allocation3 + $0xd4] sm:$0xf]  ;;  %v1148_v30 = vld [vmem:[#allocation2 + $0x152] sm:$0xff] }
 0x25d   : > { %3397 = vst.msk [vmem:[#allocation3 + $0x14] sm:$0xf] %vm673_vm3, %v3303_v52 }
 0x25e   : > { %2889 = vmatmul.bf16.gmra.mxu3 %v6016_v6  ;;  %6408 = vmatmul.msk.bf16.gmra.mxu0 %vm226_vm0, %v6020_v36  ;;  %v6060_v6 = vor.u32 %v6934_v41, %v6059_v44  ;;  %v8191_v36 = vld [vmem:[%s9613_s2] ss:$0 sm:$0xff] }
 0x260   : > { %1262 = vrot.lane.b32.xlu2 %v1176_v20, %s7175_s24 }
 0x261   : > { %v8156_v14 = vpop.f32.mrf.mxu2  ;;  %v8173_v13 = vpop.f32.mrf.mxu3 }
 0x262   : > { %v1269_v2 = vpop.permute.xlu1 %1268  ;;  %v1558_v9 = vpop.permute.xlu2 %1557 }
 0x263   : > { %1339 = vst.msk [vmem:[#allocation3 + $0x1fc] sm:$0xf] %vm673_vm3, %v1269_v2  ;;  %v6031_v60 = vld [vmem:[#allocation3 + $0xa8] sm:$0xf]  ;;  %v1588_v25 = vpop.permute.xlu0 %1587 }
 0x264   : > { %1644 = vst.msk [vmem:[#allocation3 + $0xc0] sm:$0xf] %vm673_vm3, %v1558_v9  ;;  %v6032_v56 = vor.u32 %v6928_v10, %v6031_v60 }
 0x265   : > { %1659 = vst.msk [vmem:[#allocation3 + $0x1ec] sm:$0xf] %vm673_vm3, %v1588_v25 }
 0x266   : > { %2805 = vmatmul.bf16.gmra.mxu2 %v6032_v56 }
 0x268   : > { %1585 = vrot.lane.b32.xlu2 %v7961_v43, %s7175_s24 }
 0x269   : > { %v8167_v61 = vpop.f32.mrf.mxu2  ;;  %v8183_v37 = vpop.f32.mrf.mxu3 }
 0x26a   : > { %v1239_v32 = vpop.permute.xlu2 %1238 }
 0x26b   : > { %v8169_v48 = vpop.f32.mrf.mxu0  ;;  %v6033_v21 = vld [vmem:[#allocation3 + $0xbc] sm:$0xf0]  ;;  %1324 = vst.msk [vmem:[#allocation3 + $0xd0] sm:$0xf] %vm673_vm3, %v1239_v32 }
 0x26c   : > { %v6036_v23 = vor.u32 %v6926_v33, %v6033_v21 }
 0x26e   : > { %2894 = vmatmul.bf16.gmra.mxu3 %v6036_v23  ;;  %6409 = vmatmul.msk.bf16.gmra.mxu0 %vm226_vm0, %v6040_v8  ;;  %v6939_v23 = vld [vmem:[#allocation3 + $0x110] sm:$0xf0] }
 0x26f   : > { %v6080_v41 = vor.u32 %v6939_v23, %v6079_v22 }
 0x270   : > { %1266 = vrot.lane.b32.xlu2 %v1178_v0, %s7175_s24 }
 0x271   : > { %v8176_v43 = vpop.f32.mrf.mxu2 }
 0x272   : > { %v1562_v7 = vpop.permute.xlu2 %1561  ;;  %v6051_v35 = vld [vmem:[#allocation3 + $0xd0] sm:$0xf] }
 0x273   : > { %v8178_v59 = vpop.f32.mrf.mxu0  ;;  %1646 = vst.msk [vmem:[#allocation3 + $0xe8] sm:$0xf] %vm673_vm3, %v1562_v7  ;;  %v6052_v53 = vor.u32 %v6933_v27, %v6051_v35  ;;  %v6936_v35 = vld [vmem:[#allocation3 + $0xfc] sm:$0xf] }
 0x276   : > { %2810 = vmatmul.bf16.gmra.mxu2 %v6052_v53  ;;  %v1150_v53 = vld [vmem:[#allocation2 + $0x16a] sm:$0xff] }
 0x278   : > { %1589 = vrot.lane.b32.xlu2 %v7993_v12, %s7175_s24  ;;  %v1180_v12 = vpack.c.bf16 %v1148_v30, %v1148_v30 }
 0x279   : > { %v2673_v42 = vpop.f32.mrf.mxu2 }
 0x27a   : > { %v1243_v3 = vpop.permute.xlu2 %1242  ;;  %v6053_v45 = vld [vmem:[#allocation3 + $0xe4] sm:$0xf0]  ;;  %v2674_v20 = vadd.f32 %v8191_v36, %v2673_v42  ;;  %v8208_v42 = vpop.f32.mrf.mxu1 }
 0x27b   : > { %v8185_v18 = vpop.f32.mrf.mxu0  ;;  %1326 = vst.msk [vmem:[#allocation3 + $0xf8] sm:$0xf] %vm673_vm3, %v1243_v3  ;;  %v6056_v52 = vor.u32 %v6931_v50, %v6053_v45 }
 0x27e   : > { %2899 = vmatmul.bf16.gmra.mxu3 %v6056_v52  ;;  %6410 = vmatmul.msk.bf16.gmra.mxu0 %vm226_vm0, %v6060_v6 }
 0x280   : > { %1270 = vrot.lane.b32.xlu2 %v1180_v12, %s7175_s24 }
 0x281   : > { %v2675_v2 = vpop.f32.mrf.mxu2  ;;  %v2762_v9 = vpop.f32.mrf.mxu3 }
 0x282   : > { %v8196_v60 = vadd.f32 %v2762_v9, %v2674_v20  ;;  %v1566_v10 = vpop.permute.xlu2 %1565  ;;  %v6071_v56 = vld [vmem:[#allocation3 + $0xf8] sm:$0xf]  ;;  %v2676_v32 = vadd.f32 %v8191_v36, %v2675_v2  ;;  %v6943_v20 = vld [vmem:[#allocation3 + $0x130] sm:$0xf0] }
 0x283   : > { %v8198_v25 = vpop.f32.mrf.mxu0  ;;  %1648 = vst.msk [vmem:[#allocation3 + $0x110] sm:$0xf] %vm673_vm3, %v1566_v10  ;;  %v6072_v34 = vor.u32 %v6938_v54, %v6071_v56  ;;  %v1472_v2 = vld [vmem:[#allocation2 + $0x189] sm:$0xff]  ;;  %v2699_v10 = vpop.f32.mrf.mxu1 }
 0x284   : > { %v1504_v56 = vpack.c.bf16 %v1472_v2, %v1472_v2  ;;  %v6948_v2 = vld [vmem:[#allocation3 + $0x158] sm:$0xf0] }
 0x286   : > { %2815 = vmatmul.bf16.gmra.mxu2 %v6072_v34 }
 0x288   : > { %1593 = vrot.lane.b32.xlu2 %v8021_v15, %s7175_s24  ;;  %v1182_v15 = vpack.c.bf16 %v1150_v53, %v1150_v53 }
 0x289   : > { %v2678_v33 = vpop.f32.mrf.mxu2  ;;  %v2764_v21 = vpop.f32.mrf.mxu3 }
 0x28a   : > { %v8204_v8 = vadd.f32 %v2764_v21, %v2676_v32  ;;  %v1247_v0 = vpop.permute.xlu2 %1246  ;;  %v6073_v27 = vld [vmem:[#allocation3 + $0x10c] sm:$0xf0]  ;;  %v2679_v3 = vadd.f32 %v8191_v36, %v2678_v33  ;;  %v6099_v33 = vld [vmem:[#allocation3 + $0x128] sm:$0xf]  ;;  %v6944_v21 = vld [vmem:[#allocation3 + $0x138] sm:$0xf0] }
 0x28b   : > { %v8206_v7 = vpop.f32.mrf.mxu0  ;;  %1328 = vst.msk [vmem:[#allocation3 + $0x120] sm:$0xf] %vm673_vm3, %v1247_v0  ;;  %v6076_v44 = vor.u32 %v6936_v35, %v6073_v27  ;;  %v6941_v35 = vld [vmem:[#allocation3 + $0x124] sm:$0xf] }
 0x28e   : > { %2904 = vmatmul.bf16.gmra.mxu3 %v6076_v44  ;;  %6411 = vmatmul.msk.bf16.gmra.mxu0 %vm226_vm0, %v6080_v41  ;;  %v6100_v44 = vor.u32 %v6944_v21, %v6099_v33  ;;  %v2702_v41 = vpop.f32.mrf.mxu1  ;;  %v6119_v33 = vld [vmem:[#allocation3 + $0x150] sm:$0xf]  ;;  %v6949_v21 = vld [vmem:[#allocation3 + $0x160] sm:$0xf0] }
 0x290   : > { %1274 = vrot.lane.b32.xlu2 %v1182_v15, %s7175_s24 }
 0x291   : > { %v2680_v50 = vpop.f32.mrf.mxu2  ;;  %v2767_v45 = vpop.f32.mrf.mxu3 }
 0x292   : > { %v8214_v30 = vadd.f32 %v2767_v45, %v2679_v3  ;;  %v1570_v52 = vpop.permute.xlu2 %1569  ;;  %v6091_v12 = vld [vmem:[#allocation3 + $0x120] sm:$0xf]  ;;  %v2681_v54 = vadd.f32 %v8191_v36, %v2680_v50 }
 0x293   : > { %v8216_v6 = vpop.f32.mrf.mxu0  ;;  %1650 = vst.msk [vmem:[#allocation3 + $0x138] sm:$0xf] %vm673_vm3, %v1570_v52  ;;  %v6092_v9 = vor.u32 %v6943_v20, %v6091_v12 }
 0x294   : > { %9624 = vst [vmem:[#allocation4_spill] sm:$0xff] %v8214_v30 }
 0x296   : > { %2820 = vmatmul.bf16.gmra.mxu2 %v6092_v9 }
 0x298   : > { %1597 = vrot.lane.b32.xlu2 %v1504_v56, %s7175_s24 }
 0x299   : > { %v2683_v34 = vpop.f32.mrf.mxu2  ;;  %v2769_v32 = vpop.f32.mrf.mxu3 }
 0x29a   : > { %v8221_v22 = vadd.f32 %v2769_v32, %v2681_v54  ;;  %v1251_v23 = vpop.permute.xlu2 %1250  ;;  %v6093_v27 = vld [vmem:[#allocation3 + $0x134] sm:$0xf0]  ;;  %v2684_v15 = vadd.f32 %v8191_v36, %v2683_v34  ;;  %v8234_v34 = vpop.f32.mrf.mxu1 }
 0x29b   : > { %v8223_v0 = vpop.f32.mrf.mxu0  ;;  %1330 = vst.msk [vmem:[#allocation3 + $0x148] sm:$0xf] %vm673_vm3, %v1251_v23  ;;  %v6096_v53 = vor.u32 %v6941_v35, %v6093_v27 }
 0x29c   : > { %9625 = vst [vmem:[#allocation5_spill] sm:$0xff] %v8221_v22 }
 0x29e   : > { %2909 = vmatmul.bf16.gmra.mxu3 %v6096_v53  ;;  %6412 = vmatmul.msk.bf16.gmra.mxu0 %vm226_vm0, %v6100_v44  ;;  %v6946_v53 = vld [vmem:[#allocation3 + $0x14c] sm:$0xf] }
 0x2a1   : > { %v2685_v3 = vpop.f32.mrf.mxu2  ;;  %v2772_v50 = vpop.f32.mrf.mxu3 }
 0x2a2   : > { %v8228_v45 = vadd.f32 %v2772_v50, %v2684_v15  ;;  %v1574_v52 = vpop.permute.xlu2 %1573  ;;  %v6111_v20 = vld [vmem:[#allocation3 + $0x148] sm:$0xf]  ;;  %v2686_v56 = vadd.f32 %v8191_v36, %v2685_v3  ;;  %v2609_v15 = vadd.f32 %v8191_v36, %v8071_v28  ;;  %v2611_v28 = vadd.f32 %v8191_v36, %v8085_v29  ;;  %v8245_v30 = vpop.f32.mrf.mxu1 }
 0x2a3   : > { %v8230_v12 = vpop.f32.mrf.mxu0  ;;  %1652 = vst.msk [vmem:[#allocation3 + $0x160] sm:$0xf] %vm673_vm3, %v1574_v52  ;;  %v6112_v9 = vor.u32 %v6948_v2, %v6111_v20  ;;  %v6120_v52 = vor.u32 %v6949_v21, %v6119_v33 }
 0x2a4   : > { %9626 = vst [vmem:[#allocation6_spill] sm:$0xff] %v8228_v45  ;;  %v2698_v3 = vadd.f32 %v8208_v42, %v2609_v15  ;;  %v2700_v33 = vadd.f32 %v2699_v10, %v2611_v28 }
 0x2a6   : > { %2825 = vmatmul.bf16.gmra.mxu2 %v6112_v9 }
 0x2a9   : > { %v2774_v54 = vpop.f32.mrf.mxu3  ;;  %v2786_v32 = vpop.f32.mrf.mxu2 }
 0x2aa   : > { %v8236_v23 = vadd.f32 %v2774_v54, %v2686_v56  ;;  %v1576_v35 = vpop.permute.xlu2 %1575  ;;  %v6113_v44 = vld [vmem:[#allocation3 + $0x15c] sm:$0xf0]  ;;  %v2787_v20 = vadd.f32 %v2786_v32, %v2698_v3  ;;  %v6131_v56 = vld [vmem:[#allocation3 + $0x170] sm:$0xf]  ;;  %v6953_v54 = vld [vmem:[#allocation3 + $0x180] sm:$0xf0] }
 0x2ab   : > { %v2964_v27 = vpop.f32.mrf.mxu0  ;;  %1653 = vst.msk [vmem:[#allocation3 + $0x174] sm:$0xf] %vm673_vm3, %v1576_v35  ;;  %v6116_v50 = vor.u32 %v6946_v53, %v6113_v44  ;;  %v6132_v42 = vor.u32 %v6953_v54, %v6131_v56  ;;  %v8252_v56 = vpop.f32.mrf.mxu1 }
 0x2ac   : > { %9627 = vst [vmem:[#allocation7_spill] sm:$0xff] %v8236_v23 }
 0x2ae   : > { %2914 = vmatmul.bf16.gmra.mxu3 %v6116_v50  ;;  %6413 = vmatmul.msk.bf16.gmra.mxu0 %vm226_vm0, %v6120_v52  ;;  %v6139_v50 = vld [vmem:[#allocation3 + $0x178] sm:$0xf]  ;;  %v6954_v52 = vld [vmem:[#allocation3 + $0x188] sm:$0xf0] }
 0x2b1   : > { %v2788_v2 = vpop.f32.mrf.mxu2  ;;  %v2875_v9 = vpop.f32.mrf.mxu3 }
 0x2b2   : > { %v2876_v23 = vadd.f32 %v2875_v9, %v2787_v20  ;;  %v1261_v45 = vpop.permute.xlu2 %1260  ;;  %v2789_v32 = vadd.f32 %v2788_v2, %v2700_v33  ;;  %v6951_v15 = vld [vmem:[#allocation3 + $0x174] sm:$0xf]  ;;  %v6133_v9 = vld [vmem:[#allocation3 + $0x184] sm:$0xf0] }
 0x2b3   : > { %v2966_v22 = vpop.f32.mrf.mxu0  ;;  %1335 = vst.msk [vmem:[#allocation3 + $0x1ac] sm:$0xf] %vm673_vm3, %v1261_v45  ;;  %v6136_v10 = vor.u32 %v6951_v15, %v6133_v9  ;;  %v2616_v15 = vadd.f32 %v8191_v36, %v8110_v39 }
 0x2b4   : > { %v2965_v35 = vadd.f32 %v2964_v27, %v2876_v23  ;;  %v2614_v23 = vadd.f32 %v8191_v36, %v8096_v38  ;;  %v6140_v27 = vor.u32 %v6954_v52, %v6139_v50 }
 0x2b6   : > { %v3044_v21 = vmax.f32 %v2965_v35, 0.0  ;;  %2830 = vmatmul.bf16.gmra.mxu2 %v6132_v42  ;;  %v2703_v2 = vadd.f32 %v2702_v41, %v2614_v23  ;;  %v6151_v41 = vld [vmem:[#allocation3 + $0x198] sm:$0xf]  ;;  %v8261_v23 = vpop.f32.mrf.mxu1 }
 0x2b8   : > { %3076 = vst.msk [vmem:[#allocation2 + $0x19] sm:$0xff] %vm226_vm0, %v3044_v21 }
 0x2b9   : > { %v2791_v53 = vpop.f32.mrf.mxu2  ;;  %v2877_v44 = vpop.f32.mrf.mxu3 }
 0x2ba   : > { %v2878_v3 = vadd.f32 %v2877_v44, %v2789_v32  ;;  %v1263_v20 = vpop.permute.xlu2 %1262  ;;  %v2792_v35 = vadd.f32 %v2791_v53, %v2703_v2  ;;  %v6958_v38 = vld [vmem:[#allocation3 + $0x1a8] sm:$0xf0]  ;;  %v6159_v2 = vld [vmem:[#allocation3 + $0x1a0] sm:$0xf] }
 0x2bb   : > { %v2969_v29 = vpop.f32.mrf.mxu0  ;;  %1336 = vst.msk [vmem:[#allocation3 + $0x1c0] sm:$0xf] %vm673_vm3, %v1263_v20  ;;  %v6152_v52 = vor.u32 %v6958_v38, %v6151_v41  ;;  %v1149_v53 = vld [vmem:[#allocation2 + $0x15a] sm:$0xff] }
 0x2bc   : > { %v2967_v45 = vadd.f32 %v2966_v22, %v2878_v3  ;;  %v2705_v3 = vadd.f32 %v8234_v34, %v2616_v15 }
 0x2be   : > { %v3045_v54 = vmax.f32 %v2967_v45, 0.0  ;;  %2919 = vmatmul.bf16.gmra.mxu3 %v6136_v10  ;;  %6414 = vmatmul.msk.bf16.gmra.mxu0 %vm226_vm0, %v6140_v27  ;;  %v1181_v27 = vpack.c.bf16 %v1149_v53, %v1149_v53 }
 0x2bf   : > { %v3206_v28 = vld [vmem:[#allocation2 + $0x19] sm:$0xff] }
 0x2c0   : > { %3077 = vst.msk [vmem:[#allocation2 + $0x21] sm:$0xff] %vm226_vm0, %v3045_v54  ;;  %v3238_v42 = vpack.c.bf16 %v3206_v28, %v3206_v28  ;;  %v6153_v28 = vld [vmem:[#allocation3 + $0x1ac] sm:$0xf0] }
 0x2c1   : > { %v2793_v33 = vpop.f32.mrf.mxu2  ;;  %v2880_v21 = vpop.f32.mrf.mxu3 }
 0x2c2   : > { %v2881_v22 = vadd.f32 %v2880_v21, %v2792_v35  ;;  %3304 = vrot.lane.b32.xlu1 %v3238_v42, %s7175_s24  ;;  %v1586_v32 = vpop.permute.xlu2 %1585  ;;  %v2794_v45 = vadd.f32 %v2793_v33, %v2705_v3  ;;  %v6959_v35 = vld [vmem:[#allocation3 + $0x1b0] sm:$0xf0]  ;;  %v2619_v33 = vadd.f32 %v8191_v36, %v8121_v11  ;;  %v2714_v11 = vpop.f32.mrf.mxu1 }
 0x2c3   : > { %v2971_v44 = vpop.f32.mrf.mxu0  ;;  %1658 = vst.msk [vmem:[#allocation3 + $0x1d8] sm:$0xf] %vm673_vm3, %v1586_v32  ;;  %v6160_v32 = vor.u32 %v6959_v35, %v6159_v2 }
 0x2c4   : > { %v2970_v50 = vadd.f32 %v2969_v29, %v2881_v22  ;;  %v6956_v29 = vld [vmem:[#allocation3 + $0x19c] sm:$0xf]  ;;  %v2708_v41 = vadd.f32 %v8245_v30, %v2619_v33 }
 0x2c5   : > { %v6156_v22 = vor.u32 %v6956_v29, %v6153_v28 }
 0x2c6   : > { %v3046_v20 = vmax.f32 %v2970_v50, 0.0  ;;  %2835 = vmatmul.bf16.gmra.mxu2 %v6152_v52 }
 0x2c7   : > { %v3207_v9 = vld [vmem:[#allocation2 + $0x21] sm:$0xff] }
 0x2c8   : > { %3078 = vst.msk [vmem:[#allocation2 + $0x31] sm:$0xff] %vm226_vm0, %v3046_v20  ;;  %v3239_v10 = vpack.c.bf16 %v3207_v9, %v3207_v9  ;;  %v6171_v9 = vld [vmem:[#allocation3 + $0x1c0] sm:$0xf] }
 0x2c9   : > { %v2796_v54 = vpop.f32.mrf.mxu2  ;;  %v2882_v39 = vpop.f32.mrf.mxu3 }
 0x2ca   : > { %v2883_v42 = vadd.f32 %v2882_v39, %v2794_v45  ;;  %3306 = vrot.lane.b32.xlu0 %v3239_v10, %s7175_s24  ;;  %1272 = vrot.lane.b32.xlu1 %v1181_v27, %s7175_s24  ;;  %v1267_v34 = vpop.permute.xlu2 %1266  ;;  %v2797_v52 = vadd.f32 %v2796_v54, %v2708_v41  ;;  %v6963_v10 = vld [vmem:[#allocation3 + $0x1d0] sm:$0xf0]  ;;  %v2621_v27 = vadd.f32 %v8191_v36, %v8137_v51  ;;  %v1151_v39 = vld [vmem:[#allocation2 + $0x172] sm:$0xff]  ;;  %v6964_v51 = vld [vmem:[#allocation3 + $0x1d8] sm:$0xf0] }
 0x2cb   : > { %v2974_v21 = vpop.f32.mrf.mxu0  ;;  %1338 = vst.msk [vmem:[#allocation3 + $0x1e8] sm:$0xf] %vm673_vm3, %v1267_v34  ;;  %v6172_v54 = vor.u32 %v6963_v10, %v6171_v9  ;;  %v1183_v34 = vpack.c.bf16 %v1151_v39, %v1151_v39  ;;  %v1471_v9 = vld [vmem:[#allocation2 + $0x181] sm:$0xff] }
 0x2cc   : > { %v2972_v38 = vadd.f32 %v2971_v44, %v2883_v42  ;;  %v2710_v29 = vadd.f32 %v8252_v56, %v2621_v27 }
 0x2ce   : > { %v3047_v15 = vmax.f32 %v2972_v38, 0.0  ;;  %2924 = vmatmul.bf16.gmra.mxu3 %v6156_v22  ;;  %6415 = vmatmul.msk.bf16.gmra.mxu0 %vm226_vm0, %v6160_v32  ;;  %v6173_v22 = vld [vmem:[#allocation3 + $0x1d4] sm:$0xf0]  ;;  %v6179_v32 = vld [vmem:[#allocation3 + $0x1c8] sm:$0xf] }
 0x2cf   : > { %v3208_v50 = vld [vmem:[#allocation2 + $0x31] sm:$0xff] }
 0x2d0   : > { %3079 = vst.msk [vmem:[#allocation2 + $0x39] sm:$0xff] %vm226_vm0, %v3047_v15  ;;  %v3240_v53 = vpack.c.bf16 %v3208_v50, %v3208_v50  ;;  %v6961_v15 = vld [vmem:[#allocation3 + $0x1c4] sm:$0xf]  ;;  %v2624_v50 = vadd.f32 %v8191_v36, %v8147_v46 }
 0x2d1   : > { %v2798_v3 = vpop.f32.mrf.mxu2  ;;  %v2885_v20 = vpop.f32.mrf.mxu3 }
 0x2d2   : > { %v2886_v44 = vadd.f32 %v2885_v20, %v2797_v52  ;;  %1591 = vrot.lane.b32.xlu0 %v8033_v17, %s7175_s24  ;;  %3308 = vrot.lane.b32.xlu1 %v3240_v53, %s7175_s24  ;;  %v1590_v30 = vpop.permute.xlu2 %1589  ;;  %v2799_v42 = vadd.f32 %v2798_v3, %v2710_v29  ;;  %v2717_v52 = vpop.f32.mrf.mxu1  ;;  %v6176_v3 = vor.u32 %v6961_v15, %v6173_v22 }
 0x2d3   : > { %v2976_v45 = vpop.f32.mrf.mxu0  ;;  %1660 = vst.msk [vmem:[#allocation3 + $0x200] sm:$0xf] %vm673_vm3, %v1590_v30  ;;  %v6180_v20 = vor.u32 %v6964_v51, %v6179_v32 }
 0x2d4   : > { %v2975_v2 = vadd.f32 %v2974_v21, %v2886_v44  ;;  %v2713_v44 = vadd.f32 %v8261_v23, %v2624_v50 }
 0x2d6   : > { %v3048_v28 = vmax.f32 %v2975_v2, 0.0  ;;  %2840 = vmatmul.bf16.gmra.mxu2 %v6172_v54  ;;  %v1503_v2 = vpack.c.bf16 %v1471_v9, %v1471_v9  ;;  %v6966_v9 = vld [vmem:[#allocation3 + $0x1ec] sm:$0xf] }
 0x2d7   : > { %v3209_v35 = vld [vmem:[#allocation2 + $0x39] sm:$0xff] }
 0x2d8   : > { %3080 = vst.msk [vmem:[#allocation2 + $0x49] sm:$0xff] %vm226_vm0, %v3048_v28  ;;  %v3241_v17 = vpack.c.bf16 %v3209_v35, %v3209_v35  ;;  %v6968_v35 = vld [vmem:[#allocation3 + $0x1f8] sm:$0xf0] }
 0x2d9   : > { %v2801_v33 = vpop.f32.mrf.mxu2  ;;  %v2887_v38 = vpop.f32.mrf.mxu3 }
 0x2da   : > { %v2888_v21 = vadd.f32 %v2887_v38, %v2799_v42  ;;  %3310 = vrot.lane.b32.xlu0 %v3241_v17, %s7175_s24  ;;  %1276 = vrot.lane.b32.xlu1 %v1183_v34, %s7175_s24  ;;  %v1271_v41 = vpop.permute.xlu2 %1270  ;;  %v2802_v27 = vadd.f32 %v2801_v33, %v2713_v44  ;;  %v2626_v42 = vadd.f32 %v8191_v36, %v8158_v24  ;;  %v2719_v38 = vpop.f32.mrf.mxu1  ;;  %v6193_v50 = vld [vmem:[#allocation3 + $0x1fc] sm:$0xf0] }
 0x2db   : > { %v2979_v56 = vpop.f32.mrf.mxu0  ;;  %1340 = vst.msk [vmem:[#allocation3 + $0x210] sm:$0xf] %vm673_vm3, %v1271_v41 }
 0x2dc   : > { %v2977_v53 = vadd.f32 %v2976_v45, %v2888_v21  ;;  %v6191_v45 = vld [vmem:[#allocation3 + $0x1e8] sm:$0xf]  ;;  %v2715_v33 = vadd.f32 %v2714_v11, %v2626_v42  ;;  %v2629_v11 = vadd.f32 %v8191_v36, %v8169_v48  ;;  %v2631_v42 = vadd.f32 %v8191_v36, %v8178_v59 }
 0x2dd   : > { %v6192_v34 = vor.u32 %v6968_v35, %v6191_v45  ;;  %v7108_v48 = vld [vmem:[%s9614_s3 + $0x38] sm:$0xff] }
 0x2de   : > { %v3049_v30 = vmax.f32 %v2977_v53, 0.0  ;;  %2929 = vmatmul.bf16.gmra.mxu3 %v6176_v3  ;;  %6416 = vmatmul.msk.bf16.gmra.mxu0 %vm226_vm0, %v6180_v20  ;;  %v6199_v53 = vld [vmem:[#allocation3 + $0x1f0] sm:$0xf]  ;;  %v6969_v3 = vld [vmem:[#allocation3 + $0x200] sm:$0xf0] }
 0x2df   : > { %v3210_v10 = vld [vmem:[#allocation2 + $0x49] sm:$0xff]  ;;  %5320 = vmatpush.bf16.msrb.mxu1 %v7108_v48  ;;  %v2636_v48 = vadd.f32 %v8191_v36, %v8198_v25 }
 0x2e0   : > { %3081 = vst.msk [vmem:[#allocation2 + $0x51] sm:$0xff] %vm226_vm0, %v3049_v30  ;;  %v3242_v54 = vpack.c.bf16 %v3210_v10, %v3210_v10  ;;  %v6196_v30 = vor.u32 %v6966_v9, %v6193_v50  ;;  %v6200_v10 = vor.u32 %v6969_v3, %v6199_v53  ;;  %v6219_v50 = vld [vmem:[#allocation3 + $0x218] sm:$0xf]  ;;  %v6974_v53 = vld [vmem:[#allocation3 + $0x228] sm:$0xf0] }
 0x2e1   : > { %v2803_v46 = vpop.f32.mrf.mxu2  ;;  %v2890_v39 = vpop.f32.mrf.mxu3  ;;  %v6220_v9 = vor.u32 %v6974_v53, %v6219_v50  ;;  %v7102_v25 = vld [vmem:[%s9614_s3 + $0x8] sm:$0xff] }
 0x2e2   : > { %v2891_v29 = vadd.f32 %v2890_v39, %v2802_v27  ;;  %1595 = vrot.lane.b32.xlu0 %v1503_v2, %s7175_s24  ;;  %3312 = vrot.lane.b32.xlu1 %v3242_v54, %s7175_s24  ;;  %v1594_v28 = vpop.permute.xlu2 %1593  ;;  %v2804_v51 = vadd.f32 %v2803_v46, %v2715_v33  ;;  %v2718_v27 = vadd.f32 %v2717_v52, %v2629_v11  ;;  %v2722_v46 = vpop.f32.mrf.mxu1 }
 0x2e3   : > { %v2981_v23 = vpop.f32.mrf.mxu0  ;;  %1662 = vst.msk [vmem:[#allocation3 + $0x228] sm:$0xf] %vm673_vm3, %v1594_v28 }
 0x2e4   : > { %v2980_v17 = vadd.f32 %v2979_v56, %v2891_v29 }
 0x2e6   : > { %v3050_v22 = vmax.f32 %v2980_v17, 0.0  ;;  %2845 = vmatmul.bf16.gmra.mxu2 %v6192_v34  ;;  %v2720_v34 = vadd.f32 %v2719_v38, %v2631_v42  ;;  %v7106_v38 = vld [vmem:[%s9614_s3 + $0x28] sm:$0xff] }
 0x2e7   : > { %v3211_v32 = vld [vmem:[#allocation2 + $0x51] sm:$0xff] }
 0x2e8   : > { %3082 = vst.msk [vmem:[#allocation2 + $0x61] sm:$0xff] %vm226_vm0, %v3050_v22  ;;  %v3243_v21 = vpack.c.bf16 %v3211_v32, %v3211_v32 }
 0x2e9   : > { %v2806_v41 = vpop.f32.mrf.mxu2  ;;  %v2892_v15 = vpop.f32.mrf.mxu3 }
 0x2ea   : > { %v2893_v20 = vadd.f32 %v2892_v15, %v2804_v51  ;;  %3314 = vrot.lane.b32.xlu0 %v3243_v21, %s7175_s24  ;;  %v1275_v24 = vpop.permute.xlu2 %1274  ;;  %v2807_v39 = vadd.f32 %v2806_v41, %v2718_v27  ;;  %v7107_v21 = vld [vmem:[%s9614_s3 + $0x30] sm:$0xff]  ;;  %v2724_v3 = vpop.f32.mrf.mxu1 }
 0x2eb   : > { %v2984_v56 = vpop.f32.mrf.mxu0  ;;  %1342 = vst.msk [vmem:[#allocation3 + $0x238] sm:$0xf] %vm673_vm3, %v1275_v24  ;;  %5321 = vmatpush.bf16.msrb.mxu1 %v7107_v21  ;;  %v2634_v24 = vadd.f32 %v8191_v36, %v8185_v18  ;;  %v7104_v18 = vld [vmem:[%s9614_s3 + $0x18] sm:$0xff] }
 0x2ec   : > { %v2982_v44 = vadd.f32 %v2981_v23, %v2893_v20 }
 0x2ed   : > { %v2723_v11 = vadd.f32 %v2722_v46, %v2634_v24 }
 0x2ee   : > { %v3051_v2 = vmax.f32 %v2982_v44, 0.0  ;;  %2934 = vmatmul.bf16.gmra.mxu3 %v6196_v30  ;;  %6417 = vmatmul.msk.bf16.gmra.mxu0 %vm226_vm0, %v6200_v10 }
 0x2ef   : > { %v3212_v54 = vld [vmem:[#allocation2 + $0x61] sm:$0xff]  ;;  %5322 = vmatpush.bf16.msrb.mxu1 %v7106_v38 }
 0x2f0   : > { %3083 = vst.msk [vmem:[#allocation2 + $0x69] sm:$0xff] %vm226_vm0, %v3051_v2  ;;  %v3244_v45 = vpack.c.bf16 %v3212_v54, %v3212_v54  ;;  %v7105_v2 = vld [vmem:[%s9614_s3 + $0x20] sm:$0xff] }
 0x2f1   : > { %v2808_v29 = vpop.f32.mrf.mxu2  ;;  %v2895_v28 = vpop.f32.mrf.mxu3 }
 0x2f2   : > { %v2896_v23 = vadd.f32 %v2895_v28, %v2807_v39  ;;  %3316 = vrot.lane.b32.xlu2 %v3244_v45, %s7175_s24  ;;  %v1598_v52 = vpop.permute.xlu2 %1597  ;;  %v2809_v32 = vadd.f32 %v2808_v29, %v2720_v34  ;;  %v2727_v29 = vpop.f32.mrf.mxu1  ;;  %v7103_v34 = vld [vmem:[%s9614_s3 + $0x10] sm:$0xff] }
 0x2f3   : > { %v2986_v35 = vpop.f32.mrf.mxu0  ;;  %1664 = vst.msk [vmem:[#allocation3 + $0x250] sm:$0xf] %vm673_vm3, %v1598_v52  ;;  %5323 = vmatpush.bf16.msrb.mxu1 %v7105_v2 }
 0x2f4   : > { %v2985_v17 = vadd.f32 %v2984_v56, %v2896_v23  ;;  %v2725_v23 = vadd.f32 %v2724_v3, %v2636_v48 }
 0x2f6   : > { %v3052_v33 = vmax.f32 %v2985_v17, 0.0 }
 0x2f7   : > { %v3213_v22 = vld [vmem:[#allocation2 + $0x69] sm:$0xff]  ;;  %5324 = vmatpush.bf16.msrb.mxu1 %v7104_v18 }
 0x2f8   : > { %3084 = vst.msk [vmem:[#allocation2 + $0x79] sm:$0xff] %vm226_vm0, %v3052_v33  ;;  %v3245_v51 = vpack.c.bf16 %v3213_v22, %v3213_v22 }
 0x2f9   : > { %v2811_v41 = vpop.f32.mrf.mxu2  ;;  %v2897_v15 = vpop.f32.mrf.mxu3 }
 0x2fa   : > { %v2898_v59 = vadd.f32 %v2897_v15, %v2809_v32  ;;  %3318 = vrot.lane.b32.xlu1 %v3245_v51, %s7175_s24  ;;  %v2812_v10 = vadd.f32 %v2811_v41, %v2723_v11  ;;  %v6239_v32 = vld [vmem:[#allocation3 + $0x240] sm:$0xf]  ;;  %v6979_v51 = vld [vmem:[#allocation3 + $0x250] sm:$0xf0]  ;;  %v2639_v15 = vadd.f32 %v8191_v36, %v8206_v7 }
 0x2fb   : > { %v2989_v20 = vpop.f32.mrf.mxu0  ;;  %5325 = vmatpush.bf16.msrb.mxu1 %v7103_v34  ;;  %v6240_v53 = vor.u32 %v6979_v51, %v6239_v32  ;;  %v6423_v11 = vld [vmem:[#allocation3] sm:$0xf] }
 0x2fc   : > { %v2987_v56 = vadd.f32 %v2986_v35, %v2898_v59  ;;  %v2728_v3 = vadd.f32 %v2727_v29, %v2639_v15  ;;  %v2729_v59 = vpop.f32.mrf.mxu1 }
 0x2fe   : > { %v3053_v44 = vmax.f32 %v2987_v56, 0.0  ;;  %6418 = vmatmul.msk.bf16.gmra.mxu0 %vm226_vm0, %v6220_v9  ;;  %v7101_v9 = vld [vmem:[%s9614_s3] sm:$0xff] }
 0x2ff   : > { %v3214_v30 = vld [vmem:[#allocation2 + $0x79] sm:$0xff]  ;;  %5326 = vmatpush.bf16.msrb.mxu1 %v7102_v25 }
 0x300   : > { %3085 = vst.msk [vmem:[#allocation2 + $0x81] sm:$0xff] %vm226_vm0, %v3053_v44  ;;  %v3246_v27 = vpack.c.bf16 %v3214_v30, %v3214_v30  ;;  %v7023_v44 = vld [vmem:[#allocation3 + $0x10] sm:$0xf0] }
 0x301   : > { %v2813_v54 = vpop.f32.mrf.mxu2  ;;  %v2900_v39 = vpop.f32.mrf.mxu3 }
 0x302   : > { %v2901_v45 = vadd.f32 %v2900_v39, %v2812_v10  ;;  %3320 = vrot.lane.b32.xlu0 %v3246_v27, %s7175_s24  ;;  %v2814_v42 = vadd.f32 %v2813_v54, %v2725_v23  ;;  %v6424_v10 = vor.u32 %v7023_v44, %v6423_v11  ;;  %v2641_v54 = vadd.f32 %v8191_v36, %v8216_v6  ;;  %v3110_v23 = vld [vmem:[#allocation2 + $0x18] sm:$0xff] }
 0x303   : > { %v2991_v46 = vpop.f32.mrf.mxu0  ;;  %5327 = vmatpush.bf16.msrb.mxu1 %v7101_v9  ;;  %v2644_v6 = vadd.f32 %v8191_v36, %v8223_v0  ;;  %v2646_v0 = vadd.f32 %v8191_v36, %v8230_v12 }
 0x304   : > { %v2990_v28 = vadd.f32 %v2989_v20, %v2901_v45  ;;  %v2730_v45 = vadd.f32 %v2729_v59, %v2641_v54  ;;  %v2732_v48 = vpop.f32.mrf.mxu1 }
 0x306   : > { %v3054_v52 = vmax.f32 %v2990_v28, 0.0  ;;  %5328 = vmatmul.bf16.vlgmr.msrb.gmra.mxu1 %v6424_v10 }
 0x307   : > { %v3215_v35 = vld [vmem:[#allocation2 + $0x81] sm:$0xff] }
 0x308   : > { %3086 = vst.msk [vmem:[#allocation2 + $0x91] sm:$0xff] %vm226_vm0, %v3054_v52  ;;  %v3247_v17 = vpack.c.bf16 %v3215_v35, %v3215_v35 }
 0x309   : > { %v2816_v33 = vpop.f32.mrf.mxu2  ;;  %v2902_v22 = vpop.f32.mrf.mxu3 }
 0x30a   : > { %v2903_v21 = vadd.f32 %v2902_v22, %v2814_v42  ;;  %3322 = vrot.lane.b32.xlu2 %v3247_v17, %s7175_s24  ;;  %v2817_v24 = vadd.f32 %v2816_v33, %v2728_v3  ;;  %v8347_v42 = vpack.c.bf16 %v3110_v23, %v3110_v23  ;;  %v2733_v22 = vadd.f32 %v2732_v48, %v2644_v6  ;;  %v3748_v48 = vld [vmem:[#allocation2 + $0x19] sm:$0xff] }
 0x30b   : > { %v2994_v41 = vpop.f32.mrf.mxu0  ;;  %v3116_v23 = vld [vmem:[#allocation2 + $0x60] sm:$0xff] }
 0x30c   : > { %v2992_v50 = vadd.f32 %v2991_v46, %v2903_v21  ;;  %3174 = vst.msk [vmem:[#allocation3 + $0x28] sm:$0xf] %vm448_vm2, %v8347_v42  ;;  %v2734_v59 = vpop.f32.mrf.mxu1 }
 0x30e   : > { %v3055_v38 = vmax.f32 %v2992_v50, 0.0  ;;  %6419 = vmatmul.msk.bf16.gmra.mxu0 %vm226_vm0, %v6240_v53 }
 0x30f   : > { %v3216_v20 = vld [vmem:[#allocation2 + $0x91] sm:$0xff] }
 0x310   : > { %3087 = vst.msk [vmem:[#allocation2 + $0x99] sm:$0xff] %vm226_vm0, %v3055_v38  ;;  %v3248_v56 = vpack.c.bf16 %v3216_v20, %v3216_v20 }
 0x311   : > { %v2818_v7 = vpop.f32.mrf.mxu2  ;;  %v2905_v30 = vpop.f32.mrf.mxu3 }
 0x312   : > { %v2906_v27 = vadd.f32 %v2905_v30, %v2817_v24  ;;  %3324 = vrot.lane.b32.xlu1 %v3248_v56, %s7175_s24  ;;  %v2819_v29 = vadd.f32 %v2818_v7, %v2730_v45  ;;  %v2735_v24 = vadd.f32 %v2734_v59, %v2646_v0  ;;  %v3112_v7 = vld [vmem:[#allocation2 + $0x30] sm:$0xff] }
 0x313   : > { %v2996_v2 = vpop.f32.mrf.mxu0 }
 0x314   : > { %v2995_v39 = vadd.f32 %v2994_v41, %v2906_v27  ;;  %v3111_v41 = vld [vmem:[#allocation2 + $0x20] sm:$0xff]  ;;  %v8363_v27 = vpack.c.bf16 %v3112_v7, %v3112_v7 }
 0x315   : > { %v8355_v53 = vpack.c.bf16 %v3111_v41, %v3111_v41  ;;  %v3844_v41 = vld [vmem:[#allocation2 + $0x1a] sm:$0xff] }
 0x316   : > { %v3056_v18 = vmax.f32 %v2995_v39, 0.0  ;;  %3176 = vst.msk [vmem:[#allocation3 + $0x50] sm:$0xf] %vm448_vm2, %v8363_v27  ;;  %v8387_v59 = vpack.c.bf16 %v3844_v41, %v3844_v41 }
 0x317   : > { %v3217_v46 = vld [vmem:[#allocation2 + $0x99] sm:$0xff]  ;;  %3175 = vst.msk [vmem:[#allocation3 + $0x3c] sm:$0xf] %vm448_vm2, %v8355_v53 }
 0x318   : > { %3088 = vst.msk [vmem:[#allocation2 + $0xa9] sm:$0xff] %vm226_vm0, %v3056_v18  ;;  %v3249_v28 = vpack.c.bf16 %v3217_v46, %v3217_v46 }
 0x319   : > { %v2821_v52 = vpop.f32.mrf.mxu2  ;;  %v2907_v35 = vpop.f32.mrf.mxu3  ;;  %3494 = vst.msk [vmem:[#allocation3 + $0x2c] sm:$0xf] %vm448_vm2, %v8387_v59 }
 0x31a   : > { %v2908_v17 = vadd.f32 %v2907_v35, %v2819_v29  ;;  %3326 = vrot.lane.b32.xlu0 %v3249_v28, %s7175_s24  ;;  %v2822_v21 = vadd.f32 %v2821_v52, %v2733_v22  ;;  %v3113_v52 = vld [vmem:[#allocation2 + $0x38] sm:$0xff] }
 0x31b   : > { %v2999_v34 = vpop.f32.mrf.mxu0  ;;  %v8374_v6 = vpack.c.bf16 %v3113_v52, %v3113_v52 }
 0x31c   : > { %v2997_v33 = vadd.f32 %v2996_v2, %v2908_v17  ;;  %v2649_v2 = vadd.f32 %v8191_v36, %v8081_v47  ;;  %v3780_v47 = vpack.c.bf16 %v3748_v48, %v3748_v48  ;;  %v3115_v48 = vld [vmem:[#allocation2 + $0x50] sm:$0xff] }
 0x31d   : > { %3177 = vst.msk [vmem:[#allocation3 + $0x64] sm:$0xf] %vm448_vm2, %v8374_v6 }
 0x31e   : > { %v3057_v32 = vmax.f32 %v2997_v33, 0.0  ;;  %v2738_v45 = vadd.f32 %v8075_v40, %v2649_v2  ;;  %v2651_v33 = vadd.f32 %v8191_v36, %v8092_v5  ;;  %3812 = vst.msk [vmem:[#allocation3 + $0x8] sm:$0xf] %vm448_vm2, %v3780_v47  ;;  %v8406_v47 = vpack.c.bf16 %v3115_v48, %v3115_v48 }
 0x31f   : > { %v3218_v51 = vld [vmem:[#allocation2 + $0xa9] sm:$0xff] }
 0x320   : > { %3089 = vst.msk [vmem:[#allocation2 + $0xb1] sm:$0xff] %vm226_vm0, %v3057_v32  ;;  %v3250_v25 = vpack.c.bf16 %v3218_v51, %v3218_v51 }
 0x321   : > { %v2823_v15 = vpop.f32.mrf.mxu2  ;;  %v2910_v50 = vpop.f32.mrf.mxu3  ;;  %3179 = vst.msk [vmem:[#allocation3 + $0x8c] sm:$0xf] %vm448_vm2, %v8406_v47 }
 0x322   : > { %v2911_v3 = vadd.f32 %v2910_v50, %v2822_v21  ;;  %3328 = vrot.lane.b32.xlu2 %v3250_v25, %s7175_s24  ;;  %v2824_v11 = vadd.f32 %v2823_v15, %v2735_v24  ;;  %v2740_v21 = vadd.f32 %v8089_v31, %v2651_v33  ;;  %v2654_v31 = vadd.f32 %v8191_v36, %v8103_v63 }
 0x323   : > { %v3001_v38 = vpop.f32.mrf.mxu0 }
 0x324   : > { %v3000_v20 = vadd.f32 %v2999_v34, %v2911_v3  ;;  %v8372_v34 = vpack.c.bf16 %v3116_v23, %v3116_v23  ;;  %v3114_v3 = vld [vmem:[#allocation2 + $0x48] sm:$0xff]  ;;  %v2743_v63 = vadd.f32 %v8099_v26, %v2654_v31  ;;  %v2656_v26 = vadd.f32 %v8191_v36, %v8113_v62 }
 0x325   : > { %v8389_v24 = vpack.c.bf16 %v3114_v3, %v3114_v3 }
 0x326   : > { %v3058_v56 = vmax.f32 %v3000_v20, 0.0  ;;  %3180 = vst.msk [vmem:[#allocation3 + $0xa0] sm:$0xf] %vm448_vm2, %v8372_v34 }
 0x327   : > { %v3219_v9 = vld [vmem:[#allocation2 + $0xb1] sm:$0xff]  ;;  %3178 = vst.msk [vmem:[#allocation3 + $0x78] sm:$0xf] %vm448_vm2, %v8389_v24 }
 0x328   : > { %3090 = vst.msk [vmem:[#allocation2 + $0xc1] sm:$0xff] %vm226_vm0, %v3058_v56  ;;  %v3251_v44 = vpack.c.bf16 %v3219_v9, %v3219_v9  ;;  %v3431_v9 = vld [vmem:[#allocation2 + $0x22] sm:$0xff] }
 0x329   : > { %v2826_v30 = vpop.f32.mrf.mxu2  ;;  %v2912_v10 = vpop.f32.mrf.mxu3  ;;  %v3463_v7 = vpack.c.bf16 %v3431_v9, %v3431_v9 }
 0x32a   : > { %v2913_v54 = vadd.f32 %v2912_v10, %v2824_v11  ;;  %3330 = vrot.lane.b32.xlu1 %v3251_v44, %s7175_s24  ;;  %v2827_v29 = vadd.f32 %v2826_v30, %v2738_v45  ;;  %v4068_v45 = vld [vmem:[#allocation2 + $0x30] sm:$0xff] }
 0x32b   : > { %v3004_v12 = vpop.f32.mrf.mxu0  ;;  %3495 = vst.msk [vmem:[#allocation3 + $0x40] sm:$0xf] %vm448_vm2, %v3463_v7 }
 0x32c   : > { %v3002_v39 = vadd.f32 %v3001_v38, %v2913_v54  ;;  %v3749_v38 = vld [vmem:[#allocation2 + $0x21] sm:$0xff] }
 0x32d   : > { %v3781_v56 = vpack.c.bf16 %v3749_v38, %v3749_v38 }
 0x32e   : > { %v3059_v18 = vmax.f32 %v3002_v39, 0.0  ;;  %v4164_v39 = vld [vmem:[#allocation2 + $0x31] sm:$0xff] }
 0x32f   : > { %v3220_v46 = vld [vmem:[#allocation2 + $0xc1] sm:$0xff]  ;;  %3813 = vst.msk [vmem:[#allocation3 + $0x1c] sm:$0xf] %vm448_vm2, %v3781_v56  ;;  %v3846_v56 = vld [vmem:[#allocation2 + $0x32] sm:$0xff] }
 0x330   : > { %3091 = vst.msk [vmem:[#allocation2 + $0xc9] sm:$0xff] %vm226_vm0, %v3059_v18  ;;  %v3252_v28 = vpack.c.bf16 %v3220_v46, %v3220_v46 }
 0x331   : > { %v2828_v35 = vpop.f32.mrf.mxu2  ;;  %v2915_v17 = vpop.f32.mrf.mxu3 }
 0x332   : > { %v2916_v40 = vadd.f32 %v2915_v17, %v2827_v29  ;;  %3332 = vrot.lane.b32.xlu0 %v3252_v28, %s7175_s24  ;;  %v2829_v15 = vadd.f32 %v2828_v35, %v2740_v21  ;;  %v8404_v29 = vpack.c.bf16 %v4164_v39, %v4164_v39  ;;  %v4100_v28 = vpack.c.bf16 %v4068_v45, %v4068_v45  ;;  %v6213_v45 = vld [vmem:[#allocation3 + $0x224] sm:$0xf0] }
 0x333   : > { %v3006_v22 = vpop.f32.mrf.mxu0 }
 0x334   : > { %v3005_v32 = vadd.f32 %v3004_v12, %v2916_v40  ;;  %v3305_v51 = vpop.permute.xlu1 %3304  ;;  %3814 = vst.msk [vmem:[#allocation3 + $0x30] sm:$0xf] %vm448_vm2, %v8404_v29 }
 0x335   : > { %3398 = vst.msk [vmem:[#allocation3 + $0x28] sm:$0xf] %vm673_vm3, %v3305_v51 }
 0x336   : > { %v3060_v25 = vmax.f32 %v3005_v32, 0.0  ;;  %v6211_v32 = vld [vmem:[#allocation3 + $0x210] sm:$0xf]  ;;  %4132 = vst.msk [vmem:[#allocation3 + $0xc] sm:$0xf] %vm448_vm2, %v4100_v28 }
 0x337   : > { %v3221_v5 = vld [vmem:[#allocation2 + $0xc9] sm:$0xff] }
 0x338   : > { %3092 = vst.msk [vmem:[#allocation2 + $0xd9] sm:$0xff] %vm226_vm0, %v3060_v25  ;;  %v3253_v50 = vpack.c.bf16 %v3221_v5, %v3221_v5  ;;  %v2745_v25 = vadd.f32 %v8116_v4, %v2656_v26  ;;  %v8424_v4 = vpack.c.bf16 %v3846_v56, %v3846_v56 }
 0x339   : > { %v2831_v0 = vpop.f32.mrf.mxu2  ;;  %v2917_v20 = vpop.f32.mrf.mxu3 }
 0x33a   : > { %v2918_v11 = vadd.f32 %v2917_v20, %v2829_v15  ;;  %3334 = vrot.lane.b32.xlu2 %v3253_v50, %s7175_s24  ;;  %v2832_v18 = vadd.f32 %v2831_v0, %v2743_v63  ;;  %v4165_v50 = vld [vmem:[#allocation2 + $0x39] sm:$0xff]  ;;  %3496 = vst.msk [vmem:[#allocation3 + $0x54] sm:$0xf] %vm448_vm2, %v8424_v4 }
 0x33b   : > { %v3009_v44 = vpop.f32.mrf.mxu0  ;;  %v3119_v0 = vld [vmem:[#allocation2 + $0x80] sm:$0xff]  ;;  %v8420_v20 = vpack.c.bf16 %v4165_v50, %v4165_v50  ;;  %4452 = vst.msk [vmem:[#allocation3 + $0x10] sm:$0xf] %vm448_vm2, %v8424_v4 }
 0x33c   : > { %v3007_v30 = vadd.f32 %v3006_v22, %v2918_v11  ;;  %v1273_v10 = vpop.permute.xlu1 %1272  ;;  %v3307_v2 = vpop.permute.xlu0 %3306  ;;  %v6443_v36 = vld [vmem:[#allocation3 + $0x28] sm:$0xf]  ;;  %v8422_v11 = vpack.c.bf16 %v3119_v0, %v3119_v0 }
 0x33d   : > { %1341 = vst.msk [vmem:[#allocation3 + $0x224] sm:$0xf] %vm673_vm3, %v1273_v10  ;;  %v4069_v10 = vld [vmem:[#allocation2 + $0x38] sm:$0xff] }
 0x33e   : > { %v3061_v54 = vmax.f32 %v3007_v30, 0.0  ;;  %3399 = vst.msk [vmem:[#allocation3 + $0x3c] sm:$0xf] %vm673_vm3, %v3307_v2 }
 0x33f   : > { %v3222_v12 = vld [vmem:[#allocation2 + $0xd9] sm:$0xff]  ;;  %3815 = vst.msk [vmem:[#allocation3 + $0x44] sm:$0xf] %vm448_vm2, %v8420_v20 }
 0x340   : > { %3093 = vst.msk [vmem:[#allocation2 + $0xe1] sm:$0xff] %vm226_vm0, %v3061_v54  ;;  %v3254_v46 = vpack.c.bf16 %v3222_v12, %v3222_v12 }
 0x341   : > { %v2833_v23 = vpop.f32.mrf.mxu2  ;;  %v2920_v52 = vpop.f32.mrf.mxu3  ;;  %3183 = vst.msk [vmem:[#allocation3 + $0xdc] sm:$0xf] %vm448_vm2, %v8422_v11 }
 0x342   : > { %v2921_v35 = vadd.f32 %v2920_v52, %v2832_v18  ;;  %3336 = vrot.lane.b32.xlu1 %v3254_v46, %s7175_s24  ;;  %v2834_v3 = vadd.f32 %v2833_v23, %v2745_v25  ;;  %v4101_v18 = vpack.c.bf16 %v4069_v10, %v4069_v10  ;;  %v4166_v52 = vld [vmem:[#allocation2 + $0x49] sm:$0xff]  ;;  %v4167_v10 = vld [vmem:[#allocation2 + $0x51] sm:$0xff] }
 0x343   : > { %v3011_v17 = vpop.f32.mrf.mxu0 }
 0x344   : > { %v3010_v33 = vadd.f32 %v3009_v44, %v2921_v35  ;;  %v3309_v40 = vpop.permute.xlu1 %3308  ;;  %v1592_v22 = vpop.permute.xlu0 %1591  ;;  %v6973_v51 = vld [vmem:[#allocation3 + $0x220] sm:$0xf0]  ;;  %v8429_v44 = vld [vmem:[%s9613_s2] ss:$0 sm:$0xff]  ;;  %4133 = vst.msk [vmem:[#allocation3 + $0x20] sm:$0xf] %vm448_vm2, %v4101_v18 }
 0x345   : > { %3400 = vst.msk [vmem:[#allocation3 + $0x50] sm:$0xf] %vm673_vm3, %v3309_v40  ;;  %v6212_v62 = vor.u32 %v6973_v51, %v6211_v32  ;;  %v7028_v21 = vld [vmem:[#allocation3 + $0x38] sm:$0xf0]  ;;  %v2659_v7 = vadd.f32 %v8429_v44, %v8125_v57  ;;  %v4389_v40 = vld [vmem:[#allocation2 + $0x3a] sm:$0xff]  ;;  %v2661_v51 = vadd.f32 %v8429_v44, %v8135_v19 }
 0x346   : > { %v3062_v5 = vmax.f32 %v3010_v33, 0.0  ;;  %1661 = vst.msk [vmem:[#allocation3 + $0x214] sm:$0xf] %vm673_vm3, %v1592_v22  ;;  %v6444_v41 = vor.u32 %v7028_v21, %v6443_v36  ;;  %v8445_v33 = vpack.c.bf16 %v4166_v52, %v4166_v52  ;;  %v4070_v36 = vld [vmem:[#allocation2 + $0x48] sm:$0xff]  ;;  %v4421_v25 = vpack.c.bf16 %v4389_v40, %v4389_v40  ;;  %v6233_v52 = vld [vmem:[#allocation3 + $0x24c] sm:$0xf0] }
 0x347   : > { %2850 = vmatmul.bf16.gmra.mxu2 %v6212_v62  ;;  %v3223_v15 = vld [vmem:[#allocation2 + $0xe1] sm:$0xff]  ;;  %v2748_v46 = vadd.f32 %v8127_v55, %v2659_v7  ;;  %v4102_v0 = vpack.c.bf16 %v4070_v36, %v4070_v36  ;;  %v2750_v56 = vadd.f32 %v8141_v1, %v2661_v51  ;;  %v2664_v1 = vadd.f32 %v8429_v44, %v8145_v58 }
 0x348   : > { %3094 = vst.msk [vmem:[#allocation2 + $0xf1] sm:$0xff] %vm226_vm0, %v3062_v5  ;;  %5333 = vmatmul.bf16.gmra.mxu1 %v6444_v41  ;;  %v3255_v38 = vpack.c.bf16 %v3223_v15, %v3223_v15  ;;  %v6231_v15 = vld [vmem:[#allocation3 + $0x238] sm:$0xf] }
 0x349   : > { %v2836_v9 = vpop.f32.mrf.mxu2  ;;  %v2922_v31 = vpop.f32.mrf.mxu3  ;;  %3816 = vst.msk [vmem:[#allocation3 + $0x58] sm:$0xf] %vm448_vm2, %v8445_v33 }
 0x34a   : > { %v2923_v30 = vadd.f32 %v2922_v31, %v2834_v3  ;;  %3338 = vrot.lane.b32.xlu0 %v3255_v38, %s7175_s24  ;;  %v2837_v26 = vadd.f32 %v2836_v9, %v2748_v46  ;;  %4453 = vst.msk [vmem:[#allocation3 + $0x24] sm:$0xf] %vm448_vm2, %v4421_v25 }
 0x34b   : > { %v3014_v2 = vpop.f32.mrf.mxu0  ;;  %4134 = vst.msk [vmem:[#allocation3 + $0x34] sm:$0xf] %vm448_vm2, %v4102_v0  ;;  %v2666_v0 = vadd.f32 %v8429_v44, %v8156_v14 }
 0x34c   : > { %v3012_v63 = vadd.f32 %v3011_v17, %v2923_v30  ;;  %v1277_v54 = vpop.permute.xlu1 %1276  ;;  %v3317_v12 = vpop.permute.xlu2 %3316  ;;  %v3117_v17 = vld [vmem:[#allocation2 + $0x68] sm:$0xff]  ;;  %v6463_v38 = vld [vmem:[#allocation3 + $0x50] sm:$0xf]  ;;  %3497 = vst.msk [vmem:[#allocation3 + $0x68] sm:$0xf] %vm448_vm2, %v4421_v25 }
 0x34d   : > { %1343 = vst.msk [vmem:[#allocation3 + $0x24c] sm:$0xf] %vm673_vm3, %v1277_v54  ;;  %v3311_v57 = vpop.permute.xlu0 %3310  ;;  %v6971_v39 = vld [vmem:[#allocation3 + $0x214] sm:$0xf]  ;;  %v8447_v55 = vpack.c.bf16 %v3117_v17, %v3117_v17  ;;  %v3118_v54 = vld [vmem:[#allocation2 + $0x78] sm:$0xff] }
 0x34e   : > { %v3063_v48 = vmax.f32 %v3012_v63, 0.0  ;;  %3404 = vst.msk [vmem:[#allocation3 + $0xa0] sm:$0xf] %vm673_vm3, %v3317_v12  ;;  %v6216_v28 = vor.u32 %v6971_v39, %v6213_v45  ;;  %v8464_v12 = vpack.c.bf16 %v4167_v10, %v4167_v10  ;;  %v8468_v18 = vpack.c.bf16 %v3118_v54, %v3118_v54 }
 0x34f   : > { %3401 = vst.msk [vmem:[#allocation3 + $0x64] sm:$0xf] %vm673_vm3, %v3311_v57  ;;  %v3224_v23 = vld [vmem:[#allocation2 + $0xf1] sm:$0xff] }
 0x350   : > { %3095 = vst.msk [vmem:[#allocation2 + $0xf9] sm:$0xff] %vm226_vm0, %v3063_v48  ;;  %2939 = vmatmul.bf16.gmra.mxu3 %v6216_v28  ;;  %v3256_v35 = vpack.c.bf16 %v3224_v23, %v3224_v23  ;;  %v3848_v57 = vld [vmem:[#allocation2 + $0x4a] sm:$0xff] }
 0x351   : > { %v2838_v22 = vpop.f32.mrf.mxu2  ;;  %v2925_v32 = vpop.f32.mrf.mxu3  ;;  %3181 = vst.msk [vmem:[#allocation3 + $0xb4] sm:$0xf] %vm448_vm2, %v8447_v55  ;;  %v8470_v46 = vpack.c.bf16 %v3848_v57, %v3848_v57  ;;  %v4071_v48 = vld [vmem:[#allocation2 + $0x50] sm:$0xff] }
 0x352   : > { %v2926_v62 = vadd.f32 %v2925_v32, %v2837_v26  ;;  %3340 = vrot.lane.b32.xlu2 %v3256_v35, %s7175_s24  ;;  %3817 = vst.msk [vmem:[#allocation3 + $0x6c] sm:$0xf] %vm448_vm2, %v8464_v12  ;;  %v4103_v23 = vpack.c.bf16 %v4071_v48, %v4071_v48  ;;  %v2753_v26 = vadd.f32 %v8151_v16, %v2664_v1 }
 0x353   : > { %v3016_v21 = vpop.f32.mrf.mxu0  ;;  %3182 = vst.msk [vmem:[#allocation3 + $0xc8] sm:$0xf] %vm448_vm2, %v8468_v18 }
 0x354   : > { %v3015_v5 = vadd.f32 %v3014_v2, %v2926_v62  ;;  %v3313_v41 = vpop.permute.xlu1 %3312  ;;  %v6978_v50 = vld [vmem:[#allocation3 + $0x248] sm:$0xf0]  ;;  %v2839_v2 = vadd.f32 %v2838_v22, %v2750_v56  ;;  %3498 = vst.msk [vmem:[#allocation3 + $0x7c] sm:$0xf] %vm448_vm2, %v8470_v46  ;;  %v4391_v22 = vld [vmem:[#allocation2 + $0x52] sm:$0xff] }
 0x355   : > { %3402 = vst.msk [vmem:[#allocation3 + $0x78] sm:$0xf] %vm673_vm3, %v3313_v41  ;;  %v1596_v19 = vpop.permute.xlu0 %1595  ;;  %v6232_v3 = vor.u32 %v6978_v50, %v6231_v15  ;;  %v3122_v41 = vld [vmem:[#allocation2 + $0xa8] sm:$0xff]  ;;  %v4423_v50 = vpack.c.bf16 %v4391_v22, %v4391_v22 }
 0x356   : > { %v3064_v9 = vmax.f32 %v3015_v5, 0.0  ;;  %1663 = vst.msk [vmem:[#allocation3 + $0x23c] sm:$0xf] %vm673_vm3, %v1596_v19  ;;  %v7033_v31 = vld [vmem:[#allocation3 + $0x60] sm:$0xf0]  ;;  %v4168_v5 = vld [vmem:[#allocation2 + $0x61] sm:$0xff] }
 0x357   : > { %2855 = vmatmul.bf16.gmra.mxu2 %v6232_v3  ;;  %v6464_v7 = vor.u32 %v7033_v31, %v6463_v38  ;;  %v3225_v30 = vld [vmem:[#allocation2 + $0xf9] sm:$0xff]  ;;  %4135 = vst.msk [vmem:[#allocation3 + $0x48] sm:$0xf] %vm448_vm2, %v4103_v23  ;;  %v8485_v15 = vpack.c.bf16 %v4168_v5, %v4168_v5  ;;  %v8487_v38 = vpack.c.bf16 %v3122_v41, %v3122_v41  ;;  %v3850_v23 = vld [vmem:[#allocation2 + $0x62] sm:$0xff] }
 0x358   : > { %3096 = vst.msk [vmem:[#allocation2 + $0x109] sm:$0xff] %vm226_vm0, %v3064_v9  ;;  %v3257_v63 = vpack.c.bf16 %v3225_v30, %v3225_v30  ;;  %v4170_v41 = vld [vmem:[#allocation2 + $0x79] sm:$0xff] }
 0x359   : > { %5338 = vmatmul.bf16.gmra.mxu1 %v6464_v7  ;;  %v2841_v39 = vpop.f32.mrf.mxu2  ;;  %v2927_v45 = vpop.f32.mrf.mxu3  ;;  %4454 = vst.msk [vmem:[#allocation3 + $0x38] sm:$0xf] %vm448_vm2, %v8470_v46  ;;  %v3120_v7 = vld [vmem:[#allocation2 + $0x90] sm:$0xff] }
 0x35a   : > { %v2928_v28 = vadd.f32 %v2927_v45, %v2839_v2  ;;  %3342 = vrot.lane.b32.xlu1 %v3257_v63, %s7175_s24  ;;  %v2842_v62 = vadd.f32 %v2841_v39, %v2753_v26  ;;  %3818 = vst.msk [vmem:[#allocation3 + $0x80] sm:$0xf] %vm448_vm2, %v8485_v15  ;;  %v8500_v14 = vpack.c.bf16 %v3120_v7, %v3120_v7  ;;  %v4169_v39 = vld [vmem:[#allocation2 + $0x69] sm:$0xff] }
 0x35b   : > { %v3019_v35 = vpop.f32.mrf.mxu0  ;;  %3186 = vst.msk [vmem:[#allocation3 + $0x118] sm:$0xf] %vm448_vm2, %v8487_v38  ;;  %v2755_v2 = vadd.f32 %v8163_v49, %v2666_v0  ;;  %v8529_v0 = vpack.c.bf16 %v4170_v41, %v4170_v41  ;;  %v6503_v7 = vld [vmem:[#allocation3 + $0xa0] sm:$0xf]  ;;  %v7132_v41 = vld [vmem:[%s9614_s3 + $0xf8] sm:$0xff] }
 0x35c   : > { %v3017_v58 = vadd.f32 %v3016_v21, %v2928_v28  ;;  %v4072_v21 = vld [vmem:[#allocation2 + $0x60] sm:$0xff]  ;;  %4455 = vst.msk [vmem:[#allocation3 + $0x4c] sm:$0xf] %vm448_vm2, %v4423_v50  ;;  %v6483_v30 = vld [vmem:[#allocation3 + $0x78] sm:$0xf]  ;;  %v8507_v28 = vpack.c.bf16 %v4169_v39, %v4169_v39  ;;  %5587 = vmatpush.bf16.msra.mxu0 %v7132_v41  ;;  %v7115_v41 = vld [vmem:[%s9614_s3 + $0x70] sm:$0xff] }
 0x35d   : > { %v3315_v17 = vpop.permute.xlu0 %3314  ;;  %v6976_v40 = vld [vmem:[#allocation3 + $0x23c] sm:$0xf]  ;;  %v4104_v56 = vpack.c.bf16 %v4072_v21, %v4072_v21  ;;  %3184 = vst.msk [vmem:[#allocation3 + $0xf0] sm:$0xf] %vm448_vm2, %v8500_v14 }
 0x35e   : > { %v3065_v32 = vmax.f32 %v3017_v58, 0.0  ;;  %3403 = vst.msk [vmem:[#allocation3 + $0x8c] sm:$0xf] %vm673_vm3, %v3315_v17  ;;  %v6236_v51 = vor.u32 %v6976_v40, %v6233_v52  ;;  %v4073_v58 = vld [vmem:[#allocation2 + $0x68] sm:$0xff]  ;;  %v8509_v52 = vpack.c.bf16 %v3850_v23, %v3850_v23 }
 0x35f   : > { %v3226_v36 = vld [vmem:[#allocation2 + $0x109] sm:$0xff]  ;;  %4136 = vst.msk [vmem:[#allocation3 + $0x5c] sm:$0xf] %vm448_vm2, %v4104_v56  ;;  %v4105_v26 = vpack.c.bf16 %v4073_v58, %v4073_v58  ;;  %v4171_v23 = vld [vmem:[#allocation2 + $0x81] sm:$0xff] }
 0x360   : > { %3097 = vst.msk [vmem:[#allocation2 + $0x111] sm:$0xff] %vm226_vm0, %v3065_v32  ;;  %2944 = vmatmul.bf16.gmra.mxu3 %v6236_v51  ;;  %v3258_v16 = vpack.c.bf16 %v3226_v36, %v3226_v36  ;;  %v4393_v40 = vld [vmem:[#allocation2 + $0x6a] sm:$0xff]  ;;  %v3121_v32 = vld [vmem:[#allocation2 + $0x98] sm:$0xff] }
 0x361   : > { %v2843_v19 = vpop.f32.mrf.mxu2  ;;  %v2930_v3 = vpop.f32.mrf.mxu3  ;;  %3499 = vst.msk [vmem:[#allocation3 + $0x90] sm:$0xf] %vm448_vm2, %v4423_v50  ;;  %v8519_v36 = vpack.c.bf16 %v3121_v32, %v3121_v32  ;;  %v4074_v50 = vld [vmem:[#allocation2 + $0x78] sm:$0xff] }
 0x362   : > { %v2931_v25 = vadd.f32 %v2930_v3, %v2842_v62  ;;  %3344 = vrot.lane.b32.xlu0 %v3258_v16, %s7175_s24  ;;  %v2844_v45 = vadd.f32 %v2843_v19, %v2755_v2  ;;  %3819 = vst.msk [vmem:[#allocation3 + $0x94] sm:$0xf] %vm448_vm2, %v8507_v28 }
 0x363   : > { %v3021_v57 = vpop.f32.mrf.mxu0  ;;  %3500 = vst.msk [vmem:[#allocation3 + $0xa4] sm:$0xf] %vm448_vm2, %v8509_v52 }
 0x364   : > { %v3020_v9 = vadd.f32 %v3019_v35, %v2931_v25  ;;  %v3323_v31 = vpop.permute.xlu2 %3322  ;;  %v2669_v35 = vadd.f32 %v8429_v44, %v8167_v61  ;;  %4137 = vst.msk [vmem:[#allocation3 + $0x70] sm:$0xf] %vm448_vm2, %v4105_v26  ;;  %v4425_v61 = vpack.c.bf16 %v4393_v40, %v4393_v40  ;;  %v4106_v25 = vpack.c.bf16 %v4074_v50, %v4074_v50  ;;  %v7136_v50 = vld [vmem:[%s9614_s3 + $0x118] sm:$0xff] }
 0x365   : > { %3407 = vst.msk [vmem:[#allocation3 + $0xdc] sm:$0xf] %vm673_vm3, %v3323_v31  ;;  %v7038_v10 = vld [vmem:[#allocation3 + $0x88] sm:$0xf0]  ;;  %v8549_v26 = vpack.c.bf16 %v4171_v23, %v4171_v23  ;;  %5680 = vmatpush.bf16.msra.mxu1 %v7136_v50  ;;  %v1474_v50 = vld [vmem:[#allocation2 + $0x1a1] sm:$0xff] }
 0x366   : > { %v3066_v63 = vmax.f32 %v3020_v9, 0.0  ;;  %v6484_v54 = vor.u32 %v7038_v10, %v6483_v30  ;;  %v2758_v5 = vadd.f32 %v8173_v13, %v2669_v35  ;;  %3185 = vst.msk [vmem:[#allocation3 + $0x104] sm:$0xf] %vm448_vm2, %v8519_v36  ;;  %v2671_v13 = vadd.f32 %v8429_v44, %v8176_v43  ;;  %v7116_v30 = vld [vmem:[%s9614_s3 + $0x78] sm:$0xff] }
 0x367   : > { %v3227_v1 = vld [vmem:[#allocation2 + $0x111] sm:$0xff]  ;;  %4456 = vst.msk [vmem:[#allocation3 + $0x60] sm:$0xf] %vm448_vm2, %v8509_v52  ;;  %5409 = vmatpush.bf16.msra.mxu2 %v7116_v30  ;;  %v3852_v35 = vld [vmem:[#allocation2 + $0x7a] sm:$0xff] }
 0x368   : > { %3098 = vst.msk [vmem:[#allocation2 + $0x121] sm:$0xff] %vm226_vm0, %v3066_v63  ;;  %v3259_v48 = vpack.c.bf16 %v3227_v1, %v3227_v1  ;;  %v7124_v1 = vld [vmem:[%s9614_s3 + $0xb8] sm:$0xff]  ;;  %v2760_v39 = vadd.f32 %v8183_v37, %v2671_v13  ;;  %v3124_v30 = vld [vmem:[#allocation2 + $0xc0] sm:$0xff] }
 0x369   : > { %5343 = vmatmul.bf16.gmra.mxu1 %v6484_v54  ;;  %v2932_v49 = vpop.f32.mrf.mxu3  ;;  %v2846_v22 = vpop.f32.mrf.mxu2  ;;  %4457 = vst.msk [vmem:[#allocation3 + $0x74] sm:$0xf] %vm448_vm2, %v4425_v61  ;;  %v3125_v54 = vld [vmem:[#allocation2 + $0xc8] sm:$0xff]  ;;  %5498 = vmatpush.bf16.msra.mxu3 %v7124_v1 }
 0x36a   : > { %v2933_v17 = vadd.f32 %v2932_v49, %v2844_v45  ;;  %3346 = vrot.lane.b32.xlu2 %v3259_v48, %s7175_s24  ;;  %v2847_v19 = vadd.f32 %v2846_v22, %v2758_v5  ;;  %3820 = vst.msk [vmem:[#allocation3 + $0xa8] sm:$0xf] %vm448_vm2, %v8529_v0  ;;  %v8551_v22 = vpack.c.bf16 %v3852_v35, %v3852_v35 }
 0x36b   : > { %v3024_v56 = vpop.f32.mrf.mxu0  ;;  %4138 = vst.msk [vmem:[#allocation3 + $0x84] sm:$0xf] %vm448_vm2, %v4106_v25  ;;  %5410 = vmatpush.bf16.msra.mxu2 %v7115_v41  ;;  %v3131_v41 = vld [vmem:[#allocation2 + $0x110] sm:$0xff] }
 0x36c   : > { %v3022_v51 = vadd.f32 %v3021_v57, %v2933_v17  ;;  %v3319_v62 = vpop.permute.xlu1 %3318  ;;  %3501 = vst.msk [vmem:[#allocation3 + $0xb8] sm:$0xf] %vm448_vm2, %v4425_v61  ;;  %v3157_v57 = vpack.c.bf16 %v3125_v54, %v3125_v54  ;;  %v4075_v17 = vld [vmem:[#allocation2 + $0x80] sm:$0xff]  ;;  %v7048_v54 = vld [vmem:[#allocation3 + $0xd8] sm:$0xf0] }
 0x36d   : > { %3405 = vst.msk [vmem:[#allocation3 + $0xb4] sm:$0xf] %vm673_vm3, %v3319_v62  ;;  %v4107_v32 = vpack.c.bf16 %v4075_v17, %v4075_v17  ;;  %v3128_v17 = vld [vmem:[#allocation2 + $0xf0] sm:$0xff] }
 0x36e   : > { %v3067_v21 = vmax.f32 %v3022_v51, 0.0  ;;  %3189 = vst.msk [vmem:[#allocation3 + $0x154] sm:$0xf] %vm448_vm2, %v3157_v57  ;;  %v4395_v51 = vld [vmem:[#allocation2 + $0x82] sm:$0xff]  ;;  %v4173_v57 = vld [vmem:[#allocation2 + $0x99] sm:$0xff] }
 0x36f   : > { %v3228_v16 = vld [vmem:[#allocation2 + $0x121] sm:$0xff]  ;;  %3821 = vst.msk [vmem:[#allocation3 + $0xbc] sm:$0xf] %vm448_vm2, %v8549_v26 }
 0x370   : > { %3099 = vst.msk [vmem:[#allocation2 + $0x129] sm:$0xff] %vm226_vm0, %v3067_v21  ;;  %v3260_v3 = vpack.c.bf16 %v3228_v16, %v3228_v16  ;;  %v3123_v21 = vld [vmem:[#allocation2 + $0xb0] sm:$0xff] }
 0x371   : > { %v2935_v9 = vpop.f32.mrf.mxu3  ;;  %v2848_v43 = vpop.f32.mrf.mxu2  ;;  %3502 = vst.msk [vmem:[#allocation3 + $0xcc] sm:$0xf] %vm448_vm2, %v8551_v22  ;;  %v8560_v16 = vpack.c.bf16 %v3123_v21, %v3123_v21 }
 0x372   : > { %v2936_v31 = vadd.f32 %v2935_v9, %v2847_v19  ;;  %3348 = vrot.lane.b32.xlu1 %v3260_v3, %s7175_s24  ;;  %v2849_v58 = vadd.f32 %v2848_v43, %v2760_v39  ;;  %4139 = vst.msk [vmem:[#allocation3 + $0x98] sm:$0xf] %vm448_vm2, %v4107_v32  ;;  %v4427_v19 = vpack.c.bf16 %v4395_v51, %v4395_v51  ;;  %v4076_v9 = vld [vmem:[#allocation2 + $0x90] sm:$0xff]  ;;  %v1152_v32 = vld [vmem:[#allocation2 + $0x182] sm:$0xff] }
 0x373   : > { %v3026_v62 = vpop.f32.mrf.mxu0  ;;  %4458 = vst.msk [vmem:[#allocation3 + $0x88] sm:$0xf] %vm448_vm2, %v8551_v22  ;;  %v8586_v39 = vpack.c.bf16 %v4173_v57, %v4173_v57  ;;  %v4174_v51 = vld [vmem:[#allocation2 + $0xa9] sm:$0xff] }
 0x374   : > { %v3025_v10 = vadd.f32 %v3024_v56, %v2936_v31  ;;  %v3321_v2 = vpop.permute.xlu0 %3320  ;;  %v7043_v63 = vld [vmem:[#allocation3 + $0xb0] sm:$0xf0]  ;;  %3187 = vst.msk [vmem:[#allocation3 + $0x12c] sm:$0xf] %vm448_vm2, %v8560_v16  ;;  %v4172_v56 = vld [vmem:[#allocation2 + $0x91] sm:$0xff] }
 0x375   : > { %3406 = vst.msk [vmem:[#allocation3 + $0xc8] sm:$0xf] %vm673_vm3, %v3321_v2  ;;  %v6504_v44 = vor.u32 %v7043_v63, %v6503_v7  ;;  %v8573_v31 = vpack.c.bf16 %v4172_v56, %v4172_v56  ;;  %v4108_v7 = vpack.c.bf16 %v4076_v9, %v4076_v9  ;;  %v3126_v56 = vld [vmem:[#allocation2 + $0xd8] sm:$0xff] }
 0x376   : > { %v3068_v45 = vmax.f32 %v3025_v10, 0.0  ;;  %4459 = vst.msk [vmem:[#allocation3 + $0x9c] sm:$0xf] %vm448_vm2, %v4427_v19  ;;  %v8579_v10 = vpack.c.bf16 %v3124_v30, %v3124_v30  ;;  %v1506_v30 = vpack.c.bf16 %v1474_v50, %v1474_v50 }
 0x377   : > { %v3229_v48 = vld [vmem:[#allocation2 + $0x129] sm:$0xff]  ;;  %3822 = vst.msk [vmem:[#allocation3 + $0xd0] sm:$0xf] %vm448_vm2, %v8573_v31 }
 0x378   : > { %3100 = vst.msk [vmem:[#allocation2 + $0x139] sm:$0xff] %vm226_vm0, %v3068_v45  ;;  %v3261_v49 = vpack.c.bf16 %v3229_v48, %v3229_v48  ;;  %v3854_v45 = vld [vmem:[#allocation2 + $0x92] sm:$0xff] }
 0x379   : > { %5348 = vmatmul.bf16.gmra.mxu1 %v6504_v44  ;;  %v2937_v40 = vpop.f32.mrf.mxu3  ;;  %4140 = vst.msk [vmem:[#allocation3 + $0xac] sm:$0xf] %vm448_vm2, %v4108_v7  ;;  %v4077_v48 = vld [vmem:[#allocation2 + $0x98] sm:$0xff]  ;;  %v8588_v23 = vpack.c.bf16 %v3854_v45, %v3854_v45  ;;  %v7123_v7 = vld [vmem:[%s9614_s3 + $0xb0] sm:$0xff]  ;;  %v3127_v45 = vld [vmem:[#allocation2 + $0xe0] sm:$0xff] }
 0x37a   : > { %v2938_v37 = vadd.f32 %v2937_v40, %v2849_v58  ;;  %3350 = vrot.lane.b32.xlu0 %v3261_v49, %s7175_s24  ;;  %3503 = vst.msk [vmem:[#allocation3 + $0xe0] sm:$0xf] %vm448_vm2, %v4427_v19  ;;  %v4109_v58 = vpack.c.bf16 %v4077_v48, %v4077_v48  ;;  %v4397_v49 = vld [vmem:[#allocation2 + $0x9a] sm:$0xff]  ;;  %5499 = vmatpush.bf16.msra.mxu3 %v7123_v7 }
 0x37b   : > { %3188 = vst.msk [vmem:[#allocation3 + $0x140] sm:$0xf] %vm448_vm2, %v8579_v10  ;;  %v4429_v40 = vpack.c.bf16 %v4397_v49, %v4397_v49  ;;  %v3159_v48 = vpack.c.bf16 %v3127_v45, %v3127_v45 }
 0x37c   : > { %v3027_v61 = vadd.f32 %v3026_v62, %v2938_v37  ;;  %v3329_v5 = vpop.permute.xlu2 %3328  ;;  %v6523_v63 = vld [vmem:[#allocation3 + $0xc8] sm:$0xf]  ;;  %3823 = vst.msk [vmem:[#allocation3 + $0xe4] sm:$0xf] %vm448_vm2, %v8586_v39  ;;  %v8597_v37 = vpack.c.bf16 %v3128_v17, %v3128_v17  ;;  %v4078_v62 = vld [vmem:[#allocation2 + $0xa8] sm:$0xff] }
 0x37d   : > { %3410 = vst.msk [vmem:[#allocation3 + $0x118] sm:$0xf] %vm673_vm3, %v3329_v5  ;;  %v6524_v43 = vor.u32 %v7048_v54, %v6523_v63  ;;  %v8603_v5 = vpack.c.bf16 %v4174_v51, %v4174_v51  ;;  %v4110_v21 = vpack.c.bf16 %v4078_v62, %v4078_v62  ;;  %v3856_v63 = vld [vmem:[#allocation2 + $0xaa] sm:$0xff]  ;;  %v4176_v17 = vld [vmem:[#allocation2 + $0xc1] sm:$0xff] }
 0x37e   : > { %v3069_v3 = vmax.f32 %v3027_v61, 0.0  ;;  %3504 = vst.msk [vmem:[#allocation3 + $0xf4] sm:$0xf] %vm448_vm2, %v8588_v23  ;;  %v1184_v61 = vpack.c.bf16 %v1152_v32, %v1152_v32  ;;  %v8639_v32 = vpack.c.bf16 %v4176_v17, %v4176_v17 }
 0x37f   : > { %v3230_v25 = vld [vmem:[#allocation2 + $0x139] sm:$0xff]  ;;  %4141 = vst.msk [vmem:[#allocation3 + $0xc0] sm:$0xf] %vm448_vm2, %v4109_v58 }
 0x380   : > { %3101 = vst.msk [vmem:[#allocation2 + $0x141] sm:$0xff] %vm226_vm0, %v3069_v3  ;;  %v3262_v13 = vpack.c.bf16 %v3230_v25, %v3230_v25 }
 0x381   : > { %4460 = vst.msk [vmem:[#allocation3 + $0xb0] sm:$0xf] %vm448_vm2, %v8588_v23 }
 0x382   : > { %3352 = vrot.lane.b32.xlu2 %v3262_v13, %s7175_s24  ;;  %3192 = vst.msk [vmem:[#allocation3 + $0x190] sm:$0xf] %vm448_vm2, %v8597_v37  ;;  %v8615_v13 = vpack.c.bf16 %v3126_v56, %v3126_v56  ;;  %v3539_v56 = vld [vmem:[#allocation2 + $0xc8] sm:$0xff] }
 0x383   : > { %4461 = vst.msk [vmem:[#allocation3 + $0xc4] sm:$0xf] %vm448_vm2, %v4429_v40  ;;  %v8652_v7 = vpack.c.bf16 %v3539_v56, %v3539_v56  ;;  %v4403_v56 = vld [vmem:[#allocation2 + $0xe2] sm:$0xff] }
 0x384   : > { %v3325_v2 = vpop.permute.xlu1 %3324  ;;  %3505 = vst.msk [vmem:[#allocation3 + $0x108] sm:$0xf] %vm448_vm2, %v4429_v40  ;;  %v4080_v40 = vld [vmem:[#allocation2 + $0xc0] sm:$0xff] }
 0x385   : > { %3408 = vst.msk [vmem:[#allocation3 + $0xf0] sm:$0xf] %vm673_vm3, %v3325_v2  ;;  %v4175_v2 = vld [vmem:[#allocation2 + $0xb1] sm:$0xff]  ;;  %v4112_v51 = vpack.c.bf16 %v4080_v40, %v4080_v40 }
 0x386   : > { %3824 = vst.msk [vmem:[#allocation3 + $0xf8] sm:$0xf] %vm448_vm2, %v8603_v5  ;;  %v8622_v54 = vpack.c.bf16 %v4175_v2, %v4175_v2 }
 0x387   : > { %v3231_v44 = vld [vmem:[#allocation2 + $0x141] sm:$0xff]  ;;  %4142 = vst.msk [vmem:[#allocation3 + $0xd4] sm:$0xf] %vm448_vm2, %v4110_v21 }
 0x388   : > { %v3263_v1 = vpack.c.bf16 %v3231_v44, %v3231_v44  ;;  %3190 = vst.msk [vmem:[#allocation3 + $0x168] sm:$0xf] %vm448_vm2, %v8615_v13  ;;  %v4079_v44 = vld [vmem:[#allocation2 + $0xb0] sm:$0xff] }
 0x389   : > { %5353 = vmatmul.bf16.gmra.mxu1 %v6524_v43  ;;  %v8624_v43 = vpack.c.bf16 %v3856_v63, %v3856_v63  ;;  %v4111_v57 = vpack.c.bf16 %v4079_v44, %v4079_v44  ;;  %3825 = vst.msk [vmem:[#allocation3 + $0x10c] sm:$0xf] %vm448_vm2, %v8622_v54  ;;  %v4401_v63 = vld [vmem:[#allocation2 + $0xca] sm:$0xff] }
 0x38a   : > { %3354 = vrot.lane.b32.xlu1 %v3263_v1, %s7175_s24  ;;  %v4399_v1 = vld [vmem:[#allocation2 + $0xb2] sm:$0xff]  ;;  %3191 = vst.msk [vmem:[#allocation3 + $0x17c] sm:$0xf] %vm448_vm2, %v3159_v48 }
 0x38b   : > { %3506 = vst.msk [vmem:[#allocation3 + $0x11c] sm:$0xf] %vm448_vm2, %v8624_v43  ;;  %v4431_v49 = vpack.c.bf16 %v4399_v1, %v4399_v1  ;;  %v4433_v1 = vpack.c.bf16 %v4401_v63, %v4401_v63  ;;  %v4178_v48 = vld [vmem:[#allocation2 + $0xd9] sm:$0xff]  ;;  %v7122_v63 = vld [vmem:[%s9614_s3 + $0xa8] sm:$0xff] }
 0x38c   : > { %v3327_v35 = vpop.permute.xlu0 %3326  ;;  %v6543_v3 = vld [vmem:[#allocation3 + $0xf0] sm:$0xf]  ;;  %4143 = vst.msk [vmem:[#allocation3 + $0xe8] sm:$0xf] %vm448_vm2, %v4111_v57  ;;  %v3129_v57 = vld [vmem:[#allocation2 + $0xf8] sm:$0xff]  ;;  %5500 = vmatpush.bf16.msra.mxu3 %v7122_v63 }
 0x38d   : > { %3409 = vst.msk [vmem:[#allocation3 + $0x104] sm:$0xf] %vm673_vm3, %v3327_v35  ;;  %v7131_v35 = vld [vmem:[%s9614_s3 + $0xf0] sm:$0xff]  ;;  %v3161_v45 = vpack.c.bf16 %v3129_v57, %v3129_v57 }
 0x38e   : > { %5588 = vmatpush.bf16.msra.mxu0 %v7131_v35  ;;  %4462 = vst.msk [vmem:[#allocation3 + $0xd8] sm:$0xf] %vm448_vm2, %v8624_v43 }
 0x38f   : > { %4463 = vst.msk [vmem:[#allocation3 + $0xec] sm:$0xf] %vm448_vm2, %v4431_v49 }
 0x390   : > { %3507 = vst.msk [vmem:[#allocation3 + $0x130] sm:$0xf] %vm448_vm2, %v4431_v49  ;;  %v8667_v49 = vpack.c.bf16 %v4178_v48, %v4178_v48  ;;  %v4084_v48 = vld [vmem:[#allocation2 + $0xf0] sm:$0xff] }
 0x391   : > { %3826 = vst.msk [vmem:[#allocation3 + $0x120] sm:$0xf] %vm448_vm2, %v8639_v32 }
 0x392   : > { %1278 = vrot.lane.b32.xlu1 %v1184_v61, %s7175_s24  ;;  %4144 = vst.msk [vmem:[#allocation3 + $0xfc] sm:$0xf] %vm448_vm2, %v4112_v51  ;;  %v6563_v61 = vld [vmem:[#allocation3 + $0x118] sm:$0xf]  ;;  %v3847_v51 = vld [vmem:[#allocation2 + $0x3a] sm:$0xff] }
 0x393   : > { %4145 = vst.msk [vmem:[#allocation3 + $0x110] sm:$0xf] %vm448_vm2, %v8652_v7 }
 0x394   : > { %v3335_v19 = vpop.permute.xlu2 %3334  ;;  %v7053_v25 = vld [vmem:[#allocation3 + $0x100] sm:$0xf0]  ;;  %3193 = vst.msk [vmem:[#allocation3 + $0x1a4] sm:$0xf] %vm448_vm2, %v3161_v45 }
 0x395   : > { %3413 = vst.msk [vmem:[#allocation3 + $0x154] sm:$0xf] %vm673_vm3, %v3335_v19  ;;  %v6544_v9 = vor.u32 %v7053_v25, %v6543_v3  ;;  %v3845_v19 = vld [vmem:[#allocation2 + $0x22] sm:$0xff]  ;;  %v3163_v3 = vpack.c.bf16 %v3131_v41, %v3131_v41  ;;  %v4180_v45 = vld [vmem:[#allocation2 + $0xf1] sm:$0xff] }
 0x396   : > { %v4177_v25 = vld [vmem:[#allocation2 + $0xc9] sm:$0xff]  ;;  %4465 = vst.msk [vmem:[#allocation3 + $0x114] sm:$0xf] %vm448_vm2, %v4433_v1  ;;  %v3541_v41 = vld [vmem:[#allocation2 + $0xe0] sm:$0xff] }
 0x397   : > { %3195 = vst.msk [vmem:[#allocation3 + $0x1cc] sm:$0xf] %vm448_vm2, %v3163_v3  ;;  %v8679_v3 = vpack.c.bf16 %v3541_v41, %v3541_v41 }
 0x398   : > { %3509 = vst.msk [vmem:[#allocation3 + $0x158] sm:$0xf] %vm448_vm2, %v4433_v1  ;;  %v4435_v1 = vpack.c.bf16 %v4403_v56, %v4403_v56  ;;  %v3543_v56 = vld [vmem:[#allocation2 + $0xf8] sm:$0xff] }
 0x399   : > { %5358 = vmatmul.bf16.gmra.mxu1 %v6544_v9  ;;  %v3877_v9 = vpack.c.bf16 %v3845_v19, %v3845_v19  ;;  %3828 = vst.msk [vmem:[#allocation3 + $0x148] sm:$0xf] %vm448_vm2, %v8667_v49  ;;  %v8725_v63 = vpack.c.bf16 %v3543_v56, %v3543_v56 }
 0x39a   : > { %1601 = vrot.lane.b32.xlu1 %v1506_v30, %s7175_s24  ;;  %v3858_v30 = vld [vmem:[#allocation2 + $0xc2] sm:$0xff]  ;;  %4147 = vst.msk [vmem:[#allocation3 + $0x138] sm:$0xf] %vm448_vm2, %v8679_v3 }
 0x39b   : > { %v8654_v2 = vpack.c.bf16 %v3858_v30, %v3858_v30  ;;  %v3130_v30 = vld [vmem:[#allocation2 + $0x108] sm:$0xff]  ;;  %4467 = vst.msk [vmem:[#allocation3 + $0x13c] sm:$0xf] %vm448_vm2, %v4435_v1 }
 0x39c   : > { %v3331_v58 = vpop.permute.xlu1 %3330  ;;  %3511 = vst.msk [vmem:[#allocation3 + $0x180] sm:$0xf] %vm448_vm2, %v4435_v1 }
 0x39d   : > { %3411 = vst.msk [vmem:[#allocation3 + $0x12c] sm:$0xf] %vm673_vm3, %v3331_v58  ;;  %v4082_v58 = vld [vmem:[#allocation2 + $0xd8] sm:$0xff] }
 0x39e   : > { %3508 = vst.msk [vmem:[#allocation3 + $0x144] sm:$0xf] %vm448_vm2, %v8654_v2  ;;  %v4114_v35 = vpack.c.bf16 %v4082_v58, %v4082_v58  ;;  %v8703_v58 = vpack.c.bf16 %v4180_v45, %v4180_v45  ;;  %v4405_v45 = vld [vmem:[#allocation2 + $0xfa] sm:$0xff] }
 0x39f   : > { %4464 = vst.msk [vmem:[#allocation3 + $0x100] sm:$0xf] %vm448_vm2, %v8654_v2 }
 0x3a0   : > { %4146 = vst.msk [vmem:[#allocation3 + $0x124] sm:$0xf] %vm448_vm2, %v4114_v35  ;;  %v4116_v35 = vpack.c.bf16 %v4084_v48, %v4084_v48 }
 0x3a1   : > { %3830 = vst.msk [vmem:[#allocation3 + $0x170] sm:$0xf] %vm448_vm2, %v8703_v58 }
 0x3a2   : > { %3620 = vrot.lane.b32.xlu1 %v8347_v42, %s7175_s24  ;;  %v8650_v42 = vpack.c.bf16 %v4177_v25, %v4177_v25  ;;  %4148 = vst.msk [vmem:[#allocation3 + $0x14c] sm:$0xf] %vm448_vm2, %v4116_v35  ;;  %v3132_v35 = vld [vmem:[#allocation2 + $0x120] sm:$0xff] }
 0x3a3   : > { %9629 = vst [vmem:[#allocation9_spill] sm:$0xff] %v8725_v63 }
 0x3a4   : > { %v3333_v62 = vpop.permute.xlu0 %3332  ;;  %v7058_v21 = vld [vmem:[#allocation3 + $0x128] sm:$0xf0]  ;;  %3827 = vst.msk [vmem:[#allocation3 + $0x134] sm:$0xf] %vm448_vm2, %v8650_v42 }
 0x3a5   : > { %3412 = vst.msk [vmem:[#allocation3 + $0x140] sm:$0xf] %vm673_vm3, %v3333_v62  ;;  %v6564_v50 = vor.u32 %v7058_v21, %v6563_v61  ;;  %v7063_v62 = vld [vmem:[#allocation3 + $0x150] sm:$0xf0] }
 0x3a6   : > { %v4179_v21 = vld [vmem:[#allocation2 + $0xe1] sm:$0xff]  ;;  %4149 = vst.msk [vmem:[#allocation3 + $0x160] sm:$0xf] %vm448_vm2, %v8725_v63  ;;  %v3545_v63 = vld [vmem:[#allocation2 + $0x110] sm:$0xff] }
 0x3a7   : > { %v8677_v19 = vpack.c.bf16 %v4179_v21, %v4179_v21 }
 0x3a9   : > { %5363 = vmatmul.bf16.gmra.mxu1 %v6564_v50  ;;  %v3879_v50 = vpack.c.bf16 %v3847_v51, %v3847_v51  ;;  %3829 = vst.msk [vmem:[#allocation3 + $0x15c] sm:$0xf] %vm448_vm2, %v8677_v19  ;;  %v7135_v51 = vld [vmem:[%s9614_s3 + $0x110] sm:$0xff] }
 0x3aa   : > { %3942 = vrot.lane.b32.xlu1 %v3877_v9, %s7175_s24  ;;  %v7114_v9 = vld [vmem:[%s9614_s3 + $0x68] sm:$0xff]  ;;  %5681 = vmatpush.bf16.msra.mxu1 %v7135_v51 }
 0x3ab   : > { %5411 = vmatpush.bf16.msra.mxu2 %v7114_v9 }
 0x3ac   : > { %v3341_v44 = vpop.permute.xlu2 %3340  ;;  %v6583_v40 = vld [vmem:[#allocation3 + $0x140] sm:$0xf] }
 0x3ad   : > { %3416 = vst.msk [vmem:[#allocation3 + $0x190] sm:$0xf] %vm673_vm3, %v3341_v44  ;;  %v6584_v61 = vor.u32 %v7063_v62, %v6583_v40  ;;  %v8692_v44 = vpack.c.bf16 %v3130_v30, %v3130_v30  ;;  %v7130_v40 = vld [vmem:[%s9614_s3 + $0xe8] sm:$0xff] }
 0x3ae   : > { %5589 = vmatpush.bf16.msra.mxu0 %v7130_v40  ;;  %v8736_v40 = vpop.f32.mrf.mxu1 }
 0x3af   : > { %3194 = vst.msk [vmem:[#allocation3 + $0x1b8] sm:$0xf] %vm448_vm2, %v8692_v44 }
 0x3b0   : > { %9631 = vst [vmem:[#allocation11_spill] sm:$0xff] %v8736_v40 }
 0x3b2   : > { %3624 = vrot.lane.b32.xlu1 %v8363_v27, %s7175_s24  ;;  %v3860_v27 = vld [vmem:[#allocation2 + $0xda] sm:$0xff] }
 0x3b3   : > { %v8681_v25 = vpack.c.bf16 %v3860_v27, %v3860_v27  ;;  %v4181_v27 = vld [vmem:[#allocation2 + $0xf9] sm:$0xff] }
 0x3b4   : > { %v3337_v17 = vpop.permute.xlu1 %3336  ;;  %v8723_v30 = vpack.c.bf16 %v4181_v27, %v4181_v27 }
 0x3b5   : > { %3414 = vst.msk [vmem:[#allocation3 + $0x168] sm:$0xf] %vm673_vm3, %v3337_v17  ;;  %v3134_v17 = vld [vmem:[#allocation2 + $0x138] sm:$0xff] }
 0x3b6   : > { %3510 = vst.msk [vmem:[#allocation3 + $0x16c] sm:$0xf] %vm448_vm2, %v8681_v25  ;;  %v8717_v62 = vpack.c.bf16 %v3134_v17, %v3134_v17  ;;  %v8732_v17 = vpack.c.bf16 %v3132_v35, %v3132_v35  ;;  %v8759_v40 = vpop.f32.mrf.mxu1 }
 0x3b7   : > { %4466 = vst.msk [vmem:[#allocation3 + $0x128] sm:$0xf] %vm448_vm2, %v8681_v25 }
 0x3b8   : > { %3198 = vst.msk [vmem:[#allocation3 + $0x208] sm:$0xf] %vm448_vm2, %v8717_v62 }
 0x3b9   : > { %5368 = vmatmul.bf16.gmra.mxu1 %v6584_v61  ;;  %9628 = vst [vmem:[#allocation8_spill] sm:$0xff] %v8723_v30 }
 0x3ba   : > { %3946 = vrot.lane.b32.xlu1 %v3879_v50, %s7175_s24  ;;  %v3849_v50 = vld [vmem:[#allocation2 + $0x52] sm:$0xff]  ;;  %3831 = vst.msk [vmem:[#allocation3 + $0x184] sm:$0xf] %vm448_vm2, %v8723_v30 }
 0x3bb   : > { %v3881_v9 = vpack.c.bf16 %v3849_v50, %v3849_v50  ;;  %3196 = vst.msk [vmem:[#allocation3 + $0x1e0] sm:$0xf] %vm448_vm2, %v8732_v17 }
 0x3bc   : > { %v3339_v57 = vpop.permute.xlu0 %3338  ;;  %v6603_v21 = vld [vmem:[#allocation3 + $0x168] sm:$0xf]  ;;  %9633 = vst [vmem:[#allocation13_spill] sm:$0xff] %v8759_v40 }
 0x3bd   : > { %3415 = vst.msk [vmem:[#allocation3 + $0x17c] sm:$0xf] %vm673_vm3, %v3339_v57  ;;  %v3862_v57 = vld [vmem:[#allocation2 + $0xf2] sm:$0xff] }
 0x3be   : > { %v8727_v1 = vpack.c.bf16 %v3862_v57, %v3862_v57  ;;  %v7113_v57 = vld [vmem:[%s9614_s3 + $0x60] sm:$0xff] }
 0x3bf   : > { %5412 = vmatpush.bf16.msra.mxu2 %v7113_v57  ;;  %v3864_v57 = vld [vmem:[#allocation2 + $0x10a] sm:$0xff] }
 0x3c0   : > { %9630 = vst [vmem:[#allocation10_spill] sm:$0xff] %v8727_v1 }
 0x3c1   : > { %3512 = vst.msk [vmem:[#allocation3 + $0x194] sm:$0xf] %vm448_vm2, %v8727_v1 }
 0x3c2   : > { %3628 = vrot.lane.b32.xlu1 %v8389_v24, %s7175_s24  ;;  %4468 = vst.msk [vmem:[#allocation3 + $0x150] sm:$0xf] %vm448_vm2, %v8727_v1 }
 0x3c4   : > { %v3347_v61 = vpop.permute.xlu2 %3346  ;;  %v7068_v41 = vld [vmem:[#allocation3 + $0x178] sm:$0xf0] }
 0x3c5   : > { %3419 = vst.msk [vmem:[#allocation3 + $0x1cc] sm:$0xf] %vm673_vm3, %v3347_v61  ;;  %v6604_v24 = vor.u32 %v7068_v41, %v6603_v21  ;;  %v4437_v61 = vpack.c.bf16 %v4405_v45, %v4405_v45  ;;  %v3029_v21 = vpop.f32.mrf.mxu0  ;;  %v4182_v41 = vld [vmem:[#allocation2 + $0x109] sm:$0xff] }
 0x3c6   : > { %v8745_v50 = vpack.c.bf16 %v4182_v41, %v4182_v41 }
 0x3c7   : > { %4469 = vst.msk [vmem:[#allocation3 + $0x164] sm:$0xf] %vm448_vm2, %v4437_v61 }
 0x3c8   : > { %9632 = vst [vmem:[#allocation12_spill] sm:$0xff] %v8745_v50 }
 0x3c9   : > { %5373 = vmatmul.bf16.gmra.mxu1 %v6604_v24  ;;  %v4086_v24 = vld [vmem:[#allocation2 + $0x108] sm:$0xff]  ;;  %3513 = vst.msk [vmem:[#allocation3 + $0x1a8] sm:$0xf] %vm448_vm2, %v4437_v61 }
 0x3ca   : > { %v2851_v48 = vpop.f32.mrf.mxu2  ;;  %3950 = vrot.lane.b32.xlu1 %v3881_v9, %s7175_s24  ;;  %v4118_v27 = vpack.c.bf16 %v4086_v24, %v4086_v24  ;;  %v3133_v9 = vld [vmem:[#allocation2 + $0x128] sm:$0xff]  ;;  %3832 = vst.msk [vmem:[#allocation3 + $0x198] sm:$0xf] %vm448_vm2, %v8745_v50  ;;  %v6623_v24 = vld [vmem:[#allocation3 + $0x190] sm:$0xf]  ;;  %v4183_v50 = vld [vmem:[#allocation2 + $0x111] sm:$0xff] }
 0x3cb   : > { %v2852_v56 = vadd.f32 %v2851_v48, %v8196_v60  ;;  %v3851_v48 = vld [vmem:[#allocation2 + $0x6a] sm:$0xff] }
 0x3cc   : > { %v3343_v51 = vpop.permute.xlu1 %3342  ;;  %4150 = vst.msk [vmem:[#allocation3 + $0x174] sm:$0xf] %vm448_vm2, %v4118_v27 }
 0x3cd   : > { %3417 = vst.msk [vmem:[#allocation3 + $0x1a4] sm:$0xf] %vm673_vm3, %v3343_v51  ;;  %v3165_v51 = vpack.c.bf16 %v3133_v9, %v3133_v9  ;;  %v7121_v9 = vld [vmem:[%s9614_s3 + $0xa0] sm:$0xff]  ;;  %v3031_v30 = vpop.f32.mrf.mxu0 }
 0x3ce   : > { %5501 = vmatpush.bf16.msra.mxu3 %v7121_v9  ;;  %v7129_v9 = vld [vmem:[%s9614_s3 + $0xe0] sm:$0xff] }
 0x3cf   : > { %3197 = vst.msk [vmem:[#allocation3 + $0x1f4] sm:$0xf] %vm448_vm2, %v3165_v51  ;;  %v8772_v51 = vpack.c.bf16 %v3545_v63, %v3545_v63  ;;  %5590 = vmatpush.bf16.msra.mxu0 %v7129_v9 }
 0x3d1   : > { %9635 = vst [vmem:[#allocation15_spill] sm:$0xff] %v8772_v51 }
 0x3d2   : > { %3632 = vrot.lane.b32.xlu1 %v8372_v34, %s7175_s24  ;;  %v2853_v45 = vpop.f32.mrf.mxu2  ;;  %4151 = vst.msk [vmem:[#allocation3 + $0x188] sm:$0xf] %vm448_vm2, %v8772_v51 }
 0x3d3   : > { %v2940_v35 = vpop.f32.mrf.mxu3 }
 0x3d4   : > { %v2941_v41 = vadd.f32 %v2940_v35, %v2852_v56  ;;  %v3345_v61 = vpop.permute.xlu0 %3344  ;;  %v7073_v60 = vld [vmem:[#allocation3 + $0x1a0] sm:$0xf0]  ;;  %v3883_v56 = vpack.c.bf16 %v3851_v48, %v3851_v48  ;;  %v8765_v35 = vpack.c.bf16 %v4183_v50, %v4183_v50  ;;  %v8779_v48 = vpop.f32.mrf.mxu1 }
 0x3d5   : > { %3418 = vst.msk [vmem:[#allocation3 + $0x1b8] sm:$0xf] %vm673_vm3, %v3345_v61  ;;  %v6624_v34 = vor.u32 %v7073_v60, %v6623_v24  ;;  %v8767_v61 = vpack.c.bf16 %v3864_v57, %v3864_v57  ;;  %v3135_v60 = vld [vmem:[#allocation2 + $0x140] sm:$0xff] }
 0x3d6   : > { %v3030_v1 = vadd.f32 %v3029_v21, %v2941_v41  ;;  %v2854_v21 = vadd.f32 %v2853_v45, %v8204_v8  ;;  %v4407_v41 = vld [vmem:[#allocation2 + $0x112] sm:$0xff]  ;;  %3833 = vst.msk [vmem:[#allocation3 + $0x1ac] sm:$0xf] %vm448_vm2, %v8765_v35  ;;  %v3167_v8 = vpack.c.bf16 %v3135_v60, %v3135_v60  ;;  %v3034_v60 = vpop.f32.mrf.mxu0 }
 0x3d7   : > { %9634 = vst [vmem:[#allocation14_spill] sm:$0xff] %v8767_v61  ;;  %v4439_v45 = vpack.c.bf16 %v4407_v41, %v4407_v41 }
 0x3d8   : > { %v3070_v27 = vmax.f32 %v3030_v1, 0.0  ;;  %3514 = vst.msk [vmem:[#allocation3 + $0x1bc] sm:$0xf] %vm448_vm2, %v8767_v61 }
 0x3d9   : > { %5378 = vmatmul.bf16.gmra.mxu1 %v6624_v34  ;;  %9636 = vst [vmem:[#allocation16_spill] sm:$0xff] %v8779_v48  ;;  %v4185_v48 = vld [vmem:[#allocation2 + $0x129] sm:$0xff] }
 0x3da   : > { %3102 = vst.msk [vmem:[#allocation2 + $0x151] sm:$0xff] %vm226_vm0, %v3070_v27  ;;  %3954 = vrot.lane.b32.xlu1 %v3883_v56, %s7175_s24  ;;  %v2856_v34 = vpop.f32.mrf.mxu2  ;;  %v4184_v27 = vld [vmem:[#allocation2 + $0x121] sm:$0xff] }
 0x3db   : > { %v2942_v1 = vpop.f32.mrf.mxu3  ;;  %3199 = vst.msk [vmem:[#allocation3 + $0x21c] sm:$0xf] %vm448_vm2, %v3167_v8  ;;  %v4088_v56 = vld [vmem:[#allocation2 + $0x120] sm:$0xff] }
 0x3dc   : > { %v2943_v50 = vadd.f32 %v2942_v1, %v2854_v21  ;;  %v3353_v24 = vpop.permute.xlu2 %3352  ;;  %v8787_v21 = vpack.c.bf16 %v4184_v27, %v4184_v27  ;;  %4470 = vst.msk [vmem:[#allocation3 + $0x178] sm:$0xf] %vm448_vm2, %v8767_v61  ;;  %v4120_v41 = vpack.c.bf16 %v4088_v56, %v4088_v56  ;;  %v6643_v9 = vld [vmem:[#allocation3 + $0x1b8] sm:$0xf]  ;;  %v8802_v40 = vpop.f32.mrf.mxu1 }
 0x3dd   : > { %3422 = vst.msk [vmem:[#allocation3 + $0x208] sm:$0xf] %vm673_vm3, %v3353_v24  ;;  %v3866_v61 = vld [vmem:[#allocation2 + $0x122] sm:$0xff] }
 0x3de   : > { %v3032_v63 = vadd.f32 %v3031_v30, %v2943_v50  ;;  %9637 = vst [vmem:[#allocation17_spill] sm:$0xff] %v8787_v21  ;;  %v9638_v30 = vld [vmem:[#allocation4_spill] sm:$0xff]  ;;  %v8806_v51 = vpack.c.bf16 %v3866_v61, %v3866_v61 }
 0x3df   : > { %4471 = vst.msk [vmem:[#allocation3 + $0x18c] sm:$0xf] %vm448_vm2, %v4439_v45  ;;  %v2857_v50 = vadd.f32 %v2856_v34, %v9638_v30  ;;  %v3853_v34 = vld [vmem:[#allocation2 + $0x82] sm:$0xff]  ;;  %v1153_v30 = vld [vmem:[#allocation2 + $0x18a] sm:$0xff] }
 0x3e0   : > { %v3071_v57 = vmax.f32 %v3032_v63, 0.0  ;;  %3834 = vst.msk [vmem:[#allocation3 + $0x1c0] sm:$0xf] %vm448_vm2, %v8787_v21  ;;  %v3547_v21 = vld [vmem:[#allocation2 + $0x128] sm:$0xff] }
 0x3e1   : > { %v3232_v1 = vld [vmem:[#allocation2 + $0x151] sm:$0xff]  ;;  %4152 = vst.msk [vmem:[#allocation3 + $0x19c] sm:$0xf] %vm448_vm2, %v4120_v41 }
 0x3e2   : > { %3103 = vst.msk [vmem:[#allocation2 + $0x159] sm:$0xff] %vm226_vm0, %v3071_v57  ;;  %3636 = vrot.lane.b32.xlu1 %v8468_v18, %s7175_s24  ;;  %v3264_v24 = vpack.c.bf16 %v3232_v1, %v3232_v1  ;;  %v7078_v57 = vld [vmem:[#allocation3 + $0x1c8] sm:$0xf0]  ;;  %v2858_v18 = vpop.f32.mrf.mxu2 }
 0x3e3   : > { %v2945_v8 = vpop.f32.mrf.mxu3  ;;  %3515 = vst.msk [vmem:[#allocation3 + $0x1d0] sm:$0xf] %vm448_vm2, %v4439_v45  ;;  %v6644_v1 = vor.u32 %v7078_v57, %v6643_v9  ;;  %v8811_v9 = vpack.c.bf16 %v3547_v21, %v3547_v21  ;;  %v1378_v57 = vld [vmem:[#allocation2 + $0x1a0] sm:$0xff] }
 0x3e4   : > { %v2946_v63 = vadd.f32 %v2945_v8, %v2857_v50  ;;  %3356 = vrot.lane.b32.xlu0 %v3264_v24, %s7175_s24  ;;  %v3349_v27 = vpop.permute.xlu1 %3348  ;;  %v3885_v8 = vpack.c.bf16 %v3853_v34, %v3853_v34  ;;  %v8804_v24 = vpack.c.bf16 %v4185_v48, %v4185_v48  ;;  %3516 = vst.msk [vmem:[#allocation3 + $0x1e4] sm:$0xf] %vm448_vm2, %v8806_v51  ;;  %v1473_v21 = vld [vmem:[#allocation2 + $0x199] sm:$0xff] }
 0x3e5   : > { %3420 = vst.msk [vmem:[#allocation3 + $0x1e0] sm:$0xf] %vm673_vm3, %v3349_v27  ;;  %v1185_v27 = vpack.c.bf16 %v1153_v30, %v1153_v30  ;;  %v3036_v30 = vpop.f32.mrf.mxu0 }
 0x3e6   : > { %v3035_v56 = vadd.f32 %v3034_v60, %v2946_v63  ;;  %v9639_v60 = vld [vmem:[#allocation5_spill] sm:$0xff]  ;;  %3835 = vst.msk [vmem:[#allocation3 + $0x1d4] sm:$0xf] %vm448_vm2, %v8804_v24 }
 0x3e7   : > { %v2859_v63 = vadd.f32 %v2858_v18, %v9639_v60  ;;  %v8820_v18 = vpack.c.bf16 %v1378_v57, %v1378_v57  ;;  %4153 = vst.msk [vmem:[#allocation3 + $0x1b0] sm:$0xf] %vm448_vm2, %v8811_v9  ;;  %v1505_v60 = vpack.c.bf16 %v1473_v21, %v1473_v21  ;;  %v3855_v21 = vld [vmem:[#allocation2 + $0x9a] sm:$0xff] }
 0x3e8   : > { %v3072_v50 = vmax.f32 %v3035_v56, 0.0  ;;  %v4409_v56 = vld [vmem:[#allocation2 + $0x12a] sm:$0xff]  ;;  %4472 = vst.msk [vmem:[#allocation3 + $0x1a0] sm:$0xf] %vm448_vm2, %v8806_v51 }
 0x3e9   : > { %5383 = vmatmul.bf16.gmra.mxu1 %v6644_v1  ;;  %v3233_v41 = vld [vmem:[#allocation2 + $0x159] sm:$0xff]  ;;  %v4441_v1 = vpack.c.bf16 %v4409_v56, %v4409_v56  ;;  %1442 = vst.msk [vmem:[#allocation3 + $0x278] sm:$0xf] %vm448_vm2, %v8820_v18  ;;  %v8831_v56 = vpop.f32.mrf.mxu1 }
 0x3ea   : > { %3104 = vst.msk [vmem:[#allocation2 + $0x169] sm:$0xff] %vm226_vm0, %v3072_v50  ;;  %3958 = vrot.lane.b32.xlu1 %v3885_v8, %s7175_s24  ;;  %v3265_v45 = vpack.c.bf16 %v3233_v41, %v3233_v41  ;;  %v4186_v8 = vld [vmem:[#allocation2 + $0x139] sm:$0xff] }
 0x3eb   : > { %v2947_v34 = vpop.f32.mrf.mxu3  ;;  %v4090_v41 = vld [vmem:[#allocation2 + $0x138] sm:$0xff]  ;;  %4473 = vst.msk [vmem:[#allocation3 + $0x1b4] sm:$0xf] %vm448_vm2, %v4441_v1 }
 0x3ec   : > { %v2948_v48 = vadd.f32 %v2947_v34, %v2859_v63  ;;  %3358 = vrot.lane.b32.xlu2 %v3265_v45, %s7175_s24  ;;  %1280 = vrot.lane.b32.xlu0 %v1185_v27, %s7175_s24  ;;  %v3351_v61 = vpop.permute.xlu0 %3350  ;;  %v8826_v63 = vpack.c.bf16 %v4186_v8, %v4186_v8  ;;  %v4122_v45 = vpack.c.bf16 %v4090_v41, %v4090_v41  ;;  %v3428_v8 = vld [vmem:[#allocation2 + $0x2] sm:$0xff]  ;;  %v7120_v41 = vld [vmem:[%s9614_s3 + $0x98] sm:$0xff] }
 0x3ed   : > { %3421 = vst.msk [vmem:[#allocation3 + $0x1f4] sm:$0xf] %vm673_vm3, %v3351_v61  ;;  %v6663_v61 = vld [vmem:[#allocation3 + $0x1e0] sm:$0xf]  ;;  %5502 = vmatpush.bf16.msra.mxu3 %v7120_v41  ;;  %v7128_v41 = vld [vmem:[%s9614_s3 + $0xd8] sm:$0xff] }
 0x3ee   : > { %v3037_v50 = vadd.f32 %v3036_v30, %v2948_v48  ;;  %3836 = vst.msk [vmem:[#allocation3 + $0x1e8] sm:$0xf] %vm448_vm2, %v8826_v63  ;;  %5591 = vmatpush.bf16.msra.mxu0 %v7128_v41 }
 0x3ef   : > { %4154 = vst.msk [vmem:[#allocation3 + $0x1c4] sm:$0xf] %vm448_vm2, %v4122_v45 }
 0x3f0   : > { %v3073_v27 = vmax.f32 %v3037_v50, 0.0  ;;  %v7112_v50 = vld [vmem:[%s9614_s3 + $0x58] sm:$0xff]  ;;  %3517 = vst.msk [vmem:[#allocation3 + $0x1f8] sm:$0xf] %vm448_vm2, %v4441_v1 }
 0x3f1   : > { %v3234_v34 = vld [vmem:[#allocation2 + $0x169] sm:$0xff]  ;;  %5413 = vmatpush.bf16.msra.mxu2 %v7112_v50 }
 0x3f2   : > { %3105 = vst.msk [vmem:[#allocation2 + $0x171] sm:$0xff] %vm226_vm0, %v3073_v27  ;;  %3640 = vrot.lane.b32.xlu1 %v8500_v14, %s7175_s24  ;;  %v3266_v48 = vpack.c.bf16 %v3234_v34, %v3234_v34  ;;  %v3460_v14 = vpack.c.bf16 %v3428_v8, %v3428_v8  ;;  %v4187_v27 = vld [vmem:[#allocation2 + $0x141] sm:$0xff] }
 0x3f3   : > { %v8849_v45 = vpack.c.bf16 %v4187_v27, %v4187_v27  ;;  %v3549_v34 = vld [vmem:[#allocation2 + $0x140] sm:$0xff]  ;;  %v7134_v27 = vld [vmem:[%s9614_s3 + $0x108] sm:$0xff] }
 0x3f4   : > { %1599 = vrot.lane.b32.xlu2 %v1505_v60, %s7175_s24  ;;  %3360 = vrot.lane.b32.xlu0 %v3266_v48, %s7175_s24  ;;  %v7083_v57 = vld [vmem:[#allocation3 + $0x1f0] sm:$0xf0]  ;;  %v3887_v60 = vpack.c.bf16 %v3855_v21, %v3855_v21  ;;  %3492 = vst.msk [vmem:[#allocation3 + $0x4] sm:$0xf] %vm448_vm2, %v3460_v14  ;;  %v3868_v48 = vld [vmem:[#allocation2 + $0x13a] sm:$0xff]  ;;  %v8860_v14 = vpop.f32.mrf.mxu1 }
 0x3f5   : > { %v6664_v30 = vor.u32 %v7083_v57, %v6663_v61  ;;  %v8851_v57 = vpack.c.bf16 %v3549_v34, %v3549_v34  ;;  %v8853_v1 = vpack.c.bf16 %v3868_v48, %v3868_v48  ;;  %v4411_v50 = vld [vmem:[#allocation2 + $0x142] sm:$0xff]  ;;  %3837 = vst.msk [vmem:[#allocation3 + $0x1fc] sm:$0xf] %vm448_vm2, %v8849_v45  ;;  %5682 = vmatpush.bf16.msra.mxu1 %v7134_v27  ;;  %v3137_v27 = vld [vmem:[#allocation2 + $0x158] sm:$0xff] }
 0x3f6   : > { %v4443_v21 = vpack.c.bf16 %v4411_v50, %v4411_v50 }
 0x3f7   : > { %3518 = vst.msk [vmem:[#allocation3 + $0x20c] sm:$0xf] %vm448_vm2, %v8853_v1 }
 0x3f8   : > { %4155 = vst.msk [vmem:[#allocation3 + $0x1d8] sm:$0xf] %vm448_vm2, %v8851_v57 }
 0x3f9   : > { %5388 = vmatmul.bf16.gmra.mxu1 %v6664_v30  ;;  %v3235_v61 = vld [vmem:[#allocation2 + $0x171] sm:$0xff]  ;;  %4474 = vst.msk [vmem:[#allocation3 + $0x1c8] sm:$0xf] %vm448_vm2, %v8853_v1 }
 0x3fa   : > { %3962 = vrot.lane.b32.xlu1 %v3887_v60, %s7175_s24  ;;  %v3267_v8 = vpack.c.bf16 %v3235_v61, %v3235_v61  ;;  %4475 = vst.msk [vmem:[#allocation3 + $0x1dc] sm:$0xf] %vm448_vm2, %v4443_v21  ;;  %v6683_v60 = vld [vmem:[#allocation3 + $0x208] sm:$0xf] }
 0x3fb   : > { %3519 = vst.msk [vmem:[#allocation3 + $0x220] sm:$0xf] %vm448_vm2, %v4443_v21  ;;  %v3857_v61 = vld [vmem:[#allocation2 + $0xb2] sm:$0xff] }
 0x3fc   : > { %3362 = vrot.lane.b32.xlu2 %v3267_v8, %s7175_s24  ;;  %3622 = vrot.lane.b32.xlu0 %v8355_v53, %s7175_s24  ;;  %v3355_v30 = vpop.permute.xlu1 %3354  ;;  %v8885_v50 = vpop.f32.mrf.mxu1  ;;  %v3889_v8 = vpack.c.bf16 %v3857_v61, %v3857_v61  ;;  %v3139_v61 = vld [vmem:[#allocation2 + $0x170] sm:$0xff] }
 0x3fd   : > { %3423 = vst.msk [vmem:[#allocation3 + $0x21c] sm:$0xf] %vm673_vm3, %v3355_v30 }
 0x402   : > { %3644 = vrot.lane.b32.xlu1 %v8487_v38, %s7175_s24  ;;  %v7111_v38 = vld [vmem:[%s9614_s3 + $0x50] sm:$0xff] }
 0x403   : > { %5414 = vmatpush.bf16.msra.mxu2 %v7111_v38  ;;  %v3136_v38 = vld [vmem:[#allocation2 + $0x150] sm:$0xff] }
 0x404   : > { %3940 = vrot.lane.b32.xlu2 %v8387_v59, %s7175_s24  ;;  %4260 = vrot.lane.b32.xlu0 %v8404_v29, %s7175_s24  ;;  %v1279_v53 = vpop.permute.xlu1 %1278  ;;  %v7088_v34 = vld [vmem:[#allocation3 + $0x218] sm:$0xf0]  ;;  %v8893_v29 = vpop.f32.mrf.mxu1 }
 0x405   : > { %1344 = vst.msk [vmem:[#allocation3 + $0x260] sm:$0xf] %vm673_vm3, %v1279_v53  ;;  %v6684_v48 = vor.u32 %v7088_v34, %v6683_v60  ;;  %v3169_v60 = vpack.c.bf16 %v3137_v27, %v3137_v27 }
 0x407   : > { %3201 = vst.msk [vmem:[#allocation3 + $0x244] sm:$0xf] %vm448_vm2, %v3169_v60 }
 0x409   : > { %5393 = vmatmul.bf16.gmra.mxu1 %v6684_v48  ;;  %v7110_v48 = vld [vmem:[%s9614_s3 + $0x48] sm:$0xff] }
 0x40a   : > { %3966 = vrot.lane.b32.xlu1 %v3889_v8, %s7175_s24  ;;  %5415 = vmatpush.bf16.msra.mxu2 %v7110_v48  ;;  %v4188_v48 = vld [vmem:[#allocation2 + $0x151] sm:$0xff] }
 0x40c   : > { %4262 = vrot.lane.b32.xlu2 %v8420_v20, %s7175_s24  ;;  %3626 = vrot.lane.b32.xlu0 %v8374_v6, %s7175_s24  ;;  %v1602_v59 = vpop.permute.xlu1 %1601  ;;  %v3859_v20 = vld [vmem:[#allocation2 + $0xca] sm:$0xff]  ;;  %v8912_v41 = vpop.f32.mrf.mxu1 }
 0x40d   : > { %1666 = vst.msk [vmem:[#allocation3 + $0x278] sm:$0xf] %vm673_vm3, %v1602_v59  ;;  %v3891_v30 = vpack.c.bf16 %v3859_v20, %v3859_v20  ;;  %v7126_v20 = vld [vmem:[%s9614_s3 + $0xc8] sm:$0xff] }
 0x412   : > { %3648 = vrot.lane.b32.xlu1 %v8579_v10, %s7175_s24  ;;  %v7119_v10 = vld [vmem:[%s9614_s3 + $0x90] sm:$0xff] }
 0x413   : > { %5503 = vmatpush.bf16.msra.mxu3 %v7119_v10  ;;  %v7133_v10 = vld [vmem:[%s9614_s3 + $0x100] sm:$0xff] }
 0x414   : > { %v8900_v21 = vld [vmem:[#allocation3 + $0x274] sm:$0xf0]  ;;  %3944 = vrot.lane.b32.xlu2 %v8424_v4, %s7175_s24  ;;  %4264 = vrot.lane.b32.xlu0 %v8445_v33, %s7175_s24  ;;  %v3621_v6 = vpop.permute.xlu1 %3620  ;;  %v7127_v33 = vld [vmem:[%s9614_s3 + $0xd0] sm:$0xff] }
 0x415   : > { %4163 = vst.msk [vmem:[#allocation3 + $0x278] sm:$0xf] %vm448_vm2, %v8820_v18  ;;  %5592 = vmatpush.bf16.msra.mxu0 %v7127_v33  ;;  %v8925_v18 = vpop.f32.mrf.mxu1  ;;  %5683 = vmatpush.bf16.msra.mxu1 %v7133_v10  ;;  %v7117_v33 = vld [vmem:[%s9614_s3 + $0x80] sm:$0xff] }
 0x416   : > { %3716 = vst.msk [vmem:[#allocation3 + $0x4] sm:$0xf] %vm673_vm3, %v3621_v6 }
 0x419   : > { %5593 = vmatpush.bf16.msra.mxu0 %v7126_v20 }
 0x41a   : > { %3970 = vrot.lane.b32.xlu1 %v3891_v30, %s7175_s24 }
 0x41c   : > { %4266 = vrot.lane.b32.xlu2 %v8464_v12, %s7175_s24  ;;  %3630 = vrot.lane.b32.xlu0 %v8406_v47, %s7175_s24  ;;  %v3943_v4 = vpop.permute.xlu1 %3942  ;;  %v3861_v12 = vld [vmem:[#allocation2 + $0xe2] sm:$0xff] }
 0x41d   : > { %4037 = vst.msk [vmem:[#allocation3 + $0x1c] sm:$0xf] %vm673_vm3, %v3943_v4  ;;  %v3893_v53 = vpack.c.bf16 %v3861_v12, %v3861_v12 }
 0x422   : > { %3652 = vrot.lane.b32.xlu1 %v8615_v13, %s7175_s24  ;;  %v1377_v13 = vld [vmem:[#allocation2 + $0x198] sm:$0xff] }
 0x423   : > { %v8941_v34 = vpack.c.bf16 %v1377_v13, %v1377_v13 }
 0x424   : > { %3948 = vrot.lane.b32.xlu2 %v8470_v46, %s7175_s24  ;;  %4268 = vrot.lane.b32.xlu0 %v8485_v15, %s7175_s24  ;;  %v3625_v47 = vpop.permute.xlu1 %3624  ;;  %v8939_v15 = vpop.f32.mrf.mxu1 }
 0x425   : > { %3718 = vst.msk [vmem:[#allocation3 + $0x2c] sm:$0xf] %vm673_vm3, %v3625_v47  ;;  %v3138_v47 = vld [vmem:[#allocation2 + $0x168] sm:$0xff] }
 0x426   : > { %1441 = vst.msk [vmem:[#allocation3 + $0x264] sm:$0xf] %vm448_vm2, %v8941_v34  ;;  %v8990_v12 = vpack.c.bf16 %v3138_v47, %v3138_v47  ;;  %v3551_v47 = vld [vmem:[#allocation2 + $0x158] sm:$0xff] }
 0x428   : > { %3202 = vst.msk [vmem:[#allocation3 + $0x258] sm:$0xf] %vm448_vm2, %v8990_v12 }
 0x42a   : > { %3974 = vrot.lane.b32.xlu1 %v3893_v53, %s7175_s24 }
 0x42c   : > { %4270 = vrot.lane.b32.xlu2 %v8507_v28, %s7175_s24  ;;  %3634 = vrot.lane.b32.xlu0 %v8447_v55, %s7175_s24  ;;  %v3947_v46 = vpop.permute.xlu1 %3946  ;;  %v3863_v28 = vld [vmem:[#allocation2 + $0xfa] sm:$0xff]  ;;  %v8958_v8 = vpop.f32.mrf.mxu1 }
 0x42d   : > { %4039 = vst.msk [vmem:[#allocation3 + $0x44] sm:$0xf] %vm673_vm3, %v3947_v46  ;;  %v3895_v59 = vpack.c.bf16 %v3863_v28, %v3863_v28 }
 0x432   : > { %3656 = vrot.lane.b32.xlu1 %v8597_v37, %s7175_s24  ;;  %v7118_v37 = vld [vmem:[%s9614_s3 + $0x88] sm:$0xff] }
 0x433   : > { %5504 = vmatpush.bf16.msra.mxu3 %v7118_v37  ;;  %v4092_v37 = vld [vmem:[#allocation2 + $0x150] sm:$0xff] }
 0x434   : > { %3952 = vrot.lane.b32.xlu2 %v8509_v52, %s7175_s24  ;;  %4272 = vrot.lane.b32.xlu0 %v8529_v0, %s7175_s24  ;;  %v3629_v55 = vpop.permute.xlu1 %3628  ;;  %v3171_v52 = vpack.c.bf16 %v3139_v61, %v3139_v61  ;;  %v8960_v0 = vpack.c.bf16 %v3136_v38, %v3136_v38  ;;  %v8977_v30 = vpop.f32.mrf.mxu1  ;;  %v9005_v61 = vpack.c.bf16 %v4188_v48, %v4188_v48  ;;  %v4094_v48 = vld [vmem:[#allocation2 + $0x168] sm:$0xff] }
 0x435   : > { %3720 = vst.msk [vmem:[#allocation3 + $0x54] sm:$0xf] %vm673_vm3, %v3629_v55  ;;  %v3429_v55 = vld [vmem:[#allocation2 + $0xa] sm:$0xff] }
 0x436   : > { %3203 = vst.msk [vmem:[#allocation3 + $0x26c] sm:$0xf] %vm448_vm2, %v3171_v52  ;;  %v3461_v28 = vpack.c.bf16 %v3429_v55, %v3429_v55 }
 0x437   : > { %3200 = vst.msk [vmem:[#allocation3 + $0x230] sm:$0xf] %vm448_vm2, %v8960_v0  ;;  %5505 = vmatpush.bf16.msra.mxu3 %v7117_v33 }
 0x438   : > { %3493 = vst.msk [vmem:[#allocation3 + $0x18] sm:$0xf] %vm448_vm2, %v3461_v28  ;;  %v4190_v28 = vld [vmem:[#allocation2 + $0x169] sm:$0xff] }
 0x439   : > { %3838 = vst.msk [vmem:[#allocation3 + $0x210] sm:$0xf] %vm448_vm2, %v9005_v61 }
 0x43a   : > { %3978 = vrot.lane.b32.xlu1 %v3895_v59, %s7175_s24 }
 0x43c   : > { %4274 = vrot.lane.b32.xlu2 %v8549_v26, %s7175_s24  ;;  %3638 = vrot.lane.b32.xlu0 %v8422_v11, %s7175_s24  ;;  %v3951_v6 = vpop.permute.xlu1 %3950  ;;  %v3865_v26 = vld [vmem:[#allocation2 + $0x112] sm:$0xff]  ;;  %v8995_v53 = vpop.f32.mrf.mxu1 }
 0x43d   : > { %4041 = vst.msk [vmem:[#allocation3 + $0x6c] sm:$0xf] %vm673_vm3, %v3951_v6 }
 0x442   : > { %3660 = vrot.lane.b32.xlu1 %v8692_v44, %s7175_s24  ;;  %v3897_v44 = vpack.c.bf16 %v3865_v26, %v3865_v26 }
 0x444   : > { %3956 = vrot.lane.b32.xlu2 %v8551_v22, %s7175_s24  ;;  %4276 = vrot.lane.b32.xlu0 %v8573_v31, %s7175_s24  ;;  %v3633_v11 = vpop.permute.xlu1 %3632  ;;  %v1697_v22 = vld [vmem:[#allocation2 + $0x19a] sm:$0xff]  ;;  %v1698_v31 = vld [vmem:[#allocation2 + $0x1a2] sm:$0xff]  ;;  %v9021_v38 = vpop.f32.mrf.mxu1 }
 0x445   : > { %3722 = vst.msk [vmem:[#allocation3 + $0x7c] sm:$0xf] %vm673_vm3, %v3633_v11  ;;  %v1729_v27 = vpack.c.bf16 %v1697_v22, %v1697_v22  ;;  %v1730_v46 = vpack.c.bf16 %v1698_v31, %v1698_v31  ;;  %v4413_v22 = vld [vmem:[#allocation2 + $0x15a] sm:$0xff] }
 0x446   : > { %v3359_v4 = vpop.permute.xlu2 %3358  ;;  %9640 = vst [vmem:[#allocation4_spill] sm:$0xff] %v9021_v38 }
 0x447   : > { %3425 = vst.msk [vmem:[#allocation3 + $0x244] sm:$0xf] %vm673_vm3, %v3359_v4  ;;  %v4189_v4 = vld [vmem:[#allocation2 + $0x159] sm:$0xff] }
 0x448   : > { %1761 = vst.msk [vmem:[#allocation3 + $0x268] sm:$0xf] %vm448_vm2, %v1729_v27  ;;  %v9029_v33 = vpack.c.bf16 %v4189_v4, %v4189_v4  ;;  %v3553_v4 = vld [vmem:[#allocation2 + $0x170] sm:$0xff] }
 0x449   : > { %1762 = vst.msk [vmem:[#allocation3 + $0x27c] sm:$0xf] %vm448_vm2, %v1730_v46 }
 0x44a   : > { %3982 = vrot.lane.b32.xlu1 %v3897_v44, %s7175_s24  ;;  %v3870_v44 = vld [vmem:[#allocation2 + $0x152] sm:$0xff]  ;;  %3839 = vst.msk [vmem:[#allocation3 + $0x224] sm:$0xf] %vm448_vm2, %v9029_v33 }
 0x44c   : > { %4278 = vrot.lane.b32.xlu2 %v8586_v39, %s7175_s24  ;;  %3642 = vrot.lane.b32.xlu0 %v8519_v36, %s7175_s24  ;;  %v3955_v60 = vpop.permute.xlu1 %3954  ;;  %v4124_v39 = vpack.c.bf16 %v4092_v37, %v4092_v37  ;;  %v7109_v36 = vld [vmem:[%s9614_s3 + $0x40] sm:$0xff] }
 0x44d   : > { %4043 = vst.msk [vmem:[#allocation3 + $0x94] sm:$0xf] %vm673_vm3, %v3955_v60  ;;  %5416 = vmatpush.bf16.msra.mxu2 %v7109_v36  ;;  %v4445_v60 = vpack.c.bf16 %v4413_v22, %v4413_v22  ;;  %v4126_v36 = vpack.c.bf16 %v4094_v48, %v4094_v48  ;;  %v9079_v22 = vpack.c.bf16 %v3553_v4, %v3553_v4 }
 0x44e   : > { %v1600_v13 = vpop.permute.xlu2 %1599  ;;  %4156 = vst.msk [vmem:[#allocation3 + $0x1ec] sm:$0xf] %vm448_vm2, %v4124_v39  ;;  %v9056_v39 = vpack.c.bf16 %v4190_v28, %v4190_v28 }
 0x44f   : > { %1665 = vst.msk [vmem:[#allocation3 + $0x264] sm:$0xf] %vm673_vm3, %v1600_v13  ;;  %v6259_v52 = vld [vmem:[#allocation3 + $0x268] sm:$0xf]  ;;  %v7093_v13 = vld [vmem:[#allocation3 + $0x240] sm:$0xf0] }
 0x450   : > { %4482 = vst.msk [vmem:[#allocation3 + $0x268] sm:$0xf] %vm448_vm2, %v1729_v27  ;;  %v6984_v10 = vld [vmem:[#allocation3 + $0x278] sm:$0xf0] }
 0x451   : > { %v6260_v26 = vor.u32 %v6984_v10, %v6259_v52  ;;  %4483 = vst.msk [vmem:[#allocation3 + $0x27c] sm:$0xf] %vm448_vm2, %v1730_v46 }
 0x452   : > { %3664 = vrot.lane.b32.xlu1 %v8732_v17, %s7175_s24  ;;  %v3867_v17 = vld [vmem:[#allocation2 + $0x12a] sm:$0xff]  ;;  %4477 = vst.msk [vmem:[#allocation3 + $0x204] sm:$0xf] %vm448_vm2, %v4445_v60 }
 0x453   : > { %v3899_v11 = vpack.c.bf16 %v3867_v17, %v3867_v17  ;;  %6420 = vmatmul.msk.bf16.gmra.mxu0 %vm226_vm0, %v6260_v26  ;;  %3840 = vst.msk [vmem:[#allocation3 + $0x238] sm:$0xf] %vm448_vm2, %v9056_v39  ;;  %v3869_v17 = vld [vmem:[#allocation2 + $0x142] sm:$0xff] }
 0x454   : > { %3960 = vrot.lane.b32.xlu2 %v8588_v23, %s7175_s24  ;;  %4280 = vrot.lane.b32.xlu0 %v8603_v5, %s7175_s24  ;;  %v3637_v59 = vpop.permute.xlu1 %3636  ;;  %4158 = vst.msk [vmem:[#allocation3 + $0x214] sm:$0xf] %vm448_vm2, %v4126_v36  ;;  %v3901_v10 = vpack.c.bf16 %v3869_v17, %v3869_v17 }
 0x455   : > { %3724 = vst.msk [vmem:[#allocation3 + $0xa4] sm:$0xf] %vm673_vm3, %v3637_v59 }
 0x456   : > { %v6981_v6 = vld [vmem:[#allocation3 + $0x264] sm:$0xf]  ;;  %v3363_v20 = vpop.permute.xlu2 %3362  ;;  %v3357_v23 = vpop.permute.xlu0 %3356  ;;  %3521 = vst.msk [vmem:[#allocation3 + $0x248] sm:$0xf] %vm448_vm2, %v4445_v60 }
 0x457   : > { %4162 = vst.msk [vmem:[#allocation3 + $0x264] sm:$0xf] %vm448_vm2, %v8941_v34  ;;  %v6256_v5 = vor.u32 %v6981_v6, %v8900_v21  ;;  %v9034_v21 = vpack.c.bf16 %v3551_v47, %v3551_v47  ;;  %v9036_v34 = vpack.c.bf16 %v3870_v44, %v3870_v44  ;;  %v7024_v6 = vld [vmem:[#allocation3 + $0x18] sm:$0xf0] }
 0x458   : > { %3427 = vst.msk [vmem:[#allocation3 + $0x26c] sm:$0xf] %vm673_vm3, %v3363_v20  ;;  %v3872_v47 = vld [vmem:[#allocation2 + $0x16a] sm:$0xff] }
 0x459   : > { %3424 = vst.msk [vmem:[#allocation3 + $0x230] sm:$0xf] %vm673_vm3, %v3357_v23  ;;  %2949 = vmatmul.bf16.gmra.mxu3 %v6256_v5  ;;  %v6251_v23 = vld [vmem:[#allocation3 + $0x260] sm:$0xf] }
 0x45a   : > { %3986 = vrot.lane.b32.xlu1 %v3899_v11, %s7175_s24  ;;  %3520 = vst.msk [vmem:[#allocation3 + $0x234] sm:$0xf] %vm448_vm2, %v9036_v34  ;;  %v4191_v11 = vld [vmem:[#allocation2 + $0x171] sm:$0xff] }
 0x45b   : > { %4157 = vst.msk [vmem:[#allocation3 + $0x200] sm:$0xf] %vm448_vm2, %v9034_v21  ;;  %v9074_v26 = vpack.c.bf16 %v4191_v11, %v4191_v11 }
 0x45c   : > { %4282 = vrot.lane.b32.xlu2 %v8622_v54, %s7175_s24  ;;  %3646 = vrot.lane.b32.xlu0 %v8560_v16, %s7175_s24  ;;  %v3959_v31 = vpop.permute.xlu1 %3958  ;;  %v7125_v54 = vld [vmem:[%s9614_s3 + $0xc0] sm:$0xff]  ;;  %v9053_v16 = vpop.f32.mrf.mxu1  ;;  %4476 = vst.msk [vmem:[#allocation3 + $0x1f0] sm:$0xf] %vm448_vm2, %v9036_v34 }
 0x45d   : > { %4045 = vst.msk [vmem:[#allocation3 + $0xbc] sm:$0xf] %vm673_vm3, %v3959_v31  ;;  %5594 = vmatpush.bf16.msra.mxu0 %v7125_v54  ;;  %v9081_v31 = vpack.c.bf16 %v3872_v47, %v3872_v47 }
 0x45e   : > { %v3941_v27 = vpop.permute.xlu2 %3940  ;;  %v1281_v46 = vpop.permute.xlu0 %1280  ;;  %9641 = vst [vmem:[#allocation5_spill] sm:$0xff] %v9053_v16 }
 0x45f   : > { %4036 = vst.msk [vmem:[#allocation3 + $0x8] sm:$0xf] %vm673_vm3, %v3941_v27  ;;  %v4415_v27 = vld [vmem:[#allocation2 + $0x172] sm:$0xff]  ;;  %v7098_v28 = vld [vmem:[#allocation3 + $0x268] sm:$0xf0] }
 0x460   : > { %1345 = vst.msk [vmem:[#allocation3 + $0x274] sm:$0xf] %vm673_vm3, %v1281_v46  ;;  %v6703_v55 = vld [vmem:[#allocation3 + $0x230] sm:$0xf]  ;;  %v4447_v46 = vpack.c.bf16 %v4415_v27, %v4415_v27  ;;  %v3873_v27 = vld [vmem:[#allocation2 + $0x172] sm:$0xff] }
 0x461   : > { %v6704_v37 = vor.u32 %v7093_v13, %v6703_v55  ;;  %3841 = vst.msk [vmem:[#allocation3 + $0x24c] sm:$0xf] %vm448_vm2, %v9074_v26 }
 0x462   : > { %3668 = vrot.lane.b32.xlu1 %v8717_v62, %s7175_s24  ;;  %4159 = vst.msk [vmem:[#allocation3 + $0x228] sm:$0xf] %vm448_vm2, %v9079_v22 }
 0x463   : > { %5398 = vmatmul.bf16.gmra.mxu1 %v6704_v37  ;;  %4478 = vst.msk [vmem:[#allocation3 + $0x218] sm:$0xf] %vm448_vm2, %v9081_v31  ;;  %v3871_v37 = vld [vmem:[#allocation2 + $0x15a] sm:$0xff] }
 0x464   : > { %3964 = vrot.lane.b32.xlu2 %v8624_v43, %s7175_s24  ;;  %4284 = vrot.lane.b32.xlu0 %v8639_v32, %s7175_s24  ;;  %v3641_v59 = vpop.permute.xlu1 %3640  ;;  %v9076_v44 = vpop.f32.mrf.mxu1  ;;  %4479 = vst.msk [vmem:[#allocation3 + $0x22c] sm:$0xf] %vm448_vm2, %v4447_v46 }
 0x465   : > { %3726 = vst.msk [vmem:[#allocation3 + $0xcc] sm:$0xf] %vm673_vm3, %v3641_v59  ;;  %v7029_v59 = vld [vmem:[#allocation3 + $0x40] sm:$0xf0] }
 0x466   : > { %v4263_v52 = vpop.permute.xlu2 %4262  ;;  %v6431_v62 = vld [vmem:[#allocation3 + $0x8] sm:$0xf]  ;;  %v3361_v20 = vpop.permute.xlu0 %3360  ;;  %3522 = vst.msk [vmem:[#allocation3 + $0x25c] sm:$0xf] %vm448_vm2, %v9081_v31 }
 0x467   : > { %4357 = vst.msk [vmem:[#allocation3 + $0x20] sm:$0xf] %vm673_vm3, %v4263_v52  ;;  %v6983_v5 = vld [vmem:[#allocation3 + $0x270] sm:$0xf0]  ;;  %v6432_v43 = vor.u32 %v7024_v6, %v6431_v62  ;;  %v7021_v52 = vld [vmem:[#allocation3 + $0x4] sm:$0xf] }
 0x468   : > { %3426 = vst.msk [vmem:[#allocation3 + $0x258] sm:$0xf] %vm673_vm3, %v3361_v20  ;;  %v6252_v32 = vor.u32 %v6983_v5, %v6251_v23 }
 0x469   : > { %5506 = vmatmul.bf16.vlgmr.msra.gmra.mxu3 %v6432_v43  ;;  %3523 = vst.msk [vmem:[#allocation3 + $0x270] sm:$0xf] %vm448_vm2, %v4447_v46  ;;  %v6439_v43 = vld [vmem:[#allocation3 + $0x10] sm:$0xf] }
 0x46a   : > { %2860 = vmatmul.bf16.gmra.mxu2 %v6252_v32  ;;  %3990 = vrot.lane.b32.xlu1 %v3901_v10, %s7175_s24  ;;  %v7025_v32 = vld [vmem:[#allocation3 + $0x20] sm:$0xf0] }
 0x46c   : > { %4286 = vrot.lane.b32.xlu2 %v8650_v42, %s7175_s24  ;;  %3650 = vrot.lane.b32.xlu0 %v8652_v7, %s7175_s24  ;;  %v3963_v60 = vpop.permute.xlu1 %3962  ;;  %v9102_v7 = vpop.f32.mrf.mxu1 }
 0x46d   : > { %4047 = vst.msk [vmem:[#allocation3 + $0xe4] sm:$0xf] %vm673_vm3, %v3963_v60 }
 0x46e   : > { %v3945_v13 = vpop.permute.xlu2 %3944  ;;  %v3623_v54 = vpop.permute.xlu0 %3622  ;;  %v6433_v4 = vld [vmem:[#allocation3 + $0x1c] sm:$0xf0] }
 0x46f   : > { %4038 = vst.msk [vmem:[#allocation3 + $0x30] sm:$0xf] %vm673_vm3, %v3945_v13  ;;  %v6723_v55 = vld [vmem:[#allocation3 + $0x258] sm:$0xf]  ;;  %v7034_v13 = vld [vmem:[#allocation3 + $0x68] sm:$0xf0] }
 0x470   : > { %3717 = vst.msk [vmem:[#allocation3 + $0x18] sm:$0xf] %vm673_vm3, %v3623_v54  ;;  %v6724_v42 = vor.u32 %v7098_v28, %v6723_v55  ;;  %v7026_v55 = vld [vmem:[#allocation3 + $0x2c] sm:$0xf] }
 0x472   : > { %3672 = vrot.lane.b32.xlu1 %v8960_v0, %s7175_s24 }
 0x473   : > { %5403 = vmatmul.bf16.gmra.mxu1 %v6724_v42 }
 0x474   : > { %3968 = vrot.lane.b32.xlu2 %v8654_v2, %s7175_s24  ;;  %4288 = vrot.lane.b32.xlu0 %v8667_v49, %s7175_s24  ;;  %v3645_v48 = vpop.permute.xlu1 %3644  ;;  %v3903_v2 = vpack.c.bf16 %v3871_v37, %v3871_v37  ;;  %v9117_v23 = vpop.f32.mrf.mxu1  ;;  %v9643_v37 = vld [vmem:[#allocation9_spill] sm:$0xff] }
 0x475   : > { %3728 = vst.msk [vmem:[#allocation3 + $0xf4] sm:$0xf] %vm673_vm3, %v3645_v48  ;;  %v3905_v48 = vpack.c.bf16 %v3873_v27, %v3873_v27 }
 0x476   : > { %v4267_v36 = vpop.permute.xlu2 %4266  ;;  %v6451_v0 = vld [vmem:[#allocation3 + $0x30] sm:$0xf]  ;;  %v4261_v17 = vpop.permute.xlu0 %4260 }
 0x477   : > { %4359 = vst.msk [vmem:[#allocation3 + $0x48] sm:$0xf] %vm673_vm3, %v4267_v36  ;;  %v6425_v62 = vld [vmem:[#allocation3 + $0x14] sm:$0xf0]  ;;  %v6452_v6 = vor.u32 %v7029_v59, %v6451_v0 }
 0x478   : > { %4356 = vst.msk [vmem:[#allocation3 + $0xc] sm:$0xf] %vm673_vm3, %v4261_v17  ;;  %v6428_v20 = vor.u32 %v7021_v52, %v6425_v62  ;;  %v6459_v59 = vld [vmem:[#allocation3 + $0x38] sm:$0xf]  ;;  %v7030_v17 = vld [vmem:[#allocation3 + $0x48] sm:$0xf0] }
 0x479   : > { %5511 = vmatmul.bf16.gmra.mxu3 %v6452_v6 }
 0x47a   : > { %5417 = vmatmul.bf16.vlgmr.msra.gmra.mxu2 %v6428_v20  ;;  %3994 = vrot.lane.b32.xlu1 %v3903_v2, %s7175_s24  ;;  %v6460_v2 = vor.u32 %v7030_v17, %v6459_v59 }
 0x47c   : > { %4290 = vrot.lane.b32.xlu2 %v8677_v19, %s7175_s24  ;;  %3654 = vrot.lane.b32.xlu0 %v8679_v3, %s7175_s24  ;;  %v3967_v49 = vpop.permute.xlu1 %3966  ;;  %v6440_v19 = vor.u32 %v7025_v32, %v6439_v43  ;;  %v9130_v42 = vpop.f32.mrf.mxu1  ;;  %v9645_v43 = vld [vmem:[#allocation12_spill] sm:$0xff] }
 0x47d   : > { %4049 = vst.msk [vmem:[#allocation3 + $0x10c] sm:$0xf] %vm673_vm3, %v3967_v49 }
 0x47e   : > { %v3949_v5 = vpop.permute.xlu2 %3948  ;;  %v3627_v10 = vpop.permute.xlu0 %3626  ;;  %v6453_v6 = vld [vmem:[#allocation3 + $0x44] sm:$0xf0] }
 0x47f   : > { %4040 = vst.msk [vmem:[#allocation3 + $0x58] sm:$0xf] %vm673_vm3, %v3949_v5  ;;  %v7022_v11 = vld [vmem:[#allocation3 + $0xc] sm:$0xf]  ;;  %v9644_v5 = vld [vmem:[#allocation10_spill] sm:$0xff] }
 0x480   : > { %3719 = vst.msk [vmem:[#allocation3 + $0x40] sm:$0xf] %vm673_vm3, %v3627_v10  ;;  %v6436_v47 = vor.u32 %v7022_v11, %v6433_v4  ;;  %v7039_v4 = vld [vmem:[#allocation3 + $0x90] sm:$0xf0] }
 0x482   : > { %5595 = vmatmul.bf16.vlgmr.msra.gmra.mxu0 %v6436_v47  ;;  %3676 = vrot.lane.b32.xlu1 %v8990_v12, %s7175_s24 }
 0x483   : > { %6885 = vmatmul.msk.bf16.vlgmr.msra.gmra.mxu1 %vm226_vm0, %v6440_v19  ;;  %v7031_v19 = vld [vmem:[#allocation3 + $0x54] sm:$0xf] }
 0x484   : > { %3972 = vrot.lane.b32.xlu2 %v8681_v25, %s7175_s24  ;;  %4292 = vrot.lane.b32.xlu0 %v8703_v58, %s7175_s24  ;;  %v3649_v3 = vpop.permute.xlu1 %3648  ;;  %v9642_v58 = vld [vmem:[#allocation8_spill] sm:$0xff]  ;;  %v9141_v49 = vpop.f32.mrf.mxu1 }
 0x485   : > { %3730 = vst.msk [vmem:[#allocation3 + $0x11c] sm:$0xf] %vm673_vm3, %v3649_v3 }
 0x486   : > { %v4271_v60 = vpop.permute.xlu2 %4270  ;;  %v6471_v46 = vld [vmem:[#allocation3 + $0x58] sm:$0xf]  ;;  %v4265_v54 = vpop.permute.xlu0 %4264 }
 0x487   : > { %4361 = vst.msk [vmem:[#allocation3 + $0x70] sm:$0xf] %vm673_vm3, %v4271_v60  ;;  %v6445_v12 = vld [vmem:[#allocation3 + $0x3c] sm:$0xf0]  ;;  %v6472_v28 = vor.u32 %v7034_v13, %v6471_v46  ;;  %v9647_v13 = vld [vmem:[#allocation15_spill] sm:$0xff] }
 0x488   : > { %4358 = vst.msk [vmem:[#allocation3 + $0x34] sm:$0xf] %vm673_vm3, %v4265_v54  ;;  %v6448_v25 = vor.u32 %v7026_v55, %v6445_v12  ;;  %v6479_v12 = vld [vmem:[#allocation3 + $0x60] sm:$0xf] }
 0x489   : > { %5516 = vmatmul.bf16.gmra.mxu3 %v6472_v28  ;;  %v7035_v28 = vld [vmem:[#allocation3 + $0x70] sm:$0xf0] }
 0x48a   : > { %5422 = vmatmul.bf16.gmra.mxu2 %v6448_v25  ;;  %3998 = vrot.lane.b32.xlu1 %v3905_v48, %s7175_s24 }
 0x48c   : > { %4294 = vrot.lane.b32.xlu2 %v9642_v58, %s7175_s24  ;;  %3658 = vrot.lane.b32.xlu0 %v9643_v37, %s7175_s24  ;;  %v3971_v36 = vpop.permute.xlu1 %3970  ;;  %v9151_v46 = vpop.f32.mrf.mxu1 }
 0x48d   : > { %4051 = vst.msk [vmem:[#allocation3 + $0x134] sm:$0xf] %vm673_vm3, %v3971_v36  ;;  %v6480_v36 = vor.u32 %v7035_v28, %v6479_v12  ;;  %v7049_v12 = vld [vmem:[#allocation3 + $0xe0] sm:$0xf0] }
 0x48e   : > { %v3953_v0 = vpop.permute.xlu2 %3952  ;;  %v3631_v52 = vpop.permute.xlu0 %3630  ;;  %9646 = vst [vmem:[#allocation8_spill] sm:$0xff] %v9151_v46  ;;  %v6473_v58 = vld [vmem:[#allocation3 + $0x6c] sm:$0xf0] }
 0x48f   : > { %4042 = vst.msk [vmem:[#allocation3 + $0x80] sm:$0xf] %vm673_vm3, %v3953_v0  ;;  %v7027_v62 = vld [vmem:[#allocation3 + $0x34] sm:$0xf]  ;;  %v9649_v0 = vld [vmem:[#allocation17_spill] sm:$0xff] }
 0x490   : > { %3721 = vst.msk [vmem:[#allocation3 + $0x68] sm:$0xf] %vm673_vm3, %v3631_v52  ;;  %v6456_v20 = vor.u32 %v7027_v62, %v6453_v6  ;;  %v7044_v6 = vld [vmem:[#allocation3 + $0xb8] sm:$0xf0] }
 0x492   : > { %5600 = vmatmul.bf16.gmra.mxu0 %v6456_v20 }
 0x493   : > { %6886 = vmatmul.msk.bf16.gmra.mxu1 %vm226_vm0, %v6460_v2  ;;  %v7036_v2 = vld [vmem:[#allocation3 + $0x7c] sm:$0xf] }
 0x494   : > { %3976 = vrot.lane.b32.xlu2 %v9644_v5, %s7175_s24  ;;  %4296 = vrot.lane.b32.xlu0 %v9645_v43, %s7175_s24  ;;  %v3653_v32 = vpop.permute.xlu1 %3652  ;;  %v9166_v17 = vpop.f32.mrf.mxu1 }
 0x495   : > { %3732 = vst.msk [vmem:[#allocation3 + $0x144] sm:$0xf] %vm673_vm3, %v3653_v32 }
 0x496   : > { %v4275_v10 = vpop.permute.xlu2 %4274  ;;  %v6491_v11 = vld [vmem:[#allocation3 + $0x80] sm:$0xf]  ;;  %v4269_v47 = vpop.permute.xlu0 %4268  ;;  %9650 = vst [vmem:[#allocation9_spill] sm:$0xff] %v9166_v17 }
 0x497   : > { %4363 = vst.msk [vmem:[#allocation3 + $0x98] sm:$0xf] %vm673_vm3, %v4275_v10  ;;  %v6465_v3 = vld [vmem:[#allocation3 + $0x64] sm:$0xf0]  ;;  %v6492_v27 = vor.u32 %v7039_v4, %v6491_v11 }
 0x498   : > { %4360 = vst.msk [vmem:[#allocation3 + $0x5c] sm:$0xf] %vm673_vm3, %v4269_v47  ;;  %v6468_v60 = vor.u32 %v7031_v19, %v6465_v3  ;;  %v6499_v4 = vld [vmem:[#allocation3 + $0x88] sm:$0xf]  ;;  %v7040_v47 = vld [vmem:[#allocation3 + $0x98] sm:$0xf0] }
 0x499   : > { %5521 = vmatmul.bf16.gmra.mxu3 %v6492_v27 }
 0x49a   : > { %5427 = vmatmul.bf16.gmra.mxu2 %v6468_v60 }
 0x49c   : > { %4298 = vrot.lane.b32.xlu2 %v8765_v35, %s7175_s24  ;;  %3662 = vrot.lane.b32.xlu0 %v9647_v13, %s7175_s24  ;;  %v3975_v54 = vpop.permute.xlu1 %3974  ;;  %v9648_v35 = vld [vmem:[#allocation14_spill] sm:$0xff]  ;;  %v9176_v60 = vpop.f32.mrf.mxu1 }
 0x49d   : > { %4053 = vst.msk [vmem:[#allocation3 + $0x15c] sm:$0xf] %vm673_vm3, %v3975_v54 }
 0x49e   : > { %v3957_v55 = vpop.permute.xlu2 %3956  ;;  %v3635_v25 = vpop.permute.xlu0 %3634  ;;  %v6493_v27 = vld [vmem:[#allocation3 + $0x94] sm:$0xf0]  ;;  %9651 = vst [vmem:[#allocation10_spill] sm:$0xff] %v9176_v60  ;;  %v9663_v60 = vld [vmem:[#allocation13_spill] sm:$0xff] }
 0x49f   : > { %4044 = vst.msk [vmem:[#allocation3 + $0xa8] sm:$0xf] %vm673_vm3, %v3957_v55  ;;  %v7032_v48 = vld [vmem:[#allocation3 + $0x5c] sm:$0xf] }
 0x4a0   : > { %3723 = vst.msk [vmem:[#allocation3 + $0x90] sm:$0xf] %vm673_vm3, %v3635_v25  ;;  %v6476_v37 = vor.u32 %v7032_v48, %v6473_v58  ;;  %v7041_v25 = vld [vmem:[#allocation3 + $0xa4] sm:$0xf] }
 0x4a2   : > { %5605 = vmatmul.bf16.gmra.mxu0 %v6476_v37 }
 0x4a3   : > { %6887 = vmatmul.msk.bf16.gmra.mxu1 %vm226_vm0, %v6480_v36 }
 0x4a4   : > { %3980 = vrot.lane.b32.xlu2 %v9648_v35, %s7175_s24  ;;  %4300 = vrot.lane.b32.xlu0 %v9649_v0, %s7175_s24  ;;  %v3657_v59 = vpop.permute.xlu1 %3656  ;;  %v6519_v35 = vld [vmem:[#allocation3 + $0xb0] sm:$0xf]  ;;  %v7045_v0 = vld [vmem:[#allocation3 + $0xc0] sm:$0xf0] }
 0x4a5   : > { %3734 = vst.msk [vmem:[#allocation3 + $0x16c] sm:$0xf] %vm673_vm3, %v3657_v59 }
 0x4a6   : > { %v4279_v52 = vpop.permute.xlu2 %4278  ;;  %v6511_v62 = vld [vmem:[#allocation3 + $0xa8] sm:$0xf]  ;;  %v4273_v20 = vpop.permute.xlu0 %4272 }
 0x4a7   : > { %4365 = vst.msk [vmem:[#allocation3 + $0xc0] sm:$0xf] %vm673_vm3, %v4279_v52  ;;  %v6485_v5 = vld [vmem:[#allocation3 + $0x8c] sm:$0xf0]  ;;  %v6512_v43 = vor.u32 %v7044_v6, %v6511_v62 }
 0x4a8   : > { %4362 = vst.msk [vmem:[#allocation3 + $0x84] sm:$0xf] %vm673_vm3, %v4273_v20  ;;  %v6488_v32 = vor.u32 %v7036_v2, %v6485_v5  ;;  %v6520_v20 = vor.u32 %v7045_v0, %v6519_v35  ;;  %v6559_v0 = vld [vmem:[#allocation3 + $0x100] sm:$0xf] }
 0x4a9   : > { %5526 = vmatmul.bf16.gmra.mxu3 %v6512_v43  ;;  %v7054_v43 = vld [vmem:[#allocation3 + $0x108] sm:$0xf0] }
 0x4aa   : > { %5432 = vmatmul.bf16.gmra.mxu2 %v6488_v32 }
 0x4ac   : > { %4302 = vrot.lane.b32.xlu2 %v8804_v24, %s7175_s24  ;;  %3666 = vrot.lane.b32.xlu0 %v8811_v9, %s7175_s24  ;;  %v3979_v10 = vpop.permute.xlu1 %3978  ;;  %v6500_v24 = vor.u32 %v7040_v47, %v6499_v4 }
 0x4ad   : > { %4055 = vst.msk [vmem:[#allocation3 + $0x184] sm:$0xf] %vm673_vm3, %v3979_v10  ;;  %v7046_v10 = vld [vmem:[#allocation3 + $0xcc] sm:$0xf] }
 0x4ae   : > { %v3961_v11 = vpop.permute.xlu2 %3960  ;;  %v3639_v19 = vpop.permute.xlu0 %3638  ;;  %v6513_v62 = vld [vmem:[#allocation3 + $0xbc] sm:$0xf0] }
 0x4af   : > { %4046 = vst.msk [vmem:[#allocation3 + $0xd0] sm:$0xf] %vm673_vm3, %v3961_v11  ;;  %v7037_v3 = vld [vmem:[#allocation3 + $0x84] sm:$0xf] }
 0x4b0   : > { %3725 = vst.msk [vmem:[#allocation3 + $0xb8] sm:$0xf] %vm673_vm3, %v3639_v19  ;;  %v6496_v13 = vor.u32 %v7037_v3, %v6493_v27  ;;  %v6539_v3 = vld [vmem:[#allocation3 + $0xd8] sm:$0xf]  ;;  %v7050_v27 = vld [vmem:[#allocation3 + $0xe8] sm:$0xf0] }
 0x4b2   : > { %5610 = vmatmul.bf16.gmra.mxu0 %v6496_v13 }
 0x4b3   : > { %6888 = vmatmul.msk.bf16.gmra.mxu1 %vm226_vm0, %v6500_v24 }
 0x4b4   : > { %3984 = vrot.lane.b32.xlu2 %v8806_v51, %s7175_s24  ;;  %4304 = vrot.lane.b32.xlu0 %v8826_v63, %s7175_s24  ;;  %v3661_v9 = vpop.permute.xlu1 %3660  ;;  %v9187_v51 = vpop.f32.mrf.mxu1 }
 0x4b5   : > { %3736 = vst.msk [vmem:[#allocation3 + $0x194] sm:$0xf] %vm673_vm3, %v3661_v9 }
 0x4b6   : > { %v4283_v54 = vpop.permute.xlu2 %4282  ;;  %v6531_v55 = vld [vmem:[#allocation3 + $0xd0] sm:$0xf]  ;;  %v4277_v28 = vpop.permute.xlu0 %4276  ;;  %9652 = vst [vmem:[#allocation12_spill] sm:$0xff] %v9187_v51 }
 0x4b7   : > { %4367 = vst.msk [vmem:[#allocation3 + $0xe8] sm:$0xf] %vm673_vm3, %v4283_v54  ;;  %v6505_v48 = vld [vmem:[#allocation3 + $0xb4] sm:$0xf0]  ;;  %v6532_v58 = vor.u32 %v7049_v12, %v6531_v55 }
 0x4b8   : > { %4364 = vst.msk [vmem:[#allocation3 + $0xac] sm:$0xf] %vm673_vm3, %v4277_v28  ;;  %v6508_v37 = vor.u32 %v7041_v25, %v6505_v48  ;;  %v7059_v28 = vld [vmem:[#allocation3 + $0x130] sm:$0xf0] }
 0x4b9   : > { %5531 = vmatmul.bf16.gmra.mxu3 %v6532_v58  ;;  %v7051_v48 = vld [vmem:[#allocation3 + $0xf4] sm:$0xf] }
 0x4ba   : > { %5437 = vmatmul.bf16.gmra.mxu2 %v6508_v37 }
 0x4bc   : > { %4306 = vrot.lane.b32.xlu2 %v8849_v45, %s7175_s24  ;;  %3670 = vrot.lane.b32.xlu0 %v8851_v57, %s7175_s24  ;;  %v3983_v63 = vpop.permute.xlu1 %3982  ;;  %v9197_v45 = vpop.f32.mrf.mxu1 }
 0x4bd   : > { %4057 = vst.msk [vmem:[#allocation3 + $0x1ac] sm:$0xf] %vm673_vm3, %v3983_v63 }
 0x4be   : > { %v3965_v36 = vpop.permute.xlu2 %3964  ;;  %v3643_v59 = vpop.permute.xlu0 %3642  ;;  %9653 = vst [vmem:[#allocation15_spill] sm:$0xff] %v9197_v45  ;;  %v6533_v9 = vld [vmem:[#allocation3 + $0xe4] sm:$0xf0] }
 0x4bf   : > { %4048 = vst.msk [vmem:[#allocation3 + $0xf8] sm:$0xf] %vm673_vm3, %v3965_v36  ;;  %v7042_v52 = vld [vmem:[#allocation3 + $0xac] sm:$0xf] }
 0x4c0   : > { %3727 = vst.msk [vmem:[#allocation3 + $0xe0] sm:$0xf] %vm673_vm3, %v3643_v59  ;;  %v6516_v6 = vor.u32 %v7042_v52, %v6513_v62  ;;  %v7055_v59 = vld [vmem:[#allocation3 + $0x110] sm:$0xf0] }
 0x4c2   : > { %5615 = vmatmul.bf16.gmra.mxu0 %v6516_v6 }
 0x4c3   : > { %6889 = vmatmul.msk.bf16.gmra.mxu1 %vm226_vm0, %v6520_v20 }
 0x4c4   : > { %3988 = vrot.lane.b32.xlu2 %v8853_v1, %s7175_s24  ;;  %4308 = vrot.lane.b32.xlu0 %v9005_v61, %s7175_s24  ;;  %v3665_v57 = vpop.permute.xlu1 %3664  ;;  %v9211_v61 = vpop.f32.mrf.mxu1 }
 0x4c5   : > { %3738 = vst.msk [vmem:[#allocation3 + $0x1bc] sm:$0xf] %vm673_vm3, %v3665_v57 }
 0x4c6   : > { %v4287_v2 = vpop.permute.xlu2 %4286  ;;  %v6551_v5 = vld [vmem:[#allocation3 + $0xf8] sm:$0xf]  ;;  %v4281_v32 = vpop.permute.xlu0 %4280  ;;  %9654 = vst [vmem:[#allocation14_spill] sm:$0xff] %v9211_v61 }
 0x4c7   : > { %4369 = vst.msk [vmem:[#allocation3 + $0x110] sm:$0xf] %vm673_vm3, %v4287_v2  ;;  %v6525_v11 = vld [vmem:[#allocation3 + $0xdc] sm:$0xf0]  ;;  %v6552_v4 = vor.u32 %v7054_v43, %v6551_v5 }
 0x4c8   : > { %4366 = vst.msk [vmem:[#allocation3 + $0xd4] sm:$0xf] %vm673_vm3, %v4281_v32  ;;  %v6528_v47 = vor.u32 %v7046_v10, %v6525_v11  ;;  %v7064_v32 = vld [vmem:[#allocation3 + $0x158] sm:$0xf0] }
 0x4c9   : > { %5536 = vmatmul.bf16.gmra.mxu3 %v6552_v4  ;;  %v7056_v11 = vld [vmem:[#allocation3 + $0x11c] sm:$0xf] }
 0x4ca   : > { %5442 = vmatmul.bf16.gmra.mxu2 %v6528_v47 }
 0x4cc   : > { %4310 = vrot.lane.b32.xlu2 %v9029_v33, %s7175_s24  ;;  %3674 = vrot.lane.b32.xlu0 %v9034_v21, %s7175_s24  ;;  %v3987_v1 = vpop.permute.xlu1 %3986  ;;  %v6540_v33 = vor.u32 %v7050_v27, %v6539_v3  ;;  %v9222_v63 = vpop.f32.mrf.mxu1 }
 0x4cd   : > { %4059 = vst.msk [vmem:[#allocation3 + $0x1d4] sm:$0xf] %vm673_vm3, %v3987_v1 }
 0x4ce   : > { %v3969_v19 = vpop.permute.xlu2 %3968  ;;  %v3647_v13 = vpop.permute.xlu0 %3646  ;;  %9655 = vst [vmem:[#allocation17_spill] sm:$0xff] %v9222_v63  ;;  %v6553_v6 = vld [vmem:[#allocation3 + $0x10c] sm:$0xf0] }
 0x4cf   : > { %4050 = vst.msk [vmem:[#allocation3 + $0x120] sm:$0xf] %vm673_vm3, %v3969_v19  ;;  %v7047_v24 = vld [vmem:[#allocation3 + $0xd4] sm:$0xf] }
 0x4d0   : > { %3729 = vst.msk [vmem:[#allocation3 + $0x108] sm:$0xf] %vm673_vm3, %v3647_v13  ;;  %v6536_v54 = vor.u32 %v7047_v24, %v6533_v9  ;;  %v3039_v27 = vpop.f32.mrf.mxu0  ;;  %v9658_v24 = vld [vmem:[#allocation6_spill] sm:$0xff] }
 0x4d2   : > { %5620 = vmatmul.bf16.gmra.mxu0 %v6536_v54 }
 0x4d3   : > { %6890 = vmatmul.msk.bf16.gmra.mxu1 %vm226_vm0, %v6540_v33  ;;  %v6579_v33 = vld [vmem:[#allocation3 + $0x128] sm:$0xf] }
 0x4d4   : > { %3992 = vrot.lane.b32.xlu2 %v9036_v34, %s7175_s24  ;;  %4312 = vrot.lane.b32.xlu0 %v9056_v39, %s7175_s24  ;;  %v3669_v21 = vpop.permute.xlu1 %3668 }
 0x4d5   : > { %3740 = vst.msk [vmem:[#allocation3 + $0x1e4] sm:$0xf] %vm673_vm3, %v3669_v21  ;;  %v7060_v21 = vld [vmem:[#allocation3 + $0x138] sm:$0xf0] }
 0x4d6   : > { %v4291_v55 = vpop.permute.xlu2 %4290  ;;  %v6571_v12 = vld [vmem:[#allocation3 + $0x120] sm:$0xf]  ;;  %v4285_v25 = vpop.permute.xlu0 %4284 }
 0x4d7   : > { %4371 = vst.msk [vmem:[#allocation3 + $0x138] sm:$0xf] %vm673_vm3, %v4291_v55  ;;  %v6545_v58 = vld [vmem:[#allocation3 + $0x104] sm:$0xf0]  ;;  %v6572_v37 = vor.u32 %v7059_v28, %v6571_v12 }
 0x4d8   : > { %4368 = vst.msk [vmem:[#allocation3 + $0xfc] sm:$0xf] %vm673_vm3, %v4285_v25  ;;  %v6548_v34 = vor.u32 %v7051_v48, %v6545_v58 }
 0x4d9   : > { %5541 = vmatmul.bf16.gmra.mxu3 %v6572_v37  ;;  %v6580_v37 = vor.u32 %v7060_v21, %v6579_v33  ;;  %v6599_v21 = vld [vmem:[#allocation3 + $0x150] sm:$0xf] }
 0x4da   : > { %5447 = vmatmul.bf16.gmra.mxu2 %v6548_v34 }
 0x4dc   : > { %v2950_v39 = vpop.f32.mrf.mxu3  ;;  %4314 = vrot.lane.b32.xlu2 %v9074_v26, %s7175_s24  ;;  %3678 = vrot.lane.b32.xlu0 %v9079_v22, %s7175_s24  ;;  %v3991_v36 = vpop.permute.xlu1 %3990  ;;  %v6560_v26 = vor.u32 %v7055_v59, %v6559_v0 }
 0x4dd   : > { %4061 = vst.msk [vmem:[#allocation3 + $0x1fc] sm:$0xf] %vm673_vm3, %v3991_v36 }
 0x4de   : > { %v3973_v35 = vpop.permute.xlu2 %3972  ;;  %v3651_v52 = vpop.permute.xlu0 %3650  ;;  %v6573_v28 = vld [vmem:[#allocation3 + $0x134] sm:$0xf0] }
 0x4df   : > { %4052 = vst.msk [vmem:[#allocation3 + $0x148] sm:$0xf] %vm673_vm3, %v3973_v35  ;;  %v7052_v62 = vld [vmem:[#allocation3 + $0xfc] sm:$0xf] }
 0x4e0   : > { %v9231_v20 = vpop.f32.mrf.mxu1  ;;  %3731 = vst.msk [vmem:[#allocation3 + $0x130] sm:$0xf] %vm673_vm3, %v3651_v52  ;;  %v6556_v57 = vor.u32 %v7052_v62, %v6553_v6 }
 0x4e1   : > { %9656 = vst [vmem:[#allocation18_spill] sm:$0xff] %v9231_v20  ;;  %v7080_v20 = vld [vmem:[#allocation3 + $0x1d8] sm:$0xf0] }
 0x4e2   : > { %5625 = vmatmul.bf16.gmra.mxu0 %v6556_v57  ;;  %v7069_v57 = vld [vmem:[#allocation3 + $0x180] sm:$0xf0] }
 0x4e3   : > { %6891 = vmatmul.msk.bf16.gmra.mxu1 %vm226_vm0, %v6560_v26  ;;  %v3041_v26 = vpop.f32.mrf.mxu0 }
 0x4e4   : > { %v2952_v22 = vpop.f32.mrf.mxu3  ;;  %3996 = vrot.lane.b32.xlu2 %v9081_v31, %s7175_s24  ;;  %v3673_v2 = vpop.permute.xlu1 %3672 }
 0x4e5   : > { %3742 = vst.msk [vmem:[#allocation3 + $0x20c] sm:$0xf] %vm673_vm3, %v3673_v2 }
 0x4e6   : > { %v4295_v5 = vpop.permute.xlu2 %4294  ;;  %v6591_v43 = vld [vmem:[#allocation3 + $0x148] sm:$0xf]  ;;  %v4289_v10 = vpop.permute.xlu0 %4288 }
 0x4e7   : > { %4373 = vst.msk [vmem:[#allocation3 + $0x160] sm:$0xf] %vm673_vm3, %v4295_v5  ;;  %v6565_v4 = vld [vmem:[#allocation3 + $0x12c] sm:$0xf0]  ;;  %v6592_v47 = vor.u32 %v7064_v32, %v6591_v43  ;;  %v7061_v5 = vld [vmem:[#allocation3 + $0x144] sm:$0xf] }
 0x4e8   : > { %v9239_v1 = vpop.f32.mrf.mxu1  ;;  %4370 = vst.msk [vmem:[#allocation3 + $0x124] sm:$0xf] %vm673_vm3, %v4289_v10  ;;  %v6568_v19 = vor.u32 %v7056_v11, %v6565_v4 }
 0x4e9   : > { %9657 = vst [vmem:[#allocation19_spill] sm:$0xff] %v9239_v1  ;;  %5546 = vmatmul.bf16.gmra.mxu3 %v6592_v47 }
 0x4ea   : > { %5452 = vmatmul.bf16.gmra.mxu2 %v6568_v19 }
 0x4ec   : > { %v9242_v31 = vpop.f32.mrf.mxu3  ;;  %v3995_v3 = vpop.permute.xlu1 %3994 }
 0x4ed   : > { %v2861_v13 = vpop.f32.mrf.mxu2  ;;  %4063 = vst.msk [vmem:[#allocation3 + $0x224] sm:$0xf] %vm673_vm3, %v3995_v3 }
 0x4ee   : > { %v2862_v9 = vadd.f32 %v2861_v13, %v9658_v24  ;;  %v3977_v54 = vpop.permute.xlu2 %3976  ;;  %v3655_v55 = vpop.permute.xlu0 %3654 }
 0x4ef   : > { %4054 = vst.msk [vmem:[#allocation3 + $0x170] sm:$0xf] %vm673_vm3, %v3977_v54  ;;  %v7057_v12 = vld [vmem:[#allocation3 + $0x124] sm:$0xf] }
 0x4f0   : > { %v2951_v25 = vadd.f32 %v2950_v39, %v2862_v9  ;;  %v9247_v48 = vpop.f32.mrf.mxu1  ;;  %3733 = vst.msk [vmem:[#allocation3 + $0x158] sm:$0xf] %vm673_vm3, %v3655_v55  ;;  %v6576_v58 = vor.u32 %v7057_v12, %v6573_v28  ;;  %v9660_v39 = vld [vmem:[#allocation7_spill] sm:$0xff]  ;;  %v7065_v55 = vld [vmem:[#allocation3 + $0x160] sm:$0xf0] }
 0x4f1   : > { %9659 = vst [vmem:[#allocation6_spill] sm:$0xff] %v9247_v48  ;;  %v7076_v48 = vld [vmem:[#allocation3 + $0x1bc] sm:$0xf] }
 0x4f2   : > { %v3040_v34 = vadd.f32 %v3039_v27, %v2951_v25  ;;  %5630 = vmatmul.bf16.gmra.mxu0 %v6576_v58  ;;  %v6593_v58 = vld [vmem:[#allocation3 + $0x15c] sm:$0xf0] }
 0x4f3   : > { %6892 = vmatmul.msk.bf16.gmra.mxu1 %vm226_vm0, %v6580_v37 }
 0x4f4   : > { %v3074_v36 = vmax.f32 %v3040_v34, 0.0  ;;  %v9251_v35 = vpop.f32.mrf.mxu3  ;;  %v3677_v0 = vpop.permute.xlu1 %3676 }
 0x4f5   : > { %v2863_v59 = vpop.f32.mrf.mxu2  ;;  %3744 = vst.msk [vmem:[#allocation3 + $0x234] sm:$0xf] %vm673_vm3, %v3677_v0 }
 0x4f6   : > { %3106 = vst.msk [vmem:[#allocation2 + $0x181] sm:$0xff] %vm226_vm0, %v3074_v36  ;;  %v2864_v52 = vadd.f32 %v2863_v59, %v9660_v39  ;;  %v4299_v62 = vpop.permute.xlu2 %4298  ;;  %v6611_v6 = vld [vmem:[#allocation3 + $0x170] sm:$0xf]  ;;  %v4293_v2 = vpop.permute.xlu0 %4292  ;;  %v6600_v36 = vor.u32 %v7065_v55, %v6599_v21 }
 0x4f7   : > { %4375 = vst.msk [vmem:[#allocation3 + $0x188] sm:$0xf] %vm673_vm3, %v4299_v62  ;;  %v6585_v43 = vld [vmem:[#allocation3 + $0x154] sm:$0xf0]  ;;  %v6612_v32 = vor.u32 %v7069_v57, %v6611_v6 }
 0x4f8   : > { %v2953_v10 = vadd.f32 %v2952_v22, %v2864_v52  ;;  %v9257_v11 = vpop.f32.mrf.mxu1  ;;  %4372 = vst.msk [vmem:[#allocation3 + $0x14c] sm:$0xf] %vm673_vm3, %v4293_v2  ;;  %v6588_v4 = vor.u32 %v7061_v5, %v6585_v43  ;;  %v7074_v43 = vld [vmem:[#allocation3 + $0x1a8] sm:$0xf0] }
 0x4f9   : > { %9661 = vst [vmem:[#allocation7_spill] sm:$0xff] %v9257_v11  ;;  %5551 = vmatmul.bf16.gmra.mxu3 %v6612_v32 }
 0x4fa   : > { %v3042_v47 = vadd.f32 %v3041_v26, %v2953_v10  ;;  %5457 = vmatmul.bf16.gmra.mxu2 %v6588_v4 }
 0x4fc   : > { %v3075_v19 = vmax.f32 %v3042_v47, 0.0  ;;  %v9260_v3 = vpop.f32.mrf.mxu3  ;;  %v3999_v27 = vpop.permute.xlu1 %3998  ;;  %v7066_v47 = vld [vmem:[#allocation3 + $0x16c] sm:$0xf] }
 0x4fd   : > { %v9262_v13 = vpop.f32.mrf.mxu2  ;;  %4065 = vst.msk [vmem:[#allocation3 + $0x24c] sm:$0xf] %vm673_vm3, %v3999_v27  ;;  %v4192_v24 = vld [vmem:[#allocation2 + $0x181] sm:$0xff] }
 0x4fe   : > { %v3554_v9 = vld [vmem:[#allocation2 + $0x180] sm:$0xff]  ;;  %3107 = vst.msk [vmem:[#allocation2 + $0x189] sm:$0xff] %vm226_vm0, %v3075_v19  ;;  %v3981_v22 = vpop.permute.xlu2 %3980  ;;  %v4224_v54 = vpack.c.bf16 %v4192_v24, %v4192_v24  ;;  %v3659_v28 = vpop.permute.xlu0 %3658 }
 0x4ff   : > { %v3586_v33 = vpack.c.bf16 %v3554_v9, %v3554_v9  ;;  %4056 = vst.msk [vmem:[#allocation3 + $0x198] sm:$0xf] %vm673_vm3, %v3981_v22  ;;  %v9267_v12 = vpop.f32.mrf.mxu0  ;;  %v7062_v25 = vld [vmem:[#allocation3 + $0x14c] sm:$0xf] }
 0x500   : > { %v9269_v37 = vpop.f32.mrf.mxu1  ;;  %3735 = vst.msk [vmem:[#allocation3 + $0x180] sm:$0xf] %vm673_vm3, %v3659_v28  ;;  %4316 = vrot.lane.b32.xlu0 %v4224_v54, %s7175_s24  ;;  %v6596_v34 = vor.u32 %v7062_v25, %v6593_v58  ;;  %v6619_v25 = vld [vmem:[#allocation3 + $0x178] sm:$0xf]  ;;  %v7070_v58 = vld [vmem:[#allocation3 + $0x188] sm:$0xf0] }
 0x501   : > { %3680 = vrot.lane.b32.xlu1 %v3586_v33, %s7175_s24  ;;  %3842 = vst.msk [vmem:[#allocation3 + $0x260] sm:$0xf] %vm448_vm2, %v4224_v54  ;;  %v4194_v54 = vld [vmem:[#allocation2 + $0x199] sm:$0xff] }
 0x502   : > { %5635 = vmatmul.bf16.gmra.mxu0 %v6596_v34  ;;  %4160 = vst.msk [vmem:[#allocation3 + $0x23c] sm:$0xf] %vm448_vm2, %v3586_v33  ;;  %v4226_v21 = vpack.c.bf16 %v4194_v54, %v4194_v54 }
 0x503   : > { %6893 = vmatmul.msk.bf16.gmra.mxu1 %vm226_vm0, %v6600_v36 }
 0x504   : > { %v9277_v0 = vpop.f32.mrf.mxu3 }
 0x505   : > { %v9279_v59 = vpop.f32.mrf.mxu2  ;;  %v4193_v39 = vld [vmem:[#allocation2 + $0x189] sm:$0xff] }
 0x506   : > { %v3555_v52 = vld [vmem:[#allocation2 + $0x188] sm:$0xff]  ;;  %v4303_v6 = vpop.permute.xlu2 %4302  ;;  %v4225_v57 = vpack.c.bf16 %v4193_v39, %v4193_v39  ;;  %v4297_v4 = vpop.permute.xlu0 %4296 }
 0x507   : > { %v3875_v62 = vld [vmem:[#allocation2 + $0x18a] sm:$0xff]  ;;  %v3587_v26 = vpack.c.bf16 %v3555_v52, %v3555_v52  ;;  %v3874_v32 = vld [vmem:[#allocation2 + $0x182] sm:$0xff]  ;;  %4377 = vst.msk [vmem:[#allocation3 + $0x1b0] sm:$0xf] %vm673_vm3, %v4303_v6  ;;  %v9282_v10 = vpop.f32.mrf.mxu0  ;;  %v6613_v52 = vld [vmem:[#allocation3 + $0x184] sm:$0xf0] }
 0x508   : > { %v3907_v2 = vpack.c.bf16 %v3875_v62, %v3875_v62  ;;  %v6631_v5 = vld [vmem:[#allocation3 + $0x198] sm:$0xf]  ;;  %v6605_v19 = vld [vmem:[#allocation3 + $0x17c] sm:$0xf0]  ;;  %v3906_v24 = vpack.c.bf16 %v3874_v32, %v3874_v32  ;;  %v9284_v9 = vpop.f32.mrf.mxu1  ;;  %4374 = vst.msk [vmem:[#allocation3 + $0x174] sm:$0xf] %vm673_vm3, %v4297_v4  ;;  %4318 = vrot.lane.b32.xlu2 %v4225_v57, %s7175_s24 }
 0x509   : > { %v6632_v27 = vor.u32 %v7074_v43, %v6631_v5  ;;  %3682 = vrot.lane.b32.xlu0 %v3587_v26, %s7175_s24  ;;  %v6608_v22 = vor.u32 %v7066_v47, %v6605_v19  ;;  %4161 = vst.msk [vmem:[#allocation3 + $0x250] sm:$0xf] %vm448_vm2, %v3587_v26  ;;  %v4195_v26 = vld [vmem:[#allocation2 + $0x1a1] sm:$0xff] }
 0x50a   : > { %4002 = vrot.lane.b32.xlu1 %v3907_v2, %s7175_s24  ;;  %4480 = vst.msk [vmem:[#allocation3 + $0x240] sm:$0xf] %vm448_vm2, %v3906_v24  ;;  %v4227_v5 = vpack.c.bf16 %v4195_v26, %v4195_v26  ;;  %v7079_v47 = vld [vmem:[#allocation3 + $0x1d0] sm:$0xf0] }
 0x50b   : > { %5556 = vmatmul.bf16.gmra.mxu3 %v6632_v27  ;;  %5462 = vmatmul.bf16.gmra.mxu2 %v6608_v22  ;;  %4481 = vst.msk [vmem:[#allocation3 + $0x254] sm:$0xf] %vm448_vm2, %v3907_v2 }
 0x50c   : > { %v9293_v33 = vpop.f32.mrf.mxu3  ;;  %3843 = vst.msk [vmem:[#allocation3 + $0x274] sm:$0xf] %vm448_vm2, %v4225_v57  ;;  %v6620_v57 = vor.u32 %v7070_v58, %v6619_v25 }
 0x50d   : > { %v9295_v55 = vpop.f32.mrf.mxu2 }
 0x50e   : > { %v3985_v28 = vpop.permute.xlu2 %3984  ;;  %v3663_v36 = vpop.permute.xlu0 %3662 }
 0x50f   : > { %4058 = vst.msk [vmem:[#allocation3 + $0x1c0] sm:$0xf] %vm673_vm3, %v3985_v28  ;;  %v9299_v34 = vpop.f32.mrf.mxu0  ;;  %v7067_v39 = vld [vmem:[#allocation3 + $0x174] sm:$0xf] }
 0x510   : > { %v9301_v62 = vpop.f32.mrf.mxu1  ;;  %3737 = vst.msk [vmem:[#allocation3 + $0x1a8] sm:$0xf] %vm673_vm3, %v3663_v36  ;;  %4000 = vrot.lane.b32.xlu2 %v3906_v24, %s7175_s24  ;;  %v6616_v6 = vor.u32 %v7067_v39, %v6613_v52  ;;  %v7071_v24 = vld [vmem:[#allocation3 + $0x194] sm:$0xf]  ;;  %v6639_v39 = vld [vmem:[#allocation3 + $0x1a0] sm:$0xf] }
 0x511   : > { %4320 = vrot.lane.b32.xlu0 %v4226_v21, %s7175_s24  ;;  %v7075_v52 = vld [vmem:[#allocation3 + $0x1b0] sm:$0xf0] }
 0x512   : > { %5640 = vmatmul.bf16.gmra.mxu0 %v6616_v6 }
 0x513   : > { %6894 = vmatmul.msk.bf16.gmra.mxu1 %vm226_vm0, %v6620_v57 }
 0x514   : > { %v9307_v2 = vpop.f32.mrf.mxu3 }
 0x515   : > { %v9309_v43 = vpop.f32.mrf.mxu2 }
 0x516   : > { %v4307_v32 = vpop.permute.xlu2 %4306  ;;  %v6651_v4 = vld [vmem:[#allocation3 + $0x1c0] sm:$0xf]  ;;  %v4301_v27 = vpop.permute.xlu0 %4300 }
 0x517   : > { %4379 = vst.msk [vmem:[#allocation3 + $0x1d8] sm:$0xf] %vm673_vm3, %v4307_v32  ;;  %v9312_v19 = vpop.f32.mrf.mxu0  ;;  %v6625_v22 = vld [vmem:[#allocation3 + $0x1a4] sm:$0xf0]  ;;  %v6652_v54 = vor.u32 %v7079_v47, %v6651_v4  ;;  %v6633_v32 = vld [vmem:[#allocation3 + $0x1ac] sm:$0xf0]  ;;  %v6640_v47 = vor.u32 %v7075_v52, %v6639_v39 }
 0x518   : > { %v9314_v21 = vpop.f32.mrf.mxu1  ;;  %4376 = vst.msk [vmem:[#allocation3 + $0x19c] sm:$0xf] %vm673_vm3, %v4301_v27  ;;  %v6628_v28 = vor.u32 %v7071_v24, %v6625_v22  ;;  %4322 = vrot.lane.b32.xlu2 %v4227_v5, %s7175_s24  ;;  %v9342_v52 = vld [vmem:[%s9615_s4] ss:$0 sm:$0xff] }
 0x519   : > { %v5332_v17 = vadd.f32 %v9342_v52, %v9663_v60 }
 0x51b   : > { %5561 = vmatmul.bf16.gmra.mxu3 %v6652_v54  ;;  %5467 = vmatmul.bf16.gmra.mxu2 %v6628_v28  ;;  %v7084_v28 = vld [vmem:[#allocation3 + $0x1f8] sm:$0xf0] }
 0x51c   : > { %v9318_v25 = vpop.f32.mrf.mxu3 }
 0x51d   : > { %v9320_v58 = vpop.f32.mrf.mxu2 }
 0x51e   : > { %v3989_v36 = vpop.permute.xlu2 %3988  ;;  %v3667_v57 = vpop.permute.xlu0 %3666 }
 0x51f   : > { %4060 = vst.msk [vmem:[#allocation3 + $0x1e8] sm:$0xf] %vm673_vm3, %v3989_v36  ;;  %v9323_v6 = vpop.f32.mrf.mxu0  ;;  %v7072_v26 = vld [vmem:[#allocation3 + $0x19c] sm:$0xf] }
 0x520   : > { %v9325_v4 = vpop.f32.mrf.mxu1  ;;  %3739 = vst.msk [vmem:[#allocation3 + $0x1d0] sm:$0xf] %vm673_vm3, %v3667_v57  ;;  %v6636_v5 = vor.u32 %v7072_v26, %v6633_v32 }
 0x522   : > { %5645 = vmatmul.bf16.gmra.mxu0 %v6636_v5 }
 0x523   : > { %6895 = vmatmul.msk.bf16.gmra.mxu1 %vm226_vm0, %v6640_v47  ;;  %v9662_v47 = vld [vmem:[#allocation11_spill] sm:$0xff] }
 0x524   : > { %v9329_v27 = vpop.f32.mrf.mxu3 }
 0x525   : > { %v9331_v24 = vpop.f32.mrf.mxu2 }
 0x526   : > { %v4311_v22 = vpop.permute.xlu2 %4310  ;;  %v6671_v54 = vld [vmem:[#allocation3 + $0x1e8] sm:$0xf]  ;;  %v4305_v11 = vpop.permute.xlu0 %4304 }
 0x527   : > { %4381 = vst.msk [vmem:[#allocation3 + $0x200] sm:$0xf] %vm673_vm3, %v4311_v22  ;;  %v9334_v36 = vpop.f32.mrf.mxu0  ;;  %v6645_v1 = vld [vmem:[#allocation3 + $0x1cc] sm:$0xf0]  ;;  %v6672_v57 = vor.u32 %v7084_v28, %v6671_v54  ;;  %v5330_v22 = vadd.f32 %v9342_v52, %v9662_v47  ;;  %v6659_v28 = vld [vmem:[#allocation3 + $0x1c8] sm:$0xf] }
 0x528   : > { %v9336_v26 = vpop.f32.mrf.mxu1  ;;  %4378 = vst.msk [vmem:[#allocation3 + $0x1c4] sm:$0xf] %vm673_vm3, %v4305_v11  ;;  %v6648_v39 = vor.u32 %v7076_v48, %v6645_v1  ;;  %v6660_v45 = vor.u32 %v7080_v20, %v6659_v28 }
 0x529   : > { %v5419_v63 = vadd.f32 %v9262_v13, %v5330_v22  ;;  %v7089_v22 = vld [vmem:[#allocation3 + $0x220] sm:$0xf0] }
 0x52b   : > { %5566 = vmatmul.bf16.gmra.mxu3 %v6672_v57  ;;  %5472 = vmatmul.bf16.gmra.mxu2 %v6648_v39  ;;  %v6653_v57 = vld [vmem:[#allocation3 + $0x1d4] sm:$0xf0]  ;;  %v5508_v47 = vadd.f32 %v9242_v31, %v5419_v63  ;;  %v5421_v31 = vadd.f32 %v9279_v59, %v5332_v17  ;;  %v6679_v59 = vld [vmem:[#allocation3 + $0x1f0] sm:$0xf] }
 0x52c   : > { %v9344_v32 = vpop.f32.mrf.mxu3 }
 0x52d   : > { %v9346_v5 = vpop.f32.mrf.mxu2  ;;  %v5597_v63 = vadd.f32 %v9267_v12, %v5508_v47  ;;  %v7085_v47 = vld [vmem:[#allocation3 + $0x200] sm:$0xf0] }
 0x52e   : > { %v3993_v54 = vpop.permute.xlu2 %3992  ;;  %v3671_v48 = vpop.permute.xlu0 %3670 }
 0x52f   : > { %4062 = vst.msk [vmem:[#allocation3 + $0x210] sm:$0xf] %vm673_vm3, %v3993_v54  ;;  %v9351_v1 = vpop.f32.mrf.mxu0  ;;  %v7077_v11 = vld [vmem:[#allocation3 + $0x1c4] sm:$0xf] }
 0x530   : > { %v9354_v39 = vpop.f32.mrf.mxu1  ;;  %3741 = vst.msk [vmem:[#allocation3 + $0x1f8] sm:$0xf] %vm673_vm3, %v3671_v48  ;;  %v6656_v61 = vor.u32 %v7077_v11, %v6653_v57  ;;  %v5686_v57 = vadd.f32 %v9269_v37, %v5597_v63  ;;  %v6673_v37 = vld [vmem:[#allocation3 + $0x1fc] sm:$0xf0] }
 0x532   : > { %5650 = vmatmul.bf16.gmra.mxu0 %v6656_v61  ;;  %v7081_v61 = vld [vmem:[#allocation3 + $0x1e4] sm:$0xf] }
 0x533   : > { %6896 = vmatmul.msk.bf16.gmra.mxu1 %vm226_vm0, %v6660_v45 }
 0x534   : > { %v9359_v51 = vpop.f32.mrf.mxu3 }
 0x535   : > { %v9361_v54 = vpop.f32.mrf.mxu2 }
 0x536   : > { %v4315_v16 = vpop.permute.xlu2 %4314  ;;  %v6691_v13 = vld [vmem:[#allocation3 + $0x210] sm:$0xf]  ;;  %v4309_v20 = vpop.permute.xlu0 %4308 }
 0x537   : > { %4383 = vst.msk [vmem:[#allocation3 + $0x228] sm:$0xf] %vm673_vm3, %v4315_v16  ;;  %v9366_v48 = vpop.f32.mrf.mxu0  ;;  %v6665_v28 = vld [vmem:[#allocation3 + $0x1f4] sm:$0xf0]  ;;  %v6692_v45 = vor.u32 %v7089_v22, %v6691_v13  ;;  %v5510_v16 = vadd.f32 %v9251_v35, %v5421_v31  ;;  %v9664_v13 = vld [vmem:[#allocation16_spill] sm:$0xff]  ;;  %v6680_v31 = vor.u32 %v7085_v47, %v6679_v59 }
 0x538   : > { %v9370_v11 = vpop.f32.mrf.mxu1  ;;  %4380 = vst.msk [vmem:[#allocation3 + $0x1ec] sm:$0xf] %vm673_vm3, %v4309_v20  ;;  %v6668_v60 = vor.u32 %v7081_v61, %v6665_v28  ;;  %v5335_v12 = vadd.f32 %v9342_v52, %v9664_v13  ;;  %v7086_v47 = vld [vmem:[#allocation3 + $0x20c] sm:$0xf] }
 0x539   : > { %v5599_v35 = vadd.f32 %v9282_v10, %v5510_v16  ;;  %v5337_v10 = vadd.f32 %v9342_v52, %v8802_v40  ;;  %v7094_v16 = vld [vmem:[#allocation3 + $0x248] sm:$0xf0] }
 0x53a   : > { %v5424_v28 = vadd.f32 %v9295_v55, %v5335_v12 }
 0x53b   : > { %5571 = vmatmul.bf16.gmra.mxu3 %v6692_v45  ;;  %5477 = vmatmul.bf16.gmra.mxu2 %v6668_v60  ;;  %v5688_v60 = vadd.f32 %v9284_v9, %v5599_v35 }
 0x53c   : > { %v9375_v46 = vpop.f32.mrf.mxu3 }
 0x53d   : > { %v9377_v38 = vpop.f32.mrf.mxu2 }
 0x53e   : > { %v3997_v17 = vpop.permute.xlu2 %3996  ;;  %v3675_v20 = vpop.permute.xlu0 %3674 }
 0x53f   : > { %5765 = vxpose.xlu1.b32.start [1/16] (narrow) %v5686_v57, 64  ;;  %4064 = vst.msk [vmem:[#allocation3 + $0x238] sm:$0xf] %vm673_vm3, %v3997_v17  ;;  %v9382_v22 = vpop.f32.mrf.mxu0  ;;  %v7082_v61 = vld [vmem:[#allocation3 + $0x1ec] sm:$0xf]  ;;  %v5513_v57 = vadd.f32 %v9260_v3, %v5424_v28  ;;  %v5426_v3 = vadd.f32 %v9309_v43, %v5337_v10 }
 0x540   : > { %v9386_v45 = vpop.f32.mrf.mxu1  ;;  %3743 = vst.msk [vmem:[#allocation3 + $0x220] sm:$0xf] %vm673_vm3, %v3675_v20  ;;  %v6676_v63 = vor.u32 %v7082_v61, %v6673_v37  ;;  %v6699_v43 = vld [vmem:[#allocation3 + $0x218] sm:$0xf] }
 0x541   : > { %v5602_v9 = vadd.f32 %v9299_v34, %v5513_v57  ;;  %v5515_v28 = vadd.f32 %v9277_v0, %v5426_v3  ;;  %v5340_v34 = vadd.f32 %v9342_v52, %v8831_v56 }
 0x542   : > { %5655 = vmatmul.bf16.gmra.mxu0 %v6676_v63 }
 0x543   : > { %6897 = vmatmul.msk.bf16.gmra.mxu1 %vm226_vm0, %v6680_v31  ;;  %v5691_v40 = vadd.f32 %v9301_v62, %v5602_v9  ;;  %v5429_v62 = vadd.f32 %v9320_v58, %v5340_v34 }
 0x544   : > { %v9392_v13 = vpop.f32.mrf.mxu3 }
 0x545   : > { %v9394_v17 = vpop.f32.mrf.mxu2 }
 0x546   : > { %v6711_v55 = vld [vmem:[#allocation3 + $0x238] sm:$0xf]  ;;  %v4313_v59 = vpop.permute.xlu0 %4312 }
 0x547   : > { %5766 = vxpose.xlu1.b32.cont [2/16] (narrow) %v5688_v60, 64  ;;  %v9398_v12 = vpop.f32.mrf.mxu0  ;;  %v6685_v20 = vld [vmem:[#allocation3 + $0x21c] sm:$0xf0]  ;;  %v6712_v61 = vor.u32 %v7094_v16, %v6711_v55  ;;  %4382 = vst.msk [vmem:[#allocation3 + $0x214] sm:$0xf] %vm673_vm3, %v4313_v59  ;;  %v5604_v59 = vadd.f32 %v9312_v19, %v5515_v28  ;;  %v5342_v19 = vadd.f32 %v9342_v52, %v8860_v14 }
 0x548   : > { %v9402_v37 = vpop.f32.mrf.mxu1  ;;  %v6688_v35 = vor.u32 %v7086_v47, %v6685_v20  ;;  %v7090_v60 = vld [vmem:[#allocation3 + $0x228] sm:$0xf0]  ;;  %v6693_v16 = vld [vmem:[#allocation3 + $0x224] sm:$0xf0] }
 0x549   : > { %v6700_v20 = vor.u32 %v7090_v60, %v6699_v43  ;;  %v5693_v56 = vadd.f32 %v9314_v21, %v5604_v59  ;;  %v5431_v34 = vadd.f32 %v9331_v24, %v5342_v19 }
 0x54b   : > { %5576 = vmatmul.bf16.gmra.mxu3 %v6712_v61  ;;  %5482 = vmatmul.bf16.gmra.mxu2 %v6688_v35  ;;  %v5518_v61 = vadd.f32 %v9293_v33, %v5429_v62  ;;  %v7091_v35 = vld [vmem:[#allocation3 + $0x234] sm:$0xf]  ;;  %v5520_v60 = vadd.f32 %v9307_v2, %v5431_v34 }
 0x54c   : > { %v9407_v63 = vpop.f32.mrf.mxu3 }
 0x54d   : > { %v9409_v31 = vpop.f32.mrf.mxu2  ;;  %v5607_v28 = vadd.f32 %v9323_v6, %v5518_v61  ;;  %v7095_v6 = vld [vmem:[#allocation3 + $0x250] sm:$0xf0]  ;;  %v5609_v24 = vadd.f32 %v9334_v36, %v5520_v60  ;;  %v5347_v36 = vadd.f32 %v9342_v52, %v8893_v29  ;;  %v5350_v60 = vadd.f32 %v9342_v52, %v8912_v41 }
 0x54e   : > { %v3679_v10 = vpop.permute.xlu0 %3678  ;;  %v7087_v55 = vld [vmem:[#allocation3 + $0x214] sm:$0xf] }
 0x54f   : > { %5767 = vxpose.xlu1.b32.cont [3/16] (narrow) %v5691_v40, 64  ;;  %v9413_v57 = vpop.f32.mrf.mxu0  ;;  %3745 = vst.msk [vmem:[#allocation3 + $0x248] sm:$0xf] %vm673_vm3, %v3679_v10  ;;  %v6696_v47 = vor.u32 %v7087_v55, %v6693_v16  ;;  %v5696_v33 = vadd.f32 %v9325_v4, %v5607_v28  ;;  %v5345_v55 = vadd.f32 %v9342_v52, %v8885_v50  ;;  %v6719_v16 = vld [vmem:[#allocation3 + $0x240] sm:$0xf] }
 0x550   : > { %v9417_v0 = vpop.f32.mrf.mxu1  ;;  %v6720_v4 = vor.u32 %v7095_v6, %v6719_v16  ;;  %v5439_v16 = vadd.f32 %v9377_v38, %v5350_v60  ;;  %v5352_v38 = vadd.f32 %v9342_v52, %v8925_v18 }
 0x551   : > { %v5434_v62 = vadd.f32 %v9346_v5, %v5345_v55 }
 0x552   : > { %5660 = vmatmul.bf16.gmra.mxu0 %v6696_v47  ;;  %v5528_v41 = vadd.f32 %v9344_v32, %v5439_v16 }
 0x553   : > { %6898 = vmatmul.msk.bf16.gmra.mxu1 %vm226_vm0, %v6700_v20  ;;  %v5698_v20 = vadd.f32 %v9336_v26, %v5609_v24  ;;  %v5523_v50 = vadd.f32 %v9318_v25, %v5434_v62 }
 0x554   : > { %v9423_v9 = vpop.f32.mrf.mxu3 }
 0x555   : > { %v9425_v3 = vpop.f32.mrf.mxu2  ;;  %v5612_v19 = vadd.f32 %v9351_v1, %v5523_v50  ;;  %v5441_v50 = vadd.f32 %v9394_v17, %v5352_v38 }
 0x556   : > { %v6705_v40 = vld [vmem:[#allocation3 + $0x244] sm:$0xf0] }
 0x557   : > { %5768 = vxpose.xlu1.b32.cont [4/16] (narrow) %v5693_v56, 64  ;;  %v9429_v58 = vpop.f32.mrf.mxu0  ;;  %v6708_v21 = vor.u32 %v7091_v35, %v6705_v40  ;;  %v5436_v35 = vadd.f32 %v9361_v54, %v5347_v36  ;;  %v5701_v25 = vadd.f32 %v9354_v39, %v5612_v19 }
 0x558   : > { %v9433_v43 = vpop.f32.mrf.mxu1 }
 0x559   : > { %v5525_v26 = vadd.f32 %v9329_v27, %v5436_v35 }
 0x55b   : > { %5487 = vmatmul.bf16.gmra.mxu2 %v6708_v21  ;;  %v6739_v21 = vld [vmem:[#allocation3 + $0x268] sm:$0xf]  ;;  %v5614_v55 = vadd.f32 %v9366_v48, %v5525_v26 }
 0x55c   : > { %v9437_v10 = vpop.f32.mrf.mxu3 }
 0x55d   : > { %v9439_v14 = vpop.f32.mrf.mxu2  ;;  %v5703_v62 = vadd.f32 %v9370_v11, %v5614_v55 }
 0x55f   : > { %5769 = vxpose.xlu1.b32.cont [5/16] (narrow) %v5696_v33, 64  ;;  %v9443_v59 = vpop.f32.mrf.mxu0  ;;  %v7100_v33 = vld [vmem:[#allocation3 + $0x278] sm:$0xf0] }
 0x560   : > { %v9447_v47 = vpop.f32.mrf.mxu1  ;;  %v6740_v54 = vor.u32 %v7100_v33, %v6739_v21  ;;  %v5355_v21 = vadd.f32 %v9342_v52, %v8939_v15 }
 0x562   : > { %v4319_v2 = vpop.permute.xlu2 %4318 }
 0x563   : > { %4385 = vst.msk [vmem:[#allocation3 + $0x250] sm:$0xf] %vm673_vm3, %v4319_v2  ;;  %6899 = vmatmul.msk.bf16.gmra.mxu1 %vm226_vm0, %v6720_v4 }
 0x564   : > { %v9453_v56 = vpop.f32.mrf.mxu3 }
 0x565   : > { %v9455_v61 = vpop.f32.mrf.mxu2 }
 0x567   : > { %5770 = vxpose.xlu1.b32.cont [6/16] (narrow) %v5698_v20, 64  ;;  %v9459_v5 = vpop.f32.mrf.mxu0  ;;  %v5617_v20 = vadd.f32 %v9382_v22, %v5528_v41 }
 0x568   : > { %v9463_v40 = vpop.f32.mrf.mxu1 }
 0x569   : > { %v5706_v18 = vadd.f32 %v9386_v45, %v5617_v20 }
 0x56a   : > { %v4001_v28 = vpop.permute.xlu2 %4000  ;;  %v6713_v35 = vld [vmem:[#allocation3 + $0x24c] sm:$0xf0] }
 0x56b   : > { %4066 = vst.msk [vmem:[#allocation3 + $0x260] sm:$0xf] %vm673_vm3, %v4001_v28  ;;  %v5370_v28 = vadd.f32 %v9342_v52, %v9076_v44  ;;  %v5444_v44 = vadd.f32 %v9409_v31, %v5355_v21 }
 0x56c   : > { %v5547_v34 = vpop.f32.mrf.mxu3 }
 0x56d   : > { %v9468_v29 = vpop.f32.mrf.mxu2 }
 0x56f   : > { %5771 = vxpose.xlu1.b32.cont [7/16] (narrow) %v5701_v25, 64  ;;  %v9472_v1 = vpop.f32.mrf.mxu0  ;;  %v5530_v25 = vadd.f32 %v9359_v51, %v5441_v50  ;;  %v5357_v50 = vadd.f32 %v9342_v52, %v8958_v8 }
 0x570   : > { %v9476_v6 = vpop.f32.mrf.mxu1 }
 0x572   : > { %v4317_v27 = vpop.permute.xlu0 %4316  ;;  %v4323_v24 = vpop.permute.xlu2 %4322  ;;  %v6731_v15 = vld [vmem:[#allocation3 + $0x260] sm:$0xf] }
 0x573   : > { %v3681_v39 = vpop.permute.xlu1 %3680  ;;  %6900 = vmatmul.msk.bf16.gmra.mxu1 %vm226_vm0, %v6740_v54  ;;  %4384 = vst.msk [vmem:[#allocation3 + $0x23c] sm:$0xf] %vm673_vm3, %v4317_v27  ;;  %v5619_v54 = vadd.f32 %v9398_v12, %v5530_v25  ;;  %v5533_v12 = vadd.f32 %v9375_v46, %v5444_v44 }
 0x574   : > { %3746 = vst.msk [vmem:[#allocation3 + $0x25c] sm:$0xf] %vm673_vm3, %v3681_v39  ;;  %v5549_v4 = vpop.f32.mrf.mxu3 }
 0x575   : > { %v9483_v2 = vpop.f32.mrf.mxu2  ;;  %4387 = vst.msk [vmem:[#allocation3 + $0x278] sm:$0xf] %vm673_vm3, %v4323_v24  ;;  %v5372_v24 = vadd.f32 %v9342_v52, %v9102_v7  ;;  %v5708_v38 = vadd.f32 %v9402_v37, %v5619_v54 }
 0x577   : > { %5772 = vxpose.xlu1.b32.cont [8/16] (narrow) %v5703_v62, 64  ;;  %v9488_v48 = vpop.f32.mrf.mxu0 }
 0x578   : > { %v9492_v11 = vpop.f32.mrf.mxu1 }
 0x57a   : > { %v7092_v19 = vld [vmem:[#allocation3 + $0x23c] sm:$0xf] }
 0x57b   : > { %v3683_v32 = vpop.permute.xlu0 %3682  ;;  %v6716_v22 = vor.u32 %v7092_v19, %v6713_v35  ;;  %v7096_v39 = vld [vmem:[#allocation3 + $0x25c] sm:$0xf]  ;;  %v5622_v19 = vadd.f32 %v9413_v57, %v5533_v12  ;;  %v5446_v35 = vadd.f32 %v9425_v3, %v5357_v50  ;;  %v5360_v57 = vadd.f32 %v9342_v52, %v8977_v30 }
 0x57c   : > { %v4003_v36 = vpop.permute.xlu1 %4002  ;;  %3747 = vst.msk [vmem:[#allocation3 + $0x270] sm:$0xf] %vm673_vm3, %v3683_v32  ;;  %v5552_v26 = vpop.f32.mrf.mxu3  ;;  %v6733_v46 = vld [vmem:[#allocation3 + $0x274] sm:$0xf0] }
 0x57d   : > { %4067 = vst.msk [vmem:[#allocation3 + $0x274] sm:$0xf] %vm673_vm3, %v4003_v36  ;;  %v5458_v17 = vpop.f32.mrf.mxu2  ;;  %5665 = vmatmul.bf16.gmra.mxu0 %v6716_v22  ;;  %v5711_v8 = vadd.f32 %v9417_v0, %v5622_v19  ;;  %v5535_v21 = vadd.f32 %v9392_v13, %v5446_v35  ;;  %v5449_v44 = vadd.f32 %v9439_v14, %v5360_v57 }
 0x57e   : > { %v5459_v33 = vadd.f32 %v5458_v17, %v5370_v28  ;;  %v5375_v17 = vadd.f32 %v9342_v52, %v9117_v23  ;;  %v5377_v13 = vadd.f32 %v9342_v52, %v9130_v42 }
 0x57f   : > { %5773 = vxpose.xlu1.b32.cont [9/16] (narrow) %v5706_v18, 64  ;;  %v5636_v60 = vpop.f32.mrf.mxu0  ;;  %v5624_v54 = vadd.f32 %v9429_v58, %v5535_v21  ;;  %v5538_v30 = vadd.f32 %v9407_v63, %v5449_v44  ;;  %v5380_v63 = vadd.f32 %v9342_v52, %v9141_v49 }
 0x580   : > { %v5548_v55 = vadd.f32 %v5547_v34, %v5459_v33  ;;  %v5725_v45 = vpop.f32.mrf.mxu1 }
 0x582   : > { %v5637_v16 = vadd.f32 %v5636_v60, %v5548_v55 }
 0x583   : > { %v4321_v51 = vpop.permute.xlu0 %4320  ;;  %v6725_v27 = vld [vmem:[#allocation3 + $0x26c] sm:$0xf0] }
 0x584   : > { %4386 = vst.msk [vmem:[#allocation3 + $0x264] sm:$0xf] %vm673_vm3, %v4321_v51  ;;  %v7099_v62 = vld [vmem:[#allocation3 + $0x270] sm:$0xf0]  ;;  %v6728_v41 = vor.u32 %v7096_v39, %v6725_v27  ;;  %v5726_v20 = vadd.f32 %v5725_v45, %v5637_v16  ;;  %v5554_v7 = vpop.f32.mrf.mxu3  ;;  %v5713_v16 = vadd.f32 %v9433_v43, %v5624_v54  ;;  %v5362_v27 = vadd.f32 %v9342_v52, %v8995_v53 }
 0x585   : > { %v6732_v31 = vor.u32 %v7099_v62, %v6731_v15  ;;  %v5460_v34 = vpop.f32.mrf.mxu2 }
 0x586   : > { %5492 = vmatmul.bf16.gmra.mxu2 %v6728_v41  ;;  %v5461_v32 = vadd.f32 %v5460_v34, %v5372_v24  ;;  %5797 = vxpose.xlu0.b32.start [1/16] (narrow) %v5726_v20, 64  ;;  %v5451_v24 = vadd.f32 %v9455_v61, %v5362_v27  ;;  %v9665_v20 = vld [vmem:[#allocation4_spill] sm:$0xff] }
 0x587   : > { %5581 = vmatmul.bf16.gmra.mxu3 %v6732_v31  ;;  %5774 = vxpose.xlu1.b32.cont [10/16] (narrow) %v5708_v38, 64  ;;  %v5638_v36 = vpop.f32.mrf.mxu0  ;;  %v5365_v31 = vadd.f32 %v9342_v52, %v9665_v20 }
 0x588   : > { %v5550_v37 = vadd.f32 %v5549_v4, %v5461_v32  ;;  %v5727_v28 = vpop.f32.mrf.mxu1  ;;  %v5540_v38 = vadd.f32 %v9423_v9, %v5451_v24 }
 0x589   : > { %v5454_v50 = vadd.f32 %v9468_v29, %v5365_v31 }
 0x58a   : > { %v5639_v18 = vadd.f32 %v5638_v36, %v5550_v37  ;;  %v5629_v34 = vadd.f32 %v9459_v5, %v5540_v38  ;;  %v9666_v36 = vld [vmem:[#allocation8_spill] sm:$0xff] }
 0x58b   : > { %v7097_v25 = vld [vmem:[#allocation3 + $0x264] sm:$0xf]  ;;  %v5543_v19 = vadd.f32 %v9437_v10, %v5454_v50  ;;  %v9672_v50 = vld [vmem:[#allocation14_spill] sm:$0xff] }
 0x58c   : > { %v6736_v22 = vor.u32 %v7097_v25, %v6733_v46  ;;  %v5728_v33 = vadd.f32 %v5727_v28, %v5639_v18  ;;  %v5718_v9 = vadd.f32 %v9463_v40, %v5629_v34  ;;  %v9667_v46 = vld [vmem:[#allocation5_spill] sm:$0xff] }
 0x58d   : > { %v5367_v18 = vadd.f32 %v9342_v52, %v9667_v46  ;;  %v5632_v25 = vadd.f32 %v9472_v1, %v5543_v19  ;;  %v9668_v40 = vld [vmem:[#allocation9_spill] sm:$0xff] }
 0x58e   : > { %v5463_v60 = vpop.f32.mrf.mxu2  ;;  %5670 = vmatmul.bf16.gmra.mxu0 %v6736_v22  ;;  %5798 = vxpose.xlu0.b32.cont [2/16] (narrow) %v5728_v33, 64  ;;  %v5557_v45 = vpop.f32.mrf.mxu3  ;;  %v5385_v10 = vadd.f32 %v9342_v52, %v9668_v40 }
 0x58f   : > { %5775 = vxpose.xlu1.b32.cont [11/16] (narrow) %v5711_v8, 64  ;;  %v5464_v3 = vadd.f32 %v5463_v60, %v5375_v17  ;;  %v5641_v4 = vpop.f32.mrf.mxu0  ;;  %v5456_v22 = vadd.f32 %v9483_v2, %v5367_v18  ;;  %v5721_v33 = vadd.f32 %v9476_v6, %v5632_v25 }
 0x590   : > { %v5730_v23 = vpop.f32.mrf.mxu1 }
 0x591   : > { %v5553_v55 = vadd.f32 %v5552_v26, %v5464_v3  ;;  %v5627_v26 = vadd.f32 %v9443_v59, %v5538_v30  ;;  %v5545_v60 = vadd.f32 %v9453_v56, %v5456_v22 }
 0x593   : > { %v5642_v0 = vadd.f32 %v5641_v4, %v5553_v55  ;;  %v5716_v43 = vadd.f32 %v9447_v47, %v5627_v26  ;;  %v5382_v47 = vadd.f32 %v9342_v52, %v9666_v36  ;;  %v5634_v1 = vadd.f32 %v9488_v48, %v5545_v60 }
 0x595   : > { %v5731_v51 = vadd.f32 %v5730_v23, %v5642_v0 }
 0x596   : > { %v5465_v39 = vpop.f32.mrf.mxu2  ;;  %v5559_v41 = vpop.f32.mrf.mxu3 }
 0x597   : > { %5776 = vxpose.xlu1.b32.cont [12/16] (narrow) %v5713_v16, 64  ;;  %v5466_v58 = vadd.f32 %v5465_v39, %v5377_v13  ;;  %5799 = vxpose.xlu0.b32.cont [3/16] (narrow) %v5731_v51, 64  ;;  %v5643_v14 = vpop.f32.mrf.mxu0  ;;  %v5723_v13 = vadd.f32 %v9492_v11, %v5634_v1 }
 0x598   : > { %v5732_v62 = vpop.f32.mrf.mxu1 }
 0x599   : > { %v5555_v15 = vadd.f32 %v5554_v7, %v5466_v58 }
 0x59b   : > { %v5644_v42 = vadd.f32 %v5643_v14, %v5555_v15  ;;  %v9670_v14 = vld [vmem:[#allocation12_spill] sm:$0xff] }
 0x59c   : > { %v5390_v48 = vadd.f32 %v9342_v52, %v9670_v14  ;;  %v9676_v14 = vld [vmem:[#allocation6_spill] sm:$0xff] }
 0x59d   : > { %v5733_v53 = vadd.f32 %v5732_v62, %v5644_v42 }
 0x59e   : > { %v5468_v12 = vpop.f32.mrf.mxu2  ;;  %v5562_v37 = vpop.f32.mrf.mxu3 }
 0x59f   : > { %5777 = vxpose.xlu1.b32.cont [13/16] (narrow) %v5716_v43, 64  ;;  %v5469_v59 = vadd.f32 %v5468_v12, %v5380_v63  ;;  %5800 = vxpose.xlu0.b32.cont [4/16] (narrow) %v5733_v53, 64  ;;  %v5646_v61 = vpop.f32.mrf.mxu0  ;;  %v9671_v43 = vld [vmem:[#allocation15_spill] sm:$0xff] }
 0x5a0   : > { %v5735_v7 = vpop.f32.mrf.mxu1  ;;  %v5392_v38 = vadd.f32 %v9342_v52, %v9671_v43 }
 0x5a1   : > { %v5558_v32 = vadd.f32 %v5557_v45, %v5469_v59  ;;  %v9669_v45 = vld [vmem:[#allocation10_spill] sm:$0xff] }
 0x5a2   : > { %v5387_v0 = vadd.f32 %v9342_v52, %v9669_v45  ;;  %v9675_v45 = vld [vmem:[#allocation19_spill] sm:$0xff] }
 0x5a3   : > { %v5647_v49 = vadd.f32 %v5646_v61, %v5558_v32  ;;  %v5395_v32 = vadd.f32 %v9342_v52, %v9672_v50 }
 0x5a5   : > { %v5736_v35 = vadd.f32 %v5735_v7, %v5647_v49 }
 0x5a6   : > { %v5470_v28 = vpop.f32.mrf.mxu2  ;;  %v5564_v54 = vpop.f32.mrf.mxu3 }
 0x5a7   : > { %5778 = vxpose.xlu1.b32.cont [14/16] (narrow) %v5718_v9, 64  ;;  %v5471_v5 = vadd.f32 %v5470_v28, %v5382_v47  ;;  %5801 = vxpose.xlu0.b32.cont [5/16] (narrow) %v5736_v35, 64  ;;  %v5648_v29 = vpop.f32.mrf.mxu0  ;;  %v9673_v28 = vld [vmem:[#allocation17_spill] sm:$0xff] }
 0x5a8   : > { %v5737_v8 = vpop.f32.mrf.mxu1  ;;  %v5397_v46 = vadd.f32 %v9342_v52, %v9673_v28 }
 0x5a9   : > { %v5560_v17 = vadd.f32 %v5559_v41, %v5471_v5 }
 0x5ab   : > { %v5649_v21 = vadd.f32 %v5648_v29, %v5560_v17 }
 0x5ad   : > { %v5738_v57 = vadd.f32 %v5737_v8, %v5649_v21 }
 0x5ae   : > { %v5473_v3 = vpop.f32.mrf.mxu2  ;;  %v5567_v27 = vpop.f32.mrf.mxu3 }
 0x5af   : > { %5779 = vxpose.xlu1.b32.cont [15/16] (narrow) %v5721_v33, 64  ;;  %v5474_v4 = vadd.f32 %v5473_v3, %v5385_v10  ;;  %5802 = vxpose.xlu0.b32.cont [6/16] (narrow) %v5738_v57, 64  ;;  %v5651_v44 = vpop.f32.mrf.mxu0  ;;  %v9674_v33 = vld [vmem:[#allocation18_spill] sm:$0xff] }
 0x5b0   : > { %v5740_v55 = vpop.f32.mrf.mxu1  ;;  %v5400_v60 = vadd.f32 %v9342_v52, %v9674_v33 }
 0x5b1   : > { %v5563_v2 = vadd.f32 %v5562_v37, %v5474_v4  ;;  %v5829_v4 = vld [vmem:[%s7222_s23] sm:$0xff] }
 0x5b3   : > { %v5652_v23 = vadd.f32 %v5651_v44, %v5563_v2 }
 0x5b5   : > { %v5741_v6 = vadd.f32 %v5740_v55, %v5652_v23 }
 0x5b6   : > { %v5475_v16 = vpop.f32.mrf.mxu2  ;;  %v5569_v63 = vpop.f32.mrf.mxu3 }
 0x5b7   : > { %5780 = vxpose.xlu1.b32.end [16/16] (narrow) %v5723_v13, 64  ;;  %v5476_v56 = vadd.f32 %v5475_v16, %v5387_v0  ;;  %5803 = vxpose.xlu0.b32.cont [7/16] (narrow) %v5741_v6, 64  ;;  %v5653_v30 = vpop.f32.mrf.mxu0  ;;  %v5402_v0 = vadd.f32 %v9342_v52, %v9675_v45  ;;  %v5838_v45 = vld [vmem:[%s7222_s23 + $0x48] sm:$0xff] }
 0x5b8   : > { %v5742_v39 = vpop.f32.mrf.mxu1 }
 0x5b9   : > { %v5565_v51 = vadd.f32 %v5564_v54, %v5476_v56 }
 0x5bb   : > { %v5654_v58 = vadd.f32 %v5653_v30, %v5565_v51 }
 0x5bd   : > { %v5743_v26 = vadd.f32 %v5742_v39, %v5654_v58 }
 0x5be   : > { %v5478_v24 = vpop.f32.mrf.mxu2  ;;  %v5572_v49 = vpop.f32.mrf.mxu3 }
 0x5bf   : > { %v5479_v15 = vadd.f32 %v5478_v24, %v5390_v48  ;;  %5804 = vxpose.xlu0.b32.cont [8/16] (narrow) %v5743_v26, 64  ;;  %v5656_v62 = vpop.f32.mrf.mxu0  ;;  %v5405_v48 = vadd.f32 %v9342_v52, %v9676_v14 }
 0x5c0   : > { %v5745_v11 = vpop.f32.mrf.mxu1 }
 0x5c1   : > { %v5568_v42 = vadd.f32 %v5567_v27, %v5479_v15 }
 0x5c3   : > { %v5657_v41 = vadd.f32 %v5656_v62, %v5568_v42 }
 0x5c5   : > { %v5746_v53 = vadd.f32 %v5745_v11, %v5657_v41 }
 0x5c6   : > { %v5480_v12 = vpop.f32.mrf.mxu2  ;;  %v5574_v25 = vpop.f32.mrf.mxu3 }
 0x5c7   : > { %v5481_v20 = vadd.f32 %v5480_v12, %v5392_v38  ;;  %5805 = vxpose.xlu0.b32.cont [9/16] (narrow) %v5746_v53, 64  ;;  %v5658_v31 = vpop.f32.mrf.mxu0 }
 0x5c8   : > { %v5747_v61 = vpop.f32.mrf.mxu1 }
 0x5c9   : > { %v5570_v59 = vadd.f32 %v5569_v63, %v5481_v20  ;;  %v9677_v63 = vld [vmem:[#allocation7_spill] sm:$0xff] }
 0x5ca   : > { %v5407_v43 = vadd.f32 %v9342_v52, %v9677_v63 }
 0x5cb   : > { %v5659_v34 = vadd.f32 %v5658_v31, %v5570_v59 }
 0x5cd   : > { %v5748_v7 = vadd.f32 %v5747_v61, %v5659_v34 }
 0x5ce   : > { %v5483_v36 = vpop.f32.mrf.mxu2  ;;  %v5577_v3 = vpop.f32.mrf.mxu3 }
 0x5cf   : > { %v5484_v47 = vadd.f32 %v5483_v36, %v5395_v32  ;;  %5806 = vxpose.xlu0.b32.cont [10/16] (narrow) %v5748_v7, 64  ;;  %v5661_v9 = vpop.f32.mrf.mxu0  ;;  %v5831_v32 = vld [vmem:[%s7222_s23 + $0x10] sm:$0xff] }
 0x5d0   : > { %v5750_v35 = vpop.f32.mrf.mxu1 }
 0x5d1   : > { %v5573_v19 = vadd.f32 %v5572_v49, %v5484_v47  ;;  %v5833_v49 = vld [vmem:[%s7222_s23 + $0x20] sm:$0xff] }
 0x5d3   : > { %v5662_v37 = vadd.f32 %v5661_v9, %v5573_v19  ;;  %v5835_v9 = vld [vmem:[%s7222_s23 + $0x30] sm:$0xff] }
 0x5d5   : > { %v5751_v18 = vadd.f32 %v5750_v35, %v5662_v37  ;;  %v5837_v37 = vld [vmem:[%s7222_s23 + $0x40] sm:$0xff] }
 0x5d6   : > { %v5485_v5 = vpop.f32.mrf.mxu2  ;;  %v5579_v56 = vpop.f32.mrf.mxu3 }
 0x5d7   : > { %v5486_v29 = vadd.f32 %v5485_v5, %v5397_v46  ;;  %5807 = vxpose.xlu0.b32.cont [11/16] (narrow) %v5751_v18, 64  ;;  %v5663_v17 = vpop.f32.mrf.mxu0  ;;  %v5830_v18 = vld [vmem:[%s7222_s23 + $0x8] sm:$0xff] }
 0x5d8   : > { %v5752_v21 = vpop.f32.mrf.mxu1 }
 0x5d9   : > { %v5575_v22 = vadd.f32 %v5574_v25, %v5486_v29  ;;  %v5839_v25 = vld [vmem:[%s7222_s23 + $0x50] sm:$0xff] }
 0x5db   : > { %v5664_v8 = vadd.f32 %v5663_v17, %v5575_v22 }
 0x5dd   : > { %v5753_v40 = vadd.f32 %v5752_v21, %v5664_v8  ;;  %v5832_v8 = vld [vmem:[%s7222_s23 + $0x18] sm:$0xff] }
 0x5de   : > { %v5488_v10 = vpop.f32.mrf.mxu2 }
 0x5df   : > { %5808 = vxpose.xlu0.b32.cont [12/16] (narrow) %v5753_v40, 64  ;;  %v5489_v57 = vadd.f32 %v5488_v10, %v5400_v60  ;;  %v5841_v10 = vld [vmem:[%s7222_s23 + $0x60] sm:$0xff] }
 0x5e0   : > { %v5755_v44 = vpop.f32.mrf.mxu1 }
 0x5e1   : > { %v5578_v1 = vadd.f32 %v5577_v3, %v5489_v57  ;;  %v5834_v57 = vld [vmem:[%s7222_s23 + $0x28] sm:$0xff] }
 0x5e3   : > { %v5781_v54 = vpop.trf.xlu1 }
 0x5e4   : > { %v5845_v2 = vadd.f32 %v5829_v4, %v5781_v54  ;;  %v5843_v54 = vld [vmem:[%s7222_s23 + $0x70] sm:$0xff] }
 0x5e6   : > { %v5490_v55 = vpop.f32.mrf.mxu2  ;;  %5861 = vst [vmem:[%s9568_s11] sm:$0xff] %v5845_v2  ;;  %v5836_v2 = vld [vmem:[%s7222_s23 + $0x38] sm:$0xff] }
 0x5e7   : > { %v5491_v6 = vadd.f32 %v5490_v55, %v5402_v0 }
 0x5e8   : > { %v5757_v39 = vpop.f32.mrf.mxu1 }
 0x5e9   : > { %v5580_v30 = vadd.f32 %v5579_v56, %v5491_v6  ;;  %v5840_v6 = vld [vmem:[%s7222_s23 + $0x58] sm:$0xff] }
 0x5eb   : > { %v5782_v52 = vpop.trf.xlu1 }
 0x5ec   : > { %v5847_v7 = vadd.f32 %v5831_v32, %v5782_v52 }
 0x5ee   : > { %5863 = vst [vmem:[%s9568_s11 + $0x10] sm:$0xff] %v5847_v7 }
 0x5f0   : > { %v5760_v11 = vpop.f32.mrf.mxu1 }
 0x5f3   : > { %v5783_v36 = vpop.trf.xlu1 }
 0x5f4   : > { %v5849_v47 = vadd.f32 %v5833_v49, %v5783_v36 }
 0x5f6   : > { %5865 = vst [vmem:[%s9568_s11 + $0x20] sm:$0xff] %v5849_v47 }
 0x5f8   : > { %v5762_v34 = vpop.f32.mrf.mxu1 }
 0x5fa   : > { %v5666_v23 = vpop.f32.mrf.mxu0 }
 0x5fb   : > { %v5667_v13 = vadd.f32 %v5666_v23, %v5578_v1  ;;  %v5784_v19 = vpop.trf.xlu1 }
 0x5fc   : > { %v5851_v35 = vadd.f32 %v5835_v9, %v5784_v19 }
 0x5fd   : > { %v5756_v16 = vadd.f32 %v5755_v44, %v5667_v13 }
 0x5fe   : > { %5867 = vst [vmem:[%s9568_s11 + $0x30] sm:$0xff] %v5851_v35 }
 0x5ff   : > { %5809 = vxpose.xlu0.b32.cont [13/16] (narrow) %v5756_v16, 64 }
 0x602   : > { %v5668_v51 = vpop.f32.mrf.mxu0 }
 0x603   : > { %v5669_v27 = vadd.f32 %v5668_v51, %v5580_v30  ;;  %v5785_v28 = vpop.trf.xlu1  ;;  %v5842_v30 = vld [vmem:[%s7222_s23 + $0x68] sm:$0xff] }
 0x604   : > { %v5853_v46 = vadd.f32 %v5837_v37, %v5785_v28 }
 0x605   : > { %v5758_v58 = vadd.f32 %v5757_v39, %v5669_v27  ;;  %v5844_v27 = vld [vmem:[%s7222_s23 + $0x78] sm:$0xff] }
 0x606   : > { %5869 = vst [vmem:[%s9568_s11 + $0x40] sm:$0xff] %v5853_v46 }
 0x607   : > { %5810 = vxpose.xlu0.b32.cont [14/16] (narrow) %v5758_v58, 64 }
 0x609   : > { %v5493_v26 = vpop.f32.mrf.mxu2 }
 0x60a   : > { %v5494_v24 = vadd.f32 %v5493_v26, %v5405_v48  ;;  %v5582_v15 = vpop.f32.mrf.mxu3 }
 0x60b   : > { %v5671_v42 = vpop.f32.mrf.mxu0  ;;  %v5786_v22 = vpop.trf.xlu1 }
 0x60c   : > { %v5583_v62 = vadd.f32 %v5582_v15, %v5494_v24  ;;  %v5855_v17 = vadd.f32 %v5839_v25, %v5786_v22 }
 0x60e   : > { %v5672_v41 = vadd.f32 %v5671_v42, %v5583_v62  ;;  %5871 = vst [vmem:[%s9568_s11 + $0x50] sm:$0xff] %v5855_v17 }
 0x610   : > { %v5761_v38 = vadd.f32 %v5760_v11, %v5672_v41 }
 0x611   : > { %v5495_v53 = vpop.f32.mrf.mxu2 }
 0x612   : > { %v5496_v12 = vadd.f32 %v5495_v53, %v5407_v43  ;;  %5811 = vxpose.xlu0.b32.cont [15/16] (narrow) %v5761_v38, 64  ;;  %v5584_v20 = vpop.f32.mrf.mxu3 }
 0x613   : > { %v5673_v59 = vpop.f32.mrf.mxu0  ;;  %v5787_v33 = vpop.trf.xlu1 }
 0x614   : > { %v5585_v31 = vadd.f32 %v5584_v20, %v5496_v12  ;;  %v5857_v60 = vadd.f32 %v5841_v10, %v5787_v33 }
 0x616   : > { %v5674_v61 = vadd.f32 %v5673_v59, %v5585_v31  ;;  %5873 = vst [vmem:[%s9568_s11 + $0x60] sm:$0xff] %v5857_v60 }
 0x618   : > { %v5763_v50 = vadd.f32 %v5762_v34, %v5674_v61 }
 0x61a   : > { %5812 = vxpose.xlu0.b32.end [16/16] (narrow) %v5763_v50, 64 }
 0x61b   : > { %v5788_v44 = vpop.trf.xlu1 }
 0x61c   : > { %v5859_v1 = vadd.f32 %v5843_v54, %v5788_v44 }
 0x61e   : > { %5875 = vst [vmem:[%s9568_s11 + $0x70] sm:$0xff] %v5859_v1 }
 0x646   : > { %v5813_v5 = vpop.trf.xlu0 }
 0x647   : > { %v5846_v29 = vadd.f32 %v5830_v18, %v5813_v5 }
 0x649   : > { %5862 = vst [vmem:[%s9568_s11 + $0x8] sm:$0xff] %v5846_v29 }
 0x64e   : > { %v5814_v21 = vpop.trf.xlu0 }
 0x64f   : > { %v5848_v40 = vadd.f32 %v5832_v8, %v5814_v21 }
 0x651   : > { %5864 = vst [vmem:[%s9568_s11 + $0x18] sm:$0xff] %v5848_v40 }
 0x656   : > { %v5815_v3 = vpop.trf.xlu0 }
 0x657   : > { %v5850_v4 = vadd.f32 %v5834_v57, %v5815_v3 }
 0x659   : > { %5866 = vst [vmem:[%s9568_s11 + $0x28] sm:$0xff] %v5850_v4 }
 0x65e   : > { %v5816_v55 = vpop.trf.xlu0 }
 0x65f   : > { %v5852_v23 = vadd.f32 %v5836_v2, %v5816_v55 }
 0x661   : > { %5868 = vst [vmem:[%s9568_s11 + $0x38] sm:$0xff] %v5852_v23 }
 0x666   : > { %v5817_v0 = vpop.trf.xlu0 }
 0x667   : > { %v5854_v13 = vadd.f32 %v5838_v45, %v5817_v0 }
 0x669   : > { %5870 = vst [vmem:[%s9568_s11 + $0x48] sm:$0xff] %v5854_v13 }
 0x66e   : > { %v5818_v16 = vpop.trf.xlu0 }
 0x66f   : > { %v5856_v56 = vadd.f32 %v5840_v6, %v5818_v16 }
 0x671   : > { %5872 = vst [vmem:[%s9568_s11 + $0x58] sm:$0xff] %v5856_v56 }
 0x676   : > { %v5819_v51 = vpop.trf.xlu0 }
 0x677   : > { %v5858_v39 = vadd.f32 %v5842_v30, %v5819_v51 }
 0x679   : > { %5874 = vst [vmem:[%s9568_s11 + $0x68] sm:$0xff] %v5858_v39 }
 0x67e   : > { %v5820_v58 = vpop.trf.xlu0 }
 0x67f   : > { %v5860_v14 = vadd.f32 %v5844_v27, %v5820_v58 }
 0x681   : > { %5876 = vst [vmem:[%s9568_s11 + $0x78] sm:$0xff] %v5860_v14 }
 0x682 PF: > { %s15_s18 = sadd.s32 1, %s7172_s18  }
 0x683   : > { %p12_p4 = scmp.ge.s32.totalorder %s15_s18, 4  }
 0x685   :  { %14 = sbr.rel (!%p12_p4) target bundleno = 1 (0x1), region = 73 }

</bundles_post_ra>
